<compile_context>
chip_gen: v6e
topology: v6e:2x2x1
jax: 0.10.0
libtpu: 0.0.40
codegen_flags: <defaults>
</compile_context>

<pallas_src>
import functools

import jax
import jax.numpy as jnp
from jax.experimental import pallas as pl
from jax.experimental.pallas import tpu as pltpu


# ----------------------------------------------------------------------------
# In-kernel helpers
# ----------------------------------------------------------------------------

def _gelu(x):
    # TODO(synk): PyTorch nn.GELU() default is the exact erf form; the tanh
    # approximation (max abs err ~3e-3) is used for a guaranteed Mosaic
    # lowering (tanh runs on the EUP slot, effectively free here).
    c = 0.7978845608028654  # sqrt(2/pi)
    return 0.5 * x * (1.0 + jnp.tanh(c * (x + 0.044715 * x * x * x)))


# ----------------------------------------------------------------------------
# Pallas kernels
# ----------------------------------------------------------------------------

def _conv3_bias_stats_kernel(xp_ref, w_ref, b_ref, y_ref, sum_ref, sumsq_ref):
    """3x3 conv (stride 1, input pre-padded) + bias + per-sample BN partial stats.

    xp_ref : (1, H+2, W+2, Cin) f32   w_ref: (3, 3, Cin, Cout) bf16
    b_ref  : (1, Cout) f32            y_ref: (1, H, W, Cout) f32 (pre-BN)
    sum_ref/sumsq_ref : (1, 1, Cout) f32 per-sample channel sums.
    """
    H, W, Cout = y_ref.shape[1], y_ref.shape[2], y_ref.shape[3]
    Cin = xp_ref.shape[3]
    xp = xp_ref[0]                                           # (H+2, W+2, Cin)
    acc = jnp.zeros((H * W, Cout), jnp.float32)
    for di in range(3):
        for dj in range(3):
            patch = xp[di:di + H, dj:dj + W, :].reshape(H * W, Cin)
            acc = acc + jnp.dot(patch.astype(jnp.bfloat16), w_ref[di, dj],
                                preferred_element_type=jnp.float32)
    acc = acc + b_ref[...]
    y_ref[...] = acc.reshape(1, H, W, Cout)
    sum_ref[...] = jnp.sum(acc, axis=0, keepdims=True)[None]
    sumsq_ref[...] = jnp.sum(acc * acc, axis=0, keepdims=True)[None]


def _bn_gelu_conv3_stats_kernel(y1p_ref, sc_ref, sh_ref, w_ref, b_ref,
                                x1_ref, y2_ref, sum_ref, sumsq_ref):
    """Fused: BN-affine + GELU of layer-1 output, then 3x3 conv2 + bias + stats.

    y1p_ref is the *padded* raw conv1 output; the pad value was chosen per
    channel so that GELU(scale*pad + shift) == 0, i.e. the activation's zero
    padding for conv2 falls out of the same fused affine+GELU.
    """
    H, W, C = y2_ref.shape[1], y2_ref.shape[2], y2_ref.shape[3]
    x1p = _gelu(y1p_ref[0] * sc_ref[...] + sh_ref[...])      # (H+2, W+2, C) f32
    x1_ref[...] = x1p[1:H + 1, 1:W + 1, :][None]             # layer-1 activation
    acc = jnp.zeros((H * W, C), jnp.float32)
    for di in range(3):
        for dj in range(3):
            patch = x1p[di:di + H, dj:dj + W, :].reshape(H * W, C)
            acc = acc + jnp.dot(patch.astype(jnp.bfloat16), w_ref[di, dj],
                                preferred_element_type=jnp.float32)
    acc = acc + b_ref[...]
    y2_ref[...] = acc.reshape(1, H, W, C)
    sum_ref[...] = jnp.sum(acc, axis=0, keepdims=True)[None]
    sumsq_ref[...] = jnp.sum(acc * acc, axis=0, keepdims=True)[None]


def _bn_gelu_res_out_kernel(y2_ref, sc_ref, sh_ref, res_ref, out_ref, *, out_scale):
    """Fused: BN-affine + GELU + residual add + /1.414."""
    x2 = _gelu(y2_ref[0] * sc_ref[...] + sh_ref[...])
    out_ref[...] = ((x2 + res_ref[0]) * out_scale)[None]


def _bn_gelu_out_kernel(y2_ref, sc_ref, sh_ref, out_ref):
    """Fused: BN-affine + GELU (no residual)."""
    out_ref[...] = _gelu(y2_ref[0] * sc_ref[...] + sh_ref[...])[None]


# ----------------------------------------------------------------------------
# pallas_call wrappers (grid over batch; full spatial plane per step)
# ----------------------------------------------------------------------------

_PARALLEL = pltpu.CompilerParams(dimension_semantics=("parallel",))


def _conv1_call(xp, w_b, b_row, H, W):
    N, Hp, Wp, Cin = xp.shape
    Cout = b_row.shape[1]
    return pl.pallas_call(
        _conv3_bias_stats_kernel,
        out_shape=(jax.ShapeDtypeStruct((N, H, W, Cout), jnp.float32),
                   jax.ShapeDtypeStruct((N, 1, Cout), jnp.float32),
                   jax.ShapeDtypeStruct((N, 1, Cout), jnp.float32)),
        grid=(N,),
        in_specs=[
            pl.BlockSpec((1, Hp, Wp, Cin), lambda n: (n, 0, 0, 0)),
            pl.BlockSpec((3, 3, Cin, Cout), lambda n: (0, 0, 0, 0)),
            pl.BlockSpec((1, Cout), lambda n: (0, 0)),
        ],
        out_specs=(
            pl.BlockSpec((1, H, W, Cout), lambda n: (n, 0, 0, 0)),
            pl.BlockSpec((1, 1, Cout), lambda n: (n, 0, 0)),
            pl.BlockSpec((1, 1, Cout), lambda n: (n, 0, 0)),
        ),
        compiler_params=_PARALLEL,
    )(xp, w_b, b_row)


def _conv2_call(y1p, scale1, shift1, w_b, b_row, H, W):
    N, Hp, Wp, C = y1p.shape
    return pl.pallas_call(
        _bn_gelu_conv3_stats_kernel,
        out_shape=(jax.ShapeDtypeStruct((N, H, W, C), jnp.float32),   # x1
                   jax.ShapeDtypeStruct((N, H, W, C), jnp.float32),   # raw y2
                   jax.ShapeDtypeStruct((N, 1, C), jnp.float32),
                   jax.ShapeDtypeStruct((N, 1, C), jnp.float32)),
        grid=(N,),
        in_specs=[
            pl.BlockSpec((1, Hp, Wp, C), lambda n: (n, 0, 0, 0)),
            pl.BlockSpec((1, C), lambda n: (0, 0)),
            pl.BlockSpec((1, C), lambda n: (0, 0)),
            pl.BlockSpec((3, 3, C, C), lambda n: (0, 0, 0, 0)),
            pl.BlockSpec((1, C), lambda n: (0, 0)),
        ],
        out_specs=(
            pl.BlockSpec((1, H, W, C), lambda n: (n, 0, 0, 0)),
            pl.BlockSpec((1, H, W, C), lambda n: (n, 0, 0, 0)),
            pl.BlockSpec((1, 1, C), lambda n: (n, 0, 0)),
            pl.BlockSpec((1, 1, C), lambda n: (n, 0, 0)),
        ),
        compiler_params=_PARALLEL,
    )(y1p, scale1, shift1, w_b, b_row)


def _finalize_res_call(y2, scale2, shift2, res, out_scale):
    N, H, W, C = y2.shape
    kern = functools.partial(_bn_gelu_res_out_kernel, out_scale=out_scale)
    return pl.pallas_call(
        kern,
        out_shape=jax.ShapeDtypeStruct((N, H, W, C), jnp.float32),
        grid=(N,),
        in_specs=[
            pl.BlockSpec((1, H, W, C), lambda n: (n, 0, 0, 0)),
            pl.BlockSpec((1, C), lambda n: (0, 0)),
            pl.BlockSpec((1, C), lambda n: (0, 0)),
            pl.BlockSpec((1, H, W, C), lambda n: (n, 0, 0, 0)),
        ],
        out_specs=pl.BlockSpec((1, H, W, C), lambda n: (n, 0, 0, 0)),
        compiler_params=_PARALLEL,
    )(y2, scale2, shift2, res)


def _finalize_call(y2, scale2, shift2):
    N, H, W, C = y2.shape
    return pl.pallas_call(
        _bn_gelu_out_kernel,
        out_shape=jax.ShapeDtypeStruct((N, H, W, C), jnp.float32),
        grid=(N,),
        in_specs=[
            pl.BlockSpec((1, H, W, C), lambda n: (n, 0, 0, 0)),
            pl.BlockSpec((1, C), lambda n: (0, 0)),
            pl.BlockSpec((1, C), lambda n: (0, 0)),
        ],
        out_specs=pl.BlockSpec((1, H, W, C), lambda n: (n, 0, 0, 0)),
        compiler_params=_PARALLEL,
    )(y2, scale2, shift2)


# ----------------------------------------------------------------------------
# Host-side glue (tiny per-channel math, layout plumbing)
# ----------------------------------------------------------------------------

def _bn_scale_shift(psum, psumsq, gamma, beta, count, eps=1e-5):
    """Training-mode BatchNorm: fold (mean, biased var, gamma, beta) into a
    per-channel affine scale/shift from per-sample partial sums."""
    total = jnp.sum(psum, axis=0)                    # (1, C)
    total_sq = jnp.sum(psumsq, axis=0)               # (1, C)
    mean = total / count
    var = jnp.maximum(total_sq / count - mean * mean, 0.0)
    scale = gamma.reshape(1, -1) * jax.lax.rsqrt(var + eps)
    shift = beta.reshape(1, -1) - mean * scale
    return scale, shift


@functools.partial(jax.jit, static_argnames=("is_res",))
def residual_conv_block_forward(x_nchw, params, is_res=False):
    """Forward pass of ResidualConvBlock.  x: (N, Cin, H, W) f32 -> (N, Cout, H, W)."""
    w1, b1, g1, be1, w2, b2, g2, be2 = params
    x = jnp.transpose(x_nchw.astype(jnp.float32), (0, 2, 3, 1))      # NHWC
    N, H, W, Cin = x.shape
    Cout = w1.shape[0]
    same_channels = (Cin == Cout)
    count = float(N * H * W)

    # PyTorch OIHW -> (kh, kw, Cin, Cout), bf16 for the MXU.
    w1m = jnp.transpose(w1, (2, 3, 1, 0)).astype(jnp.bfloat16)
    w2m = jnp.transpose(w2, (2, 3, 1, 0)).astype(jnp.bfloat16)

    # ---- conv1 + bias (+ BN partial stats), fused single Pallas pass ----
    xp = jnp.pad(x, ((0, 0), (1, 1), (1, 1), (0, 0)))
    y1, s1, ss1 = _conv1_call(xp, w1m, b1.reshape(1, Cout), H, W)
    scale1, shift1 = _bn_scale_shift(s1, ss1, g1, be1, count)

    # Pad raw y1 with the per-channel value that maps to exactly 0 after the
    # fused affine+GELU -> conv2's zero padding comes for free inside kernel 2.
    pad1 = -shift1 / scale1                                          # (1, Cout)
    y1p = jnp.broadcast_to(pad1.reshape(1, 1, 1, Cout),
                           (N, H + 2, W + 2, Cout))
    y1p = y1p.at[:, 1:H + 1, 1:W + 1, :].set(y1)

    # ---- BN1 + GELU + conv2 + bias (+ BN2 partial stats), fused ----
    x1, y2, s2, ss2 = _conv2_call(y1p, scale1, shift1, w2m,
                                  b2.reshape(1, Cout), H, W)
    scale2, shift2 = _bn_scale_shift(s2, ss2, g2, be2, count)

    # ---- BN2 + GELU (+ residual + /1.414), fused ----
    if is_res:
        res = x if same_channels else x1
        out = _finalize_res_call(y2, scale2, shift2, res, 1.0 / 1.414)
    else:
        out = _finalize_call(y2, scale2, shift2)

    return jnp.transpose(out, (0, 3, 1, 2))                          # NCHW


# ----------------------------------------------------------------------------
# Pure-JAX reference (PyTorch semantics, exact erf GELU) for validation
# ----------------------------------------------------------------------------

def _reference_forward(x_nchw, params, is_res):
    w1, b1, g1, be1, w2, b2, g2, be2 = params

    def conv_bn_gelu(x, w, b, g, be):
        y = jax.lax.conv_general_dilated(
            x, w, window_strides=(1, 1), padding=((1, 1), (1, 1)),
            dimension_numbers=("NCHW", "OIHW", "NCHW"))
        y = y + b.reshape(1, -1, 1, 1)
        mean = jnp.mean(y, axis=(0, 2, 3), keepdims=True)
        var = jnp.mean((y - mean) ** 2, axis=(0, 2, 3), keepdims=True)
        y = (y - mean) * jax.lax.rsqrt(var + 1e-5)
        y = y * g.reshape(1, -1, 1, 1) + be.reshape(1, -1, 1, 1)
        return jax.nn.gelu(y, approximate=False)

    x1 = conv_bn_gelu(x_nchw, w1, b1, g1, be1)
    x2 = conv_bn_gelu(x1, w2, b2, g2, be2)
    if is_res:
        res = x_nchw if x_nchw.shape[1] == x2.shape[1] else x1
        return (res + x2) / 1.414
    return x2


# ----------------------------------------------------------------------------
# Demo
# ----------------------------------------------------------------------------

if __name__ == "__main__":
    key = jax.random.PRNGKey(0)
    kx, kw1, kb1, kg1, kbe1, kw2, kb2, kg2, kbe2 = jax.random.split(key, 9)

    N, Cin, H, W = 2, 4, 16, 16
    Cout = 32
    is_res = True  # Cin != Cout -> residual is x1 + x2, scaled by 1/1.414

    x = jax.random.normal(kx, (N, Cin, H, W), jnp.float32)
    params = (
        0.1 * jax.random.normal(kw1, (Cout, Cin, 3, 3), jnp.float32),
        0.1 * jax.random.normal(kb1, (Cout,), jnp.float32),
        1.0 + 0.1 * jax.random.normal(kg1, (Cout,), jnp.float32),
        0.1 * jax.random.normal(kbe1, (Cout,), jnp.float32),
        0.1 * jax.random.normal(kw2, (Cout, Cout, 3, 3), jnp.float32),
        0.1 * jax.random.normal(kb2, (Cout,), jnp.float32),
        1.0 + 0.1 * jax.random.normal(kg2, (Cout,), jnp.float32),
        0.1 * jax.random.normal(kbe2, (Cout,), jnp.float32),
    )

    out = residual_conv_block_forward(x, params, is_res=is_res)
    out = jax.block_until_ready(out)

    assert out.shape == (N, Cout, H, W), out.shape
    assert bool(jnp.all(jnp.isfinite(out)))

    ref = _reference_forward(x, params, is_res)
    err = float(jnp.max(jnp.abs(out - ref)))
    assert err < 0.25, f"max abs error vs reference: {err}"

    print("KERNEL_OK")
</pallas_src>

<mosaic_0001>
module attributes {stable_mosaic.version = 11 : i64} {
  func.func @_conv3_bias_stats_kernel(%arg0: i32, %arg1: memref<1x18x18x4xf32, #tpu.memory_space<vmem>>, %arg2: memref<3x3x4x32xbf16, #tpu.memory_space<vmem>>, %arg3: memref<1x32xf32, #tpu.memory_space<vmem>>, %arg4: memref<1x16x16x32xf32, #tpu.memory_space<vmem>>, %arg5: memref<1x1x32xf32, #tpu.memory_space<vmem>>, %arg6: memref<1x1x32xf32, #tpu.memory_space<vmem>>) attributes {dimension_semantics = [#tpu.dimension_semantics<parallel>], iteration_bounds = array<i64: 2>, scalar_prefetch = 0 : i64, scratch_operands = 0 : i64, tpu.core_type = #tpu.core_type<tc>, window_params = [{transform_indices = @transform_0, window_bounds = array<i64: 1, 18, 18, 4>}, {pipeline_mode = #tpu.pipeline_mode<synchronous>, transform_indices = @transform_1, window_bounds = array<i64: 3, 3, 4, 32>}, {pipeline_mode = #tpu.pipeline_mode<synchronous>, transform_indices = @transform_2, window_bounds = array<i64: 1, 32>}, {transform_indices = @transform_3, window_bounds = array<i64: 1, 16, 16, 32>}, {transform_indices = @transform_4, window_bounds = array<i64: 1, 1, 32>}, {transform_indices = @transform_5, window_bounds = array<i64: 1, 1, 32>}]} {
    %c0 = arith.constant 0 : index
    %c0_0 = arith.constant 0 : index
    %c0_1 = arith.constant 0 : index
    %c0_2 = arith.constant 0 : index
    %0 = vector.load %arg1[%c0, %c0_0, %c0_1, %c0_2] : memref<1x18x18x4xf32, #tpu.memory_space<vmem>>, vector<1x18x18x4xf32>
    %1 = vector.shape_cast %0 : vector<1x18x18x4xf32> to vector<18x18x4xf32>
    %cst = arith.constant 0.000000e+00 : f32
    %2 = vector.broadcast %cst : f32 to vector<256x32xf32>
    %3 = vector.extract_strided_slice %1 {offsets = [0, 0, 0], sizes = [16, 16, 4], strides = [1, 1, 1]} : vector<18x18x4xf32> to vector<16x16x4xf32>
    %4 = vector.shape_cast %3 : vector<16x16x4xf32> to vector<256x4xf32>
    %5 = arith.truncf %4 : vector<256x4xf32> to vector<256x4xbf16>
    %c0_3 = arith.constant 0 : index
    %c0_4 = arith.constant 0 : index
    %c0_5 = arith.constant 0 : index
    %c0_6 = arith.constant 0 : index
    %6 = vector.load %arg2[%c0_3, %c0_4, %c0_5, %c0_6] : memref<3x3x4x32xbf16, #tpu.memory_space<vmem>>, vector<1x1x4x32xbf16>
    %7 = vector.shape_cast %6 : vector<1x1x4x32xbf16> to vector<4x32xbf16>
    %cst_7 = arith.constant dense<0.000000e+00> : vector<256x32xf32>
    %8 = tpu.matmul %5, %7, %cst_7 {dimension_numbers = #tpu.dot_dimension_numbers<[1], [0], [0], [1], [0, 0, 1, 1], [], []>} : vector<256x4xbf16>, vector<4x32xbf16>, vector<256x32xf32> -> vector<256x32xf32>
    %9 = arith.addf %2, %8 : vector<256x32xf32>
    %10 = vector.extract_strided_slice %1 {offsets = [0, 1, 0], sizes = [16, 16, 4], strides = [1, 1, 1]} : vector<18x18x4xf32> to vector<16x16x4xf32>
    %11 = vector.shape_cast %10 : vector<16x16x4xf32> to vector<256x4xf32>
    %12 = arith.truncf %11 : vector<256x4xf32> to vector<256x4xbf16>
    %c0_8 = arith.constant 0 : index
    %c1 = arith.constant 1 : index
    %c0_9 = arith.constant 0 : index
    %c0_10 = arith.constant 0 : index
    %13 = vector.load %arg2[%c0_8, %c1, %c0_9, %c0_10] : memref<3x3x4x32xbf16, #tpu.memory_space<vmem>>, vector<1x1x4x32xbf16>
    %14 = vector.shape_cast %13 : vector<1x1x4x32xbf16> to vector<4x32xbf16>
    %cst_11 = arith.constant dense<0.000000e+00> : vector<256x32xf32>
    %15 = tpu.matmul %12, %14, %cst_11 {dimension_numbers = #tpu.dot_dimension_numbers<[1], [0], [0], [1], [0, 0, 1, 1], [], []>} : vector<256x4xbf16>, vector<4x32xbf16>, vector<256x32xf32> -> vector<256x32xf32>
    %16 = arith.addf %9, %15 : vector<256x32xf32>
    %17 = vector.extract_strided_slice %1 {offsets = [0, 2, 0], sizes = [16, 16, 4], strides = [1, 1, 1]} : vector<18x18x4xf32> to vector<16x16x4xf32>
    %18 = vector.shape_cast %17 : vector<16x16x4xf32> to vector<256x4xf32>
    %19 = arith.truncf %18 : vector<256x4xf32> to vector<256x4xbf16>
    %c0_12 = arith.constant 0 : index
    %c2 = arith.constant 2 : index
    %c0_13 = arith.constant 0 : index
    %c0_14 = arith.constant 0 : index
    %20 = vector.load %arg2[%c0_12, %c2, %c0_13, %c0_14] : memref<3x3x4x32xbf16, #tpu.memory_space<vmem>>, vector<1x1x4x32xbf16>
    %21 = vector.shape_cast %20 : vector<1x1x4x32xbf16> to vector<4x32xbf16>
    %cst_15 = arith.constant dense<0.000000e+00> : vector<256x32xf32>
    %22 = tpu.matmul %19, %21, %cst_15 {dimension_numbers = #tpu.dot_dimension_numbers<[1], [0], [0], [1], [0, 0, 1, 1], [], []>} : vector<256x4xbf16>, vector<4x32xbf16>, vector<256x32xf32> -> vector<256x32xf32>
    %23 = arith.addf %16, %22 : vector<256x32xf32>
    %24 = vector.extract_strided_slice %1 {offsets = [1, 0, 0], sizes = [16, 16, 4], strides = [1, 1, 1]} : vector<18x18x4xf32> to vector<16x16x4xf32>
    %25 = vector.shape_cast %24 : vector<16x16x4xf32> to vector<256x4xf32>
    %26 = arith.truncf %25 : vector<256x4xf32> to vector<256x4xbf16>
    %c1_16 = arith.constant 1 : index
    %c0_17 = arith.constant 0 : index
    %c0_18 = arith.constant 0 : index
    %c0_19 = arith.constant 0 : index
    %27 = vector.load %arg2[%c1_16, %c0_17, %c0_18, %c0_19] : memref<3x3x4x32xbf16, #tpu.memory_space<vmem>>, vector<1x1x4x32xbf16>
    %28 = vector.shape_cast %27 : vector<1x1x4x32xbf16> to vector<4x32xbf16>
    %cst_20 = arith.constant dense<0.000000e+00> : vector<256x32xf32>
    %29 = tpu.matmul %26, %28, %cst_20 {dimension_numbers = #tpu.dot_dimension_numbers<[1], [0], [0], [1], [0, 0, 1, 1], [], []>} : vector<256x4xbf16>, vector<4x32xbf16>, vector<256x32xf32> -> vector<256x32xf32>
    %30 = arith.addf %23, %29 : vector<256x32xf32>
    %31 = vector.extract_strided_slice %1 {offsets = [1, 1, 0], sizes = [16, 16, 4], strides = [1, 1, 1]} : vector<18x18x4xf32> to vector<16x16x4xf32>
    %32 = vector.shape_cast %31 : vector<16x16x4xf32> to vector<256x4xf32>
    %33 = arith.truncf %32 : vector<256x4xf32> to vector<256x4xbf16>
    %c1_21 = arith.constant 1 : index
    %c1_22 = arith.constant 1 : index
    %c0_23 = arith.constant 0 : index
    %c0_24 = arith.constant 0 : index
    %34 = vector.load %arg2[%c1_21, %c1_22, %c0_23, %c0_24] : memref<3x3x4x32xbf16, #tpu.memory_space<vmem>>, vector<1x1x4x32xbf16>
    %35 = vector.shape_cast %34 : vector<1x1x4x32xbf16> to vector<4x32xbf16>
    %cst_25 = arith.constant dense<0.000000e+00> : vector<256x32xf32>
    %36 = tpu.matmul %33, %35, %cst_25 {dimension_numbers = #tpu.dot_dimension_numbers<[1], [0], [0], [1], [0, 0, 1, 1], [], []>} : vector<256x4xbf16>, vector<4x32xbf16>, vector<256x32xf32> -> vector<256x32xf32>
    %37 = arith.addf %30, %36 : vector<256x32xf32>
    %38 = vector.extract_strided_slice %1 {offsets = [1, 2, 0], sizes = [16, 16, 4], strides = [1, 1, 1]} : vector<18x18x4xf32> to vector<16x16x4xf32>
    %39 = vector.shape_cast %38 : vector<16x16x4xf32> to vector<256x4xf32>
    %40 = arith.truncf %39 : vector<256x4xf32> to vector<256x4xbf16>
    %c1_26 = arith.constant 1 : index
    %c2_27 = arith.constant 2 : index
    %c0_28 = arith.constant 0 : index
    %c0_29 = arith.constant 0 : index
    %41 = vector.load %arg2[%c1_26, %c2_27, %c0_28, %c0_29] : memref<3x3x4x32xbf16, #tpu.memory_space<vmem>>, vector<1x1x4x32xbf16>
    %42 = vector.shape_cast %41 : vector<1x1x4x32xbf16> to vector<4x32xbf16>
    %cst_30 = arith.constant dense<0.000000e+00> : vector<256x32xf32>
    %43 = tpu.matmul %40, %42, %cst_30 {dimension_numbers = #tpu.dot_dimension_numbers<[1], [0], [0], [1], [0, 0, 1, 1], [], []>} : vector<256x4xbf16>, vector<4x32xbf16>, vector<256x32xf32> -> vector<256x32xf32>
    %44 = arith.addf %37, %43 : vector<256x32xf32>
    %45 = vector.extract_strided_slice %1 {offsets = [2, 0, 0], sizes = [16, 16, 4], strides = [1, 1, 1]} : vector<18x18x4xf32> to vector<16x16x4xf32>
    %46 = vector.shape_cast %45 : vector<16x16x4xf32> to vector<256x4xf32>
    %47 = arith.truncf %46 : vector<256x4xf32> to vector<256x4xbf16>
    %c2_31 = arith.constant 2 : index
    %c0_32 = arith.constant 0 : index
    %c0_33 = arith.constant 0 : index
    %c0_34 = arith.constant 0 : index
    %48 = vector.load %arg2[%c2_31, %c0_32, %c0_33, %c0_34] : memref<3x3x4x32xbf16, #tpu.memory_space<vmem>>, vector<1x1x4x32xbf16>
    %49 = vector.shape_cast %48 : vector<1x1x4x32xbf16> to vector<4x32xbf16>
    %cst_35 = arith.constant dense<0.000000e+00> : vector<256x32xf32>
    %50 = tpu.matmul %47, %49, %cst_35 {dimension_numbers = #tpu.dot_dimension_numbers<[1], [0], [0], [1], [0, 0, 1, 1], [], []>} : vector<256x4xbf16>, vector<4x32xbf16>, vector<256x32xf32> -> vector<256x32xf32>
    %51 = arith.addf %44, %50 : vector<256x32xf32>
    %52 = vector.extract_strided_slice %1 {offsets = [2, 1, 0], sizes = [16, 16, 4], strides = [1, 1, 1]} : vector<18x18x4xf32> to vector<16x16x4xf32>
    %53 = vector.shape_cast %52 : vector<16x16x4xf32> to vector<256x4xf32>
    %54 = arith.truncf %53 : vector<256x4xf32> to vector<256x4xbf16>
    %c2_36 = arith.constant 2 : index
    %c1_37 = arith.constant 1 : index
    %c0_38 = arith.constant 0 : index
    %c0_39 = arith.constant 0 : index
    %55 = vector.load %arg2[%c2_36, %c1_37, %c0_38, %c0_39] : memref<3x3x4x32xbf16, #tpu.memory_space<vmem>>, vector<1x1x4x32xbf16>
    %56 = vector.shape_cast %55 : vector<1x1x4x32xbf16> to vector<4x32xbf16>
    %cst_40 = arith.constant dense<0.000000e+00> : vector<256x32xf32>
    %57 = tpu.matmul %54, %56, %cst_40 {dimension_numbers = #tpu.dot_dimension_numbers<[1], [0], [0], [1], [0, 0, 1, 1], [], []>} : vector<256x4xbf16>, vector<4x32xbf16>, vector<256x32xf32> -> vector<256x32xf32>
    %58 = arith.addf %51, %57 : vector<256x32xf32>
    %59 = vector.extract_strided_slice %1 {offsets = [2, 2, 0], sizes = [16, 16, 4], strides = [1, 1, 1]} : vector<18x18x4xf32> to vector<16x16x4xf32>
    %60 = vector.shape_cast %59 : vector<16x16x4xf32> to vector<256x4xf32>
    %61 = arith.truncf %60 : vector<256x4xf32> to vector<256x4xbf16>
    %c2_41 = arith.constant 2 : index
    %c2_42 = arith.constant 2 : index
    %c0_43 = arith.constant 0 : index
    %c0_44 = arith.constant 0 : index
    %62 = vector.load %arg2[%c2_41, %c2_42, %c0_43, %c0_44] : memref<3x3x4x32xbf16, #tpu.memory_space<vmem>>, vector<1x1x4x32xbf16>
    %63 = vector.shape_cast %62 : vector<1x1x4x32xbf16> to vector<4x32xbf16>
    %cst_45 = arith.constant dense<0.000000e+00> : vector<256x32xf32>
    %64 = tpu.matmul %61, %63, %cst_45 {dimension_numbers = #tpu.dot_dimension_numbers<[1], [0], [0], [1], [0, 0, 1, 1], [], []>} : vector<256x4xbf16>, vector<4x32xbf16>, vector<256x32xf32> -> vector<256x32xf32>
    %65 = arith.addf %58, %64 : vector<256x32xf32>
    %c0_46 = arith.constant 0 : index
    %c0_47 = arith.constant 0 : index
    %66 = vector.load %arg3[%c0_46, %c0_47] : memref<1x32xf32, #tpu.memory_space<vmem>>, vector<1x32xf32>
    %67 = vector.broadcast %66 : vector<1x32xf32> to vector<256x32xf32>
    %68 = arith.addf %65, %67 : vector<256x32xf32>
    %69 = vector.shape_cast %68 : vector<256x32xf32> to vector<1x16x16x32xf32>
    %c0_48 = arith.constant 0 : index
    %c0_49 = arith.constant 0 : index
    %c0_50 = arith.constant 0 : index
    %c0_51 = arith.constant 0 : index
    %70 = vector.load %arg4[%c0_48, %c0_49, %c0_50, %c0_51] : memref<1x16x16x32xf32, #tpu.memory_space<vmem>>, vector<1x16x16x32xf32>
    tpu.vector_store %arg4[%c0_48, %c0_49, %c0_50, %c0_51], %69 {strides = array<i32>} : memref<1x16x16x32xf32, #tpu.memory_space<vmem>>, vector<1x16x16x32xf32>,
    %cst_52 = arith.constant dense<0.000000e+00> : vector<32xf32>
    %71 = vector.multi_reduction <add>, %68, %cst_52 [0] : vector<256x32xf32> to vector<32xf32>
    %72 = vector.shape_cast %71 : vector<32xf32> to vector<1x32xf32>
    %73 = vector.shape_cast %72 : vector<1x32xf32> to vector<1x1x32xf32>
    %c0_53 = arith.constant 0 : index
    %c0_54 = arith.constant 0 : index
    %c0_55 = arith.constant 0 : index
    %74 = vector.load %arg5[%c0_53, %c0_54, %c0_55] : memref<1x1x32xf32, #tpu.memory_space<vmem>>, vector<1x1x32xf32>
    tpu.vector_store %arg5[%c0_53, %c0_54, %c0_55], %73 {strides = array<i32>} : memref<1x1x32xf32, #tpu.memory_space<vmem>>, vector<1x1x32xf32>,
    %75 = arith.mulf %68, %68 : vector<256x32xf32>
    %cst_56 = arith.constant dense<0.000000e+00> : vector<32xf32>
    %76 = vector.multi_reduction <add>, %75, %cst_56 [0] : vector<256x32xf32> to vector<32xf32>
    %77 = vector.shape_cast %76 : vector<32xf32> to vector<1x32xf32>
    %78 = vector.shape_cast %77 : vector<1x32xf32> to vector<1x1x32xf32>
    %c0_57 = arith.constant 0 : index
    %c0_58 = arith.constant 0 : index
    %c0_59 = arith.constant 0 : index
    %79 = vector.load %arg6[%c0_57, %c0_58, %c0_59] : memref<1x1x32xf32, #tpu.memory_space<vmem>>, vector<1x1x32xf32>
    tpu.vector_store %arg6[%c0_57, %c0_58, %c0_59], %78 {strides = array<i32>} : memref<1x1x32xf32, #tpu.memory_space<vmem>>, vector<1x1x32xf32>,
    return
  }
  func.func @transform_0(%arg0: i32) -> (i32, i32, i32, i32) {
    %c0_i32 = arith.constant 0 : i32
    %c0_i32_0 = arith.constant 0 : i32
    %c0_i32_1 = arith.constant 0 : i32
    %c0_i32_2 = arith.constant 0 : i32
    return %arg0, %c0_i32, %c0_i32_0, %c0_i32_1 : i32, i32, i32, i32
  }
  func.func @transform_1(%arg0: i32) -> (i32, i32, i32, i32) {
    %c0_i32 = arith.constant 0 : i32
    %c0_i32_0 = arith.constant 0 : i32
    %c0_i32_1 = arith.constant 0 : i32
    %c0_i32_2 = arith.constant 0 : i32
    %c0_i32_3 = arith.constant 0 : i32
    return %c0_i32, %c0_i32_0, %c0_i32_1, %c0_i32_2 : i32, i32, i32, i32
  }
  func.func @transform_2(%arg0: i32) -> (i32, i32) {
    %c0_i32 = arith.constant 0 : i32
    %c0_i32_0 = arith.constant 0 : i32
    %c0_i32_1 = arith.constant 0 : i32
    return %c0_i32, %c0_i32_0 : i32, i32
  }
  func.func @transform_3(%arg0: i32) -> (i32, i32, i32, i32) {
    %c0_i32 = arith.constant 0 : i32
    %c0_i32_0 = arith.constant 0 : i32
    %c0_i32_1 = arith.constant 0 : i32
    %c0_i32_2 = arith.constant 0 : i32
    return %arg0, %c0_i32, %c0_i32_0, %c0_i32_1 : i32, i32, i32, i32
  }
  func.func @transform_4(%arg0: i32) -> (i32, i32, i32) {
    %c0_i32 = arith.constant 0 : i32
    %c0_i32_0 = arith.constant 0 : i32
    %c0_i32_1 = arith.constant 0 : i32
    return %arg0, %c0_i32, %c0_i32_0 : i32, i32, i32
  }
  func.func @transform_5(%arg0: i32) -> (i32, i32, i32) {
    %c0_i32 = arith.constant 0 : i32
    %c0_i32_0 = arith.constant 0 : i32
    %c0_i32_1 = arith.constant 0 : i32
    return %arg0, %c0_i32, %c0_i32_0 : i32, i32, i32
  }
}

module attributes {stable_mosaic.version = 11 : i64} {
  func.func @_bn_gelu_conv3_stats_kernel(%arg0: i32, %arg1: memref<1x18x18x32xf32, #tpu.memory_space<vmem>>, %arg2: memref<1x32xf32, #tpu.memory_space<vmem>>, %arg3: memref<1x32xf32, #tpu.memory_space<vmem>>, %arg4: memref<3x3x32x32xbf16, #tpu.memory_space<vmem>>, %arg5: memref<1x32xf32, #tpu.memory_space<vmem>>, %arg6: memref<1x16x16x32xf32, #tpu.memory_space<vmem>>, %arg7: memref<1x16x16x32xf32, #tpu.memory_space<vmem>>, %arg8: memref<1x1x32xf32, #tpu.memory_space<vmem>>, %arg9: memref<1x1x32xf32, #tpu.memory_space<vmem>>) attributes {dimension_semantics = [#tpu.dimension_semantics<parallel>], iteration_bounds = array<i64: 2>, scalar_prefetch = 0 : i64, scratch_operands = 0 : i64, tpu.core_type = #tpu.core_type<tc>, window_params = [{transform_indices = @transform_0, window_bounds = array<i64: 1, 18, 18, 32>}, {pipeline_mode = #tpu.pipeline_mode<synchronous>, transform_indices = @transform_1, window_bounds = array<i64: 1, 32>}, {pipeline_mode = #tpu.pipeline_mode<synchronous>, transform_indices = @transform_2, window_bounds = array<i64: 1, 32>}, {pipeline_mode = #tpu.pipeline_mode<synchronous>, transform_indices = @transform_3, window_bounds = array<i64: 3, 3, 32, 32>}, {pipeline_mode = #tpu.pipeline_mode<synchronous>, transform_indices = @transform_4, window_bounds = array<i64: 1, 32>}, {transform_indices = @transform_5, window_bounds = array<i64: 1, 16, 16, 32>}, {transform_indices = @transform_6, window_bounds = array<i64: 1, 16, 16, 32>}, {transform_indices = @transform_7, window_bounds = array<i64: 1, 1, 32>}, {transform_indices = @transform_8, window_bounds = array<i64: 1, 1, 32>}]} {
    %c0 = arith.constant 0 : index
    %c0_0 = arith.constant 0 : index
    %c0_1 = arith.constant 0 : index
    %c0_2 = arith.constant 0 : index
    %0 = vector.load %arg1[%c0, %c0_0, %c0_1, %c0_2] : memref<1x18x18x32xf32, #tpu.memory_space<vmem>>, vector<1x18x18x32xf32>
    %1 = vector.shape_cast %0 : vector<1x18x18x32xf32> to vector<18x18x32xf32>
    %c0_3 = arith.constant 0 : index
    %c0_4 = arith.constant 0 : index
    %2 = vector.load %arg2[%c0_3, %c0_4] : memref<1x32xf32, #tpu.memory_space<vmem>>, vector<1x32xf32>
    %3 = vector.shape_cast %2 : vector<1x32xf32> to vector<1x1x32xf32>
    %4 = vector.broadcast %3 : vector<1x1x32xf32> to vector<18x18x32xf32>
    %5 = arith.mulf %1, %4 : vector<18x18x32xf32>
    %c0_5 = arith.constant 0 : index
    %c0_6 = arith.constant 0 : index
    %6 = vector.load %arg3[%c0_5, %c0_6] : memref<1x32xf32, #tpu.memory_space<vmem>>, vector<1x32xf32>
    %7 = vector.shape_cast %6 : vector<1x32xf32> to vector<1x1x32xf32>
    %8 = vector.broadcast %7 : vector<1x1x32xf32> to vector<18x18x32xf32>
    %9 = arith.addf %5, %8 : vector<18x18x32xf32>
    %cst = arith.constant 5.000000e-01 : f32
    %10 = vector.broadcast %cst : f32 to vector<18x18x32xf32>
    %11 = arith.mulf %10, %9 : vector<18x18x32xf32>
    %cst_7 = arith.constant 4.471500e-02 : f32
    %12 = vector.broadcast %cst_7 : f32 to vector<18x18x32xf32>
    %13 = arith.mulf %12, %9 : vector<18x18x32xf32>
    %14 = arith.mulf %13, %9 : vector<18x18x32xf32>
    %15 = arith.mulf %14, %9 : vector<18x18x32xf32>
    %16 = arith.addf %9, %15 : vector<18x18x32xf32>
    %cst_8 = arith.constant 0.797884583 : f32
    %17 = vector.broadcast %cst_8 : f32 to vector<18x18x32xf32>
    %18 = arith.mulf %17, %16 : vector<18x18x32xf32>
    %19 = math.tanh %18 : vector<18x18x32xf32>
    %cst_9 = arith.constant 1.000000e+00 : f32
    %20 = vector.broadcast %cst_9 : f32 to vector<18x18x32xf32>
    %21 = arith.addf %20, %19 : vector<18x18x32xf32>
    %22 = arith.mulf %11, %21 : vector<18x18x32xf32>
    %23 = vector.extract_strided_slice %22 {offsets = [1, 1, 0], sizes = [16, 16, 32], strides = [1, 1, 1]} : vector<18x18x32xf32> to vector<16x16x32xf32>
    %24 = vector.shape_cast %23 : vector<16x16x32xf32> to vector<1x16x16x32xf32>
    %c0_10 = arith.constant 0 : index
    %c0_11 = arith.constant 0 : index
    %c0_12 = arith.constant 0 : index
    %c0_13 = arith.constant 0 : index
    %25 = vector.load %arg6[%c0_10, %c0_11, %c0_12, %c0_13] : memref<1x16x16x32xf32, #tpu.memory_space<vmem>>, vector<1x16x16x32xf32>
    tpu.vector_store %arg6[%c0_10, %c0_11, %c0_12, %c0_13], %24 {strides = array<i32>} : memref<1x16x16x32xf32, #tpu.memory_space<vmem>>, vector<1x16x16x32xf32>,
    %cst_14 = arith.constant 0.000000e+00 : f32
    %26 = vector.broadcast %cst_14 : f32 to vector<256x32xf32>
    %27 = vector.extract_strided_slice %22 {offsets = [0, 0, 0], sizes = [16, 16, 32], strides = [1, 1, 1]} : vector<18x18x32xf32> to vector<16x16x32xf32>
    %28 = vector.shape_cast %27 : vector<16x16x32xf32> to vector<256x32xf32>
    %29 = arith.truncf %28 : vector<256x32xf32> to vector<256x32xbf16>
    %c0_15 = arith.constant 0 : index
    %c0_16 = arith.constant 0 : index
    %c0_17 = arith.constant 0 : index
    %c0_18 = arith.constant 0 : index
    %30 = vector.load %arg4[%c0_15, %c0_16, %c0_17, %c0_18] : memref<3x3x32x32xbf16, #tpu.memory_space<vmem>>, vector<1x1x32x32xbf16>
    %31 = vector.shape_cast %30 : vector<1x1x32x32xbf16> to vector<32x32xbf16>
    %cst_19 = arith.constant dense<0.000000e+00> : vector<256x32xf32>
    %32 = tpu.matmul %29, %31, %cst_19 {dimension_numbers = #tpu.dot_dimension_numbers<[1], [0], [0], [1], [0, 0, 1, 1], [], []>} : vector<256x32xbf16>, vector<32x32xbf16>, vector<256x32xf32> -> vector<256x32xf32>
    %33 = arith.addf %26, %32 : vector<256x32xf32>
    %34 = vector.extract_strided_slice %22 {offsets = [0, 1, 0], sizes = [16, 16, 32], strides = [1, 1, 1]} : vector<18x18x32xf32> to vector<16x16x32xf32>
    %35 = vector.shape_cast %34 : vector<16x16x32xf32> to vector<256x32xf32>
    %36 = arith.truncf %35 : vector<256x32xf32> to vector<256x32xbf16>
    %c0_20 = arith.constant 0 : index
    %c1 = arith.constant 1 : index
    %c0_21 = arith.constant 0 : index
    %c0_22 = arith.constant 0 : index
    %37 = vector.load %arg4[%c0_20, %c1, %c0_21, %c0_22] : memref<3x3x32x32xbf16, #tpu.memory_space<vmem>>, vector<1x1x32x32xbf16>
    %38 = vector.shape_cast %37 : vector<1x1x32x32xbf16> to vector<32x32xbf16>
    %cst_23 = arith.constant dense<0.000000e+00> : vector<256x32xf32>
    %39 = tpu.matmul %36, %38, %cst_23 {dimension_numbers = #tpu.dot_dimension_numbers<[1], [0], [0], [1], [0, 0, 1, 1], [], []>} : vector<256x32xbf16>, vector<32x32xbf16>, vector<256x32xf32> -> vector<256x32xf32>
    %40 = arith.addf %33, %39 : vector<256x32xf32>
    %41 = vector.extract_strided_slice %22 {offsets = [0, 2, 0], sizes = [16, 16, 32], strides = [1, 1, 1]} : vector<18x18x32xf32> to vector<16x16x32xf32>
    %42 = vector.shape_cast %41 : vector<16x16x32xf32> to vector<256x32xf32>
    %43 = arith.truncf %42 : vector<256x32xf32> to vector<256x32xbf16>
    %c0_24 = arith.constant 0 : index
    %c2 = arith.constant 2 : index
    %c0_25 = arith.constant 0 : index
    %c0_26 = arith.constant 0 : index
    %44 = vector.load %arg4[%c0_24, %c2, %c0_25, %c0_26] : memref<3x3x32x32xbf16, #tpu.memory_space<vmem>>, vector<1x1x32x32xbf16>
    %45 = vector.shape_cast %44 : vector<1x1x32x32xbf16> to vector<32x32xbf16>
    %cst_27 = arith.constant dense<0.000000e+00> : vector<256x32xf32>
    %46 = tpu.matmul %43, %45, %cst_27 {dimension_numbers = #tpu.dot_dimension_numbers<[1], [0], [0], [1], [0, 0, 1, 1], [], []>} : vector<256x32xbf16>, vector<32x32xbf16>, vector<256x32xf32> -> vector<256x32xf32>
    %47 = arith.addf %40, %46 : vector<256x32xf32>
    %48 = vector.extract_strided_slice %22 {offsets = [1, 0, 0], sizes = [16, 16, 32], strides = [1, 1, 1]} : vector<18x18x32xf32> to vector<16x16x32xf32>
    %49 = vector.shape_cast %48 : vector<16x16x32xf32> to vector<256x32xf32>
    %50 = arith.truncf %49 : vector<256x32xf32> to vector<256x32xbf16>
    %c1_28 = arith.constant 1 : index
    %c0_29 = arith.constant 0 : index
    %c0_30 = arith.constant 0 : index
    %c0_31 = arith.constant 0 : index
    %51 = vector.load %arg4[%c1_28, %c0_29, %c0_30, %c0_31] : memref<3x3x32x32xbf16, #tpu.memory_space<vmem>>, vector<1x1x32x32xbf16>
    %52 = vector.shape_cast %51 : vector<1x1x32x32xbf16> to vector<32x32xbf16>
    %cst_32 = arith.constant dense<0.000000e+00> : vector<256x32xf32>
    %53 = tpu.matmul %50, %52, %cst_32 {dimension_numbers = #tpu.dot_dimension_numbers<[1], [0], [0], [1], [0, 0, 1, 1], [], []>} : vector<256x32xbf16>, vector<32x32xbf16>, vector<256x32xf32> -> vector<256x32xf32>
    %54 = arith.addf %47, %53 : vector<256x32xf32>
    %55 = vector.extract_strided_slice %22 {offsets = [1, 1, 0], sizes = [16, 16, 32], strides = [1, 1, 1]} : vector<18x18x32xf32> to vector<16x16x32xf32>
    %56 = vector.shape_cast %55 : vector<16x16x32xf32> to vector<256x32xf32>
    %57 = arith.truncf %56 : vector<256x32xf32> to vector<256x32xbf16>
    %c1_33 = arith.constant 1 : index
    %c1_34 = arith.constant 1 : index
    %c0_35 = arith.constant 0 : index
    %c0_36 = arith.constant 0 : index
    %58 = vector.load %arg4[%c1_33, %c1_34, %c0_35, %c0_36] : memref<3x3x32x32xbf16, #tpu.memory_space<vmem>>, vector<1x1x32x32xbf16>
    %59 = vector.shape_cast %58 : vector<1x1x32x32xbf16> to vector<32x32xbf16>
    %cst_37 = arith.constant dense<0.000000e+00> : vector<256x32xf32>
    %60 = tpu.matmul %57, %59, %cst_37 {dimension_numbers = #tpu.dot_dimension_numbers<[1], [0], [0], [1], [0, 0, 1, 1], [], []>} : vector<256x32xbf16>, vector<32x32xbf16>, vector<256x32xf32> -> vector<256x32xf32>
    %61 = arith.addf %54, %60 : vector<256x32xf32>
    %62 = vector.extract_strided_slice %22 {offsets = [1, 2, 0], sizes = [16, 16, 32], strides = [1, 1, 1]} : vector<18x18x32xf32> to vector<16x16x32xf32>
    %63 = vector.shape_cast %62 : vector<16x16x32xf32> to vector<256x32xf32>
    %64 = arith.truncf %63 : vector<256x32xf32> to vector<256x32xbf16>
    %c1_38 = arith.constant 1 : index
    %c2_39 = arith.constant 2 : index
    %c0_40 = arith.constant 0 : index
    %c0_41 = arith.constant 0 : index
    %65 = vector.load %arg4[%c1_38, %c2_39, %c0_40, %c0_41] : memref<3x3x32x32xbf16, #tpu.memory_space<vmem>>, vector<1x1x32x32xbf16>
    %66 = vector.shape_cast %65 : vector<1x1x32x32xbf16> to vector<32x32xbf16>
    %cst_42 = arith.constant dense<0.000000e+00> : vector<256x32xf32>
    %67 = tpu.matmul %64, %66, %cst_42 {dimension_numbers = #tpu.dot_dimension_numbers<[1], [0], [0], [1], [0, 0, 1, 1], [], []>} : vector<256x32xbf16>, vector<32x32xbf16>, vector<256x32xf32> -> vector<256x32xf32>
    %68 = arith.addf %61, %67 : vector<256x32xf32>
    %69 = vector.extract_strided_slice %22 {offsets = [2, 0, 0], sizes = [16, 16, 32], strides = [1, 1, 1]} : vector<18x18x32xf32> to vector<16x16x32xf32>
    %70 = vector.shape_cast %69 : vector<16x16x32xf32> to vector<256x32xf32>
    %71 = arith.truncf %70 : vector<256x32xf32> to vector<256x32xbf16>
    %c2_43 = arith.constant 2 : index
    %c0_44 = arith.constant 0 : index
    %c0_45 = arith.constant 0 : index
    %c0_46 = arith.constant 0 : index
    %72 = vector.load %arg4[%c2_43, %c0_44, %c0_45, %c0_46] : memref<3x3x32x32xbf16, #tpu.memory_space<vmem>>, vector<1x1x32x32xbf16>
    %73 = vector.shape_cast %72 : vector<1x1x32x32xbf16> to vector<32x32xbf16>
    %cst_47 = arith.constant dense<0.000000e+00> : vector<256x32xf32>
    %74 = tpu.matmul %71, %73, %cst_47 {dimension_numbers = #tpu.dot_dimension_numbers<[1], [0], [0], [1], [0, 0, 1, 1], [], []>} : vector<256x32xbf16>, vector<32x32xbf16>, vector<256x32xf32> -> vector<256x32xf32>
    %75 = arith.addf %68, %74 : vector<256x32xf32>
    %76 = vector.extract_strided_slice %22 {offsets = [2, 1, 0], sizes = [16, 16, 32], strides = [1, 1, 1]} : vector<18x18x32xf32> to vector<16x16x32xf32>
    %77 = vector.shape_cast %76 : vector<16x16x32xf32> to vector<256x32xf32>
    %78 = arith.truncf %77 : vector<256x32xf32> to vector<256x32xbf16>
    %c2_48 = arith.constant 2 : index
    %c1_49 = arith.constant 1 : index
    %c0_50 = arith.constant 0 : index
    %c0_51 = arith.constant 0 : index
    %79 = vector.load %arg4[%c2_48, %c1_49, %c0_50, %c0_51] : memref<3x3x32x32xbf16, #tpu.memory_space<vmem>>, vector<1x1x32x32xbf16>
    %80 = vector.shape_cast %79 : vector<1x1x32x32xbf16> to vector<32x32xbf16>
    %cst_52 = arith.constant dense<0.000000e+00> : vector<256x32xf32>
    %81 = tpu.matmul %78, %80, %cst_52 {dimension_numbers = #tpu.dot_dimension_numbers<[1], [0], [0], [1], [0, 0, 1, 1], [], []>} : vector<256x32xbf16>, vector<32x32xbf16>, vector<256x32xf32> -> vector<256x32xf32>
    %82 = arith.addf %75, %81 : vector<256x32xf32>
    %83 = vector.extract_strided_slice %22 {offsets = [2, 2, 0], sizes = [16, 16, 32], strides = [1, 1, 1]} : vector<18x18x32xf32> to vector<16x16x32xf32>
    %84 = vector.shape_cast %83 : vector<16x16x32xf32> to vector<256x32xf32>
    %85 = arith.truncf %84 : vector<256x32xf32> to vector<256x32xbf16>
    %c2_53 = arith.constant 2 : index
    %c2_54 = arith.constant 2 : index
    %c0_55 = arith.constant 0 : index
    %c0_56 = arith.constant 0 : index
    %86 = vector.load %arg4[%c2_53, %c2_54, %c0_55, %c0_56] : memref<3x3x32x32xbf16, #tpu.memory_space<vmem>>, vector<1x1x32x32xbf16>
    %87 = vector.shape_cast %86 : vector<1x1x32x32xbf16> to vector<32x32xbf16>
    %cst_57 = arith.constant dense<0.000000e+00> : vector<256x32xf32>
    %88 = tpu.matmul %85, %87, %cst_57 {dimension_numbers = #tpu.dot_dimension_numbers<[1], [0], [0], [1], [0, 0, 1, 1], [], []>} : vector<256x32xbf16>, vector<32x32xbf16>, vector<256x32xf32> -> vector<256x32xf32>
    %89 = arith.addf %82, %88 : vector<256x32xf32>
    %c0_58 = arith.constant 0 : index
    %c0_59 = arith.constant 0 : index
    %90 = vector.load %arg5[%c0_58, %c0_59] : memref<1x32xf32, #tpu.memory_space<vmem>>, vector<1x32xf32>
    %91 = vector.broadcast %90 : vector<1x32xf32> to vector<256x32xf32>
    %92 = arith.addf %89, %91 : vector<256x32xf32>
    %93 = vector.shape_cast %92 : vector<256x32xf32> to vector<1x16x16x32xf32>
    %c0_60 = arith.constant 0 : index
    %c0_61 = arith.constant 0 : index
    %c0_62 = arith.constant 0 : index
    %c0_63 = arith.constant 0 : index
    %94 = vector.load %arg7[%c0_60, %c0_61, %c0_62, %c0_63] : memref<1x16x16x32xf32, #tpu.memory_space<vmem>>, vector<1x16x16x32xf32>
    tpu.vector_store %arg7[%c0_60, %c0_61, %c0_62, %c0_63], %93 {strides = array<i32>} : memref<1x16x16x32xf32, #tpu.memory_space<vmem>>, vector<1x16x16x32xf32>,
    %cst_64 = arith.constant dense<0.000000e+00> : vector<32xf32>
    %95 = vector.multi_reduction <add>, %92, %cst_64 [0] : vector<256x32xf32> to vector<32xf32>
    %96 = vector.shape_cast %95 : vector<32xf32> to vector<1x32xf32>
    %97 = vector.shape_cast %96 : vector<1x32xf32> to vector<1x1x32xf32>
    %c0_65 = arith.constant 0 : index
    %c0_66 = arith.constant 0 : index
    %c0_67 = arith.constant 0 : index
    %98 = vector.load %arg8[%c0_65, %c0_66, %c0_67] : memref<1x1x32xf32, #tpu.memory_space<vmem>>, vector<1x1x32xf32>
    tpu.vector_store %arg8[%c0_65, %c0_66, %c0_67], %97 {strides = array<i32>} : memref<1x1x32xf32, #tpu.memory_space<vmem>>, vector<1x1x32xf32>,
    %99 = arith.mulf %92, %92 : vector<256x32xf32>
    %cst_68 = arith.constant dense<0.000000e+00> : vector<32xf32>
    %100 = vector.multi_reduction <add>, %99, %cst_68 [0] : vector<256x32xf32> to vector<32xf32>
    %101 = vector.shape_cast %100 : vector<32xf32> to vector<1x32xf32>
    %102 = vector.shape_cast %101 : vector<1x32xf32> to vector<1x1x32xf32>
    %c0_69 = arith.constant 0 : index
    %c0_70 = arith.constant 0 : index
    %c0_71 = arith.constant 0 : index
    %103 = vector.load %arg9[%c0_69, %c0_70, %c0_71] : memref<1x1x32xf32, #tpu.memory_space<vmem>>, vector<1x1x32xf32>
    tpu.vector_store %arg9[%c0_69, %c0_70, %c0_71], %102 {strides = array<i32>} : memref<1x1x32xf32, #tpu.memory_space<vmem>>, vector<1x1x32xf32>,
    return
  }
  func.func @transform_0(%arg0: i32) -> (i32, i32, i32, i32) {
    %c0_i32 = arith.constant 0 : i32
    %c0_i32_0 = arith.constant 0 : i32
    %c0_i32_1 = arith.constant 0 : i32
    %c0_i32_2 = arith.constant 0 : i32
    return %arg0, %c0_i32, %c0_i32_0, %c0_i32_1 : i32, i32, i32, i32
  }
  func.func @transform_1(%arg0: i32) -> (i32, i32) {
    %c0_i32 = arith.constant 0 : i32
    %c0_i32_0 = arith.constant 0 : i32
    %c0_i32_1 = arith.constant 0 : i32
    return %c0_i32, %c0_i32_0 : i32, i32
  }
  func.func @transform_2(%arg0: i32) -> (i32, i32) {
    %c0_i32 = arith.constant 0 : i32
    %c0_i32_0 = arith.constant 0 : i32
    %c0_i32_1 = arith.constant 0 : i32
    return %c0_i32, %c0_i32_0 : i32, i32
  }
  func.func @transform_3(%arg0: i32) -> (i32, i32, i32, i32) {
    %c0_i32 = arith.constant 0 : i32
    %c0_i32_0 = arith.constant 0 : i32
    %c0_i32_1 = arith.constant 0 : i32
    %c0_i32_2 = arith.constant 0 : i32
    %c0_i32_3 = arith.constant 0 : i32
    return %c0_i32, %c0_i32_0, %c0_i32_1, %c0_i32_2 : i32, i32, i32, i32
  }
  func.func @transform_4(%arg0: i32) -> (i32, i32) {
    %c0_i32 = arith.constant 0 : i32
    %c0_i32_0 = arith.constant 0 : i32
    %c0_i32_1 = arith.constant 0 : i32
    return %c0_i32, %c0_i32_0 : i32, i32
  }
  func.func @transform_5(%arg0: i32) -> (i32, i32, i32, i32) {
    %c0_i32 = arith.constant 0 : i32
    %c0_i32_0 = arith.constant 0 : i32
    %c0_i32_1 = arith.constant 0 : i32
    %c0_i32_2 = arith.constant 0 : i32
    return %arg0, %c0_i32, %c0_i32_0, %c0_i32_1 : i32, i32, i32, i32
  }
  func.func @transform_6(%arg0: i32) -> (i32, i32, i32, i32) {
    %c0_i32 = arith.constant 0 : i32
    %c0_i32_0 = arith.constant 0 : i32
    %c0_i32_1 = arith.constant 0 : i32
    %c0_i32_2 = arith.constant 0 : i32
    return %arg0, %c0_i32, %c0_i32_0, %c0_i32_1 : i32, i32, i32, i32
  }
  func.func @transform_7(%arg0: i32) -> (i32, i32, i32) {
    %c0_i32 = arith.constant 0 : i32
    %c0_i32_0 = arith.constant 0 : i32
    %c0_i32_1 = arith.constant 0 : i32
    return %arg0, %c0_i32, %c0_i32_0 : i32, i32, i32
  }
  func.func @transform_8(%arg0: i32) -> (i32, i32, i32) {
    %c0_i32 = arith.constant 0 : i32
    %c0_i32_0 = arith.constant 0 : i32
    %c0_i32_1 = arith.constant 0 : i32
    return %arg0, %c0_i32, %c0_i32_0 : i32, i32, i32
  }
}

module attributes {stable_mosaic.version = 11 : i64} {
  func.func @_bn_gelu_res_out_kernel(%arg0: i32, %arg1: memref<1x16x16x32xf32, #tpu.memory_space<vmem>>, %arg2: memref<1x32xf32, #tpu.memory_space<vmem>>, %arg3: memref<1x32xf32, #tpu.memory_space<vmem>>, %arg4: memref<1x16x16x32xf32, #tpu.memory_space<vmem>>, %arg5: memref<1x16x16x32xf32, #tpu.memory_space<vmem>>) attributes {dimension_semantics = [#tpu.dimension_semantics<parallel>], iteration_bounds = array<i64: 2>, scalar_prefetch = 0 : i64, scratch_operands = 0 : i64, tpu.core_type = #tpu.core_type<tc>, window_params = [{transform_indices = @transform_0, window_bounds = array<i64: 1, 16, 16, 32>}, {pipeline_mode = #tpu.pipeline_mode<synchronous>, transform_indices = @transform_1, window_bounds = array<i64: 1, 32>}, {pipeline_mode = #tpu.pipeline_mode<synchronous>, transform_indices = @transform_2, window_bounds = array<i64: 1, 32>}, {transform_indices = @transform_3, window_bounds = array<i64: 1, 16, 16, 32>}, {transform_indices = @transform_4, window_bounds = array<i64: 1, 16, 16, 32>}]} {
    %c0 = arith.constant 0 : index
    %c0_0 = arith.constant 0 : index
    %c0_1 = arith.constant 0 : index
    %c0_2 = arith.constant 0 : index
    %0 = vector.load %arg1[%c0, %c0_0, %c0_1, %c0_2] : memref<1x16x16x32xf32, #tpu.memory_space<vmem>>, vector<1x16x16x32xf32>
    %1 = vector.shape_cast %0 : vector<1x16x16x32xf32> to vector<16x16x32xf32>
    %c0_3 = arith.constant 0 : index
    %c0_4 = arith.constant 0 : index
    %2 = vector.load %arg2[%c0_3, %c0_4] : memref<1x32xf32, #tpu.memory_space<vmem>>, vector<1x32xf32>
    %3 = vector.shape_cast %2 : vector<1x32xf32> to vector<1x1x32xf32>
    %4 = vector.broadcast %3 : vector<1x1x32xf32> to vector<16x16x32xf32>
    %5 = arith.mulf %1, %4 : vector<16x16x32xf32>
    %c0_5 = arith.constant 0 : index
    %c0_6 = arith.constant 0 : index
    %6 = vector.load %arg3[%c0_5, %c0_6] : memref<1x32xf32, #tpu.memory_space<vmem>>, vector<1x32xf32>
    %7 = vector.shape_cast %6 : vector<1x32xf32> to vector<1x1x32xf32>
    %8 = vector.broadcast %7 : vector<1x1x32xf32> to vector<16x16x32xf32>
    %9 = arith.addf %5, %8 : vector<16x16x32xf32>
    %cst = arith.constant 5.000000e-01 : f32
    %10 = vector.broadcast %cst : f32 to vector<16x16x32xf32>
    %11 = arith.mulf %10, %9 : vector<16x16x32xf32>
    %cst_7 = arith.constant 4.471500e-02 : f32
    %12 = vector.broadcast %cst_7 : f32 to vector<16x16x32xf32>
    %13 = arith.mulf %12, %9 : vector<16x16x32xf32>
    %14 = arith.mulf %13, %9 : vector<16x16x32xf32>
    %15 = arith.mulf %14, %9 : vector<16x16x32xf32>
    %16 = arith.addf %9, %15 : vector<16x16x32xf32>
    %cst_8 = arith.constant 0.797884583 : f32
    %17 = vector.broadcast %cst_8 : f32 to vector<16x16x32xf32>
    %18 = arith.mulf %17, %16 : vector<16x16x32xf32>
    %19 = math.tanh %18 : vector<16x16x32xf32>
    %cst_9 = arith.constant 1.000000e+00 : f32
    %20 = vector.broadcast %cst_9 : f32 to vector<16x16x32xf32>
    %21 = arith.addf %20, %19 : vector<16x16x32xf32>
    %22 = arith.mulf %11, %21 : vector<16x16x32xf32>
    %c0_10 = arith.constant 0 : index
    %c0_11 = arith.constant 0 : index
    %c0_12 = arith.constant 0 : index
    %c0_13 = arith.constant 0 : index
    %23 = vector.load %arg4[%c0_10, %c0_11, %c0_12, %c0_13] : memref<1x16x16x32xf32, #tpu.memory_space<vmem>>, vector<1x16x16x32xf32>
    %24 = vector.shape_cast %23 : vector<1x16x16x32xf32> to vector<16x16x32xf32>
    %25 = arith.addf %22, %24 : vector<16x16x32xf32>
    %cst_14 = arith.constant 0.70721358 : f32
    %26 = vector.broadcast %cst_14 : f32 to vector<16x16x32xf32>
    %27 = arith.mulf %25, %26 : vector<16x16x32xf32>
    %28 = vector.shape_cast %27 : vector<16x16x32xf32> to vector<1x16x16x32xf32>
    %c0_15 = arith.constant 0 : index
    %c0_16 = arith.constant 0 : index
    %c0_17 = arith.constant 0 : index
    %c0_18 = arith.constant 0 : index
    %29 = vector.load %arg5[%c0_15, %c0_16, %c0_17, %c0_18] : memref<1x16x16x32xf32, #tpu.memory_space<vmem>>, vector<1x16x16x32xf32>
    tpu.vector_store %arg5[%c0_15, %c0_16, %c0_17, %c0_18], %28 {strides = array<i32>} : memref<1x16x16x32xf32, #tpu.memory_space<vmem>>, vector<1x16x16x32xf32>,
    return
  }
  func.func @transform_0(%arg0: i32) -> (i32, i32, i32, i32) {
    %c0_i32 = arith.constant 0 : i32
    %c0_i32_0 = arith.constant 0 : i32
    %c0_i32_1 = arith.constant 0 : i32
    %c0_i32_2 = arith.constant 0 : i32
    return %arg0, %c0_i32, %c0_i32_0, %c0_i32_1 : i32, i32, i32, i32
  }
  func.func @transform_1(%arg0: i32) -> (i32, i32) {
    %c0_i32 = arith.constant 0 : i32
    %c0_i32_0 = arith.constant 0 : i32
    %c0_i32_1 = arith.constant 0 : i32
    return %c0_i32, %c0_i32_0 : i32, i32
  }
  func.func @transform_2(%arg0: i32) -> (i32, i32) {
    %c0_i32 = arith.constant 0 : i32
    %c0_i32_0 = arith.constant 0 : i32
    %c0_i32_1 = arith.constant 0 : i32
    return %c0_i32, %c0_i32_0 : i32, i32
  }
  func.func @transform_3(%arg0: i32) -> (i32, i32, i32, i32) {
    %c0_i32 = arith.constant 0 : i32
    %c0_i32_0 = arith.constant 0 : i32
    %c0_i32_1 = arith.constant 0 : i32
    %c0_i32_2 = arith.constant 0 : i32
    return %arg0, %c0_i32, %c0_i32_0, %c0_i32_1 : i32, i32, i32, i32
  }
  func.func @transform_4(%arg0: i32) -> (i32, i32, i32, i32) {
    %c0_i32 = arith.constant 0 : i32
    %c0_i32_0 = arith.constant 0 : i32
    %c0_i32_1 = arith.constant 0 : i32
    %c0_i32_2 = arith.constant 0 : i32
    return %arg0, %c0_i32, %c0_i32_0, %c0_i32_1 : i32, i32, i32, i32
  }
}

</mosaic_0001>

<bundles_post_ra>
// kernel: residual_conv_block_forward.3
= control target key start
LH: loop header
LB: loop body
LE: loop exit
PB: predicated region body
PF: predicated region fallthrough
CT: control target
= control target key end

     0   :  { %s3572_s18 = smov 0   ;;  %s5058_s0 = inlined_call_operand.vmem [shape: f32[2,18,18,4], index: 0, kind: input, shape index: {}]   ;;  %s5059_s1 = inlined_call_operand.vmem [shape: bf16[3,3,4,32], index: 1, kind: input, shape index: {}]   ;;  %s5060_s2 = inlined_call_operand.vmem [shape: f32[1,32], index: 2, kind: input, shape index: {}]   ;;  %s5061_s3 = inlined_call_operand.vmem [shape: f32[2,16,16,32], index: 3, kind: output, shape index: {0}]   ;;  %s5062_s4 = inlined_call_operand.vmem [shape: f32[2,1,32], index: 4, kind: output, shape index: {1}]   ;;  %s5063_s5 = inlined_call_operand.vmem [shape: f32[2,1,32], index: 5, kind: output, shape index: {2}]  }
   0x1 LB: > { %s2890_s19 = sadd.s32 4294967295, %s3540_s18   ;;  %p2894_p0 = scmp.ge.s32.totalorder %s3540_s18, 1  ;;  %s3540_s18 = sphi %s3572_s18, %s16_s18  }
   0x2   : > { %p192_p1 = scmp.lt.s32.totalorder %s3540_s18, 3 }
   0x4   : > { %p193_p2 = pnand %p2894_p0, %p192_p1 }
   0x6   : > { %196 = sbr.rel (%p193_p2) target bundleno = 535 (0x217), region = 32 }
   0xb   : > { %v2898_v0 = vld [vmem:[%s5059_s1 + $0x2] sm:$0x3]  ;;  %vm542_vm0 = vcmask 1041408   ;;  %p226_p3 = scmp.lt.s32.totalorder %s2890_s19, 1  ;;  %v313_v2 = vld [vmem:[%s5059_s1] sm:$0x3] }
   0xc   : > { %3516 = vmatprep.subr.msk.bf16.mxu1 %vm542_vm0, %v2898_v0  ;;  %3515 = vmatprep.subr.msk.bf16.mxu0 %vm542_vm0, %v2898_v0  ;;  %v544_v1 = vsel %vm542_vm0, %v2898_v0, 0  ;;  %v2931_v3 = vld [vmem:[%s5059_s1 + $0x4] sm:$0x3]  ;;  %vm362_vm1 = vcmask 1046528   ;;  %vm493_vm2 = vcmask 31744   ;;  %v756_v30 = vsel %vm542_vm0, %v313_v2, 0 }
   0xd   : > { %3514 = vmatpush3.bf16.msra.mxu1 %v544_v1  ;;  %3208 = vmatpush3.bf16.msra.mxu0 %v544_v1  ;;  %s5215_s19 = smov (!%p226_p3, %s2890_s19), 1  ;;  %v1099_v37 = vsel %vm542_vm0, %v2931_v3, 0  ;;  %v3696_v51 = vld [vmem:[%s5059_s1 + $0x8] sm:$0x3]  ;;  %vm919_vm3 = vcmask 1045504   ;;  %vm2579_vm4 = vcmask 261120  }
   0xe   : > { %3517 = vmatprep.subr.msk.bf16.mxu1 %vm542_vm0, %v313_v2  ;;  %3518 = vmatprep.subr.msk.bf16.mxu0 %vm542_vm0, %v2931_v3  ;;  %s3525_s26 = smul.u32 432, %s5215_s19  ;;  %s3053_s17 = sshll.u32 %s5215_s19, 8  ;;  %vm2681_vm5 = vcmask 253952  }
   0xf   : > { %s4805_s24 = scalar_lea.vmem %s5061_s3, %s3053_s17  ;;  %s238_s27 = scalar_lea.vmem %s5062_s4, %s5215_s19 }
  0x10   : > { %s3600_s29 = scalar_lea.vmem %s5058_s0, %s3525_s26  ;;  %s241_s30 = scalar_lea.vmem %s5063_s5, %s5215_s19 }
  0x11   : > { %v3603_v4 = vld [vmem:[%s3600_s29] sm:$0xff]  ;;  %v3606_v5 = vld [vmem:[%s3600_s29 + $0x8] sm:$0xff]  ;;  %v3609_v6 = vld [vmem:[%s3600_s29 + $0x10] sm:$0x3] }
  0x12   : > { %v363_v7 = vrot.slane %v3603_v4, 1  ;;  %v364_v8 = vrot.slane %v3606_v5, 1  ;;  %v366_v9 = vrot.slane %v3609_v6, 1  ;;  %v3615_v10 = vld [vmem:[%s3600_s29 + $0xc0] sm:$0xff]  ;;  %v3618_v11 = vld [vmem:[%s3600_s29 + $0xc8] sm:$0xff]  ;;  %v3629_v18 = vld [vmem:[%s3600_s29 + $0x18] sm:$0xff] }
  0x13   : > { %v3621_v12 = vld [vmem:[%s3600_s29 + $0xd0] sm:$0x3]  ;;  %v403_v13 = vrot.slane %v3615_v10, 1  ;;  %v404_v14 = vrot.slane %v3618_v11, 1  ;;  %v3632_v19 = vld [vmem:[%s3600_s29 + $0x20] sm:$0xff]  ;;  %v368_v23 = vrot.slane %v3629_v18, 1 }
  0x14   : > { %5092 = vst [vmem:[#allocation2_spill] sm:$0xff] %v3621_v12  ;;  %v365_v15 = vsel %vm362_vm1, %v363_v7, %v364_v8  ;;  %v367_v16 = vsel %vm362_vm1, %v364_v8, %v366_v9  ;;  %v406_v17 = vrot.slane %v3621_v12, 1  ;;  %v3635_v20 = vld [vmem:[%s3600_s29 + $0x28] sm:$0x3]  ;;  %v369_v24 = vrot.slane %v3632_v19, 1  ;;  %v3641_v25 = vld [vmem:[%s3600_s29 + $0xd8] sm:$0xff] }
  0x15   : > { %v475_v21 = vpack.c.bf16 %v367_v16, %v365_v15  ;;  %v405_v22 = vsel %vm362_vm1, %v403_v13, %v404_v14  ;;  %v3644_v26 = vld [vmem:[%s3600_s29 + $0xe0] sm:$0xff]  ;;  %v3647_v27 = vld [vmem:[%s3600_s29 + $0xe8] sm:$0x3]  ;;  %v371_v29 = vrot.slane %v3635_v20, 1  ;;  %v3653_v31 = vld [vmem:[%s3600_s29 + $0x30] sm:$0xff]  ;;  %v408_v36 = vrot.slane %v3641_v25, 1 }
  0x16   : > { %5093 = vst [vmem:[#allocation3_spill] sm:$0xff] %v3647_v27  ;;  %v407_v28 = vsel %vm362_vm1, %v404_v14, %v406_v17  ;;  %v3656_v32 = vld [vmem:[%s3600_s29 + $0x38] sm:$0xff]  ;;  %v3659_v33 = vld [vmem:[%s3600_s29 + $0xf0] sm:$0xff]  ;;  %v370_v35 = vsel %vm362_vm1, %v368_v23, %v369_v24  ;;  %v3668_v38 = vld [vmem:[%s3600_s29 + $0x40] sm:$0x3]  ;;  %v409_v41 = vrot.slane %v3644_v26, 1 }
  0x17   : > { %3209 = vmatprep.mubr.msk.bf16.mxu0 %vm493_vm2, %v475_v21  ;;  %v3662_v34 = vpack.c.bf16 %v407_v28, %v405_v22  ;;  %v3671_v39 = vld [vmem:[%s3600_s29 + $0xf8] sm:$0xff]  ;;  %v372_v40 = vsel %vm362_vm1, %v369_v24, %v371_v29  ;;  %v411_v42 = vrot.slane %v3647_v27, 1  ;;  %v373_v43 = vrot.slane %v3653_v31, 1  ;;  %v3678_v44 = vld [vmem:[%s3600_s29 + $0x100] sm:$0x3]  ;;  %v3681_v45 = vld [vmem:[%s3600_s29 + $0x48] sm:$0xff] }
  0x18   : > { %5095 = vst [vmem:[#allocation5_spill] sm:$0xff] %v3678_v44  ;;  %v3685_v46 = vpack.c.bf16 %v372_v40, %v370_v35  ;;  %v374_v47 = vrot.slane %v3656_v32, 1  ;;  %v376_v48 = vrot.slane %v3668_v38, 1  ;;  %v413_v49 = vrot.slane %v3659_v33, 1  ;;  %v3691_v50 = vld [vmem:[%s3600_s29 + $0x50] sm:$0xff]  ;;  %v3706_v57 = vld [vmem:[%s3600_s29 + $0x108] sm:$0xff] }
  0x19   : > { %5094 = vst [vmem:[#allocation4_spill] sm:$0xff] %v3662_v34  ;;  %3225 = vmatprep.mubr.msk.bf16.mxu1 %vm493_vm2, %v3662_v34  ;;  %v410_v52 = vsel %vm362_vm1, %v408_v36, %v409_v41  ;;  %v412_v53 = vsel %vm362_vm1, %v409_v41, %v411_v42  ;;  %v414_v54 = vrot.slane %v3671_v39, 1  ;;  %v416_v55 = vrot.slane %v3678_v44, 1  ;;  %v3703_v56 = vld [vmem:[%s3600_s29 + $0x58] sm:$0x3]  ;;  %v3709_v58 = vld [vmem:[%s3600_s29 + $0x110] sm:$0xff] }
  0x1a   : > { %5096 = vst [vmem:[#allocation6_spill] sm:$0xff] %v3685_v46  ;;  %3210 = vmatmul.mubr.msk.bf16.vlgmr.msra.gmra.mxu0 %vm493_vm2, %v3685_v46  ;;  %v3713_v59 = vpack.c.bf16 %v412_v53, %v410_v52  ;;  %v375_v60 = vsel %vm362_vm1, %v373_v43, %v374_v47  ;;  %v377_v61 = vsel %vm362_vm1, %v374_v47, %v376_v48  ;;  %v378_v62 = vrot.slane %v3681_v45, 1  ;;  %v3719_v63 = vld [vmem:[%s3600_s29 + $0x118] sm:$0x3]  ;;  %v3722_v0 = vld [vmem:[%s3600_s29 + $0x60] sm:$0xff]  ;;  %v3725_v1 = vld [vmem:[%s3600_s29 + $0x68] sm:$0xff] }
  0x1b   : > { %5098 = vst [vmem:[#allocation8_spill] sm:$0xff] %v3719_v63  ;;  %3276 = vmatpush3.bf16.msra.mxu0 %v1099_v37  ;;  %v3727_v2 = vpack.c.bf16 %v377_v61, %v375_v60  ;;  %v415_v3 = vsel %vm362_vm1, %v413_v49, %v414_v54  ;;  %v417_v7 = vsel %vm362_vm1, %v414_v54, %v416_v55  ;;  %v379_v8 = vrot.slane %v3691_v50, 1  ;;  %v3733_v9 = vld [vmem:[%s3600_s29 + $0x70] sm:$0x3]  ;;  %v3736_v13 = vld [vmem:[%s3600_s29 + $0x120] sm:$0xff]  ;;  %v3751_v22 = vld [vmem:[%s3600_s29 + $0x128] sm:$0xff] }
  0x1c   : > { %5097 = vst [vmem:[#allocation7_spill] sm:$0xff] %v3713_v59  ;;  %v3741_v14 = vld [vmem:[%s5059_s1 + $0x6] sm:$0x3]  ;;  %3226 = vmatmul.mubr.msk.bf16.vlgmr.msra.gmra.mxu1 %vm493_vm2, %v3713_v59  ;;  %v3745_v15 = vpack.c.bf16 %v417_v7, %v415_v3  ;;  %v381_v16 = vrot.slane %v3703_v56, 1  ;;  %v418_v17 = vrot.slane %v3706_v57, 1  ;;  %v419_v21 = vrot.slane %v3709_v58, 1  ;;  %3520 = vmatprep.subr.msk.bf16.mxu0 %vm542_vm0, %v3696_v51 }
  0x1d   : > { %5099 = vst [vmem:[#allocation9_spill] sm:$0xff] %v3727_v2  ;;  %3242 = vmatpush3.bf16.msra.mxu1 %v756_v30  ;;  %3213 = vmatprep.mubr.msk.bf16.mxu0 %vm493_vm2, %v3727_v2  ;;  %v380_v23 = vsel %vm362_vm1, %v378_v62, %v379_v8  ;;  %v421_v24 = vrot.slane %v3719_v63, 1  ;;  %v383_v28 = vrot.slane %v3722_v0, 1  ;;  %v384_v29 = vrot.slane %v3725_v1, 1  ;;  %v3762_v35 = vld [vmem:[%s3600_s29 + $0x130] sm:$0x3] }
  0x1e   : > { %5100 = vst [vmem:[#allocation10_spill] sm:$0xff] %v3745_v15  ;;  %5101 = vst [vmem:[#allocation11_spill] sm:$0xff] %v3762_v35  ;;  %v3765_v36 = vld [vmem:[%s3600_s29 + $0x78] sm:$0xff]  ;;  %3229 = vmatprep.mubr.msk.bf16.mxu1 %vm493_vm2, %v3745_v15  ;;  %v382_v30 = vsel %vm362_vm1, %v379_v8, %v381_v16  ;;  %v420_v37 = vsel %vm362_vm1, %v418_v17, %v419_v21  ;;  %v386_v40 = vrot.slane %v3733_v9, 1  ;;  %v423_v41 = vrot.slane %v3736_v13, 1  ;;  %v3774_v42 = vld [vmem:[%s3600_s29 + $0x80] sm:$0xff] }
  0x1f   : > { %v3777_v43 = vld [vmem:[%s3600_s29 + $0x88] sm:$0x3]  ;;  %3519 = vmatprep.subr.msk.bf16.mxu1 %vm542_vm0, %v3741_v14  ;;  %v3781_v47 = vpack.c.bf16 %v382_v30, %v380_v23  ;;  %v422_v48 = vsel %vm362_vm1, %v419_v21, %v421_v24  ;;  %v385_v49 = vsel %vm362_vm1, %v383_v28, %v384_v29  ;;  %v424_v52 = vrot.slane %v3751_v22, 1  ;;  %v3787_v53 = vld [vmem:[%s3600_s29 + $0x138] sm:$0xff]  ;;  %v3790_v54 = vld [vmem:[%s3600_s29 + $0x140] sm:$0xff] }
  0x20   : > { %v3793_v55 = vld [vmem:[%s3600_s29 + $0x148] sm:$0x3]  ;;  %v3795_v60 = vpack.c.bf16 %v422_v48, %v420_v37  ;;  %v387_v61 = vsel %vm362_vm1, %v384_v29, %v386_v40  ;;  %v426_v62 = vrot.slane %v3762_v35, 1  ;;  %v388_v3 = vrot.slane %v3765_v36, 1  ;;  %v3801_v7 = vld [vmem:[%s3600_s29 + $0x90] sm:$0xff]  ;;  %v3809_v23 = vld [vmem:[%s3600_s29 + $0x98] sm:$0xff] }
  0x21   : > { %5102 = vst [vmem:[#allocation12_spill] sm:$0xff] %v3781_v47  ;;  %5103 = vst [vmem:[#allocation13_spill] sm:$0xff] %v3793_v55  ;;  %v3803_v8 = vpack.c.bf16 %v387_v61, %v385_v49  ;;  %v425_v16 = vsel %vm362_vm1, %v423_v41, %v424_v52  ;;  %v389_v17 = vrot.slane %v3774_v42, 1  ;;  %v391_v21 = vrot.slane %v3777_v43, 1  ;;  %v3812_v24 = vld [vmem:[%s3600_s29 + $0x150] sm:$0xff]  ;;  %v3824_v41 = vld [vmem:[%s3600_s29 + $0x158] sm:$0xff] }
  0x22   : > { %5104 = vst [vmem:[#allocation14_spill] sm:$0xff] %v3795_v60  ;;  %3214 = vmatmul.mubr.msk.bf16.gmra.mxu0 %vm493_vm2, %v3781_v47  ;;  %v427_v28 = vsel %vm362_vm1, %v424_v52, %v426_v62  ;;  %v428_v29 = vrot.slane %v3787_v53, 1  ;;  %v429_v30 = vrot.slane %v3790_v54, 1  ;;  %v431_v37 = vrot.slane %v3793_v55, 1  ;;  %v3821_v40 = vld [vmem:[%s3600_s29 + $0xa0] sm:$0x3] }
  0x23   : > { %5105 = vst [vmem:[#allocation15_spill] sm:$0xff] %v3803_v8  ;;  %3217 = vmatprep.mubr.msk.bf16.mxu0 %vm493_vm2, %v3803_v8  ;;  %v3828_v48 = vpack.c.bf16 %v427_v28, %v425_v16  ;;  %v390_v49 = vsel %vm362_vm1, %v388_v3, %v389_v17  ;;  %v392_v52 = vsel %vm362_vm1, %v389_v17, %v391_v21  ;;  %v393_v61 = vrot.slane %v3801_v7, 1  ;;  %v3834_v62 = vld [vmem:[%s3600_s29 + $0x160] sm:$0x3]  ;;  %v3837_v15 = vld [vmem:[%s3600_s29 + $0xa8] sm:$0xff]  ;;  %v3846_v17 = vld [vmem:[%s3600_s29 + $0xb0] sm:$0xff] }
  0x24   : > { %5107 = vst [vmem:[#allocation17_spill] sm:$0xff] %v3834_v62  ;;  %5108 = vst [vmem:[#allocation18_spill] sm:$0xff] %v3837_v15  ;;  %v920_v59 = vrot.slane %v3603_v4, 2  ;;  %v921_v34 = vrot.slane %v3606_v5, 2  ;;  %3230 = vmatmul.mubr.msk.bf16.gmra.mxu1 %vm493_vm2, %v3795_v60  ;;  %v430_v3 = vsel %vm362_vm1, %v428_v29, %v429_v30  ;;  %v394_v16 = vrot.slane %v3809_v23, 1  ;;  %v3863_v35 = vld [vmem:[%s3600_s29 + $0x168] sm:$0xff] }
  0x25   : > { %5106 = vst [vmem:[#allocation16_spill] sm:$0xff] %v3828_v48  ;;  %v3849_v21 = vld [vmem:[%s3600_s29 + $0xb8] sm:$0x3]  ;;  %3233 = vmatprep.mubr.msk.bf16.mxu1 %vm493_vm2, %v3828_v48  ;;  %v432_v28 = vsel %vm362_vm1, %v429_v30, %v431_v37  ;;  %v396_v8 = vrot.slane %v3821_v40, 1  ;;  %v433_v47 = vrot.slane %v3812_v24, 1  ;;  %v434_v60 = vrot.slane %v3824_v41, 1 }
  0x26   : > { %v3857_v2 = vpack.c.bf16 %v392_v52, %v390_v49  ;;  %v395_v29 = vsel %vm362_vm1, %v393_v61, %v394_v16  ;;  %v436_v46 = vrot.slane %v3834_v62, 1  ;;  %v398_v55 = vrot.slane %v3837_v15, 1  ;;  %v3866_v63 = vld [vmem:[%s3600_s29 + $0x170] sm:$0xff]  ;;  %v3869_v48 = vld [vmem:[%s3600_s29 + $0x178] sm:$0x3] }
  0x27   : > { %v397_v30 = vsel %vm362_vm1, %v394_v16, %v396_v8  ;;  %v435_v37 = vsel %vm362_vm1, %v433_v47, %v434_v60  ;;  %v399_v44 = vrot.slane %v3846_v17, 1  ;;  %v401_v49 = vrot.slane %v3849_v21, 1 }
  0x28   : > { %v923_v52 = vrot.slane %v3609_v6, 2  ;;  %v3876_v61 = vpack.c.bf16 %v432_v28, %v430_v3  ;;  %v3878_v62 = vpack.c.bf16 %v397_v30, %v395_v29  ;;  %v437_v27 = vsel %vm362_vm1, %v434_v60, %v436_v46 }
  0x29   : > { %v3881_v12 = vpack.c.bf16 %v437_v27, %v435_v37  ;;  %v438_v15 = vrot.slane %v3863_v35, 1  ;;  %v439_v8 = vrot.slane %v3866_v63, 1  ;;  %v441_v47 = vrot.slane %v3869_v48, 1 }
  0x2a   : > { %3218 = vmatmul.mubr.msk.bf16.gmra.mxu0 %vm493_vm2, %v3857_v2  ;;  %v400_v6 = vsel %vm362_vm1, %v398_v55, %v399_v44  ;;  %v402_v3 = vsel %vm362_vm1, %v399_v44, %v401_v49  ;;  %v922_v27 = vsel %vm919_vm3, %v920_v59, %v921_v34  ;;  %v924_v46 = vsel %vm919_vm3, %v921_v34, %v923_v52 }
  0x2b   : > { %3221 = vmatprep.mubr.msk.bf16.mxu0 %vm493_vm2, %v3878_v62  ;;  %v440_v60 = vsel %vm362_vm1, %v438_v15, %v439_v8  ;;  %v442_v16 = vsel %vm362_vm1, %v439_v8, %v441_v47  ;;  %v3900_v28 = vpack.c.bf16 %v402_v3, %v400_v6  ;;  %v925_v55 = vrot.slane %v3629_v18, 2 }
  0x2c   : > { %3234 = vmatmul.mubr.msk.bf16.gmra.mxu1 %vm493_vm2, %v3876_v61  ;;  %v926_v44 = vrot.slane %v3632_v19, 2  ;;  %v928_v29 = vrot.slane %v3635_v20, 2  ;;  %v1032_v30 = vpack.c.bf16 %v924_v46, %v922_v27  ;;  %v3905_v37 = vpack.c.bf16 %v442_v16, %v440_v60 }
  0x2d   : > { %3237 = vmatprep.mubr.msk.bf16.mxu1 %vm493_vm2, %v3881_v12  ;;  %v930_v34 = vrot.slane %v3653_v31, 2  ;;  %v931_v59 = vrot.slane %v3656_v32, 2  ;;  %v933_v49 = vrot.slane %v3668_v38, 2  ;;  %v297_v15 = vpack.c.bf16 %v3606_v5, %v3603_v4 }
  0x2e   : > { %5109 = vst [vmem:[#allocation19_spill] sm:$0xff] %v3905_v37  ;;  %v927_v52 = vsel %vm919_vm3, %v925_v55, %v926_v44  ;;  %v929_v20 = vsel %vm919_vm3, %v926_v44, %v928_v29  ;;  %v1513_v4 = vsel %vm542_vm0, %v3696_v51, 0  ;;  %v3926_v5 = vpack.c.bf16 %v3632_v19, %v3629_v18 }
  0x2f   : > { %v932_v8 = vsel %vm919_vm3, %v930_v34, %v931_v59  ;;  %v934_v47 = vsel %vm919_vm3, %v931_v59, %v933_v49  ;;  %v3928_v38 = vpack.c.bf16 %v929_v20, %v927_v52  ;;  %v935_v6 = vrot.slane %v3681_v45, 2 }
  0x30   : > { %v3933_v3 = vpack.c.bf16 %v3618_v11, %v3615_v10  ;;  %v3935_v27 = vpack.c.bf16 %v934_v47, %v932_v8  ;;  %v936_v46 = vrot.slane %v3691_v50, 2  ;;  %v938_v60 = vrot.slane %v3703_v56, 2  ;;  %v3957_v56 = vld [vmem:[%s5059_s1 + $0xc] sm:$0x3] }
  0x31   : > { %v3941_v51 = vpack.c.bf16 %v3644_v26, %v3641_v25  ;;  %v940_v18 = vrot.slane %v3722_v0, 2  ;;  %v941_v19 = vrot.slane %v3725_v1, 2  ;;  %v943_v16 = vrot.slane %v3733_v9, 2 }
  0x32   : > { %3222 = vmatmul.mubr.msk.bf16.gmra.mxu0 %vm493_vm2, %v3900_v28  ;;  %v3948_v55 = vpack.c.bf16 %v3671_v39, %v3659_v33  ;;  %v3952_v44 = vpack.c.bf16 %v3656_v32, %v3653_v31  ;;  %v1301_v29 = vsel %vm542_vm0, %v3741_v14, 0  ;;  %v937_v9 = vsel %vm919_vm3, %v935_v6, %v936_v46 }
  0x33   : > { %3277 = vmatprep.mubr.msk.bf16.mxu0 %vm493_vm2, %v1032_v30  ;;  %v939_v31 = vsel %vm919_vm3, %v936_v46, %v938_v60  ;;  %v3969_v32 = vpack.c.bf16 %v3709_v58, %v3706_v57  ;;  %v3974_v30 = vld [vmem:[%s5059_s1 + $0xa] sm:$0x3]  ;;  %v942_v14 = vsel %vm919_vm3, %v940_v18, %v941_v19  ;;  %v944_v34 = vsel %vm919_vm3, %v941_v19, %v943_v16 }
  0x34   : > { %3238 = vmatmul.mubr.msk.bf16.gmra.mxu1 %vm493_vm2, %v3905_v37  ;;  %v3982_v59 = vpack.c.bf16 %v3751_v22, %v3736_v13  ;;  %v3990_v49 = vpack.c.bf16 %v3691_v50, %v3681_v45  ;;  %v3996_v52 = vpack.c.bf16 %v3790_v54, %v3787_v53  ;;  %v4000_v20 = vpack.c.bf16 %v944_v34, %v942_v14  ;;  %v5111_v34 = vld [vmem:[#allocation2_spill] sm:$0xff] }
  0x35   : > { %3243 = vmatprep.mubr.msk.bf16.mxu1 %vm493_vm2, %v297_v15  ;;  %v3992_v15 = vpack.c.bf16 %v939_v31, %v937_v9  ;;  %v945_v8 = vrot.slane %v3765_v36, 2  ;;  %v946_v47 = vrot.slane %v3774_v42, 2  ;;  %v950_v45 = vrot.slane %v3801_v7, 2 }
  0x36   : > { %v951_v50 = vrot.slane %v3809_v23, 2  ;;  %v953_v6 = vrot.slane %v3821_v40, 2  ;;  %v4010_v46 = vpack.c.bf16 %v3824_v41, %v3812_v24  ;;  %v4014_v60 = vpack.c.bf16 %v3725_v1, %v3722_v0 }
  0x37   : > { %v4018_v18 = vpack.c.bf16 %v3866_v63, %v3863_v35  ;;  %v956_v31 = vrot.slane %v3846_v17, 2  ;;  %v958_v14 = vrot.slane %v3849_v21, 2 }
  0x38   : > { %v952_v0 = vsel %vm919_vm3, %v950_v45, %v951_v50  ;;  %v954_v1 = vsel %vm919_vm3, %v951_v50, %v953_v6  ;;  %v961_v45 = vrot.slane %v3618_v11, 2  ;;  %v4048_v50 = vpack.c.bf16 %v3809_v23, %v3801_v7 }
  0x39   : > { %v4034_v16 = vpack.c.bf16 %v954_v1, %v952_v0  ;;  %v959_v6 = vsel %vm919_vm3, %v956_v31, %v958_v14  ;;  %v965_v7 = vrot.slane %v3641_v25, 2  ;;  %v966_v23 = vrot.slane %v3644_v26, 2 }
  0x3a   : > { %3278 = vmatmul.mubr.msk.bf16.vlgmr.msra.gmra.mxu0 %vm493_vm2, %v3928_v38  ;;  %v970_v1 = vrot.slane %v3659_v33, 2 }
  0x3b   : > { %3344 = vmatpush3.bf16.msra.mxu0 %v1513_v4  ;;  %3281 = vmatprep.mubr.msk.bf16.mxu0 %vm493_vm2, %v3935_v27  ;;  %v948_v4 = vrot.slane %v3777_v43, 2  ;;  %v947_v43 = vsel %vm919_vm3, %v945_v8, %v946_v47  ;;  %v963_v8 = vrot.slane %v5111_v34, 2  ;;  %v967_v25 = vsel %vm919_vm3, %v965_v7, %v966_v23 }
  0x3c   : > { %3244 = vmatmul.mubr.msk.bf16.vlgmr.msra.gmra.mxu1 %vm493_vm2, %v3926_v5  ;;  %3522 = vmatprep.subr.msk.bf16.mxu0 %vm542_vm0, %v3957_v56  ;;  %v975_v34 = vrot.slane %v3706_v57, 2 }
  0x3d   : > { %3310 = vmatpush3.bf16.msra.mxu1 %v1301_v29  ;;  %3247 = vmatprep.mubr.msk.bf16.mxu1 %vm493_vm2, %v3952_v44  ;;  %v949_v40 = vsel %vm919_vm3, %v946_v47, %v948_v4  ;;  %v5110_v29 = vld [vmem:[#allocation18_spill] sm:$0xff]  ;;  %v4042_v47 = vpack.c.bf16 %v3774_v42, %v3765_v36  ;;  %v960_v4 = vrot.slane %v3615_v10, 2  ;;  %v964_v11 = vsel %vm919_vm3, %v961_v45, %v963_v8 }
  0x3e   : > { %3521 = vmatprep.subr.msk.bf16.mxu1 %vm542_vm0, %v3974_v30  ;;  %v4032_v19 = vpack.c.bf16 %v949_v40, %v947_v43  ;;  %v955_v9 = vrot.slane %v5110_v29, 2  ;;  %v5112_v43 = vld [vmem:[#allocation3_spill] sm:$0xff]  ;;  %v4071_v0 = vpack.c.bf16 %v3846_v17, %v5110_v29  ;;  %v976_v8 = vrot.slane %v3709_v58, 2 }
  0x3f   : > { %v962_v10 = vsel %vm919_vm3, %v960_v4, %v961_v45  ;;  %v968_v40 = vrot.slane %v5112_v43, 2  ;;  %v5114_v4 = vld [vmem:[#allocation8_spill] sm:$0xff]  ;;  %v985_v43 = vrot.slane %v3787_v53, 2 }
  0x40   : > { %v957_v21 = vsel %vm919_vm3, %v955_v9, %v956_v31  ;;  %v4064_v42 = vpack.c.bf16 %v964_v11, %v962_v10  ;;  %v971_v9 = vrot.slane %v3671_v39, 2  ;;  %v5113_v31 = vld [vmem:[#allocation5_spill] sm:$0xff]  ;;  %v978_v45 = vrot.slane %v5114_v4, 2  ;;  %v5115_v10 = vld [vmem:[#allocation11_spill] sm:$0xff] }
  0x41   : > { %v4062_v36 = vpack.c.bf16 %v959_v6, %v957_v21  ;;  %v973_v14 = vrot.slane %v5113_v31, 2  ;;  %v969_v26 = vsel %vm919_vm3, %v966_v23, %v968_v40  ;;  %v980_v21 = vrot.slane %v3736_v13, 2 }
  0x42   : > { %3282 = vmatmul.mubr.msk.bf16.gmra.mxu0 %vm493_vm2, %v3992_v15  ;;  %v972_v17 = vsel %vm919_vm3, %v970_v1, %v971_v9  ;;  %v4088_v39 = vpack.c.bf16 %v969_v26, %v967_v25  ;;  %v981_v6 = vrot.slane %v3751_v22, 2  ;;  %v983_v11 = vrot.slane %v5115_v10, 2  ;;  %v5116_v1 = vld [vmem:[#allocation13_spill] sm:$0xff]  ;;  %v292_v10 = vld [vmem:[%s3600_s29 + $0x188] sm:$0xff] }
  0x43   : > { %3285 = vmatprep.mubr.msk.bf16.mxu0 %vm493_vm2, %v4000_v20  ;;  %v974_v33 = vsel %vm919_vm3, %v971_v9, %v973_v14  ;;  %v977_v7 = vsel %vm919_vm3, %v975_v34, %v976_v8  ;;  %v979_v57 = vsel %vm919_vm3, %v976_v8, %v978_v45  ;;  %v986_v40 = vrot.slane %v3790_v54, 2  ;;  %v5117_v25 = vld [vmem:[#allocation17_spill] sm:$0xff] }
  0x44   : > { %3248 = vmatmul.mubr.msk.bf16.gmra.mxu1 %vm493_vm2, %v3990_v49  ;;  %v4090_v29 = vpack.c.bf16 %v974_v33, %v972_v17  ;;  %v982_v58 = vsel %vm919_vm3, %v980_v21, %v981_v6  ;;  %v984_v13 = vsel %vm919_vm3, %v981_v6, %v983_v11  ;;  %v4110_v22 = vpack.c.bf16 %v979_v57, %v977_v7  ;;  %v291_v6 = vld [vmem:[%s3600_s29 + $0x180] sm:$0xff]  ;;  %v293_v11 = vld [vmem:[%s3600_s29 + $0x190] sm:$0x3] }
  0x45   : > { %3251 = vmatprep.mubr.msk.bf16.mxu1 %vm493_vm2, %v4014_v60  ;;  %v4112_v23 = vpack.c.bf16 %v984_v13, %v982_v58  ;;  %v988_v9 = vrot.slane %v5116_v1, 2  ;;  %v990_v31 = vrot.slane %v3812_v24, 2  ;;  %v991_v14 = vrot.slane %v3824_v41, 2  ;;  %v3033_v1 = vld [vmem:[%s5059_s1 + $0x10] sm:$0x3] }
  0x46   : > { %v993_v26 = vrot.slane %v5117_v25, 2  ;;  %v987_v17 = vsel %vm919_vm3, %v985_v43, %v986_v40  ;;  %v995_v34 = vrot.slane %v3863_v35, 2  ;;  %v996_v8 = vrot.slane %v3866_v63, 2  ;;  %v5118_v43 = vld [vmem:[#allocation6_spill] sm:$0xff]  ;;  %v5123_v25 = vld [vmem:[#allocation7_spill] sm:$0xff] }
  0x47   : > { %v989_v53 = vsel %vm919_vm3, %v986_v40, %v988_v9  ;;  %v992_v54 = vsel %vm919_vm3, %v990_v31, %v991_v14  ;;  %v998_v4 = vrot.slane %v3869_v48, 2  ;;  %v1708_v63 = vrot.slane %v291_v6, 2  ;;  %v5119_v9 = vld [vmem:[#allocation9_spill] sm:$0xff] }
  0x48   : > { %v994_v24 = vsel %vm919_vm3, %v991_v14, %v993_v26  ;;  %v4132_v41 = vpack.c.bf16 %v989_v53, %v987_v17  ;;  %v997_v45 = vsel %vm919_vm3, %v995_v34, %v996_v8  ;;  %v1709_v35 = vrot.slane %v292_v10, 2  ;;  %v5120_v14 = vld [vmem:[#allocation12_spill] sm:$0xff]  ;;  %v5124_v26 = vld [vmem:[#allocation10_spill] sm:$0xff] }
  0x49   : > { %v4134_v33 = vpack.c.bf16 %v994_v24, %v992_v54  ;;  %v999_v21 = vsel %vm919_vm3, %v996_v8, %v998_v4  ;;  %v1711_v7 = vrot.slane %v293_v11, 2  ;;  %v1924_v40 = vsel %vm542_vm0, %v3957_v56, 0  ;;  %v5121_v56 = vld [vmem:[#allocation15_spill] sm:$0xff]  ;;  %v5125_v17 = vld [vmem:[#allocation14_spill] sm:$0xff]  ;;  %v5126_v53 = vld [vmem:[#allocation16_spill] sm:$0xff] }
  0x4a   : > { %3286 = vmatmul.mubr.msk.bf16.gmra.mxu0 %vm493_vm2, %v4032_v19  ;;  %v4151_v48 = vpack.c.bf16 %v999_v21, %v997_v45  ;;  %v1710_v57 = vsel %vm919_vm3, %v1708_v63, %v1709_v35  ;;  %v1722_v31 = vsel %vm542_vm0, %v3974_v30, 0  ;;  %v5122_v30 = vld [vmem:[#allocation4_spill] sm:$0xff]  ;;  %v1499_v54 = vrot.slane %v291_v6, 1 }
  0x4b   : > { %3289 = vmatprep.mubr.msk.bf16.mxu0 %vm493_vm2, %v4034_v16  ;;  %v1712_v58 = vsel %vm919_vm3, %v1709_v35, %v1711_v7  ;;  %v1500_v24 = vrot.slane %v292_v10, 1  ;;  %v1502_v34 = vrot.slane %v293_v11, 1  ;;  %v1294_v21 = vpack.c.bf16 %v292_v10, %v291_v6  ;;  %v4325_v7 = vld [vmem:[%s3600_s29 + $0x198] sm:$0xff] }
  0x4c   : > { %3252 = vmatmul.mubr.msk.bf16.gmra.mxu1 %vm493_vm2, %v4042_v47  ;;  %v4158_v13 = vpack.c.bf16 %v1712_v58, %v1710_v57  ;;  %v2345_v63 = vsel %vm542_vm0, %v3033_v1, 0  ;;  %v4328_v57 = vld [vmem:[%s3600_s29 + $0x1a0] sm:$0xff] }
  0x4d   : > { %3255 = vmatprep.mubr.msk.bf16.mxu1 %vm493_vm2, %v4048_v50  ;;  %v1501_v8 = vsel %vm362_vm1, %v1499_v54, %v1500_v24  ;;  %v1503_v4 = vsel %vm362_vm1, %v1500_v24, %v1502_v34 }
  0x4e   : > { %v4236_v45 = vpack.c.bf16 %v1503_v4, %v1501_v8 }
  0x50   : > { %5127 = vst [vmem:[#allocation18_spill] sm:$0xff] %v4236_v45 }
  0x52   : > { %3290 = vmatmul.mubr.msk.bf16.gmra.mxu0 %vm493_vm2, %v4062_v36 }
  0x53   : > { %3293 = vmatprep.mubr.msk.bf16.mxu0 %vm493_vm2, %v4064_v42 }
  0x54   : > { %3256 = vmatmul.mubr.msk.bf16.gmra.mxu1 %vm493_vm2, %v4071_v0 }
  0x55   : > { %3259 = vmatprep.mubr.msk.bf16.mxu1 %vm493_vm2, %v3933_v3 }
  0x5a   : > { %3294 = vmatmul.mubr.msk.bf16.gmra.mxu0 %vm493_vm2, %v4088_v39 }
  0x5b   : > { %3297 = vmatprep.mubr.msk.bf16.mxu0 %vm493_vm2, %v4090_v29 }
  0x5c   : > { %3260 = vmatmul.mubr.msk.bf16.gmra.mxu1 %vm493_vm2, %v3941_v51 }
  0x5d   : > { %3263 = vmatprep.mubr.msk.bf16.mxu1 %vm493_vm2, %v3948_v55 }
  0x62   : > { %3298 = vmatmul.mubr.msk.bf16.gmra.mxu0 %vm493_vm2, %v4110_v22 }
  0x63   : > { %3301 = vmatprep.mubr.msk.bf16.mxu0 %vm493_vm2, %v4112_v23 }
  0x64   : > { %3264 = vmatmul.mubr.msk.bf16.gmra.mxu1 %vm493_vm2, %v3969_v32 }
  0x65   : > { %3267 = vmatprep.mubr.msk.bf16.mxu1 %vm493_vm2, %v3982_v59 }
  0x6a   : > { %3302 = vmatmul.mubr.msk.bf16.gmra.mxu0 %vm493_vm2, %v4132_v41 }
  0x6b   : > { %3305 = vmatprep.mubr.msk.bf16.mxu0 %vm493_vm2, %v4134_v33 }
  0x6c   : > { %3268 = vmatmul.mubr.msk.bf16.gmra.mxu1 %vm493_vm2, %v3996_v52 }
  0x6d   : > { %3271 = vmatprep.mubr.msk.bf16.mxu1 %vm493_vm2, %v4010_v46 }
  0x72   : > { %3306 = vmatmul.mubr.msk.bf16.gmra.mxu0 %vm493_vm2, %v4151_v48 }
  0x73   : > { %3345 = vmatprep.mubr.msk.bf16.mxu0 %vm493_vm2, %v5118_v43 }
  0x74   : > { %3272 = vmatmul.mubr.msk.bf16.gmra.mxu1 %vm493_vm2, %v4018_v18 }
  0x75   : > { %3311 = vmatprep.mubr.msk.bf16.mxu1 %vm493_vm2, %v3926_v5  ;;  %v3016_v5 = vld [vmem:[%s5059_s1 + $0xe] sm:$0x3] }
  0x76   : > { %v2136_v35 = vsel %vm542_vm0, %v3016_v5, 0 }
  0x7a   : > { %3346 = vmatmul.mubr.msk.bf16.vlgmr.msra.gmra.mxu0 %vm493_vm2, %v5119_v9 }
  0x7b   : > { %3412 = vmatpush3.bf16.msra.mxu0 %v1924_v40  ;;  %3349 = vmatprep.mubr.msk.bf16.mxu0 %vm493_vm2, %v5120_v14 }
  0x7c   : > { %3312 = vmatmul.mubr.msk.bf16.vlgmr.msra.gmra.mxu1 %vm493_vm2, %v3952_v44  ;;  %3524 = vmatprep.subr.msk.bf16.mxu0 %vm542_vm0, %v3033_v1 }
  0x7d   : > { %3378 = vmatpush3.bf16.msra.mxu1 %v1722_v31  ;;  %3315 = vmatprep.mubr.msk.bf16.mxu1 %vm493_vm2, %v3990_v49 }
  0x7e   : > { %3523 = vmatprep.subr.msk.bf16.mxu1 %vm542_vm0, %v3016_v5 }
  0x82   : > { %3350 = vmatmul.mubr.msk.bf16.gmra.mxu0 %vm493_vm2, %v5121_v56 }
  0x83   : > { %3353 = vmatprep.mubr.msk.bf16.mxu0 %vm493_vm2, %v3857_v2 }
  0x84   : > { %3316 = vmatmul.mubr.msk.bf16.gmra.mxu1 %vm493_vm2, %v4014_v60 }
  0x85   : > { %3319 = vmatprep.mubr.msk.bf16.mxu1 %vm493_vm2, %v4042_v47 }
  0x8a   : > { %3354 = vmatmul.mubr.msk.bf16.gmra.mxu0 %vm493_vm2, %v3878_v62 }
  0x8b   : > { %3357 = vmatprep.mubr.msk.bf16.mxu0 %vm493_vm2, %v3900_v28 }
  0x8c   : > { %3320 = vmatmul.mubr.msk.bf16.gmra.mxu1 %vm493_vm2, %v4048_v50 }
  0x8d   : > { %3323 = vmatprep.mubr.msk.bf16.mxu1 %vm493_vm2, %v4071_v0 }
  0x92   : > { %3358 = vmatmul.mubr.msk.bf16.gmra.mxu0 %vm493_vm2, %v5122_v30 }
  0x93   : > { %3361 = vmatprep.mubr.msk.bf16.mxu0 %vm493_vm2, %v5123_v25 }
  0x94   : > { %3324 = vmatmul.mubr.msk.bf16.gmra.mxu1 %vm493_vm2, %v3933_v3 }
  0x95   : > { %3327 = vmatprep.mubr.msk.bf16.mxu1 %vm493_vm2, %v3941_v51 }
  0x9a   : > { %3362 = vmatmul.mubr.msk.bf16.gmra.mxu0 %vm493_vm2, %v5124_v26 }
  0x9b   : > { %3365 = vmatprep.mubr.msk.bf16.mxu0 %vm493_vm2, %v5125_v17 }
  0x9c   : > { %3328 = vmatmul.mubr.msk.bf16.gmra.mxu1 %vm493_vm2, %v3948_v55 }
  0x9d   : > { %3331 = vmatprep.mubr.msk.bf16.mxu1 %vm493_vm2, %v3969_v32 }
  0xa2   : > { %3366 = vmatmul.mubr.msk.bf16.gmra.mxu0 %vm493_vm2, %v5126_v53 }
  0xa3   : > { %3369 = vmatprep.mubr.msk.bf16.mxu0 %vm493_vm2, %v3876_v61 }
  0xa4   : > { %3332 = vmatmul.mubr.msk.bf16.gmra.mxu1 %vm493_vm2, %v3982_v59 }
  0xa5   : > { %3335 = vmatprep.mubr.msk.bf16.mxu1 %vm493_vm2, %v3996_v52 }
  0xaa   : > { %3370 = vmatmul.mubr.msk.bf16.gmra.mxu0 %vm493_vm2, %v3881_v12 }
  0xab   : > { %3373 = vmatprep.mubr.msk.bf16.mxu0 %vm493_vm2, %v3905_v37 }
  0xac   : > { %3336 = vmatmul.mubr.msk.bf16.gmra.mxu1 %vm493_vm2, %v4010_v46 }
  0xad   : > { %3339 = vmatprep.mubr.msk.bf16.mxu1 %vm493_vm2, %v4018_v18 }
  0xb2   : > { %3374 = vmatmul.mubr.msk.bf16.gmra.mxu0 %vm493_vm2, %v4236_v45 }
  0xb3   : > { %3413 = vmatprep.mubr.msk.bf16.mxu0 %vm493_vm2, %v3952_v44 }
  0xb4   : > { %3340 = vmatmul.mubr.msk.bf16.gmra.mxu1 %vm493_vm2, %v1294_v21 }
  0xb5   : > { %3379 = vmatprep.mubr.msk.bf16.mxu1 %vm493_vm2, %v3928_v38 }
  0xba   : > { %3414 = vmatmul.mubr.msk.bf16.vlgmr.msra.gmra.mxu0 %vm493_vm2, %v3990_v49 }
  0xbb   : > { %3480 = vmatpush3.bf16.msra.mxu0 %v2345_v63  ;;  %3417 = vmatprep.mubr.msk.bf16.mxu0 %vm493_vm2, %v4014_v60 }
  0xbc   : > { %3380 = vmatmul.mubr.msk.bf16.vlgmr.msra.gmra.mxu1 %vm493_vm2, %v3935_v27 }
  0xbd   : > { %3446 = vmatpush3.bf16.msra.mxu1 %v2136_v35  ;;  %3383 = vmatprep.mubr.msk.bf16.mxu1 %vm493_vm2, %v3992_v15 }
  0xc2   : > { %3418 = vmatmul.mubr.msk.bf16.gmra.mxu0 %vm493_vm2, %v4042_v47 }
  0xc3   : > { %3421 = vmatprep.mubr.msk.bf16.mxu0 %vm493_vm2, %v4048_v50 }
  0xc4   : > { %3384 = vmatmul.mubr.msk.bf16.gmra.mxu1 %vm493_vm2, %v4000_v20 }
  0xc5   : > { %3387 = vmatprep.mubr.msk.bf16.mxu1 %vm493_vm2, %v4032_v19 }
  0xca   : > { %3422 = vmatmul.mubr.msk.bf16.gmra.mxu0 %vm493_vm2, %v4071_v0 }
  0xcb   : > { %3425 = vmatprep.mubr.msk.bf16.mxu0 %vm493_vm2, %v3933_v3 }
  0xcc   : > { %3388 = vmatmul.mubr.msk.bf16.gmra.mxu1 %vm493_vm2, %v4034_v16 }
  0xcd   : > { %3391 = vmatprep.mubr.msk.bf16.mxu1 %vm493_vm2, %v4062_v36 }
  0xd2   : > { %3426 = vmatmul.mubr.msk.bf16.gmra.mxu0 %vm493_vm2, %v3941_v51 }
  0xd3   : > { %3429 = vmatprep.mubr.msk.bf16.mxu0 %vm493_vm2, %v3948_v55 }
  0xd4   : > { %3392 = vmatmul.mubr.msk.bf16.gmra.mxu1 %vm493_vm2, %v4064_v42 }
  0xd5   : > { %3395 = vmatprep.mubr.msk.bf16.mxu1 %vm493_vm2, %v4088_v39 }
  0xda   : > { %v3211_v38 = vpop.f32.mrf.mxu0  ;;  %3430 = vmatmul.mubr.msk.bf16.gmra.mxu0 %vm493_vm2, %v3969_v32 }
  0xdb   : > { %3433 = vmatprep.mubr.msk.bf16.mxu0 %vm493_vm2, %v3982_v59 }
  0xdc   : > { %v4283_v3 = vpop.f32.mrf.mxu1  ;;  %3396 = vmatmul.mubr.msk.bf16.gmra.mxu1 %vm493_vm2, %v4090_v29  ;;  %v580_v51 = vpop.f32.mrf.mxu0 }
  0xdd   : > { %3399 = vmatprep.mubr.msk.bf16.mxu1 %vm493_vm2, %v4110_v22 }
  0xde   : > { %v4289_v55 = vpop.f32.mrf.mxu1  ;;  %v3212_v44 = vpop.f32.mrf.mxu0 }
  0xe0   : > { %v4291_v49 = vpop.f32.mrf.mxu1  ;;  %v583_v60 = vpop.f32.mrf.mxu0 }
  0xe2   : > { %v4293_v47 = vpop.f32.mrf.mxu1  ;;  %v4295_v32 = vpop.f32.mrf.mxu0  ;;  %3434 = vmatmul.mubr.msk.bf16.gmra.mxu0 %vm493_vm2, %v3996_v52 }
  0xe3   : > { %3437 = vmatprep.mubr.msk.bf16.mxu0 %vm493_vm2, %v4010_v46 }
  0xe4   : > { %v4301_v59 = vpop.f32.mrf.mxu1  ;;  %3400 = vmatmul.mubr.msk.bf16.gmra.mxu1 %vm493_vm2, %v4112_v23  ;;  %v4305_v50 = vpop.f32.mrf.mxu0 }
  0xe5   : > { %3403 = vmatprep.mubr.msk.bf16.mxu1 %vm493_vm2, %v4132_v41 }
  0xe6   : > { %v4309_v0 = vpop.f32.mrf.mxu1  ;;  %v4311_v6 = vpop.f32.mrf.mxu0 }
  0xe8   : > { %v4313_v10 = vpop.f32.mrf.mxu1  ;;  %v4315_v52 = vpop.f32.mrf.mxu0 }
  0xea   : > { %v4317_v11 = vpop.f32.mrf.mxu1  ;;  %v4319_v46 = vpop.f32.mrf.mxu0  ;;  %3438 = vmatmul.mubr.msk.bf16.gmra.mxu0 %vm493_vm2, %v4018_v18  ;;  %v1917_v18 = vpack.c.bf16 %v4328_v57, %v4325_v7 }
  0xeb   : > { %3441 = vmatprep.mubr.msk.bf16.mxu0 %vm493_vm2, %v1294_v21 }
  0xec   : > { %v4330_v58 = vpop.f32.mrf.mxu1  ;;  %3404 = vmatmul.mubr.msk.bf16.gmra.mxu1 %vm493_vm2, %v4134_v33  ;;  %v4334_v43 = vpop.f32.mrf.mxu0 }
  0xed   : > { %5128 = vst [vmem:[#allocation2_spill] sm:$0xff] %v4330_v58  ;;  %3407 = vmatprep.mubr.msk.bf16.mxu1 %vm493_vm2, %v4151_v48 }
  0xee   : > { %v4338_v40 = vpop.f32.mrf.mxu1  ;;  %v4340_v1 = vpop.f32.mrf.mxu0 }
  0xef   : > { %5129 = vst [vmem:[#allocation3_spill] sm:$0xff] %v4338_v40 }
  0xf0   : > { %v4344_v31 = vpop.f32.mrf.mxu1  ;;  %v4346_v5 = vpop.f32.mrf.mxu0 }
  0xf1   : > { %5130 = vst [vmem:[#allocation5_spill] sm:$0xff] %v4344_v31 }
  0xf2   : > { %v4348_v54 = vpop.f32.mrf.mxu1  ;;  %v4350_v24 = vpop.f32.mrf.mxu0  ;;  %3442 = vmatmul.mubr.msk.bf16.gmra.mxu0 %vm493_vm2, %v1917_v18 }
  0xf3   : > { %5131 = vst [vmem:[#allocation8_spill] sm:$0xff] %v4348_v54  ;;  %3481 = vmatprep.mubr.msk.bf16.mxu0 %vm493_vm2, %v3935_v27 }
  0xf4   : > { %v4355_v34 = vpop.f32.mrf.mxu1  ;;  %3408 = vmatmul.mubr.msk.bf16.gmra.mxu1 %vm493_vm2, %v4158_v13  ;;  %v4359_v8 = vpop.f32.mrf.mxu0 }
  0xf5   : > { %5132 = vst [vmem:[#allocation11_spill] sm:$0xff] %v4355_v34  ;;  %3447 = vmatprep.mubr.msk.bf16.mxu1 %vm493_vm2, %v5119_v9 }
  0xf6   : > { %v4363_v4 = vpop.f32.mrf.mxu1  ;;  %v4365_v21 = vpop.f32.mrf.mxu0 }
  0xf7   : > { %5133 = vst [vmem:[#allocation13_spill] sm:$0xff] %v4363_v4 }
  0xf8   : > { %v4367_v63 = vpop.f32.mrf.mxu1  ;;  %v4369_v35 = vpop.f32.mrf.mxu0 }
  0xf9   : > { %5134 = vst [vmem:[#allocation17_spill] sm:$0xff] %v4367_v63 }
  0xfa   : > { %v4371_v18 = vpop.f32.mrf.mxu1  ;;  %v3279_v27 = vpop.f32.mrf.mxu0  ;;  %3482 = vmatmul.mubr.msk.bf16.vlgmr.msra.gmra.mxu0 %vm493_vm2, %v3992_v15 }
  0xfb   : > { %5135 = vst [vmem:[#allocation6_spill] sm:$0xff] %v4371_v18  ;;  %3485 = vmatprep.mubr.msk.bf16.mxu0 %vm493_vm2, %v4000_v20 }
  0xfc   : > { %v3245_v34 = vpop.f32.mrf.mxu1  ;;  %3448 = vmatmul.mubr.msk.bf16.vlgmr.msra.gmra.mxu1 %vm493_vm2, %v5120_v14  ;;  %v1135_v9 = vpop.f32.mrf.mxu0 }
  0xfd   : > { %v801_v4 = vadd.f32 %v3245_v34, %v3211_v38  ;;  %3451 = vmatprep.mubr.msk.bf16.mxu1 %vm493_vm2, %v5121_v56 }
  0xfe   : > { %v792_v63 = vpop.f32.mrf.mxu1  ;;  %v3280_v54 = vpop.f32.mrf.mxu0 }
  0xff   : > { %v4381_v31 = vadd.f32 %v3279_v27, %v801_v4  ;;  %v793_v18 = vadd.f32 %v792_v63, %v580_v51 }
 0x100   : > { %v3246_v40 = vpop.f32.mrf.mxu1  ;;  %v1138_v45 = vpop.f32.mrf.mxu0 }
 0x101   : > { %v4383_v15 = vadd.f32 %v1135_v9, %v793_v18  ;;  %v804_v58 = vadd.f32 %v3246_v40, %v3212_v44 }
 0x102   : > { %v795_v20 = vpop.f32.mrf.mxu1  ;;  %v3283_v37 = vpop.f32.mrf.mxu0  ;;  %3486 = vmatmul.mubr.msk.bf16.gmra.mxu0 %vm493_vm2, %v4032_v19 }
 0x103   : > { %v4387_v14 = vadd.f32 %v3280_v54, %v804_v58  ;;  %v796_v38 = vadd.f32 %v795_v20, %v583_v60  ;;  %3489 = vmatprep.mubr.msk.bf16.mxu0 %vm493_vm2, %v4034_v16 }
 0x104   : > { %v3249_v56 = vpop.f32.mrf.mxu1  ;;  %3452 = vmatmul.mubr.msk.bf16.gmra.mxu1 %vm493_vm2, %v3857_v2  ;;  %v1151_v51 = vpop.f32.mrf.mxu0 }
 0x105   : > { %v4393_v34 = vadd.f32 %v1138_v45, %v796_v38  ;;  %v817_v44 = vadd.f32 %v3249_v56, %v4295_v32  ;;  %3455 = vmatprep.mubr.msk.bf16.mxu1 %vm493_vm2, %v3878_v62 }
 0x106   : > { %v808_v40 = vpop.f32.mrf.mxu1  ;;  %v3284_v19 = vpop.f32.mrf.mxu0 }
 0x107   : > { %v4398_v58 = vadd.f32 %v3283_v37, %v817_v44  ;;  %v809_v60 = vadd.f32 %v808_v40, %v4305_v50 }
 0x108   : > { %v3250_v54 = vpop.f32.mrf.mxu1  ;;  %v1154_v16 = vpop.f32.mrf.mxu0 }
 0x109   : > { %v4401_v4 = vadd.f32 %v1151_v51, %v809_v60  ;;  %v820_v2 = vadd.f32 %v3250_v54, %v4311_v6 }
 0x10a   : > { %v811_v63 = vpop.f32.mrf.mxu1  ;;  %v3287_v45 = vpop.f32.mrf.mxu0  ;;  %3490 = vmatmul.mubr.msk.bf16.gmra.mxu0 %vm493_vm2, %v4062_v36 }
 0x10b   : > { %v4406_v32 = vadd.f32 %v3284_v19, %v820_v2  ;;  %v812_v62 = vadd.f32 %v811_v63, %v4315_v52  ;;  %3493 = vmatprep.mubr.msk.bf16.mxu0 %vm493_vm2, %v4064_v42 }
 0x10c   : > { %v3253_v37 = vpop.f32.mrf.mxu1  ;;  %3456 = vmatmul.mubr.msk.bf16.gmra.mxu1 %vm493_vm2, %v3900_v28  ;;  %v1167_v50 = vpop.f32.mrf.mxu0 }
 0x10d   : > { %v4413_v18 = vadd.f32 %v1154_v16, %v812_v62  ;;  %v833_v6 = vadd.f32 %v3253_v37, %v4319_v46  ;;  %3459 = vmatprep.mubr.msk.bf16.mxu1 %vm493_vm2, %v5122_v30 }
 0x10e   : > { %v824_v36 = vpop.f32.mrf.mxu1  ;;  %v3288_v27 = vpop.f32.mrf.mxu0 }
 0x10f   : > { %v4418_v9 = vadd.f32 %v3287_v45, %v833_v6  ;;  %v825_v52 = vadd.f32 %v824_v36, %v4334_v43 }
 0x110   : > { %v3254_v20 = vpop.f32.mrf.mxu1  ;;  %v1170_v42 = vpop.f32.mrf.mxu0 }
 0x111   : > { %v4421_v38 = vadd.f32 %v1167_v50, %v825_v52  ;;  %v836_v28 = vadd.f32 %v3254_v20, %v4340_v1 }
 0x112   : > { %v827_v56 = vpop.f32.mrf.mxu1  ;;  %v3291_v51 = vpop.f32.mrf.mxu0  ;;  %3494 = vmatmul.mubr.msk.bf16.gmra.mxu0 %vm493_vm2, %v4088_v39 }
 0x113   : > { %v4426_v46 = vadd.f32 %v3288_v27, %v836_v28  ;;  %v828_v30 = vadd.f32 %v827_v56, %v4346_v5  ;;  %3497 = vmatprep.mubr.msk.bf16.mxu0 %vm493_vm2, %v4090_v29 }
 0x114   : > { %v3257_v44 = vpop.f32.mrf.mxu1  ;;  %3460 = vmatmul.mubr.msk.bf16.gmra.mxu1 %vm493_vm2, %v5123_v25  ;;  %v1183_v43 = vpop.f32.mrf.mxu0 }
 0x115   : > { %v4433_v40 = vadd.f32 %v1170_v42, %v828_v30  ;;  %v849_v1 = vadd.f32 %v3257_v44, %v4350_v24  ;;  %3463 = vmatprep.mubr.msk.bf16.mxu1 %vm493_vm2, %v5124_v26  ;;  %v296_v42 = vld [vmem:[%s3600_s29 + $0x1a8] sm:$0x3]  ;;  %v2122_v44 = vrot.slane %v4325_v7, 1 }
 0x116   : > { %v840_v39 = vpop.f32.mrf.mxu1  ;;  %v3292_v19 = vpop.f32.mrf.mxu0 }
 0x117   : > { %v4438_v60 = vadd.f32 %v3291_v51, %v849_v1  ;;  %v841_v5 = vadd.f32 %v840_v39, %v4359_v8  ;;  %v2332_v51 = vrot.slane %v4328_v57, 2 }
 0x118   : > { %v3258_v54 = vpop.f32.mrf.mxu1  ;;  %v1186_v29 = vpop.f32.mrf.mxu0 }
 0x119   : > { %v4441_v16 = vadd.f32 %v1183_v43, %v841_v5  ;;  %v852_v25 = vadd.f32 %v3258_v54, %v4365_v21 }
 0x11a   : > { %v843_v2 = vpop.f32.mrf.mxu1  ;;  %v3295_v63 = vpop.f32.mrf.mxu0  ;;  %3498 = vmatmul.mubr.msk.bf16.gmra.mxu0 %vm493_vm2, %v4110_v22 }
 0x11b   : > { %v4446_v24 = vadd.f32 %v3292_v19, %v852_v25  ;;  %v844_v26 = vadd.f32 %v843_v2, %v4369_v35  ;;  %3501 = vmatprep.mubr.msk.bf16.mxu0 %vm493_vm2, %v4112_v23  ;;  %v2125_v19 = vrot.slane %v296_v42, 1  ;;  %v5136_v2 = vld [vmem:[#allocation19_spill] sm:$0xff] }
 0x11c   : > { %v3261_v45 = vpop.f32.mrf.mxu1  ;;  %3464 = vmatmul.mubr.msk.bf16.gmra.mxu1 %vm493_vm2, %v5125_v17  ;;  %v1199_v8 = vpop.f32.mrf.mxu0 }
 0x11d   : > { %v4453_v62 = vadd.f32 %v1186_v29, %v844_v26  ;;  %v865_v21 = vadd.f32 %v3261_v45, %v4283_v3  ;;  %3467 = vmatprep.mubr.msk.bf16.mxu1 %vm493_vm2, %v5126_v53  ;;  %v5137_v26 = vld [vmem:[#allocation2_spill] sm:$0xff] }
 0x11e   : > { %v856_v22 = vpop.f32.mrf.mxu1  ;;  %v3296_v37 = vpop.f32.mrf.mxu0  ;;  %v5138_v45 = vld [vmem:[#allocation18_spill] sm:$0xff] }
 0x11f   : > { %v4458_v50 = vadd.f32 %v3295_v63, %v865_v21  ;;  %v857_v35 = vadd.f32 %v856_v22, %v4289_v55 }
 0x120   : > { %v3262_v23 = vpop.f32.mrf.mxu1  ;;  %v1202_v6 = vpop.f32.mrf.mxu0 }
 0x121   : > { %v4461_v36 = vadd.f32 %v1199_v8, %v857_v35  ;;  %v868_v17 = vadd.f32 %v3262_v23, %v4291_v49  ;;  %v5139_v35 = vld [vmem:[#allocation3_spill] sm:$0xff] }
 0x122   : > { %v859_v27 = vpop.f32.mrf.mxu1  ;;  %v3299_v52 = vpop.f32.mrf.mxu0  ;;  %3502 = vmatmul.mubr.msk.bf16.gmra.mxu0 %vm493_vm2, %v4132_v41  ;;  %v2331_v41 = vrot.slane %v4325_v7, 2 }
 0x123   : > { %v4466_v3 = vadd.f32 %v3296_v37, %v868_v17  ;;  %v860_v53 = vadd.f32 %v859_v27, %v4293_v47  ;;  %3505 = vmatprep.mubr.msk.bf16.mxu0 %vm493_vm2, %v4134_v33 }
 0x124   : > { %v3265_v20 = vpop.f32.mrf.mxu1  ;;  %3468 = vmatmul.mubr.msk.bf16.gmra.mxu1 %vm493_vm2, %v3876_v61  ;;  %v1215_v55 = vpop.f32.mrf.mxu0  ;;  %v2334_v61 = vrot.slane %v296_v42, 2  ;;  %v2333_v7 = vsel %vm919_vm3, %v2331_v41, %v2332_v51  ;;  %v5141_v41 = vld [vmem:[#allocation8_spill] sm:$0xff] }
 0x125   : > { %v4474_v28 = vadd.f32 %v1202_v6, %v860_v53  ;;  %v881_v49 = vadd.f32 %v3265_v20, %v4301_v59  ;;  %3471 = vmatprep.mubr.msk.bf16.mxu1 %vm493_vm2, %v3881_v12  ;;  %v2123_v59 = vrot.slane %v4328_v57, 1  ;;  %v5140_v53 = vld [vmem:[#allocation5_spill] sm:$0xff] }
 0x126   : > { %v872_v56 = vpop.f32.mrf.mxu1  ;;  %v3300_v47 = vpop.f32.mrf.mxu0  ;;  %v2335_v57 = vsel %vm919_vm3, %v2332_v51, %v2334_v61  ;;  %v5142_v61 = vld [vmem:[#allocation11_spill] sm:$0xff] }
 0x127   : > { %v4481_v33 = vadd.f32 %v3299_v52, %v881_v49  ;;  %v873_v30 = vadd.f32 %v872_v56, %v4309_v0  ;;  %v2338_v22 = vpack.c.bf16 %v2335_v57, %v2333_v7  ;;  %v5144_v7 = vld [vmem:[#allocation17_spill] sm:$0xff] }
 0x128   : > { %v3266_v43 = vpop.f32.mrf.mxu1  ;;  %v1218_v1 = vpop.f32.mrf.mxu0 }
 0x129   : > { %v4486_v39 = vadd.f32 %v1215_v55, %v873_v30  ;;  %v884_v12 = vadd.f32 %v3266_v43, %v4313_v10 }
 0x12a   : > { %v875_v5 = vpop.f32.mrf.mxu1  ;;  %v3303_v54 = vpop.f32.mrf.mxu0  ;;  %3506 = vmatmul.mubr.msk.bf16.gmra.mxu0 %vm493_vm2, %v4151_v48 }
 0x12b   : > { %v4491_v29 = vadd.f32 %v3300_v47, %v884_v12  ;;  %v876_v0 = vadd.f32 %v875_v5, %v4317_v11  ;;  %3509 = vmatprep.mubr.msk.bf16.mxu0 %vm493_vm2, %v4158_v13  ;;  %v2124_v11 = vsel %vm362_vm1, %v2122_v44, %v2123_v59  ;;  %v2126_v13 = vsel %vm362_vm1, %v2123_v59, %v2125_v19  ;;  %v5143_v12 = vld [vmem:[#allocation13_spill] sm:$0xff] }
 0x12c   : > { %v3269_v25 = vpop.f32.mrf.mxu1  ;;  %3472 = vmatmul.mubr.msk.bf16.gmra.mxu1 %vm493_vm2, %v5136_v2  ;;  %v1231_v10 = vpop.f32.mrf.mxu0  ;;  %v2129_v27 = vpack.c.bf16 %v2126_v13, %v2124_v11 }
 0x12d   : > { %v4500_v63 = vadd.f32 %v1218_v1, %v876_v0  ;;  %v897_v48 = vadd.f32 %v3269_v25, %v5137_v26  ;;  %3475 = vmatprep.mubr.msk.bf16.mxu1 %vm493_vm2, %v5138_v45  ;;  %v5145_v26 = vld [vmem:[#allocation6_spill] sm:$0xff] }
 0x12e   : > { %v888_v8 = vpop.f32.mrf.mxu1  ;;  %v3304_v21 = vpop.f32.mrf.mxu0 }
 0x12f   : > { %v4507_v37 = vadd.f32 %v3303_v54, %v897_v48  ;;  %v889_v23 = vadd.f32 %v888_v8, %v5139_v35 }
 0x130   : > { %v3270_v6 = vpop.f32.mrf.mxu1  ;;  %v1234_v17 = vpop.f32.mrf.mxu0 }
 0x131   : > { %v4510_v52 = vadd.f32 %v1231_v10, %v889_v23  ;;  %v900_v20 = vadd.f32 %v3270_v6, %v5140_v53 }
 0x132   : > { %v891_v55 = vpop.f32.mrf.mxu1  ;;  %v3307_v42 = vpop.f32.mrf.mxu0  ;;  %3510 = vmatmul.mubr.msk.bf16.gmra.mxu0 %vm493_vm2, %v2338_v22 }
 0x133   : > { %v4514_v49 = vadd.f32 %v3304_v21, %v900_v20  ;;  %v892_v56 = vadd.f32 %v891_v55, %v5141_v41 }
 0x134   : > { %v3273_v47 = vpop.f32.mrf.mxu1  ;;  %3476 = vmatmul.mubr.msk.bf16.gmra.mxu1 %vm493_vm2, %v2129_v27  ;;  %v1247_v51 = vpop.f32.mrf.mxu0 }
 0x135   : > { %v4518_v30 = vadd.f32 %v1234_v17, %v892_v56  ;;  %v913_v44 = vadd.f32 %v3273_v47, %v5142_v61 }
 0x136   : > { %v904_v43 = vpop.f32.mrf.mxu1  ;;  %v3308_v1 = vpop.f32.mrf.mxu0 }
 0x137   : > { %v4521_v59 = vadd.f32 %v3307_v42, %v913_v44  ;;  %v905_v19 = vadd.f32 %v904_v43, %v5143_v12 }
 0x138   : > { %v3274_v5 = vpop.f32.mrf.mxu1  ;;  %v1250_v54 = vpop.f32.mrf.mxu0 }
 0x139   : > { %v4524_v0 = vadd.f32 %v1247_v51, %v905_v19  ;;  %v916_v57 = vadd.f32 %v3274_v5, %v5144_v7 }
 0x13a   : > { %v907_v25 = vpop.f32.mrf.mxu1  ;;  %v3347_v2 = vpop.f32.mrf.mxu0 }
 0x13b   : > { %v4527_v10 = vadd.f32 %v3308_v1, %v916_v57  ;;  %v908_v48 = vadd.f32 %v907_v25, %v5145_v26 }
 0x13c   : > { %v3313_v45 = vpop.f32.mrf.mxu1  ;;  %v1549_v11 = vpop.f32.mrf.mxu0 }
 0x13d   : > { %v4530_v13 = vadd.f32 %v1250_v54, %v908_v48  ;;  %v1466_v8 = vadd.f32 %v3313_v45, %v4381_v31 }
 0x13e   : > { %v1337_v21 = vpop.f32.mrf.mxu1  ;;  %v3348_v22 = vpop.f32.mrf.mxu0 }
 0x13f   : > { %v4533_v35 = vadd.f32 %v3347_v2, %v1466_v8  ;;  %v1464_v23 = vadd.f32 %v1337_v21, %v4383_v15 }
 0x140   : > { %v3314_v6 = vpop.f32.mrf.mxu1  ;;  %v1552_v17 = vpop.f32.mrf.mxu0 }
 0x141   : > { %v4536_v27 = vadd.f32 %v1549_v11, %v1464_v23  ;;  %v1467_v53 = vadd.f32 %v3314_v6, %v4387_v14 }
 0x142   : > { %v1340_v20 = vpop.f32.mrf.mxu1  ;;  %v3351_v55 = vpop.f32.mrf.mxu0 }
 0x143   : > { %v4539_v42 = vadd.f32 %v3348_v22, %v1467_v53  ;;  %v1465_v41 = vadd.f32 %v1340_v20, %v4393_v34 }
 0x144   : > { %v3317_v56 = vpop.f32.mrf.mxu1  ;;  %v1565_v31 = vpop.f32.mrf.mxu0 }
 0x145   : > { %v4542_v47 = vadd.f32 %v1552_v17, %v1465_v41  ;;  %v1470_v51 = vadd.f32 %v3317_v56, %v4398_v58 }
 0x146   : > { %v1353_v61 = vpop.f32.mrf.mxu1  ;;  %v3352_v15 = vpop.f32.mrf.mxu0 }
 0x147   : > { %v4545_v44 = vadd.f32 %v3351_v55, %v1470_v51  ;;  %v1468_v43 = vadd.f32 %v1353_v61, %v4401_v4 }
 0x148   : > { %v3318_v1 = vpop.f32.mrf.mxu1  ;;  %v1568_v14 = vpop.f32.mrf.mxu0 }
 0x149   : > { %v4548_v12 = vadd.f32 %v1565_v31, %v1468_v43  ;;  %v1471_v19 = vadd.f32 %v3318_v1, %v4406_v32 }
 0x14a   : > { %v1356_v5 = vpop.f32.mrf.mxu1  ;;  %v3355_v34 = vpop.f32.mrf.mxu0 }
 0x14b   : > { %v4551_v54 = vadd.f32 %v3352_v15, %v1471_v19  ;;  %v1469_v7 = vadd.f32 %v1356_v5, %v4413_v18 }
 0x14c   : > { %v3321_v57 = vpop.f32.mrf.mxu1  ;;  %v1581_v58 = vpop.f32.mrf.mxu0 }
 0x14d   : > { %v4554_v25 = vadd.f32 %v1568_v14, %v1469_v7  ;;  %v1474_v2 = vadd.f32 %v3321_v57, %v4418_v9 }
 0x14e   : > { %v1369_v26 = vpop.f32.mrf.mxu1  ;;  %v3356_v4 = vpop.f32.mrf.mxu0 }
 0x14f   : > { %v4557_v48 = vadd.f32 %v3355_v34, %v1474_v2  ;;  %v1472_v45 = vadd.f32 %v1369_v26, %v4421_v38 }
 0x150   : > { %v3322_v11 = vpop.f32.mrf.mxu1  ;;  %v1584_v32 = vpop.f32.mrf.mxu0 }
 0x151   : > { %v4560_v8 = vadd.f32 %v1581_v58, %v1472_v45  ;;  %v1475_v21 = vadd.f32 %v3322_v11, %v4426_v46 }
 0x152   : > { %v1372_v22 = vpop.f32.mrf.mxu1  ;;  %v3359_v18 = vpop.f32.mrf.mxu0 }
 0x153   : > { %v4563_v23 = vadd.f32 %v3356_v4, %v1475_v21  ;;  %v1473_v6 = vadd.f32 %v1372_v22, %v4433_v40 }
 0x154   : > { %v3325_v17 = vpop.f32.mrf.mxu1  ;;  %v1597_v9 = vpop.f32.mrf.mxu0 }
 0x155   : > { %v4566_v53 = vadd.f32 %v1584_v32, %v1473_v6  ;;  %v1478_v20 = vadd.f32 %v3325_v17, %v4438_v60 }
 0x156   : > { %v1385_v55 = vpop.f32.mrf.mxu1  ;;  %v3360_v38 = vpop.f32.mrf.mxu0 }
 0x157   : > { %v4569_v41 = vadd.f32 %v3359_v18, %v1478_v20  ;;  %v1476_v56 = vadd.f32 %v1385_v55, %v4441_v16 }
 0x158   : > { %v3326_v31 = vpop.f32.mrf.mxu1  ;;  %v1600_v46 = vpop.f32.mrf.mxu0 }
 0x159   : > { %v4572_v51 = vadd.f32 %v1597_v9, %v1476_v56  ;;  %v1479_v61 = vadd.f32 %v3326_v31, %v4446_v24 }
 0x15a   : > { %v1388_v15 = vpop.f32.mrf.mxu1  ;;  %v3363_v40 = vpop.f32.mrf.mxu0 }
 0x15b   : > { %v4575_v43 = vadd.f32 %v3360_v38, %v1479_v61  ;;  %v1477_v1 = vadd.f32 %v1388_v15, %v4453_v62 }
 0x15c   : > { %v3329_v14 = vpop.f32.mrf.mxu1  ;;  %v1613_v60 = vpop.f32.mrf.mxu0 }
 0x15d   : > { %v4578_v19 = vadd.f32 %v1600_v46, %v1477_v1  ;;  %v1482_v5 = vadd.f32 %v3329_v14, %v4458_v50 }
 0x15e   : > { %v1401_v34 = vpop.f32.mrf.mxu1  ;;  %v3364_v16 = vpop.f32.mrf.mxu0 }
 0x15f   : > { %v4581_v7 = vadd.f32 %v3363_v40, %v1482_v5  ;;  %v1480_v57 = vadd.f32 %v1401_v34, %v4461_v36 }
 0x160   : > { %v3330_v58 = vpop.f32.mrf.mxu1  ;;  %v1616_v24 = vpop.f32.mrf.mxu0 }
 0x161   : > { %v4584_v2 = vadd.f32 %v1613_v60, %v1480_v57  ;;  %v1483_v26 = vadd.f32 %v3330_v58, %v4466_v3 }
 0x162   : > { %v1404_v4 = vpop.f32.mrf.mxu1  ;;  %v3367_v62 = vpop.f32.mrf.mxu0 }
 0x163   : > { %v4587_v45 = vadd.f32 %v3364_v16, %v1483_v26  ;;  %v1481_v11 = vadd.f32 %v1404_v4, %v4474_v28 }
 0x164   : > { %v3333_v32 = vpop.f32.mrf.mxu1  ;;  %v1629_v50 = vpop.f32.mrf.mxu0 }
 0x165   : > { %v4590_v21 = vadd.f32 %v1616_v24, %v1481_v11  ;;  %v1486_v22 = vadd.f32 %v3333_v32, %v4481_v33 }
 0x166   : > { %v1417_v18 = vpop.f32.mrf.mxu1  ;;  %v3368_v36 = vpop.f32.mrf.mxu0 }
 0x167   : > { %5146 = vst [vmem:[#allocation9_spill] sm:$0xff] %v4590_v21  ;;  %v4593_v6 = vadd.f32 %v3367_v62, %v1486_v22  ;;  %v1484_v17 = vadd.f32 %v1417_v18, %v4486_v39 }
 0x168   : > { %v3334_v9 = vpop.f32.mrf.mxu1  ;;  %v1632_v3 = vpop.f32.mrf.mxu0 }
 0x169   : > { %5147 = vst [vmem:[#allocation12_spill] sm:$0xff] %v4593_v6  ;;  %v4596_v20 = vadd.f32 %v1629_v50, %v1484_v17  ;;  %v1487_v55 = vadd.f32 %v3334_v9, %v4491_v29 }
 0x16a   : > { %v1420_v38 = vpop.f32.mrf.mxu1  ;;  %v3371_v28 = vpop.f32.mrf.mxu0 }
 0x16b   : > { %5148 = vst [vmem:[#allocation15_spill] sm:$0xff] %v4596_v20  ;;  %v4599_v56 = vadd.f32 %v3368_v36, %v1487_v55  ;;  %v1485_v31 = vadd.f32 %v1420_v38, %v4500_v63 }
 0x16c   : > { %v3337_v46 = vpop.f32.mrf.mxu1  ;;  %v1645_v33 = vpop.f32.mrf.mxu0 }
 0x16d   : > { %5149 = vst [vmem:[#allocation4_spill] sm:$0xff] %v4599_v56  ;;  %v4602_v61 = vadd.f32 %v1632_v3, %v1485_v31  ;;  %v1490_v15 = vadd.f32 %v3337_v46, %v4507_v37 }
 0x16e   : > { %v1433_v40 = vpop.f32.mrf.mxu1  ;;  %v3372_v39 = vpop.f32.mrf.mxu0 }
 0x16f   : > { %5150 = vst [vmem:[#allocation7_spill] sm:$0xff] %v4602_v61  ;;  %v4605_v1 = vadd.f32 %v3371_v28, %v1490_v15  ;;  %v1488_v14 = vadd.f32 %v1433_v40, %v4510_v52 }
 0x170   : > { %v3338_v60 = vpop.f32.mrf.mxu1  ;;  %v1648_v29 = vpop.f32.mrf.mxu0 }
 0x171   : > { %5151 = vst [vmem:[#allocation10_spill] sm:$0xff] %v4605_v1  ;;  %v4608_v5 = vadd.f32 %v1645_v33, %v1488_v14  ;;  %v1491_v34 = vadd.f32 %v3338_v60, %v4514_v49 }
 0x172   : > { %v1436_v16 = vpop.f32.mrf.mxu1  ;;  %v3375_v63 = vpop.f32.mrf.mxu0 }
 0x173   : > { %5152 = vst [vmem:[#allocation14_spill] sm:$0xff] %v4608_v5  ;;  %v4611_v57 = vadd.f32 %v3372_v39, %v1491_v34  ;;  %v1489_v58 = vadd.f32 %v1436_v16, %v4518_v30 }
 0x174   : > { %v3341_v24 = vpop.f32.mrf.mxu1  ;;  %v1661_v37 = vpop.f32.mrf.mxu0 }
 0x175   : > { %5153 = vst [vmem:[#allocation16_spill] sm:$0xff] %v4611_v57  ;;  %v4614_v26 = vadd.f32 %v1648_v29, %v1489_v58  ;;  %v1494_v4 = vadd.f32 %v3341_v24, %v4521_v59 }
 0x176   : > { %v1449_v62 = vpop.f32.mrf.mxu1  ;;  %v3376_v52 = vpop.f32.mrf.mxu0 }
 0x177   : > { %5154 = vst [vmem:[#allocation19_spill] sm:$0xff] %v4614_v26  ;;  %v4617_v11 = vadd.f32 %v3375_v63, %v1494_v4  ;;  %v1492_v32 = vadd.f32 %v1449_v62, %v4524_v0 }
 0x178   : > { %v3342_v50 = vpop.f32.mrf.mxu1  ;;  %v1664_v49 = vpop.f32.mrf.mxu0 }
 0x179   : > { %5155 = vst [vmem:[#allocation2_spill] sm:$0xff] %v4617_v11  ;;  %v4620_v22 = vadd.f32 %v1661_v37, %v1492_v32  ;;  %v1495_v18 = vadd.f32 %v3342_v50, %v4527_v10 }
 0x17a   : > { %v1452_v36 = vpop.f32.mrf.mxu1  ;;  %v4623_v30 = vpop.f32.mrf.mxu0 }
 0x17b   : > { %5156 = vst [vmem:[#allocation18_spill] sm:$0xff] %v4620_v22  ;;  %v4625_v17 = vadd.f32 %v3376_v52, %v1495_v18  ;;  %v1493_v9 = vadd.f32 %v1452_v36, %v4530_v13 }
 0x17c   : > { %v3381_v59 = vpop.f32.mrf.mxu1  ;;  %v4628_v3 = vpop.f32.mrf.mxu0 }
 0x17d   : > { %5157 = vst [vmem:[#allocation3_spill] sm:$0xff] %v4625_v17  ;;  %v4630_v55 = vadd.f32 %v1664_v49, %v1493_v9 }
 0x17e   : > { %v1758_v38 = vpop.f32.mrf.mxu1  ;;  %v4632_v0 = vpop.f32.mrf.mxu0 }
 0x17f   : > { %5158 = vst [vmem:[#allocation5_spill] sm:$0xff] %v4630_v55 }
 0x180   : > { %v3382_v28 = vpop.f32.mrf.mxu1  ;;  %v4634_v31 = vpop.f32.mrf.mxu0 }
 0x182   : > { %v1761_v46 = vpop.f32.mrf.mxu1  ;;  %v4636_v10 = vpop.f32.mrf.mxu0 }
 0x184   : > { %v3385_v33 = vpop.f32.mrf.mxu1  ;;  %v4638_v15 = vpop.f32.mrf.mxu0 }
 0x186   : > { %v1774_v40 = vpop.f32.mrf.mxu1  ;;  %v4640_v39 = vpop.f32.mrf.mxu0 }
 0x188   : > { %v3386_v13 = vpop.f32.mrf.mxu1  ;;  %v4642_v14 = vpop.f32.mrf.mxu0 }
 0x18a   : > { %v1777_v60 = vpop.f32.mrf.mxu1  ;;  %v4644_v29 = vpop.f32.mrf.mxu0 }
 0x18c   : > { %v3389_v34 = vpop.f32.mrf.mxu1  ;;  %v4646_v16 = vpop.f32.mrf.mxu0 }
 0x18e   : > { %v1790_v63 = vpop.f32.mrf.mxu1  ;;  %v4648_v58 = vpop.f32.mrf.mxu0 }
 0x190   : > { %v3390_v24 = vpop.f32.mrf.mxu1  ;;  %v4650_v37 = vpop.f32.mrf.mxu0 }
 0x192   : > { %v1793_v4 = vpop.f32.mrf.mxu1  ;;  %v4652_v62 = vpop.f32.mrf.mxu0 }
 0x194   : > { %v3393_v52 = vpop.f32.mrf.mxu1  ;;  %v4654_v32 = vpop.f32.mrf.mxu0 }
 0x196   : > { %v1806_v50 = vpop.f32.mrf.mxu1  ;;  %v4656_v49 = vpop.f32.mrf.mxu0 }
 0x198   : > { %v3394_v18 = vpop.f32.mrf.mxu1  ;;  %v4658_v36 = vpop.f32.mrf.mxu0 }
 0x199   : > { %5159 = vst [vmem:[#allocation8_spill] sm:$0xff] %v4658_v36 }
 0x19a   : > { %v1809_v9 = vpop.f32.mrf.mxu1  ;;  %v4660_v55 = vpop.f32.mrf.mxu0 }
 0x19b   : > { %5160 = vst [vmem:[#allocation11_spill] sm:$0xff] %v4660_v55 }
 0x19c   : > { %v3397_v17 = vpop.f32.mrf.mxu1  ;;  %v4662_v22 = vpop.f32.mrf.mxu0 }
 0x19d   : > { %5161 = vst [vmem:[#allocation13_spill] sm:$0xff] %v4662_v22 }
 0x19e   : > { %v1822_v11 = vpop.f32.mrf.mxu1  ;;  %v4664_v26 = vpop.f32.mrf.mxu0 }
 0x19f   : > { %5162 = vst [vmem:[#allocation17_spill] sm:$0xff] %v4664_v26 }
 0x1a0   : > { %v3398_v57 = vpop.f32.mrf.mxu1  ;;  %v4666_v5 = vpop.f32.mrf.mxu0 }
 0x1a1   : > { %5163 = vst [vmem:[#allocation6_spill] sm:$0xff] %v4666_v5 }
 0x1a2   : > { %v4668_v1 = vpop.f32.mrf.mxu1  ;;  %v4670_v61 = vpop.f32.mrf.mxu0 }
 0x1a3   : > { %5164 = vst [vmem:[#allocation20_spill] sm:$0xff] %v4668_v1  ;;  %5165 = vst [vmem:[#allocation21_spill] sm:$0xff] %v4670_v61 }
 0x1a4   : > { %v4672_v56 = vpop.f32.mrf.mxu1  ;;  %v4674_v20 = vpop.f32.mrf.mxu0 }
 0x1a5   : > { %5166 = vst [vmem:[#allocation22_spill] sm:$0xff] %v4672_v56  ;;  %5167 = vst [vmem:[#allocation23_spill] sm:$0xff] %v4674_v20 }
 0x1a6   : > { %v4676_v6 = vpop.f32.mrf.mxu1  ;;  %v4678_v21 = vpop.f32.mrf.mxu0 }
 0x1a7   : > { %5168 = vst [vmem:[#allocation24_spill] sm:$0xff] %v4676_v6  ;;  %5169 = vst [vmem:[#allocation25_spill] sm:$0xff] %v4678_v21  ;;  %v1887_v21 = vadd.f32 %v3381_v59, %v4533_v35  ;;  %v1891_v35 = vadd.f32 %v3385_v33, %v4545_v44  ;;  %v1894_v44 = vadd.f32 %v1793_v4, %v4566_v53  ;;  %v5186_v4 = vld [vmem:[#allocation12_spill] sm:$0xff] }
 0x1a8   : > { %v4680_v55 = vpop.f32.mrf.mxu1  ;;  %v4682_v22 = vpop.f32.mrf.mxu0  ;;  %v1901_v53 = vadd.f32 %v1822_v11, %v4584_v2 }
 0x1a9   : > { %5170 = vst [vmem:[#allocation26_spill] sm:$0xff] %v4680_v55  ;;  %5171 = vst [vmem:[#allocation27_spill] sm:$0xff] %v4682_v22  ;;  %v1885_v22 = vadd.f32 %v1758_v38, %v4536_v27  ;;  %v4761_v11 = vadd.f32 %v4650_v37, %v1894_v44 }
 0x1aa   : > { %v4684_v26 = vpop.f32.mrf.mxu1  ;;  %v4686_v36 = vpop.f32.mrf.mxu0 }
 0x1ab   : > { %5172 = vst [vmem:[#allocation28_spill] sm:$0xff] %v4684_v26  ;;  %5173 = vst [vmem:[#allocation29_spill] sm:$0xff] %v4686_v36  ;;  %v1888_v36 = vadd.f32 %v3382_v28, %v4539_v42  ;;  %v1889_v42 = vadd.f32 %v1774_v40, %v4548_v12  ;;  %v1892_v28 = vadd.f32 %v3386_v13, %v4551_v54 }
 0x1ac   : > { %v4688_v5 = vpop.f32.mrf.mxu1  ;;  %v4690_v1 = vpop.f32.mrf.mxu0  ;;  %v1899_v12 = vadd.f32 %v3393_v52, %v4569_v41  ;;  %v1897_v54 = vadd.f32 %v1806_v50, %v4572_v51 }
 0x1ad   : > { %5174 = vst [vmem:[#allocation30_spill] sm:$0xff] %v4688_v5  ;;  %5175 = vst [vmem:[#allocation31_spill] sm:$0xff] %v4690_v1  ;;  %v2090_v38 = vadd.f32 %v4632_v0, %v1888_v36  ;;  %v4745_v41 = vadd.f32 %v4640_v39, %v1892_v28  ;;  %v5181_v39 = vld [vmem:[#allocation11_spill] sm:$0xff] }
 0x1ae   : > { %v4692_v61 = vpop.f32.mrf.mxu1  ;;  %v4694_v56 = vpop.f32.mrf.mxu0  ;;  %v5192_v28 = vld [vmem:[#allocation7_spill] sm:$0xff] }
 0x1af   : > { %5176 = vst [vmem:[#allocation32_spill] sm:$0xff] %v4694_v56  ;;  %v1886_v56 = vadd.f32 %v1761_v46, %v4542_v47  ;;  %v1895_v47 = vadd.f32 %v3389_v34, %v4557_v48  ;;  %v4734_v48 = vadd.f32 %v4636_v10, %v1891_v35  ;;  %v4764_v10 = vadd.f32 %v4652_v62, %v1899_v12  ;;  %v5184_v34 = vld [vmem:[#allocation20_spill] sm:$0xff]  ;;  %v5187_v62 = vld [vmem:[#allocation22_spill] sm:$0xff] }
 0x1b0   : > { %v4696_v20 = vpop.f32.mrf.mxu1  ;;  %v4698_v6 = vpop.f32.mrf.mxu0  ;;  %v1907_v52 = vadd.f32 %v5187_v62, %v5186_v4  ;;  %v5191_v35 = vld [vmem:[#allocation26_spill] sm:$0xff] }
 0x1b1   : > { %5177 = vst [vmem:[#allocation33_spill] sm:$0xff] %v4696_v20  ;;  %5178 = vst [vmem:[#allocation34_spill] sm:$0xff] %v4698_v6  ;;  %v2089_v20 = vadd.f32 %v4623_v30, %v1887_v21  ;;  %v2087_v6 = vadd.f32 %v4628_v3, %v1885_v22  ;;  %v1893_v21 = vadd.f32 %v1790_v63, %v4560_v8  ;;  %v4787_v63 = vld [vmem:[%s5060_s2] ss:$0 sm:$0xff] }
 0x1b2   : > { %v4702_v55 = vpop.f32.mrf.mxu1  ;;  %v4704_v26 = vpop.f32.mrf.mxu0  ;;  %v1896_v22 = vadd.f32 %v3390_v24, %v4563_v23  ;;  %v2088_v0 = vadd.f32 %v4634_v31, %v1886_v56  ;;  %v1898_v8 = vadd.f32 %v1809_v9, %v4578_v19  ;;  %v1903_v23 = vadd.f32 %v3397_v17, %v4581_v7  ;;  %v5185_v24 = vld [vmem:[#allocation17_spill] sm:$0xff]  ;;  %v5190_v9 = vld [vmem:[#allocation4_spill] sm:$0xff] }
 0x1b3   : > { %v4742_v56 = vadd.f32 %v4638_v15, %v1889_v42  ;;  %v4752_v19 = vadd.f32 %v4644_v29, %v1895_v47  ;;  %v4755_v7 = vadd.f32 %v4646_v16, %v1893_v21  ;;  %v5180_v15 = vld [vmem:[#allocation8_spill] sm:$0xff]  ;;  %v5183_v29 = vld [vmem:[#allocation9_spill] sm:$0xff]  ;;  %v1908_v42 = vadd.f32 %v5191_v35, %v5190_v9 }
 0x1b4   : > { %v4707_v5 = vpop.f32.mrf.mxu1  ;;  %v4709_v1 = vpop.f32.mrf.mxu0  ;;  %v4758_v2 = vadd.f32 %v4648_v58, %v1896_v22  ;;  %v4774_v40 = vadd.f32 %v5180_v15, %v1898_v8  ;;  %v4777_v13 = vadd.f32 %v5181_v39, %v1903_v23  ;;  %v1902_v16 = vadd.f32 %v5184_v34, %v5183_v29  ;;  %v5193_v47 = vld [vmem:[#allocation28_spill] sm:$0xff]  ;;  %v5194_v22 = vld [vmem:[#allocation10_spill] sm:$0xff] }
 0x1b5   : > { %5179 = vst [vmem:[#allocation35_spill] sm:$0xff] %v4709_v1  ;;  %v1890_v1 = vadd.f32 %v1777_v60, %v4554_v25  ;;  %v1900_v25 = vadd.f32 %v3394_v18, %v4575_v43  ;;  %v1904_v43 = vadd.f32 %v3398_v57, %v4587_v45  ;;  %v5189_v18 = vld [vmem:[#allocation24_spill] sm:$0xff]  ;;  %v1906_v21 = vadd.f32 %v5193_v47, %v5192_v28  ;;  %v5195_v44 = vld [vmem:[#allocation30_spill] sm:$0xff]  ;;  %v5207_v47 = vld [vmem:[#allocation27_spill] sm:$0xff] }
 0x1b6   : > { %v4715_v59 = vpop.f32.mrf.mxu1  ;;  %v4717_v27 = vpop.f32.mrf.mxu0  ;;  %v1911_v12 = vadd.f32 %v5195_v44, %v5194_v22  ;;  %v5201_v34 = vld [vmem:[#allocation2_spill] sm:$0xff]  ;;  %v5208_v22 = vld [vmem:[#allocation29_spill] sm:$0xff] }
 0x1b7   : > { %v4748_v51 = vadd.f32 %v4642_v14, %v1890_v1  ;;  %v4767_v1 = vadd.f32 %v4654_v32, %v1897_v54  ;;  %v4770_v45 = vadd.f32 %v4656_v49, %v1900_v25  ;;  %v5182_v14 = vld [vmem:[#allocation13_spill] sm:$0xff]  ;;  %v4790_v37 = vadd.f32 %v5185_v24, %v1904_v43  ;;  %v5188_v49 = vld [vmem:[#allocation15_spill] sm:$0xff]  ;;  %v5196_v25 = vld [vmem:[#allocation14_spill] sm:$0xff] }
 0x1b8   : > { %v3410_v30 = vpop.f32.mrf.mxu1  ;;  %v4727_v3 = vpop.f32.mrf.mxu0  ;;  %v4780_v60 = vadd.f32 %v5182_v14, %v1901_v53  ;;  %v1905_v36 = vadd.f32 %v5189_v18, %v5188_v49  ;;  %v1909_v8 = vadd.f32 %v4692_v61, %v5196_v25  ;;  %v5197_v43 = vld [vmem:[#allocation6_spill] sm:$0xff]  ;;  %v5199_v15 = vld [vmem:[#allocation33_spill] sm:$0xff]  ;;  %v5200_v14 = vld [vmem:[#allocation19_spill] sm:$0xff]  ;;  %v4838_v44 = vadd.f32 %v5208_v22, %v1911_v12 }
 0x1b9   : > { %v1910_v29 = vadd.f32 %v4702_v55, %v5200_v14  ;;  %v5202_v61 = vld [vmem:[#allocation18_spill] sm:$0xff]  ;;  %v5205_v55 = vld [vmem:[#allocation23_spill] sm:$0xff] }
 0x1ba   : > { %v4739_v46 = vpop.f32.mrf.mxu1  ;;  %v3483_v33 = vpop.f32.mrf.mxu0  ;;  %v1913_v62 = vadd.f32 %v4715_v59, %v5202_v61  ;;  %v4829_v18 = vadd.f32 %v5205_v55, %v1905_v36  ;;  %v5210_v36 = vld [vmem:[#allocation32_spill] sm:$0xff] }
 0x1bc   : > { %v3449_v17 = vpop.f32.mrf.mxu1  ;;  %v2381_v31 = vpop.f32.mrf.mxu0 }
 0x1bd   : > { %v2301_v57 = vadd.f32 %v3449_v17, %v2089_v20  ;;  %v4811_v17 = vadd.f32 %v5197_v43, %v1902_v16 }
 0x1be   : > { %v2172_v58 = vpop.f32.mrf.mxu1  ;;  %v3484_v20 = vpop.f32.mrf.mxu0 }
 0x1bf   : > { %v2510_v32 = vadd.f32 %v3483_v33, %v2301_v57  ;;  %v2299_v50 = vadd.f32 %v2172_v58, %v2087_v6  ;;  %v5198_v57 = vld [vmem:[#allocation16_spill] sm:$0xff]  ;;  %v1915_v58 = vadd.f32 %v4707_v5, %v5201_v34  ;;  %v5206_v5 = vld [vmem:[#allocation25_spill] sm:$0xff] }
 0x1c0   : > { %v3450_v54 = vpop.f32.mrf.mxu1  ;;  %v2384_v6 = vpop.f32.mrf.mxu0  ;;  %v1912_v39 = vadd.f32 %v5199_v15, %v5198_v57  ;;  %v4832_v9 = vadd.f32 %v5206_v5, %v1908_v42 }
 0x1c1   : > { %v2549_v23 = vadd.f32 %v4787_v63, %v2510_v32  ;;  %v2508_v53 = vadd.f32 %v2381_v31, %v2299_v50  ;;  %v2302_v33 = vadd.f32 %v3450_v54, %v2090_v38  ;;  %v5203_v31 = vld [vmem:[#allocation3_spill] sm:$0xff]  ;;  %v5204_v50 = vld [vmem:[#allocation21_spill] sm:$0xff]  ;;  %v4854_v12 = vadd.f32 %v4704_v26, %v1915_v58 }
 0x1c2   : > { %v2175_v24 = vpop.f32.mrf.mxu1  ;;  %v3487_v4 = vpop.f32.mrf.mxu0  ;;  %v1916_v38 = vadd.f32 %v3410_v30, %v5203_v31  ;;  %v4826_v49 = vadd.f32 %v5204_v50, %v1907_v52  ;;  %v4835_v30 = vadd.f32 %v5207_v47, %v1906_v21  ;;  %v4847_v42 = vadd.f32 %v5210_v36, %v1912_v39  ;;  %v5213_v26 = vld [vmem:[#allocation5_spill] sm:$0xff] }
 0x1c3   : > { %2582 = vst.msk [vmem:[%s4805_s24 + $0x10] sm:$0xff] %vm2579_vm4, %v2549_v23  ;;  %v2547_v16 = vadd.f32 %v4787_v63, %v2508_v53  ;;  %v2511_v32 = vadd.f32 %v3484_v20, %v2302_v33  ;;  %v2300_v35 = vadd.f32 %v2175_v24, %v2088_v0  ;;  %v5209_v20 = vld [vmem:[#allocation31_spill] sm:$0xff]  ;;  %v5211_v0 = vld [vmem:[#allocation34_spill] sm:$0xff]  ;;  %v2685_v14 = vmul.f32 %v2549_v23, %v2549_v23 }
 0x1c4   : > { %v3453_v28 = vpop.f32.mrf.mxu1  ;;  %v2397_v59 = vpop.f32.mrf.mxu0  ;;  %v4841_v54 = vadd.f32 %v5209_v20, %v1909_v8  ;;  %v4850_v25 = vadd.f32 %v5211_v0, %v1910_v29  ;;  %v5212_v8 = vld [vmem:[#allocation35_spill] sm:$0xff]  ;;  %v4860_v15 = vadd.f32 %v4717_v27, %v1916_v38  ;;  %v4868_v58 = vadd.f32 %v4739_v46, %v5213_v26 }
 0x1c5   : > { %2580 = vst.msk [vmem:[%s4805_s24] sm:$0xff] %vm2579_vm4, %v2547_v16  ;;  %v2550_v52 = vadd.f32 %v4787_v63, %v2511_v32  ;;  %v2509_v53 = vadd.f32 %v2384_v6, %v2300_v35  ;;  %v2305_v21 = vadd.f32 %v3453_v28, %v4734_v48  ;;  %v4857_v57 = vadd.f32 %v5212_v8, %v1913_v62 }
 0x1c6   : > { %v2188_v33 = vpop.f32.mrf.mxu1  ;;  %v3488_v43 = vpop.f32.mrf.mxu0  ;;  %v2683_v6 = vmul.f32 %v2547_v16, %v2547_v16  ;;  %v2612_v61 = vsel %vm2579_vm4, %v2547_v16, 0.0  ;;  %v2718_v35 = vsel %vm2579_vm4, %v2685_v14, 0.0 }
 0x1c7   : > { %2583 = vst.msk [vmem:[%s4805_s24 + $0x18] sm:$0xff] %vm2579_vm4, %v2550_v52  ;;  %v2303_v39 = vadd.f32 %v2188_v33, %v4742_v56  ;;  %v2548_v48 = vadd.f32 %v4787_v63, %v2509_v53  ;;  %v2514_v29 = vadd.f32 %v3487_v4, %v2305_v21  ;;  %v2686_v31 = vmul.f32 %v2550_v52, %v2550_v52 }
 0x1c8   : > { %v3454_v34 = vpop.f32.mrf.mxu1  ;;  %v2400_v24 = vpop.f32.mrf.mxu0  ;;  %v2715_v28 = vsel %vm2579_vm4, %v2683_v6, 0.0  ;;  %v2617_v20 = vsel %vm2579_vm4, %v2550_v52, 0.0 }
 0x1c9   : > { %v2512_v62 = vadd.f32 %v2397_v59, %v2303_v39  ;;  %v2306_v27 = vadd.f32 %v3454_v34, %v4745_v41  ;;  %2581 = vst.msk [vmem:[%s4805_s24 + $0x8] sm:$0xff] %vm2579_vm4, %v2548_v48  ;;  %v2613_v56 = vsel %vm2579_vm4, %v2548_v48, 0.0  ;;  %v2684_v38 = vmul.f32 %v2548_v48, %v2548_v48 }
 0x1ca   : > { %v2553_v4 = vadd.f32 %v4787_v63, %v2514_v29  ;;  %v2191_v32 = vpop.f32.mrf.mxu1  ;;  %v3491_v50 = vpop.f32.mrf.mxu0  ;;  %v2614_v55 = vadd.f32 %v2613_v56, %v2612_v61  ;;  %v2615_v41 = vsel %vm2579_vm4, %v2549_v23, 0.0  ;;  %v2720_v23 = vsel %vm2579_vm4, %v2686_v31, 0.0 }
 0x1cb   : > { %v2551_v46 = vadd.f32 %v4787_v63, %v2512_v62  ;;  %v2515_v5 = vadd.f32 %v3488_v43, %v2306_v27  ;;  %v2304_v16 = vadd.f32 %v2191_v32, %v4748_v51  ;;  %v2716_v59 = vsel %vm2579_vm4, %v2684_v38, 0.0 }
 0x1cc   : > { %2586 = vst.msk [vmem:[%s4805_s24 + $0x30] sm:$0xff] %vm2579_vm4, %v2553_v4  ;;  %v3457_v47 = vpop.f32.mrf.mxu1  ;;  %v2413_v22 = vpop.f32.mrf.mxu0  ;;  %v2616_v36 = vadd.f32 %v2615_v41, %v2614_v55  ;;  %v2717_v0 = vadd.f32 %v2716_v59, %v2715_v28  ;;  %v2689_v14 = vmul.f32 %v2553_v4, %v2553_v4 }
 0x1cd   : > { %2584 = vst.msk [vmem:[%s4805_s24 + $0x20] sm:$0xff] %vm2579_vm4, %v2551_v46  ;;  %v2687_v51 = vmul.f32 %v2551_v46, %v2551_v46  ;;  %v2554_v53 = vadd.f32 %v4787_v63, %v2515_v5  ;;  %v2513_v21 = vadd.f32 %v2400_v24, %v2304_v16  ;;  %v2309_v33 = vadd.f32 %v3457_v47, %v4752_v19 }
 0x1ce   : > { %v2204_v43 = vpop.f32.mrf.mxu1  ;;  %v3492_v8 = vpop.f32.mrf.mxu0  ;;  %v2719_v39 = vadd.f32 %v2718_v35, %v2717_v0  ;;  %v2618_v6 = vadd.f32 %v2617_v20, %v2616_v36  ;;  %v2619_v48 = vsel %vm2579_vm4, %v2551_v46, 0.0  ;;  %v2623_v35 = vsel %vm2579_vm4, %v2553_v4, 0.0 }
 0x1cf   : > { %v2307_v52 = vadd.f32 %v2204_v43, %v4755_v7  ;;  %v2722_v29 = vsel %vm2579_vm4, %v2687_v51, 0.0  ;;  %2587 = vst.msk [vmem:[%s4805_s24 + $0x38] sm:$0xff] %vm2579_vm4, %v2554_v53  ;;  %v2552_v34 = vadd.f32 %v4787_v63, %v2513_v21  ;;  %v2518_v26 = vadd.f32 %v3491_v50, %v2309_v33 }
 0x1d0   : > { %v3458_v24 = vpop.f32.mrf.mxu1  ;;  %v2416_v61 = vpop.f32.mrf.mxu0  ;;  %v2620_v19 = vadd.f32 %v2619_v48, %v2618_v6  ;;  %v2721_v62 = vadd.f32 %v2720_v23, %v2719_v39  ;;  %v2690_v56 = vmul.f32 %v2554_v53, %v2554_v53  ;;  %v2625_v20 = vsel %vm2579_vm4, %v2554_v53, 0.0 }
 0x1d1   : > { %v2516_v27 = vadd.f32 %v2413_v22, %v2307_v52  ;;  %v2310_v31 = vadd.f32 %v3458_v24, %v4758_v2  ;;  %2585 = vst.msk [vmem:[%s4805_s24 + $0x28] sm:$0xff] %vm2579_vm4, %v2552_v34  ;;  %v2621_v7 = vsel %vm2579_vm4, %v2552_v34, 0.0  ;;  %v2688_v38 = vmul.f32 %v2552_v34, %v2552_v34 }
 0x1d2   : > { %v2557_v32 = vadd.f32 %v4787_v63, %v2518_v26  ;;  %v2207_v55 = vpop.f32.mrf.mxu1  ;;  %v3495_v46 = vpop.f32.mrf.mxu0  ;;  %v2723_v50 = vadd.f32 %v2722_v29, %v2721_v62  ;;  %v2622_v5 = vadd.f32 %v2621_v7, %v2620_v19  ;;  %v2726_v2 = vsel %vm2579_vm4, %v2689_v14, 0.0 }
 0x1d3   : > { %v2555_v16 = vadd.f32 %v4787_v63, %v2516_v27  ;;  %v2519_v41 = vadd.f32 %v3492_v8, %v2310_v31  ;;  %v2724_v28 = vsel %vm2579_vm4, %v2688_v38, 0.0  ;;  %v2308_v59 = vadd.f32 %v2207_v55, %v4761_v11 }
 0x1d4   : > { %2590 = vst.msk [vmem:[%s4805_s24 + $0x50] sm:$0xff] %vm2579_vm4, %v2557_v32  ;;  %v3461_v47 = vpop.f32.mrf.mxu1  ;;  %v2429_v22 = vpop.f32.mrf.mxu0  ;;  %v2624_v36 = vadd.f32 %v2623_v35, %v2622_v5  ;;  %v2725_v0 = vadd.f32 %v2724_v28, %v2723_v50  ;;  %v2728_v4 = vsel %vm2579_vm4, %v2690_v56, 0.0  ;;  %v2693_v39 = vmul.f32 %v2557_v32, %v2557_v32 }
 0x1d5   : > { %2588 = vst.msk [vmem:[%s4805_s24 + $0x40] sm:$0xff] %vm2579_vm4, %v2555_v16  ;;  %v2691_v51 = vmul.f32 %v2555_v16, %v2555_v16  ;;  %v2558_v23 = vadd.f32 %v4787_v63, %v2519_v41  ;;  %v2517_v21 = vadd.f32 %v2416_v61, %v2308_v59  ;;  %v2313_v33 = vadd.f32 %v3461_v47, %v4764_v10 }
 0x1d6   : > { %v2220_v43 = vpop.f32.mrf.mxu1  ;;  %v3496_v8 = vpop.f32.mrf.mxu0  ;;  %v2727_v11 = vadd.f32 %v2726_v2, %v2725_v0  ;;  %v2626_v14 = vadd.f32 %v2625_v20, %v2624_v36  ;;  %v2627_v6 = vsel %vm2579_vm4, %v2555_v16, 0.0  ;;  %v2631_v5 = vsel %vm2579_vm4, %v2557_v32, 0.0 }
 0x1d7   : > { %v2311_v53 = vadd.f32 %v2220_v43, %v4767_v1  ;;  %v2730_v52 = vsel %vm2579_vm4, %v2691_v51, 0.0  ;;  %2591 = vst.msk [vmem:[%s4805_s24 + $0x58] sm:$0xff] %vm2579_vm4, %v2558_v23  ;;  %v2556_v48 = vadd.f32 %v4787_v63, %v2517_v21  ;;  %v2522_v29 = vadd.f32 %v3495_v46, %v2313_v33 }
 0x1d8   : > { %v3462_v34 = vpop.f32.mrf.mxu1  ;;  %v2432_v26 = vpop.f32.mrf.mxu0  ;;  %v2628_v10 = vadd.f32 %v2627_v6, %v2626_v14  ;;  %v2729_v24 = vadd.f32 %v2728_v4, %v2727_v11  ;;  %v2694_v62 = vmul.f32 %v2558_v23, %v2558_v23  ;;  %v2633_v28 = vsel %vm2579_vm4, %v2558_v23, 0.0 }
 0x1d9   : > { %v2520_v61 = vadd.f32 %v2429_v22, %v2311_v53  ;;  %v2314_v19 = vadd.f32 %v3462_v34, %v4770_v45  ;;  %2589 = vst.msk [vmem:[%s4805_s24 + $0x48] sm:$0xff] %vm2579_vm4, %v2556_v48  ;;  %v2629_v1 = vsel %vm2579_vm4, %v2556_v48, 0.0  ;;  %v2692_v27 = vmul.f32 %v2556_v48, %v2556_v48 }
 0x1da   : > { %v2561_v31 = vadd.f32 %v4787_v63, %v2522_v29  ;;  %v2223_v56 = vpop.f32.mrf.mxu1  ;;  %v3499_v7 = vpop.f32.mrf.mxu0  ;;  %v2731_v38 = vadd.f32 %v2730_v52, %v2729_v24  ;;  %v2630_v55 = vadd.f32 %v2629_v1, %v2628_v10  ;;  %v2734_v45 = vsel %vm2579_vm4, %v2693_v39, 0.0 }
 0x1db   : > { %v2559_v46 = vadd.f32 %v4787_v63, %v2520_v61  ;;  %v2523_v50 = vadd.f32 %v3496_v8, %v2314_v19  ;;  %v2732_v16 = vsel %vm2579_vm4, %v2692_v27, 0.0  ;;  %v2312_v41 = vadd.f32 %v2223_v56, %v4774_v40 }
 0x1dc   : > { %2594 = vst.msk [vmem:[%s4805_s24 + $0x70] sm:$0xff] %vm2579_vm4, %v2561_v31  ;;  %v3465_v35 = vpop.f32.mrf.mxu1  ;;  %v2445_v2 = vpop.f32.mrf.mxu0  ;;  %v2632_v59 = vadd.f32 %v2631_v5, %v2630_v55  ;;  %v2733_v47 = vadd.f32 %v2732_v16, %v2731_v38  ;;  %v2736_v32 = vsel %vm2579_vm4, %v2694_v62, 0.0  ;;  %v2697_v21 = vmul.f32 %v2561_v31, %v2561_v31 }
 0x1dd   : > { %2592 = vst.msk [vmem:[%s4805_s24 + $0x60] sm:$0xff] %vm2579_vm4, %v2559_v46  ;;  %v2695_v22 = vmul.f32 %v2559_v46, %v2559_v46  ;;  %v2562_v20 = vadd.f32 %v4787_v63, %v2523_v50  ;;  %v2521_v36 = vadd.f32 %v2432_v26, %v2312_v41  ;;  %v2317_v0 = vadd.f32 %v3465_v35, %v4777_v13 }
 0x1de   : > { %v2236_v51 = vpop.f32.mrf.mxu1  ;;  %v3500_v4 = vpop.f32.mrf.mxu0  ;;  %v2735_v40 = vadd.f32 %v2734_v45, %v2733_v47  ;;  %v2634_v33 = vadd.f32 %v2633_v28, %v2632_v59  ;;  %v2635_v43 = vsel %vm2579_vm4, %v2559_v46, 0.0  ;;  %v2639_v27 = vsel %vm2579_vm4, %v2561_v31, 0.0 }
 0x1df   : > { %v2315_v23 = vadd.f32 %v2236_v51, %v4780_v60  ;;  %v2738_v8 = vsel %vm2579_vm4, %v2695_v22, 0.0  ;;  %2595 = vst.msk [vmem:[%s4805_s24 + $0x78] sm:$0xff] %vm2579_vm4, %v2562_v20  ;;  %v2560_v11 = vadd.f32 %v4787_v63, %v2521_v36  ;;  %v2526_v39 = vadd.f32 %v3499_v7, %v2317_v0 }
 0x1e0   : > { %v3466_v14 = vpop.f32.mrf.mxu1  ;;  %v2448_v53 = vpop.f32.mrf.mxu0  ;;  %v2636_v13 = vadd.f32 %v2635_v43, %v2634_v33  ;;  %v2737_v6 = vadd.f32 %v2736_v32, %v2735_v40  ;;  %v2698_v29 = vmul.f32 %v2562_v20, %v2562_v20  ;;  %v2641_v46 = vsel %vm2579_vm4, %v2562_v20, 0.0 }
 0x1e1   : > { %v2524_v52 = vadd.f32 %v2445_v2, %v2315_v23  ;;  %v2318_v48 = vadd.f32 %v3466_v14, %v4790_v37  ;;  %2593 = vst.msk [vmem:[%s4805_s24 + $0x68] sm:$0xff] %vm2579_vm4, %v2560_v11  ;;  %v2637_v60 = vsel %vm2579_vm4, %v2560_v11, 0.0  ;;  %v2696_v34 = vmul.f32 %v2560_v11, %v2560_v11 }
 0x1e2   : > { %v2565_v26 = vadd.f32 %v4787_v63, %v2526_v39  ;;  %v2239_v10 = vpop.f32.mrf.mxu1  ;;  %v3503_v24 = vpop.f32.mrf.mxu0  ;;  %v2739_v61 = vadd.f32 %v2738_v8, %v2737_v6  ;;  %v2638_v19 = vadd.f32 %v2637_v60, %v2636_v13  ;;  %v2742_v37 = vsel %vm2579_vm4, %v2697_v21, 0.0 }
 0x1e3   : > { %v2563_v62 = vadd.f32 %v4787_v63, %v2524_v52  ;;  %v2527_v1 = vadd.f32 %v3500_v4, %v2318_v48  ;;  %v2740_v56 = vsel %vm2579_vm4, %v2696_v34, 0.0  ;;  %v2316_v7 = vadd.f32 %v2239_v10, %v4811_v17 }
 0x1e4   : > { %2598 = vst.msk [vmem:[%s4805_s24 + $0x90] sm:$0xff] %vm2579_vm4, %v2565_v26  ;;  %v3469_v38 = vpop.f32.mrf.mxu1  ;;  %v2461_v55 = vpop.f32.mrf.mxu0  ;;  %v2640_v50 = vadd.f32 %v2639_v27, %v2638_v19  ;;  %v2741_v5 = vadd.f32 %v2740_v56, %v2739_v61  ;;  %v2744_v31 = vsel %vm2579_vm4, %v2698_v29, 0.0  ;;  %v2701_v59 = vmul.f32 %v2565_v26, %v2565_v26 }
 0x1e5   : > { %2596 = vst.msk [vmem:[%s4805_s24 + $0x80] sm:$0xff] %vm2579_vm4, %v2563_v62  ;;  %v2699_v45 = vmul.f32 %v2563_v62, %v2563_v62  ;;  %v2566_v16 = vadd.f32 %v4787_v63, %v2527_v1  ;;  %v2525_v41 = vadd.f32 %v2448_v53, %v2316_v7  ;;  %v2321_v35 = vadd.f32 %v3469_v38, %v4826_v49 }
 0x1e6   : > { %v2252_v2 = vpop.f32.mrf.mxu1  ;;  %v3504_v28 = vpop.f32.mrf.mxu0  ;;  %v2743_v17 = vadd.f32 %v2742_v37, %v2741_v5  ;;  %v2642_v47 = vadd.f32 %v2641_v46, %v2640_v50  ;;  %v2643_v32 = vsel %vm2579_vm4, %v2563_v62, 0.0  ;;  %v2647_v52 = vsel %vm2579_vm4, %v2565_v26, 0.0 }
 0x1e7   : > { %v2319_v22 = vadd.f32 %v2252_v2, %v4829_v18  ;;  %v2746_v20 = vsel %vm2579_vm4, %v2699_v45, 0.0  ;;  %2599 = vst.msk [vmem:[%s4805_s24 + $0x98] sm:$0xff] %vm2579_vm4, %v2566_v16  ;;  %v2564_v36 = vadd.f32 %v4787_v63, %v2525_v41  ;;  %v2530_v0 = vadd.f32 %v3503_v24, %v2321_v35 }
 0x1e8   : > { %v3470_v51 = vpop.f32.mrf.mxu1  ;;  %v2464_v4 = vpop.f32.mrf.mxu0  ;;  %v2644_v49 = vadd.f32 %v2643_v32, %v2642_v47  ;;  %v2745_v40 = vadd.f32 %v2744_v31, %v2743_v17  ;;  %v2702_v23 = vmul.f32 %v2566_v16, %v2566_v16  ;;  %v2649_v10 = vsel %vm2579_vm4, %v2566_v16, 0.0 }
 0x1e9   : > { %v2528_v21 = vadd.f32 %v2461_v55, %v2319_v22  ;;  %v2322_v33 = vadd.f32 %v3470_v51, %v4832_v9  ;;  %2597 = vst.msk [vmem:[%s4805_s24 + $0x88] sm:$0xff] %vm2579_vm4, %v2564_v36  ;;  %v2645_v18 = vsel %vm2579_vm4, %v2564_v36, 0.0  ;;  %v2700_v43 = vmul.f32 %v2564_v36, %v2564_v36 }
 0x1ea   : > { %v2569_v8 = vadd.f32 %v4787_v63, %v2530_v0  ;;  %v2255_v11 = vpop.f32.mrf.mxu1  ;;  %v3507_v39 = vpop.f32.mrf.mxu0  ;;  %v2747_v14 = vadd.f32 %v2746_v20, %v2745_v40  ;;  %v2646_v53 = vadd.f32 %v2645_v18, %v2644_v49  ;;  %v2750_v9 = vsel %vm2579_vm4, %v2701_v59, 0.0 }
 0x1eb   : > { %v2567_v13 = vadd.f32 %v4787_v63, %v2528_v21  ;;  %v2531_v6 = vadd.f32 %v3504_v28, %v2322_v33  ;;  %v2748_v48 = vsel %vm2579_vm4, %v2700_v43, 0.0  ;;  %v2320_v29 = vadd.f32 %v2255_v11, %v4835_v30 }
 0x1ec   : > { %2602 = vst.msk [vmem:[%s4805_s24 + $0xb0] sm:$0xff] %vm2579_vm4, %v2569_v8  ;;  %v3473_v60 = vpop.f32.mrf.mxu1  ;;  %v2477_v34 = vpop.f32.mrf.mxu0  ;;  %v2648_v24 = vadd.f32 %v2647_v52, %v2646_v53  ;;  %v2749_v61 = vadd.f32 %v2748_v48, %v2747_v14  ;;  %v2752_v26 = vsel %vm2579_vm4, %v2702_v23, 0.0  ;;  %v2705_v7 = vmul.f32 %v2569_v8, %v2569_v8 }
 0x1ed   : > { %2600 = vst.msk [vmem:[%s4805_s24 + $0xa0] sm:$0xff] %vm2579_vm4, %v2567_v13  ;;  %v2703_v19 = vmul.f32 %v2567_v13, %v2567_v13  ;;  %v2570_v62 = vadd.f32 %v4787_v63, %v2531_v6  ;;  %v2529_v1 = vadd.f32 %v2464_v4, %v2320_v29  ;;  %v2325_v27 = vadd.f32 %v3473_v60, %v4838_v44 }
 0x1ee   : > { %v2268_v37 = vpop.f32.mrf.mxu1  ;;  %v3508_v56 = vpop.f32.mrf.mxu0  ;;  %v2751_v30 = vadd.f32 %v2750_v9, %v2749_v61  ;;  %v2650_v38 = vadd.f32 %v2649_v10, %v2648_v24  ;;  %v2651_v46 = vsel %vm2579_vm4, %v2567_v13, 0.0  ;;  %v2116_v51 = vadd.f32 %v4727_v3, %v4868_v58 }
 0x1ef   : > { %v2323_v55 = vadd.f32 %v2268_v37, %v4841_v54  ;;  %v2754_v50 = vsel %vm2579_vm4, %v2703_v19, 0.0  ;;  %2603 = vst.msk [vmem:[%s4805_s24 + $0xb8] sm:$0xff] %vm2579_vm4, %v2570_v62  ;;  %v2568_v5 = vadd.f32 %v4787_v63, %v2529_v1  ;;  %v2534_v45 = vadd.f32 %v3507_v39, %v2325_v27 }
 0x1f0   : > { %v3474_v31 = vpop.f32.mrf.mxu1  ;;  %v2480_v16 = vpop.f32.mrf.mxu0  ;;  %v2652_v44 = vadd.f32 %v2651_v46, %v2650_v38  ;;  %v2753_v41 = vadd.f32 %v2752_v26, %v2751_v30  ;;  %v2706_v28 = vmul.f32 %v2570_v62, %v2570_v62  ;;  %v2758_v21 = vsel %vm2579_vm4, %v2705_v7, 0.0 }
 0x1f1   : > { %v2532_v35 = vadd.f32 %v2477_v34, %v2323_v55  ;;  %v2326_v2 = vadd.f32 %v3474_v31, %v4847_v42  ;;  %2601 = vst.msk [vmem:[%s4805_s24 + $0xa8] sm:$0xff] %vm2579_vm4, %v2568_v5  ;;  %v2653_v54 = vsel %vm2579_vm4, %v2568_v5, 0.0  ;;  %v2704_v17 = vmul.f32 %v2568_v5, %v2568_v5 }
 0x1f2   : > { %v2573_v59 = vadd.f32 %v4787_v63, %v2534_v45  ;;  %v2271_v47 = vpop.f32.mrf.mxu1  ;;  %v3511_v22 = vpop.f32.mrf.mxu0  ;;  %v2755_v32 = vadd.f32 %v2754_v50, %v2753_v41  ;;  %v2654_v20 = vadd.f32 %v2653_v54, %v2652_v44  ;;  %v2655_v42 = vsel %vm2579_vm4, %v2569_v8, 0.0 }
 0x1f3   : > { %v2571_v36 = vadd.f32 %v4787_v63, %v2532_v35  ;;  %v2535_v0 = vadd.f32 %v3508_v56, %v2326_v2  ;;  %v2756_v4 = vsel %vm2579_vm4, %v2704_v17, 0.0  ;;  %v2324_v49 = vadd.f32 %v2271_v47, %v4850_v25 }
 0x1f4   : > { %2606 = vst.msk [vmem:[%s4805_s24 + $0xd0] sm:$0xff] %vm2579_vm4, %v2573_v59  ;;  %v3477_v40 = vpop.f32.mrf.mxu1  ;;  %v2657_v33 = vsel %vm2579_vm4, %v2570_v62, 0.0  ;;  %v2656_v23 = vadd.f32 %v2655_v42, %v2654_v20  ;;  %v2757_v18 = vadd.f32 %v2756_v4, %v2755_v32  ;;  %v2493_v43 = vpop.f32.mrf.mxu0  ;;  %v2760_v25 = vsel %vm2579_vm4, %v2706_v28, 0.0 }
 0x1f5   : > { %2604 = vst.msk [vmem:[%s4805_s24 + $0xc0] sm:$0xff] %vm2579_vm4, %v2571_v36  ;;  %v2707_v3 = vmul.f32 %v2571_v36, %v2571_v36  ;;  %v2574_v58 = vadd.f32 %v4787_v63, %v2535_v0  ;;  %v2533_v8 = vadd.f32 %v2480_v16, %v2324_v49  ;;  %v2329_v11 = vadd.f32 %v3477_v40, %v4854_v12 }
 0x1f6   : > { %v2284_v39 = vpop.f32.mrf.mxu1  ;;  %v2759_v14 = vadd.f32 %v2758_v21, %v2757_v18  ;;  %v2658_v53 = vadd.f32 %v2657_v33, %v2656_v23  ;;  %v2709_v6 = vmul.f32 %v2573_v59, %v2573_v59  ;;  %v2659_v52 = vsel %vm2579_vm4, %v2571_v36, 0.0  ;;  %v3512_v24 = vpop.f32.mrf.mxu0 }
 0x1f7   : > { %v2327_v13 = vadd.f32 %v2284_v39, %v4857_v57  ;;  %2607 = vst.msk [vmem:[%s4805_s24 + $0xd8] sm:$0xff] %vm2579_vm4, %v2574_v58  ;;  %v2572_v9 = vadd.f32 %v4787_v63, %v2533_v8  ;;  %v2538_v48 = vadd.f32 %v3511_v22, %v2329_v11  ;;  %v2762_v61 = vsel %vm2579_vm4, %v2707_v3, 0.0 }
 0x1f8   : > { %v3478_v29 = vpop.f32.mrf.mxu1  ;;  %v2660_v60 = vadd.f32 %v2659_v52, %v2658_v53  ;;  %v2761_v34 = vadd.f32 %v2760_v25, %v2759_v14  ;;  %v2663_v30 = vsel %vm2579_vm4, %v2573_v59, 0.0  ;;  %v2766_v55 = vsel %vm2579_vm4, %v2709_v6, 0.0  ;;  %v2496_v5 = vpop.f32.mrf.mxu0 }
 0x1f9   : > { %v2536_v12 = vadd.f32 %v2493_v43, %v2327_v13  ;;  %v2330_v10 = vadd.f32 %v3478_v29, %v4860_v15  ;;  %2605 = vst.msk [vmem:[%s4805_s24 + $0xc8] sm:$0xff] %vm2579_vm4, %v2572_v9  ;;  %v2661_v57 = vsel %vm2579_vm4, %v2572_v9, 0.0  ;;  %v2708_v19 = vmul.f32 %v2572_v9, %v2572_v9 }
 0x1fa   : > { %v2577_v26 = vadd.f32 %v4787_v63, %v2538_v48  ;;  %v2287_v62 = vpop.f32.mrf.mxu1  ;;  %v2763_v1 = vadd.f32 %v2762_v61, %v2761_v34  ;;  %v2662_v27 = vadd.f32 %v2661_v57, %v2660_v60  ;;  %v2710_v15 = vmul.f32 %v2574_v58, %v2574_v58 }
 0x1fb   : > { %v2575_v37 = vadd.f32 %v4787_v63, %v2536_v12  ;;  %v2539_v56 = vadd.f32 %v3512_v24, %v2330_v10  ;;  %v2764_v7 = vsel %vm2579_vm4, %v2708_v19, 0.0  ;;  %v2328_v38 = vadd.f32 %v2287_v62, %v2116_v51 }
 0x1fc   : > { %2610 = vst.msk [vmem:[%s4805_s24 + $0xf0] sm:$0xff] %vm2579_vm4, %v2577_v26  ;;  %v2664_v46 = vadd.f32 %v2663_v30, %v2662_v27  ;;  %v2765_v50 = vadd.f32 %v2764_v7, %v2763_v1  ;;  %v2665_v45 = vsel %vm2579_vm4, %v2574_v58, 0.0  ;;  %v2768_v2 = vsel %vm2579_vm4, %v2710_v15, 0.0 }
 0x1fd   : > { %2608 = vst.msk [vmem:[%s4805_s24 + $0xe0] sm:$0xff] %vm2579_vm4, %v2575_v37  ;;  %v2711_v31 = vmul.f32 %v2575_v37, %v2575_v37  ;;  %v2578_v16 = vadd.f32 %v4787_v63, %v2539_v56  ;;  %v2537_v44 = vadd.f32 %v2496_v5, %v2328_v38  ;;  %v2667_v28 = vsel %vm2579_vm4, %v2575_v37, 0.0 }
 0x1fe   : > { %v2767_v41 = vadd.f32 %v2766_v55, %v2765_v50  ;;  %v2666_v35 = vadd.f32 %v2665_v45, %v2664_v46  ;;  %v2713_v47 = vmul.f32 %v2577_v26, %v2577_v26  ;;  %v2671_v51 = vsel %vm2579_vm4, %v2577_v26, 0.0 }
 0x1ff   : > { %2611 = vst.msk [vmem:[%s4805_s24 + $0xf8] sm:$0xff] %vm2579_vm4, %v2578_v16  ;;  %v2576_v54 = vadd.f32 %v4787_v63, %v2537_v44  ;;  %v2770_v22 = vsel %vm2579_vm4, %v2711_v31, 0.0  ;;  %v2714_v42 = vmul.f32 %v2578_v16, %v2578_v16  ;;  %v2673_v21 = vsel %vm2579_vm4, %v2578_v16, 0.0 }
 0x200   : > { %v2668_v17 = vadd.f32 %v2667_v28, %v2666_v35  ;;  %v2769_v59 = vadd.f32 %v2768_v2, %v2767_v41  ;;  %v2774_v63 = vsel %vm2579_vm4, %v2713_v47, 0.0 }
 0x201   : > { %2609 = vst.msk [vmem:[%s4805_s24 + $0xe8] sm:$0xff] %vm2579_vm4, %v2576_v54  ;;  %v2669_v32 = vsel %vm2579_vm4, %v2576_v54, 0.0  ;;  %v2712_v20 = vmul.f32 %v2576_v54, %v2576_v54  ;;  %v2776_v18 = vsel %vm2579_vm4, %v2714_v42, 0.0 }
 0x202   : > { %v2771_v36 = vadd.f32 %v2770_v22, %v2769_v59  ;;  %v2670_v0 = vadd.f32 %v2669_v32, %v2668_v17 }
 0x203   : > { %v2772_v4 = vsel %vm2579_vm4, %v2712_v20, 0.0 }
 0x204   : > { %v2672_v49 = vadd.f32 %v2671_v51, %v2670_v0  ;;  %v2773_v40 = vadd.f32 %v2772_v4, %v2771_v36 }
 0x206   : > { %v2674_v33 = vadd.f32 %v2673_v21, %v2672_v49  ;;  %v2775_v23 = vadd.f32 %v2774_v63, %v2773_v40 }
 0x208   : > { %v2675_v43 = vrot.slane %v2674_v33, 4  ;;  %v2777_v3 = vadd.f32 %v2776_v18, %v2775_v23 }
 0x20a   : > { %v2676_v58 = vadd.f32 %v2675_v43, %v2674_v33  ;;  %v2778_v8 = vrot.slane %v2777_v3, 4 }
 0x20c   : > { %v2677_v11 = vrot.slane %v2676_v58, 2  ;;  %v2779_v39 = vadd.f32 %v2778_v8, %v2777_v3 }
 0x20e   : > { %v2678_v25 = vadd.f32 %v2677_v11, %v2676_v58  ;;  %v2780_v14 = vrot.slane %v2779_v39, 2 }
 0x210   : > { %v2679_v53 = vrot.slane %v2678_v25, 1  ;;  %v2781_v13 = vadd.f32 %v2780_v14, %v2779_v39 }
 0x212   : > { %v2680_v6 = vadd.f32 %v2679_v53, %v2678_v25  ;;  %v2782_v52 = vrot.slane %v2781_v13, 1 }
 0x214   : > { %2682 = vst.msk [vmem:[%s238_s27] sm:$0x1] %vm2681_vm5, %v2680_v6  ;;  %v2783_v9 = vadd.f32 %v2782_v52, %v2781_v13 }
 0x216   : > { %2784 = vst.msk [vmem:[%s241_s30] sm:$0x1] %vm2681_vm5, %v2783_v9 }
 0x217 PF: > { %s16_s18 = sadd.s32 1, %s3540_s18  }
 0x218   : > { %p13_p4 = scmp.ge.s32.totalorder %s16_s18, 4  }
 0x21a   :  { %15 = sbr.rel (!%p13_p4) target bundleno = 1 (0x1), region = 94 }

// kernel: residual_conv_block_forward.5
= control target key start
LH: loop header
LB: loop body
LE: loop exit
PB: predicated region body
PF: predicated region fallthrough
CT: control target
= control target key end

     0   :  { %9 = vsyncpa [#allocation3], 0  ;;  %s1586_s0 = inlined_call_operand.vmem [shape: f32[2,16,16,32], index: 0, kind: input, shape index: {}]   ;;  %s1587_s1 = inlined_call_operand.vmem [shape: f32[1,32], index: 1, kind: input, shape index: {}]   ;;  %s1588_s2 = inlined_call_operand.vmem [shape: f32[1,32], index: 2, kind: input, shape index: {}]   ;;  %s1589_s3 = inlined_call_operand.vmem [shape: f32[2,16,16,32], index: 3, kind: input, shape index: {}]   ;;  %s1590_s4 = inlined_call_operand.hbm [shape: f32[2,16,16,32], index: 4, kind: output, shape index: {}]  }
   0x1   :  { %11 = vsyncpa [#allocation3 + $0x1], 0  ;;  %s1045_s15 = smov 0   ;;  %s1047_s16 = smov 0  }
   0x2   :  { %s1049_s17 = smov 0   ;;  %s1051_s18 = smov 0  }
   0x3 LB: > { %s1066_s19 = sadd.s32 4294967295, %s1015_s18   ;;  %s831_s20 = sadd.s32 4294967294, %s1015_s18   ;;  %s1015_s18 = sphi %s1051_s18, %s1596_s18   ;;  %s1011_s17 = sphi %s1049_s17, %s1595_s17   ;;  %s1007_s16 = sphi %s1047_s16, %s1594_s16   ;;  %s1003_s15 = sphi %s1045_s15, %s1593_s15  }
   0x4   : > { %s1070_s21 = sadd.s32 1, %s1015_s18   ;;  %s118_s22 = sadd.s32 1, %s1011_s17 }
   0x5   : > { %s115_s23 = ssub.s32 %s1015_s18, %s1070_s21  ;;  %p128_p0 = scmp.ne.s32.totalorder %s1011_s17, %s1007_s16 }
   0x6   : > { %p116_p1 = scmp.eq.s32.totalorder %s115_s23, 0  ;;  %p129_p2 = scmp.eq.s32.totalorder %s1066_s19, 1 }
   0x7   : > { %p134_p3 = scmp.ne.s32.totalorder %s1007_s16, %s1003_s15  ;;  %p135_p4 = scmp.eq.s32.totalorder %s831_s20, 1 }
   0x8   : > { %s1081_s24 = scalar_select %p116_p1, %s1011_s17, %s118_s22  }
   0x9   : > { %p1083_p5 = por %p129_p2, %p128_p0  ;;  %p1087_p6 = por %p135_p4, %p134_p3 }
   0xa   : > { %p834_p7 = scmp.ge.s32.totalorder %s1015_s18, 1  ;;  %p175_p8 = scmp.lt.s32.totalorder %s1015_s18, 3 }
   0xc   : > { %p176_p9 = pnand %p834_p7, %p175_p8 }
   0xd   : > { %p206_p10 = scmp.lt.s32.totalorder (!%p176_p9), %s1066_s19, 1  ;;  %s203_s13 = sand.u32 (!%p176_p9), 1, %s1007_s16  }
   0xe   : > { %179 = sbr.rel (%p176_p9) target bundleno = 162 (0xa2), region = 36  ;;  %s1239_s14 = sshll.u32 (!%p176_p9), %s203_s13, 8 }
   0xf   : > { %s1258_s20 = scalar_lea.vmem (!%p176_p9), [#allocation2], %s1239_s14  ;;  %s849_s22 = sshll.u32 (!%p176_p9), %s1066_s19, 12 }
  0x10   : > { %s757_s23 = sshll.u32 (!%p176_p9), %s1258_s20, 4  ;;  %s1538_s29 = scalar_lea.hbm (!%p176_p9), %s1590_s4, %s849_s22  ;;  %s1540_s23 = int_to_ptr.vmem [resolvable:$true] %s757_s23 }
  0x11   : > { %s1546_s30 = scalar_lea.sflag (!%p176_p9), [#allocation3], %s203_s13  ;;  %s1017_s5 = smov (!%p176_p9), [#allocation2]  }
  0x12   : > { %s959_s6 = sshll.u32 (!%p176_p9), %s1017_s5, 4  ;;  %s960_s6 = int_to_ptr.vmem [resolvable:$false] %s959_s6 }
  0x13   : > { %s1095_s27 = scalar_select %p206_p10, %s1066_s19, 1  ;;  %v1101_v0 = vld [vmem:[%s1587_s1] ss:$0 sm:$0xff]  ;;  %vm710_vm0 = vcmask 261120  }
  0x14   : > { %v1114_v2 = vld [vmem:[%s1588_s2] ss:$0 sm:$0xff]  ;;  %s955_s19 = scalar_lea.vmem %s1540_s23, 4096  ;;  %p962_p0 = scmp.lt.s32.totalorder %s1540_s23, %s960_s6 }
  0x15   : > { %s847_s28 = sshll.u32 %s1095_s27, 8  ;;  %p956_p11 = scmp.ne.s32.totalorder %s1540_s23, %s955_s19 }
  0x16   : > { %s1108_s7 = scalar_lea.vmem %s1586_s0, %s847_s28  ;;  %s1218_s12 = scalar_lea.vmem %s1589_s3, %s847_s28 }
  0x17   : > { %v216_v1 = vld [vmem:[%s1108_s7] sm:$0xff]  ;;  %v217_v3 = vld [vmem:[%s1108_s7 + $0x8] sm:$0xff]  ;;  %v218_v6 = vld [vmem:[%s1108_s7 + $0x10] sm:$0xff]  ;;  %p957_p12 = pnand %p956_p11, %p1083_p5 }
  0x18   : > { %v255_v4 = vmul.f32 %v1101_v0, %v216_v1  ;;  %v256_v5 = vmul.f32 %v1101_v0, %v217_v3  ;;  %v257_v7 = vmul.f32 %v1101_v0, %v218_v6  ;;  %v219_v8 = vld [vmem:[%s1108_s7 + $0x18] sm:$0xff]  ;;  %v220_v9 = vld [vmem:[%s1108_s7 + $0x20] sm:$0xff]  ;;  %v221_v14 = vld [vmem:[%s1108_s7 + $0x28] sm:$0xff] }
  0x19   : > { %v258_v12 = vmul.f32 %v1101_v0, %v219_v8  ;;  %v259_v13 = vmul.f32 %v1101_v0, %v220_v9  ;;  %v260_v16 = vmul.f32 %v1101_v0, %v221_v14  ;;  %v222_v17 = vld [vmem:[%s1108_s7 + $0x30] sm:$0xff]  ;;  %v223_v29 = vld [vmem:[%s1108_s7 + $0x38] sm:$0xff]  ;;  %v224_v46 = vld [vmem:[%s1108_s7 + $0x40] sm:$0xff]  ;;  %p958_p13 = pneg %p957_p12 }
  0x1a   : > { %v294_v10 = vadd.f32 %v1114_v2, %v255_v4  ;;  %v295_v11 = vadd.f32 %v1114_v2, %v256_v5  ;;  %v296_v15 = vadd.f32 %v1114_v2, %v257_v7  ;;  %v261_v26 = vmul.f32 %v1101_v0, %v222_v17  ;;  %v225_v58 = vld [vmem:[%s1108_s7 + $0x48] sm:$0xff]  ;;  %v226_v62 = vld [vmem:[%s1108_s7 + $0x50] sm:$0xff]  ;;  %v227_v7 = vld [vmem:[%s1108_s7 + $0x58] sm:$0xff] }
  0x1b   : > { %v297_v21 = vadd.f32 %v1114_v2, %v258_v12  ;;  %v1133_v22 = vadd.f32 %v1114_v2, %v259_v13  ;;  %v1136_v25 = vadd.f32 %v1114_v2, %v260_v16  ;;  %v262_v41 = vmul.f32 %v1101_v0, %v223_v29 }
  0x1c   : > { %v358_v18 = vmul.f32 0.044715, %v294_v10  ;;  %v359_v19 = vmul.f32 0.044715, %v295_v11  ;;  %v360_v20 = vmul.f32 0.044715, %v296_v15  ;;  %v1145_v37 = vadd.f32 %v1114_v2, %v261_v26 }
  0x1d   : > { %v361_v28 = vmul.f32 0.044715, %v297_v21  ;;  %v1140_v30 = vmul.f32 0.5, %v294_v10  ;;  %v362_v33 = vmul.f32 0.044715, %v1133_v22  ;;  %v1149_v42 = vmul.f32 0.5, %v295_v11 }
  0x1e   : > { %v390_v23 = vmul.f32 %v358_v18, %v294_v10  ;;  %v391_v24 = vmul.f32 %v359_v19, %v295_v11  ;;  %v392_v27 = vmul.f32 %v360_v20, %v296_v15  ;;  %v363_v36 = vmul.f32 0.044715, %v1136_v25  ;;  %v230_v26 = vld [vmem:[%s1108_s7 + $0x70] sm:$0xff] }
  0x1f   : > { %v393_v35 = vmul.f32 %v361_v28, %v297_v21  ;;  %v394_v40 = vmul.f32 %v362_v33, %v1133_v22  ;;  %v364_v50 = vmul.f32 0.044715, %v1145_v37  ;;  %v301_v54 = vadd.f32 %v1114_v2, %v262_v41 }
  0x20   : > { %v422_v31 = vmul.f32 %v390_v23, %v294_v10  ;;  %v423_v32 = vmul.f32 %v391_v24, %v295_v11  ;;  %v424_v34 = vmul.f32 %v392_v27, %v296_v15  ;;  %v395_v45 = vmul.f32 %v363_v36, %v1136_v25  ;;  %v229_v24 = vld [vmem:[%s1108_s7 + $0x68] sm:$0xff] }
  0x21   : > { %v425_v44 = vmul.f32 %v393_v35, %v297_v21  ;;  %v426_v49 = vmul.f32 %v394_v40, %v1133_v22  ;;  %v396_v56 = vmul.f32 %v364_v50, %v1145_v37  ;;  %v263_v57 = vmul.f32 %v1101_v0, %v224_v46 }
  0x22   : > { %v454_v38 = vadd.f32 %v422_v31, %v294_v10  ;;  %v455_v39 = vadd.f32 %v423_v32, %v295_v11  ;;  %v456_v43 = vadd.f32 %v424_v34, %v296_v15  ;;  %v427_v53 = vmul.f32 %v395_v45, %v1136_v25  ;;  %v228_v11 = vld [vmem:[%s1108_s7 + $0x60] sm:$0xff] }
  0x23   : > { %v457_v52 = vadd.f32 %v425_v44, %v297_v21  ;;  %v458_v55 = vadd.f32 %v426_v49, %v1133_v22  ;;  %v1161_v59 = vmul.f32 0.5, %v296_v15  ;;  %v428_v1 = vmul.f32 %v396_v56, %v1145_v37  ;;  %v614_v56 = vld [vmem:[%s1218_s12] sm:$0xff] }
  0x24   : > { %v486_v47 = vmul.f32 0.7978846, %v454_v38  ;;  %v487_v48 = vmul.f32 0.7978846, %v455_v39  ;;  %v488_v51 = vmul.f32 0.7978846, %v456_v43  ;;  %v459_v61 = vadd.f32 %v427_v53, %v1136_v25 }
  0x25   : > { %v489_v60 = vmul.f32 0.7978846, %v457_v52  ;;  %v490_v63 = vmul.f32 0.7978846, %v458_v55  ;;  %v365_v3 = vmul.f32 0.044715, %v301_v54  ;;  %v1167_v5 = vadd.f32 %v1114_v2, %v263_v57 }
  0x26   : > { %891 = vtanh.f32 %v486_v47  ;;  %v491_v4 = vmul.f32 0.7978846, %v459_v61  ;;  %v264_v6 = vmul.f32 %v1101_v0, %v225_v58  ;;  %v460_v8 = vadd.f32 %v428_v1, %v1145_v37 }
  0x27   : > { %893 = vtanh.f32 %v487_v48  ;;  %v397_v9 = vmul.f32 %v365_v3, %v301_v54  ;;  %v265_v10 = vmul.f32 %v1101_v0, %v226_v62  ;;  %v1174_v12 = vmul.f32 0.5, %v297_v21 }
  0x28   : > { %895 = vtanh.f32 %v488_v51  ;;  %v366_v13 = vmul.f32 0.044715, %v1167_v5  ;;  %v1178_v14 = vadd.f32 %v1114_v2, %v264_v6  ;;  %v492_v15 = vmul.f32 0.7978846, %v460_v8  ;;  %v616_v8 = vld [vmem:[%s1218_s12 + $0x10] sm:$0xff] }
  0x29   : > { %897 = vtanh.f32 %v489_v60  ;;  %v429_v16 = vmul.f32 %v397_v9, %v301_v54  ;;  %v1181_v17 = vadd.f32 %v1114_v2, %v265_v10  ;;  %v266_v18 = vmul.f32 %v1101_v0, %v227_v7 }
  0x2a   : > { %899 = vtanh.f32 %v490_v63  ;;  %v1185_v19 = vmul.f32 0.5, %v1133_v22  ;;  %v398_v20 = vmul.f32 %v366_v13, %v1167_v5  ;;  %v367_v21 = vmul.f32 0.044715, %v1178_v14  ;;  %v615_v63 = vld [vmem:[%s1218_s12 + $0x8] sm:$0xff] }
  0x2b   : > { %901 = vtanh.f32 %v491_v4  ;;  %v267_v23 = vmul.f32 %v1101_v0, %v228_v11  ;;  %v1193_v27 = vmul.f32 0.5, %v1136_v25  ;;  %v461_v28 = vadd.f32 %v429_v16, %v301_v54 }
  0x2c   : > { %903 = vtanh.f32 %v492_v15  ;;  %v368_v29 = vmul.f32 0.044715, %v1181_v17  ;;  %v430_v31 = vmul.f32 %v398_v20, %v1167_v5  ;;  %v399_v22 = vmul.f32 %v367_v21, %v1178_v14 }
  0x2d   : > { %v1199_v32 = vadd.f32 %v1114_v2, %v266_v18  ;;  %v1202_v33 = vadd.f32 %v1114_v2, %v267_v23  ;;  %v493_v34 = vmul.f32 0.7978846, %v461_v28  ;;  %v268_v35 = vmul.f32 %v1101_v0, %v229_v24 }
  0x2e   : > { %v400_v25 = vmul.f32 %v368_v29, %v1181_v17  ;;  %v269_v36 = vmul.f32 %v1101_v0, %v230_v26  ;;  %v1208_v38 = vmul.f32 0.5, %v1145_v37  ;;  %v462_v39 = vadd.f32 %v430_v31, %v1167_v5  ;;  %v619_v29 = vld [vmem:[%s1218_s12 + $0x28] sm:$0xff] }
  0x2f   : > { %v431_v40 = vmul.f32 %v399_v22, %v1178_v14  ;;  %v369_v41 = vmul.f32 0.044715, %v1199_v32  ;;  %v1220_v43 = vmul.f32 0.5, %v301_v54  ;;  %905 = vtanh.f32 %v493_v34 }
  0x30   : > { %v432_v44 = vmul.f32 %v400_v25, %v1181_v17  ;;  %v370_v37 = vmul.f32 0.044715, %v1202_v33  ;;  %v494_v46 = vmul.f32 0.7978846, %v462_v39  ;;  %v1228_v49 = vadd.f32 %v1114_v2, %v268_v35  ;;  %v620_v35 = vld [vmem:[%s1218_s12 + $0x30] sm:$0xff] }
  0x31   : > { %v463_v47 = vadd.f32 %v431_v40, %v1178_v14  ;;  %v401_v48 = vmul.f32 %v369_v41, %v1199_v32  ;;  %v1233_v54 = vadd.f32 %v1114_v2, %v269_v36  ;;  %v232_v41 = vld [vmem:[%s1108_s7 + $0x80] sm:$0xff] }
  0x32   : > { %v464_v52 = vadd.f32 %v432_v44, %v1181_v17  ;;  %v402_v53 = vmul.f32 %v370_v37, %v1202_v33  ;;  %907 = vtanh.f32 %v494_v46  ;;  %v334_v37 = vmul.f32 0.5, %v1167_v5  ;;  %v233_v46 = vld [vmem:[%s1108_s7 + $0x88] sm:$0xff] }
  0x33   : > { %v892_v45 = vpop.eup %891  ;;  %v495_v58 = vmul.f32 0.7978846, %v463_v47  ;;  %v433_v60 = vmul.f32 %v401_v48, %v1199_v32 }
  0x34   : > { %v894_v50 = vpop.eup %893  ;;  %v550_v51 = vadd.f32 1.0, %v892_v45  ;;  %v496_v3 = vmul.f32 0.7978846, %v464_v52  ;;  %v434_v4 = vmul.f32 %v402_v53, %v1202_v33  ;;  %v371_v45 = vmul.f32 0.044715, %v1228_v49 }
  0x35   : > { %v896_v55 = vpop.eup %895  ;;  %v551_v57 = vadd.f32 1.0, %v894_v50  ;;  %909 = vtanh.f32 %v495_v58  ;;  %v465_v10 = vadd.f32 %v433_v60, %v1199_v32  ;;  %v335_v50 = vmul.f32 0.5, %v1178_v14  ;;  %v234_v14 = vld [vmem:[%s1108_s7 + $0x90] sm:$0xff]  ;;  %v621_v60 = vld [vmem:[%s1218_s12 + $0x38] sm:$0xff] }
  0x36   : > { %v898_v61 = vpop.eup %897  ;;  %v582_v62 = vmul.f32 %v550_v51, %v1140_v30  ;;  %v552_v1 = vadd.f32 1.0, %v896_v55  ;;  %v617_v30 = vld [vmem:[%s1218_s12 + $0x18] sm:$0xff]  ;;  %911 = vtanh.f32 %v496_v3  ;;  %v403_v5 = vmul.f32 %v371_v45, %v1228_v49 }
  0x37   : > { %v900_v6 = vpop.eup %899  ;;  %v583_v7 = vmul.f32 %v551_v57, %v1149_v42  ;;  %v553_v9 = vadd.f32 1.0, %v898_v61  ;;  %v618_v42 = vld [vmem:[%s1218_s12 + $0x20] sm:$0xff]  ;;  %v497_v23 = vmul.f32 0.7978846, %v465_v10  ;;  %v372_v53 = vmul.f32 0.044715, %v1233_v54 }
  0x38   : > { %v902_v11 = vpop.eup %901  ;;  %v646_v13 = vadd.f32 %v614_v56, %v582_v62  ;;  %v584_v15 = vmul.f32 %v552_v1, %v1161_v59  ;;  %v554_v16 = vadd.f32 1.0, %v900_v6  ;;  %v466_v59 = vadd.f32 %v434_v4, %v1202_v33  ;;  %v625_v45 = vld [vmem:[%s1218_s12 + $0x58] sm:$0xff] }
  0x39   : > { %v647_v18 = vadd.f32 %v615_v63, %v583_v7  ;;  %v585_v20 = vmul.f32 %v553_v9, %v1174_v12  ;;  %v555_v21 = vadd.f32 1.0, %v902_v11  ;;  %v904_v31 = vpop.eup %903  ;;  %913 = vtanh.f32 %v497_v23  ;;  %v231_v12 = vld [vmem:[%s1108_s7 + $0x78] sm:$0xff] }
  0x3a   : > { %v678_v24 = vmul.f32 0.7072136, %v646_v13  ;;  %v648_v26 = vadd.f32 %v616_v8, %v584_v15  ;;  %v586_v28 = vmul.f32 %v554_v16, %v1185_v19  ;;  %v556_v39 = vadd.f32 1.0, %v904_v31 }
  0x3b   : > { %v679_v22 = vmul.f32 0.7072136, %v647_v18  ;;  %v649_v34 = vadd.f32 %v617_v30, %v585_v20  ;;  %v587_v25 = vmul.f32 %v555_v21, %v1193_v27  ;;  %v498_v40 = vmul.f32 0.7978846, %v466_v59  ;;  %v622_v30 = vld [vmem:[%s1218_s12 + $0x40] sm:$0xff] }
  0x3c   : > { %711 = vst.msk [vmem:[%s1258_s20] sm:$0xff] %vm710_vm0, %v678_v24  ;;  %v680_v19 = vmul.f32 0.7072136, %v648_v26  ;;  %v650_v36 = vadd.f32 %v618_v42, %v586_v28  ;;  %v588_v48 = vmul.f32 %v556_v39, %v1208_v38  ;;  %v906_v51 = vpop.eup %905  ;;  %v270_v55 = vmul.f32 %v1101_v0, %v231_v12  ;;  %v623_v26 = vld [vmem:[%s1218_s12 + $0x48] sm:$0xff] }
  0x3d   : > { %712 = vst.msk [vmem:[%s1258_s20 + $0x8] sm:$0xff] %vm710_vm0, %v679_v22  ;;  %v681_v27 = vmul.f32 0.7072136, %v649_v34  ;;  %v651_v44 = vadd.f32 %v619_v29, %v587_v25  ;;  %915 = vtanh.f32 %v498_v40  ;;  %v557_v57 = vadd.f32 1.0, %v906_v51  ;;  %v624_v34 = vld [vmem:[%s1218_s12 + $0x50] sm:$0xff]  ;;  %v235_v40 = vld [vmem:[%s1108_s7 + $0x98] sm:$0xff] }
  0x3e   : > { %713 = vst.msk [vmem:[%s1258_s20 + $0x10] sm:$0xff] %vm710_vm0, %v680_v19  ;;  %v682_v47 = vmul.f32 0.7072136, %v650_v36  ;;  %v652_v56 = vadd.f32 %v620_v35, %v588_v48  ;;  %v271_v38 = vmul.f32 %v1101_v0, %v232_v41  ;;  %v272_v58 = vmul.f32 %v1101_v0, %v233_v46 }
  0x3f   : > { %714 = vst.msk [vmem:[%s1258_s20 + $0x18] sm:$0xff] %vm710_vm0, %v681_v27  ;;  %v683_v52 = vmul.f32 0.7072136, %v651_v44  ;;  %v336_v61 = vmul.f32 0.5, %v1181_v17  ;;  %v435_v62 = vmul.f32 %v403_v5, %v1228_v49  ;;  %v404_v63 = vmul.f32 %v372_v53, %v1233_v54  ;;  %v908_v3 = vpop.eup %907 }
  0x40   : > { %715 = vst.msk [vmem:[%s1258_s20 + $0x20] sm:$0xff] %vm710_vm0, %v682_v47  ;;  %v1289_v1 = vadd.f32 %v1114_v2, %v270_v55  ;;  %v684_v4 = vmul.f32 0.7072136, %v652_v56  ;;  %v589_v6 = vmul.f32 %v557_v57, %v1220_v43  ;;  %v337_v7 = vmul.f32 0.5, %v1199_v32 }
  0x41   : > { %716 = vst.msk [vmem:[%s1258_s20 + $0x28] sm:$0xff] %vm710_vm0, %v683_v52  ;;  %v1294_v8 = vadd.f32 %v1114_v2, %v271_v38  ;;  %v558_v9 = vadd.f32 1.0, %v908_v3  ;;  %v467_v17 = vadd.f32 %v435_v62, %v1228_v49  ;;  %v436_v10 = vmul.f32 %v404_v63, %v1233_v54  ;;  %v236_v38 = vld [vmem:[%s1108_s7 + $0xa0] sm:$0xff] }
  0x42   : > { %v273_v11 = vmul.f32 %v1101_v0, %v234_v14  ;;  %v910_v13 = vpop.eup %909  ;;  %717 = vst.msk [vmem:[%s1258_s20 + $0x30] sm:$0xff] %vm710_vm0, %v684_v4  ;;  %v653_v15 = vadd.f32 %v621_v60, %v589_v6  ;;  %v373_v43 = vmul.f32 0.044715, %v1289_v1  ;;  %v1305_v16 = vadd.f32 %v1114_v2, %v272_v58  ;;  %v626_v14 = vld [vmem:[%s1218_s12 + $0x60] sm:$0xff]  ;;  %v237_v4 = vld [vmem:[%s1108_s7 + $0xa8] sm:$0xff]  ;;  %v238_v6 = vld [vmem:[%s1108_s7 + $0xb0] sm:$0xff] }
  0x43   : > { %v374_v32 = vmul.f32 0.044715, %v1294_v8  ;;  %v912_v18 = vpop.eup %911  ;;  %v590_v20 = vmul.f32 %v558_v9, %v334_v37  ;;  %v559_v42 = vadd.f32 1.0, %v910_v13  ;;  %v499_v21 = vmul.f32 0.7978846, %v467_v17 }
  0x44   : > { %v468_v23 = vadd.f32 %v436_v10, %v1233_v54  ;;  %v685_v24 = vmul.f32 0.7072136, %v653_v15  ;;  %v560_v28 = vadd.f32 1.0, %v912_v18  ;;  %v405_v29 = vmul.f32 %v373_v43, %v1289_v1  ;;  %v239_v10 = vld [vmem:[%s1108_s7 + $0xb8] sm:$0xff] }
  0x45   : > { %v406_v59 = vmul.f32 %v374_v32, %v1294_v8  ;;  %v654_v31 = vadd.f32 %v622_v30, %v590_v20  ;;  %v591_v22 = vmul.f32 %v559_v42, %v335_v50  ;;  %917 = vtanh.f32 %v499_v21 }
  0x46   : > { %v500_v25 = vmul.f32 0.7978846, %v468_v23  ;;  %v914_v35 = vpop.eup %913  ;;  %718 = vst.msk [vmem:[%s1258_s20 + $0x38] sm:$0xff] %vm710_vm0, %v685_v24  ;;  %v592_v12 = vmul.f32 %v560_v28, %v336_v61  ;;  %v338_v19 = vmul.f32 0.5, %v1202_v33  ;;  %v437_v36 = vmul.f32 %v405_v29, %v1289_v1 }
  0x47   : > { %v438_v39 = vmul.f32 %v406_v59, %v1294_v8  ;;  %v686_v41 = vmul.f32 0.7072136, %v654_v31  ;;  %v655_v27 = vadd.f32 %v623_v26, %v591_v22  ;;  %v561_v44 = vadd.f32 1.0, %v914_v35 }
  0x48   : > { %919 = vtanh.f32 %v500_v25  ;;  %v656_v37 = vadd.f32 %v624_v34, %v592_v12  ;;  %v469_v46 = vadd.f32 %v437_v36, %v1289_v1  ;;  %v375_v33 = vmul.f32 0.044715, %v1305_v16  ;;  %v627_v36 = vld [vmem:[%s1218_s12 + $0x68] sm:$0xff] }
  0x49   : > { %v470_v47 = vadd.f32 %v438_v39, %v1294_v8  ;;  %719 = vst.msk [vmem:[%s1258_s20 + $0x40] sm:$0xff] %vm710_vm0, %v686_v41  ;;  %v687_v50 = vmul.f32 0.7072136, %v655_v27  ;;  %v593_v51 = vmul.f32 %v561_v44, %v337_v7  ;;  %v1325_v52 = vadd.f32 %v1114_v2, %v273_v11 }
  0x4a   : > { %v916_v48 = vpop.eup %915  ;;  %v274_v5 = vmul.f32 %v1101_v0, %v235_v40  ;;  %v688_v53 = vmul.f32 0.7072136, %v656_v37  ;;  %v501_v56 = vmul.f32 0.7978846, %v469_v46  ;;  %v407_v57 = vmul.f32 %v375_v33, %v1305_v16  ;;  %v628_v46 = vld [vmem:[%s1218_s12 + $0x70] sm:$0xff] }
  0x4b   : > { %v562_v55 = vadd.f32 1.0, %v916_v48  ;;  %720 = vst.msk [vmem:[%s1258_s20 + $0x48] sm:$0xff] %vm710_vm0, %v687_v50  ;;  %v657_v58 = vadd.f32 %v625_v45, %v593_v51  ;;  %v502_v60 = vmul.f32 0.7978846, %v470_v47  ;;  %v376_v61 = vmul.f32 0.044715, %v1325_v52 }
  0x4c   : > { %721 = vst.msk [vmem:[%s1258_s20 + $0x50] sm:$0xff] %vm710_vm0, %v688_v53  ;;  %921 = vtanh.f32 %v501_v56  ;;  %v439_v63 = vmul.f32 %v407_v57, %v1305_v16  ;;  %v1338_v3 = vadd.f32 %v1114_v2, %v274_v5  ;;  %v275_v17 = vmul.f32 %v1101_v0, %v236_v38  ;;  %v240_v45 = vld [vmem:[%s1108_s7 + $0xc0] sm:$0xff] }
  0x4d   : > { %v594_v62 = vmul.f32 %v562_v55, %v338_v19  ;;  %v689_v7 = vmul.f32 0.7072136, %v657_v58  ;;  %923 = vtanh.f32 %v502_v60  ;;  %v408_v9 = vmul.f32 %v376_v61, %v1325_v52 }
  0x4e   : > { %v339_v13 = vmul.f32 0.5, %v1228_v49  ;;  %v471_v15 = vadd.f32 %v439_v63, %v1305_v16  ;;  %v377_v30 = vmul.f32 0.044715, %v1338_v3  ;;  %v1352_v32 = vadd.f32 %v1114_v2, %v275_v17  ;;  %v629_v17 = vld [vmem:[%s1218_s12 + $0x78] sm:$0xff] }
  0x4f   : > { %v658_v11 = vadd.f32 %v626_v14, %v594_v62  ;;  %722 = vst.msk [vmem:[%s1258_s20 + $0x58] sm:$0xff] %vm710_vm0, %v689_v7  ;;  %v440_v43 = vmul.f32 %v408_v9, %v1325_v52  ;;  %v276_v18 = vmul.f32 %v1101_v0, %v237_v4  ;;  %v277_v20 = vmul.f32 %v1101_v0, %v238_v6  ;;  %v241_v7 = vld [vmem:[%s1108_s7 + $0xc8] sm:$0xff] }
  0x50   : > { %v503_v21 = vmul.f32 0.7978846, %v471_v15  ;;  %v409_v49 = vmul.f32 %v377_v30, %v1338_v3  ;;  %v278_v23 = vmul.f32 %v1101_v0, %v239_v10  ;;  %v340_v24 = vmul.f32 0.5, %v1233_v54  ;;  %v243_v15 = vld [vmem:[%s1108_s7 + $0xd8] sm:$0xff] }
  0x51   : > { %v690_v42 = vmul.f32 0.7072136, %v658_v11  ;;  %v472_v26 = vadd.f32 %v440_v43, %v1325_v52  ;;  %v378_v28 = vmul.f32 0.044715, %v1352_v32  ;;  %v1362_v29 = vadd.f32 %v1114_v2, %v276_v18  ;;  %v630_v43 = vld [vmem:[%s1218_s12 + $0x80] sm:$0xff] }
  0x52   : > { %v918_v59 = vpop.eup %917  ;;  %v341_v31 = vmul.f32 0.5, %v1289_v1  ;;  %925 = vtanh.f32 %v503_v21  ;;  %v441_v22 = vmul.f32 %v409_v49, %v1338_v3  ;;  %v1369_v34 = vadd.f32 %v1114_v2, %v277_v20 }
  0x53   : > { %723 = vst.msk [vmem:[%s1258_s20 + $0x60] sm:$0xff] %vm710_vm0, %v690_v42  ;;  %v563_v54 = vadd.f32 1.0, %v918_v59  ;;  %v504_v25 = vmul.f32 0.7978846, %v472_v26  ;;  %v410_v35 = vmul.f32 %v378_v28, %v1352_v32  ;;  %v1373_v12 = vadd.f32 %v1114_v2, %v278_v23 }
  0x54   : > { %v342_v39 = vmul.f32 0.5, %v1294_v8  ;;  %v473_v1 = vadd.f32 %v441_v22, %v1338_v3  ;;  %v379_v40 = vmul.f32 0.044715, %v1362_v29  ;;  %v380_v41 = vmul.f32 0.044715, %v1369_v34 }
  0x55   : > { %v920_v19 = vpop.eup %919  ;;  %v595_v27 = vmul.f32 %v563_v54, %v339_v13  ;;  %927 = vtanh.f32 %v504_v25  ;;  %v442_v37 = vmul.f32 %v410_v35, %v1352_v32  ;;  %v343_v47 = vmul.f32 0.5, %v1305_v16  ;;  %v242_v13 = vld [vmem:[%s1108_s7 + $0xd0] sm:$0xff] }
  0x56   : > { %v564_v44 = vadd.f32 1.0, %v920_v19  ;;  %v505_v33 = vmul.f32 0.7978846, %v473_v1  ;;  %v411_v48 = vmul.f32 %v379_v40, %v1362_v29  ;;  %v412_v8 = vmul.f32 %v380_v41, %v1369_v34  ;;  %v631_v1 = vld [vmem:[%s1218_s12 + $0x88] sm:$0xff] }
  0x57   : > { %v659_v50 = vadd.f32 %v627_v36, %v595_v27  ;;  %v474_v5 = vadd.f32 %v442_v37, %v1352_v32  ;;  %v381_v53 = vmul.f32 0.044715, %v1373_v12  ;;  %v279_v16 = vmul.f32 %v1101_v0, %v240_v45  ;;  %v244_v27 = vld [vmem:[%s1108_s7 + $0xe0] sm:$0xff] }
  0x58   : > { %v596_v51 = vmul.f32 %v564_v44, %v340_v24  ;;  %929 = vtanh.f32 %v505_v33  ;;  %v443_v55 = vmul.f32 %v411_v48, %v1362_v29  ;;  %v444_v56 = vmul.f32 %v412_v8, %v1369_v34  ;;  %v245_v48 = vld [vmem:[%s1108_s7 + $0xe8] sm:$0xff] }
  0x59   : > { %v922_v57 = vpop.eup %921  ;;  %v691_v38 = vmul.f32 0.7072136, %v659_v50  ;;  %v506_v14 = vmul.f32 0.7978846, %v474_v5  ;;  %v413_v60 = vmul.f32 %v381_v53, %v1373_v12  ;;  %v1395_v6 = vadd.f32 %v1114_v2, %v279_v16 }
  0x5a   : > { %v660_v58 = vadd.f32 %v628_v46, %v596_v51  ;;  %v924_v61 = vpop.eup %923  ;;  %v565_v62 = vadd.f32 1.0, %v922_v57  ;;  %v475_v63 = vadd.f32 %v443_v55, %v1362_v29  ;;  %v476_v4 = vadd.f32 %v444_v56, %v1369_v34  ;;  %v632_v55 = vld [vmem:[%s1218_s12 + $0x90] sm:$0xff] }
  0x5b   : > { %724 = vst.msk [vmem:[%s1258_s20 + $0x68] sm:$0xff] %vm710_vm0, %v691_v38  ;;  %v566_v10 = vadd.f32 1.0, %v924_v61  ;;  %931 = vtanh.f32 %v506_v14  ;;  %v445_v11 = vmul.f32 %v413_v60, %v1373_v12  ;;  %v344_v18 = vmul.f32 0.5, %v1325_v52 }
  0x5c   : > { %v692_v9 = vmul.f32 0.7072136, %v660_v58  ;;  %v597_v30 = vmul.f32 %v565_v62, %v341_v31  ;;  %v507_v20 = vmul.f32 0.7978846, %v475_v63  ;;  %v508_v42 = vmul.f32 0.7978846, %v476_v4 }
  0x5d   : > { %v598_v21 = vmul.f32 %v566_v10, %v342_v39  ;;  %v477_v49 = vadd.f32 %v445_v11, %v1373_v12  ;;  %v382_v23 = vmul.f32 0.044715, %v1395_v6  ;;  %v280_v24 = vmul.f32 %v1101_v0, %v241_v7  ;;  %v633_v63 = vld [vmem:[%s1218_s12 + $0x98] sm:$0xff] }
  0x5e   : > { %725 = vst.msk [vmem:[%s1258_s20 + $0x70] sm:$0xff] %vm710_vm0, %v692_v9  ;;  %v661_v26 = vadd.f32 %v629_v17, %v597_v30  ;;  %933 = vtanh.f32 %v507_v20  ;;  %v281_v28 = vmul.f32 %v1101_v0, %v242_v13  ;;  %v282_v59 = vmul.f32 %v1101_v0, %v243_v15 }
  0x5f   : > { %v926_v52 = vpop.eup %925  ;;  %v662_v31 = vadd.f32 %v630_v43, %v598_v21  ;;  %935 = vtanh.f32 %v508_v42  ;;  %v509_v22 = vmul.f32 0.7978846, %v477_v49  ;;  %v414_v54 = vmul.f32 %v382_v23, %v1395_v6  ;;  %v634_v42 = vld [vmem:[%s1218_s12 + $0xa0] sm:$0xff] }
  0x60   : > { %v693_v25 = vmul.f32 0.7072136, %v661_v26  ;;  %v567_v35 = vadd.f32 1.0, %v926_v52  ;;  %v1415_v19 = vadd.f32 %v1114_v2, %v280_v24  ;;  %v1418_v36 = vadd.f32 %v1114_v2, %v281_v28  ;;  %v246_v52 = vld [vmem:[%s1108_s7 + $0xf0] sm:$0xff] }
  0x61   : > { %v694_v39 = vmul.f32 0.7072136, %v662_v31  ;;  %937 = vtanh.f32 %v509_v22  ;;  %v446_v40 = vmul.f32 %v414_v54, %v1395_v6  ;;  %v1423_v41 = vadd.f32 %v1114_v2, %v282_v59 }
  0x62   : > { %v928_v44 = vpop.eup %927  ;;  %726 = vst.msk [vmem:[%s1258_s20 + $0x78] sm:$0xff] %vm710_vm0, %v693_v25  ;;  %v599_v37 = vmul.f32 %v567_v35, %v343_v47  ;;  %v345_v45 = vmul.f32 0.5, %v1338_v3  ;;  %v346_v46 = vmul.f32 0.5, %v1352_v32  ;;  %v383_v33 = vmul.f32 0.044715, %v1415_v19 }
  0x63   : > { %727 = vst.msk [vmem:[%s1258_s20 + $0x80] sm:$0xff] %vm710_vm0, %v694_v39  ;;  %v568_v8 = vadd.f32 1.0, %v928_v44  ;;  %v347_v50 = vmul.f32 0.5, %v1362_v29  ;;  %v478_v51 = vadd.f32 %v446_v40, %v1395_v6  ;;  %v384_v5 = vmul.f32 0.044715, %v1418_v36  ;;  %v635_v39 = vld [vmem:[%s1218_s12 + $0xa8] sm:$0xff] }
  0x64   : > { %v663_v53 = vadd.f32 %v631_v1, %v599_v37  ;;  %v415_v47 = vmul.f32 %v383_v33, %v1415_v19  ;;  %v385_v3 = vmul.f32 0.044715, %v1423_v41  ;;  %v283_v32 = vmul.f32 %v1101_v0, %v244_v27  ;;  %v247_v27 = vld [vmem:[%s1108_s7 + $0xf8] sm:$0xff]  ;;  %v636_v37 = vld [vmem:[%s1218_s12 + $0xb0] sm:$0xff]  ;;  %s961_s7 = scalar_lea.vmem %s960_s6, 8192 }
  0x65   : > { %v930_v56 = vpop.eup %929  ;;  %v600_v16 = vmul.f32 %v568_v8, %v344_v18  ;;  %v510_v57 = vmul.f32 0.7978846, %v478_v51  ;;  %v416_v38 = vmul.f32 %v384_v5, %v1418_v36  ;;  %v284_v29 = vmul.f32 %v1101_v0, %v245_v48  ;;  %p963_p1 = scmp.lt.s32.totalorder %s961_s7, %s955_s19 }
  0x66   : > { %v695_v58 = vmul.f32 0.7072136, %v663_v53  ;;  %v569_v14 = vadd.f32 1.0, %v930_v56  ;;  %v447_v60 = vmul.f32 %v415_v47, %v1415_v19  ;;  %v417_v61 = vmul.f32 %v385_v3, %v1423_v41  ;;  %v637_v53 = vld [vmem:[%s1218_s12 + $0xb8] sm:$0xff] }
  0x67   : > { %v664_v62 = vadd.f32 %v632_v55, %v600_v16  ;;  %939 = vtanh.f32 %v510_v57  ;;  %v448_v4 = vmul.f32 %v416_v38, %v1418_v36  ;;  %v1448_v7 = vadd.f32 %v1114_v2, %v283_v32  ;;  %p964_p2 = por %p963_p1, %p962_p0 }
  0x68   : > { %v932_v9 = vpop.eup %931  ;;  %728 = vst.msk [vmem:[%s1258_s20 + $0x88] sm:$0xff] %vm710_vm0, %v695_v58  ;;  %v601_v17 = vmul.f32 %v569_v14, %v345_v45  ;;  %v479_v10 = vadd.f32 %v447_v60, %v1415_v19  ;;  %v449_v11 = vmul.f32 %v417_v61, %v1423_v41  ;;  %v1455_v13 = vadd.f32 %v1114_v2, %v284_v29 }
  0x69   : > { %v696_v15 = vmul.f32 0.7072136, %v664_v62  ;;  %v570_v30 = vadd.f32 1.0, %v932_v9  ;;  %v348_v43 = vmul.f32 0.5, %v1369_v34  ;;  %v480_v18 = vadd.f32 %v448_v4, %v1418_v36  ;;  %v638_v9 = vld [vmem:[%s1218_s12 + $0xc0] sm:$0xff]  ;;  %p965_p3 = pnand %p964_p2, %p958_p13 }
  0x6a   : > { %v665_v20 = vadd.f32 %v633_v63, %v601_v17  ;;  %v511_v21 = vmul.f32 0.7978846, %v479_v10  ;;  %v481_v49 = vadd.f32 %v449_v11, %v1423_v41  ;;  %v386_v23 = vmul.f32 0.044715, %v1448_v7 }
  0x6b   : > { %v934_v24 = vpop.eup %933  ;;  %729 = vst.msk [vmem:[%s1258_s20 + $0x90] sm:$0xff] %vm710_vm0, %v696_v15  ;;  %v602_v26 = vmul.f32 %v570_v30, %v346_v46  ;;  %v349_v28 = vmul.f32 0.5, %v1373_v12  ;;  %v512_v59 = vmul.f32 0.7978846, %v480_v18  ;;  %v387_v34 = vmul.f32 0.044715, %v1455_v13 }
  0x6c   : > { %v936_v31 = vpop.eup %935  ;;  %v697_v22 = vmul.f32 0.7072136, %v665_v20  ;;  %v571_v54 = vadd.f32 1.0, %v934_v24  ;;  %941 = vtanh.f32 %v511_v21  ;;  %v513_v25 = vmul.f32 0.7978846, %v481_v49 }
  0x6d   : > { %v666_v35 = vadd.f32 %v634_v42, %v602_v26  ;;  %v572_v1 = vadd.f32 1.0, %v936_v31  ;;  %943 = vtanh.f32 %v512_v59  ;;  %v418_v40 = vmul.f32 %v386_v23, %v1448_v7 }
  0x6e   : > { %v938_v12 = vpop.eup %937  ;;  %730 = vst.msk [vmem:[%s1258_s20 + $0x98] sm:$0xff] %vm710_vm0, %v697_v22  ;;  %v603_v44 = vmul.f32 %v571_v54, %v347_v50  ;;  %945 = vtanh.f32 %v513_v25  ;;  %v419_v45 = vmul.f32 %v387_v34, %v1455_v13  ;;  %v285_v46 = vmul.f32 %v1101_v0, %v246_v52  ;;  %v640_v52 = vld [vmem:[%s1218_s12 + $0xd0] sm:$0xff]  ;;  %v641_v54 = vld [vmem:[%s1218_s12 + $0xd8] sm:$0xff] }
  0x6f   : > { %v698_v33 = vmul.f32 0.7072136, %v666_v35  ;;  %v604_v48 = vmul.f32 %v572_v1, %v348_v43  ;;  %v573_v8 = vadd.f32 1.0, %v938_v12  ;;  %v450_v51 = vmul.f32 %v418_v40, %v1448_v7 }
  0x70   : > { %v667_v5 = vadd.f32 %v635_v39, %v603_v44  ;;  %v451_v55 = vmul.f32 %v419_v45, %v1455_v13  ;;  %v1479_v47 = vadd.f32 %v1114_v2, %v285_v46  ;;  %v286_v50 = vmul.f32 %v1101_v0, %v247_v27 }
  0x71   : > { %731 = vst.msk [vmem:[%s1258_s20 + $0xa0] sm:$0xff] %vm710_vm0, %v698_v33  ;;  %v668_v3 = vadd.f32 %v636_v37, %v604_v48  ;;  %v605_v32 = vmul.f32 %v573_v8, %v349_v28  ;;  %v482_v56 = vadd.f32 %v450_v51, %v1448_v7  ;;  %v350_v57 = vmul.f32 0.5, %v1395_v6  ;;  %v639_v28 = vld [vmem:[%s1218_s12 + $0xc8] sm:$0xff]  ;;  %v642_v48 = vld [vmem:[%s1218_s12 + $0xe0] sm:$0xff] }
  0x72   : > { %v699_v16 = vmul.f32 0.7072136, %v667_v5  ;;  %v483_v38 = vadd.f32 %v451_v55, %v1455_v13  ;;  %v388_v29 = vmul.f32 0.044715, %v1479_v47  ;;  %v1489_v0 = vadd.f32 %v1114_v2, %v286_v50  ;;  %v643_v5 = vld [vmem:[%s1218_s12 + $0xe8] sm:$0xff] }
  0x73   : > { %v700_v58 = vmul.f32 0.7072136, %v668_v3  ;;  %v669_v14 = vadd.f32 %v637_v53, %v605_v32  ;;  %v514_v60 = vmul.f32 0.7978846, %v482_v56  ;;  %v351_v11 = vmul.f32 0.5, %v1415_v19 }
  0x74   : > { %v940_v61 = vpop.eup %939  ;;  %732 = vst.msk [vmem:[%s1258_s20 + $0xa8] sm:$0xff] %vm710_vm0, %v699_v16  ;;  %v515_v62 = vmul.f32 0.7978846, %v483_v38  ;;  %v420_v63 = vmul.f32 %v388_v29, %v1479_v47  ;;  %v389_v10 = vmul.f32 0.044715, %v1489_v0  ;;  %v352_v20 = vmul.f32 0.5, %v1418_v36 }
  0x75   : > { %733 = vst.msk [vmem:[%s1258_s20 + $0xb0] sm:$0xff] %vm710_vm0, %v700_v58  ;;  %v701_v6 = vmul.f32 0.7072136, %v669_v14  ;;  %v574_v4 = vadd.f32 1.0, %v940_v61  ;;  %947 = vtanh.f32 %v514_v60  ;;  %v353_v49 = vmul.f32 0.5, %v1423_v41  ;;  %v644_v16 = vld [vmem:[%s1218_s12 + $0xf0] sm:$0xff] }
  0x76   : > { %949 = vtanh.f32 %v515_v62  ;;  %v452_v17 = vmul.f32 %v420_v63, %v1479_v47  ;;  %v421_v30 = vmul.f32 %v389_v10, %v1489_v0  ;;  %v354_v12 = vmul.f32 0.5, %v1448_v7  ;;  %v645_v14 = vld [vmem:[%s1218_s12 + $0xf8] sm:$0xff] }
  0x77   : > { %734 = vst.msk [vmem:[%s1258_s20 + $0xb8] sm:$0xff] %vm710_vm0, %v701_v6  ;;  %v606_v2 = vmul.f32 %v574_v4, %v350_v57  ;;  %v355_v45 = vmul.f32 0.5, %v1455_v13  ;;  %v356_v50 = vmul.f32 0.5, %v1479_v47  ;;  %v357_v38 = vmul.f32 0.5, %v1489_v0 }
  0x78   : > { %v484_v15 = vadd.f32 %v452_v17, %v1479_v47  ;;  %v453_v24 = vmul.f32 %v421_v30, %v1489_v0 }
  0x79   : > { %v942_v43 = vpop.eup %941  ;;  %v670_v18 = vadd.f32 %v638_v9, %v606_v2 }
  0x7a   : > { %v944_v42 = vpop.eup %943  ;;  %v575_v21 = vadd.f32 1.0, %v942_v43  ;;  %v516_v23 = vmul.f32 0.7978846, %v484_v15  ;;  %v485_v22 = vadd.f32 %v453_v24, %v1489_v0 }
  0x7b   : > { %v946_v26 = vpop.eup %945  ;;  %v702_v19 = vmul.f32 0.7072136, %v670_v18  ;;  %v576_v59 = vadd.f32 1.0, %v944_v42 }
  0x7c   : > { %v607_v34 = vmul.f32 %v575_v21, %v351_v11  ;;  %v577_v31 = vadd.f32 1.0, %v946_v26  ;;  %951 = vtanh.f32 %v516_v23  ;;  %v517_v35 = vmul.f32 0.7978846, %v485_v22 }
  0x7d   : > { %735 = vst.msk [vmem:[%s1258_s20 + $0xc0] sm:$0xff] %vm710_vm0, %v702_v19  ;;  %v608_v36 = vmul.f32 %v576_v59, %v352_v20 }
  0x7e   : > { %v671_v41 = vadd.f32 %v639_v28, %v607_v34  ;;  %v609_v25 = vmul.f32 %v577_v31, %v353_v49  ;;  %953 = vtanh.f32 %v517_v35 }
  0x7f   : > { %v672_v39 = vadd.f32 %v640_v52, %v608_v36 }
  0x80   : > { %v703_v1 = vmul.f32 0.7072136, %v671_v41  ;;  %v673_v40 = vadd.f32 %v641_v54, %v609_v25 }
  0x81   : > { %v704_v27 = vmul.f32 0.7072136, %v672_v39 }
  0x82   : > { %v948_v44 = vpop.eup %947  ;;  %736 = vst.msk [vmem:[%s1258_s20 + $0xc8] sm:$0xff] %vm710_vm0, %v703_v1  ;;  %v705_v37 = vmul.f32 0.7072136, %v673_v40 }
  0x83   : > { %v950_v46 = vpop.eup %949  ;;  %737 = vst.msk [vmem:[%s1258_s20 + $0xd0] sm:$0xff] %vm710_vm0, %v704_v27  ;;  %v578_v33 = vadd.f32 1.0, %v948_v44 }
  0x84   : > { %738 = vst.msk [vmem:[%s1258_s20 + $0xd8] sm:$0xff] %vm710_vm0, %v705_v37  ;;  %v579_v8 = vadd.f32 1.0, %v950_v46 }
  0x85   : > { %v610_v51 = vmul.f32 %v578_v33, %v354_v12 }
  0x86   : > { %v611_v7 = vmul.f32 %v579_v8, %v355_v45 }
  0x87   : > { %v674_v53 = vadd.f32 %v642_v48, %v610_v51 }
  0x88   : > { %v675_v55 = vadd.f32 %v643_v5, %v611_v7 }
  0x89   : > { %v952_v13 = vpop.eup %951  ;;  %v706_v3 = vmul.f32 0.7072136, %v674_v53 }
  0x8a   : > { %v707_v32 = vmul.f32 0.7072136, %v675_v55  ;;  %v580_v56 = vadd.f32 1.0, %v952_v13 }
  0x8b   : > { %739 = vst.msk [vmem:[%s1258_s20 + $0xe0] sm:$0xff] %vm710_vm0, %v706_v3  ;;  %v954_v29 = vpop.eup %953 }
  0x8c   : > { %740 = vst.msk [vmem:[%s1258_s20 + $0xe8] sm:$0xff] %vm710_vm0, %v707_v32  ;;  %v612_v57 = vmul.f32 %v580_v56, %v356_v50  ;;  %v581_v47 = vadd.f32 1.0, %v954_v29 }
  0x8e   : > { %v676_v58 = vadd.f32 %v644_v16, %v612_v57  ;;  %v613_v61 = vmul.f32 %v581_v47, %v357_v38 }
  0x90   : > { %v708_v60 = vmul.f32 0.7072136, %v676_v58  ;;  %v677_v62 = vadd.f32 %v645_v14, %v613_v61 }
  0x92   : > { %741 = vst.msk [vmem:[%s1258_s20 + $0xf0] sm:$0xff] %vm710_vm0, %v708_v60  ;;  %v709_v0 = vmul.f32 0.7072136, %v677_v62 }
  0x94   : > { %742 = vst.msk [vmem:[%s1258_s20 + $0xf8] sm:$0xff] %vm710_vm0, %v709_v0 }
  0x95   : > { %968 = shalt.err (!%p965_p3)
}
  0x96   : > { %s969_s8 = scalar_lea.hbm %s1538_s29, 4096  ;;  %s973_s11 = scalar_lea.hbm %s1590_s4, 8192 }
  0x97   : > { %p970_p4 = scmp.ne.s32.totalorder %s1538_s29, %s969_s8  ;;  %p974_p9 = scmp.lt.s32.totalorder %s1538_s29, %s1590_s4 }
  0x98   : > { %p975_p10 = scmp.lt.s32.totalorder %s973_s11, %s969_s8 }
  0x99   : > { %p971_p7 = pnand %p970_p4, %p1083_p5 }
  0x9a   : > { %p976_p11 = por %p975_p10, %p974_p9 }
  0x9b   : > { %p972_p8 = pneg %p971_p7 }
  0x9d   : > { %p977_p12 = pnand %p976_p11, %p972_p8 }
  0x9f   : > { %980 = shalt.err (!%p977_p12)
}
  0xa0   : > { %s1018_s14 = smov 128   ;;  %s1019_s20 = smov 8  }
  0xa1   : > { %850 = dma.vmem_to_hbm [thread:$0]  (%p1083_p5), %s1540_s23, 4096, %s1538_s29, %s1546_s30, %s1018_s14, %s1018_s14, %s1019_s20  }
  0xa2 PF: > { %p856_p13 = scmp.ge.s32.totalorder %s1015_s18, 2  ;;  %s772_s22 = sand.u32 1, %s1003_s15  }
  0xa3   : > { %s773_s27 = scalar_lea.sflag [#allocation3], %s772_s22 }
  0xa4   : > { %p853_p0 = pnand %p856_p13, %p1087_p6 }
  0xa6   : > { %p854_p1 = pneg %p853_p0 }
  0xa8   : > { %998 = dma.done.wait (%p854_p1), %s773_s27, 4096  }
  0xa9   : > { %1000 = vsyncadd (%p854_p1), %s773_s27, 4294963200  ;;  %p14_p2 = scmp.ge.s32.totalorder %s1070_s21, 4   ;;  %s1593_s15 = smov %s1007_s16 }
  0xaa   : > { %s1594_s16 = smov %s1011_s17  ;;  %s1595_s17 = smov %s1081_s24 }
  0xab   : > { %s1596_s18 = smov %s1070_s21  ;;  %16 = sbr.rel (!%p14_p2) target bundleno = 3 (0x3), region = 74 }
  0xb0   :  { %778 = vsyncpa [#allocation3], 1 }
  0xb1   :  { %780 = vsyncpa [#allocation3 + $0x1], 1 }

// kernel: residual_conv_block_forward.4
= control target key start
LH: loop header
LB: loop body
LE: loop exit
PB: predicated region body
PF: predicated region fallthrough
CT: control target
= control target key end

     0   :  { %s4674_s27 = smov 0   ;;  %s6903_s0 = inlined_call_operand.vmem [shape: f32[2,18,18,32], index: 0, kind: input, shape index: {}]   ;;  %s6904_s1 = inlined_call_operand.vmem [shape: f32[1,32], index: 1, kind: input, shape index: {}]   ;;  %s6905_s2 = inlined_call_operand.vmem [shape: f32[1,32], index: 2, kind: input, shape index: {}]   ;;  %s6906_s3 = inlined_call_operand.vmem [shape: bf16[3,3,32,32], index: 3, kind: input, shape index: {}]   ;;  %s6907_s4 = inlined_call_operand.vmem [shape: f32[1,32], index: 4, kind: input, shape index: {}]   ;;  %s6908_s5 = inlined_call_operand.vmem [shape: f32[2,16,16,32], index: 5, kind: output, shape index: {0}]   ;;  %s6909_s6 = inlined_call_operand.vmem [shape: f32[2,16,16,32], index: 6, kind: output, shape index: {1}]   ;;  %s6910_s7 = inlined_call_operand.vmem [shape: f32[2,1,32], index: 7, kind: output, shape index: {2}]   ;;  %s6911_s8 = inlined_call_operand.vmem [shape: f32[2,1,32], index: 8, kind: output, shape index: {3}]  }
   0x1 LB: > { %s3779_s28 = sadd.s32 4294967295, %s4627_s27   ;;  %p3783_p0 = scmp.ge.s32.totalorder %s4627_s27, 1  ;;  %s4627_s27 = sphi %s4674_s27, %s19_s27  }
   0x2   : > { %p269_p1 = scmp.lt.s32.totalorder %s4627_s27, 3 }
   0x4   : > { %p270_p2 = pnand %p3783_p0, %p269_p1 }
   0x6   : > { %273 = sbr.rel (%p270_p2) target bundleno = 677 (0x2a5), region = 40 }
   0xb   : > { %v4489_v0 = vld [vmem:[%s6906_s3 + $0x18] sm:$0xff]   ;;  %p314_p3 = scmp.lt.s32.totalorder %s3779_s28, 1  ;;  %v4490_v1 = vld [vmem:[%s6906_s3 + $0x10] sm:$0xff]   ;;  %v4693_v2 = vld [vmem:[%s6904_s1] ss:$0 sm:$0xff]  ;;  %vm1117_vm0 = vcmask 1046528  }
   0xc   : > { %4476 = vmatprep.subr.bf16.mxu1 %v4489_v0  ;;  %4152 = vmatprep.subr.bf16.mxu0 %v4489_v0  ;;  %v4699_v3 = vld [vmem:[%s6906_s3 + $0x8] sm:$0xff]   ;;  %v4714_v5 = vld [vmem:[%s6905_s2] ss:$0 sm:$0xff]  ;;  %vm998_vm1 = vcmask 261121   ;;  %vm1000_vm2 = vcmask 261120   ;;  %vm1002_vm3 = vcmask 253952  }
   0xd   : > { %s7089_s28 = smov (!%p314_p3, %s3779_s28), 1  ;;  %4478 = vmatpush3.bf16.msra.mxu1 %v4489_v0  ;;  %4153 = vmatpush3.bf16.msra.mxu0 %v4489_v0  ;;  %v4704_v4 = vld [vmem:[%s6906_s3 + $0x28] sm:$0xff]   ;;  %vm1693_vm4 = vcmask 1045504  }
   0xe   : > { %4477 = vmatprep.subr.bf16.mxu1 %v4490_v1  ;;  %4154 = vmatprep.subr.bf16.mxu0 %v4490_v1  ;;  %s4480_s13 = smul.u32 432, %s7089_s28  ;;  %s3988_s23 = sshll.u32 %s7089_s28, 8 }
   0xf   : > { %s4835_s26 = scalar_lea.vmem %s6908_s5, %s3988_s23  ;;  %s6589_s14 = scalar_lea.vmem %s6909_s6, %s3988_s23 }
  0x10   : > { %s4709_s20 = scalar_lea.vmem %s6903_s0, %s4480_s13  ;;  %s331_s16 = scalar_lea.vmem %s6910_s7, %s7089_s28 }
  0x11   : > { %4479 = vmatpush3.bf16.msra.mxu1 %v4490_v1  ;;  %4155 = vmatpush3.bf16.msra.mxu0 %v4490_v1  ;;  %v336_v6 = vld [vmem:[%s4709_s20] sm:$0xff]  ;;  %v337_v7 = vld [vmem:[%s4709_s20 + $0x8] sm:$0xff]  ;;  %v338_v8 = vld [vmem:[%s4709_s20 + $0x10] sm:$0x3]  ;;  %s334_s19 = scalar_lea.vmem %s6911_s8, %s7089_s28 }
  0x12   : > { %v397_v9 = vmul.f32 %v4693_v2, %v336_v6  ;;  %v398_v10 = vmul.f32 %v4693_v2, %v337_v7  ;;  %v399_v11 = vmul.f32 %v4693_v2, %v338_v8  ;;  %v360_v12 = vld [vmem:[%s4709_s20 + $0xc0] sm:$0xff]  ;;  %v361_v13 = vld [vmem:[%s4709_s20 + $0xc8] sm:$0xff]  ;;  %v362_v14 = vld [vmem:[%s4709_s20 + $0xd0] sm:$0x3]  ;;  %4188 = vmatprep.subr.bf16.mxu1 %v4699_v3  ;;  %4224 = vmatprep.subr.bf16.mxu0 %v4704_v4 }
  0x13   : > { %v421_v15 = vmul.f32 %v4693_v2, %v360_v12  ;;  %v422_v16 = vmul.f32 %v4693_v2, %v361_v13  ;;  %v423_v17 = vmul.f32 %v4693_v2, %v362_v14  ;;  %v339_v18 = vld [vmem:[%s4709_s20 + $0x18] sm:$0xff]  ;;  %v340_v22 = vld [vmem:[%s4709_s20 + $0x20] sm:$0xff]  ;;  %v341_v27 = vld [vmem:[%s4709_s20 + $0x28] sm:$0x3] }
  0x14   : > { %v458_v19 = vadd.f32 %v4714_v5, %v397_v9  ;;  %v459_v20 = vadd.f32 %v4714_v5, %v398_v10  ;;  %v460_v21 = vadd.f32 %v4714_v5, %v399_v11  ;;  %v400_v28 = vmul.f32 %v4693_v2, %v339_v18  ;;  %v363_v61 = vld [vmem:[%s4709_s20 + $0xd8] sm:$0xff]  ;;  %v365_v62 = vld [vmem:[%s4709_s20 + $0xe8] sm:$0x3]  ;;  %v364_v7 = vld [vmem:[%s4709_s20 + $0xe0] sm:$0xff] }
  0x15   : > { %v482_v23 = vadd.f32 %v4714_v5, %v421_v15  ;;  %v483_v24 = vadd.f32 %v4714_v5, %v422_v16  ;;  %v4738_v25 = vadd.f32 %v4714_v5, %v423_v17  ;;  %v401_v32 = vmul.f32 %v4693_v2, %v340_v22 }
  0x16   : > { %v566_v26 = vmul.f32 0.044715, %v458_v19  ;;  %v4742_v29 = vmul.f32 0.5, %v458_v19  ;;  %v567_v30 = vmul.f32 0.044715, %v459_v20  ;;  %v4745_v33 = vmul.f32 0.5, %v459_v20 }
  0x17   : > { %v568_v31 = vmul.f32 0.044715, %v460_v21  ;;  %v590_v35 = vmul.f32 0.044715, %v482_v23  ;;  %v591_v36 = vmul.f32 0.044715, %v483_v24  ;;  %v402_v40 = vmul.f32 %v4693_v2, %v341_v27 }
  0x18   : > { %v620_v34 = vmul.f32 %v566_v26, %v458_v19  ;;  %v621_v37 = vmul.f32 %v567_v30, %v459_v20  ;;  %v592_v39 = vmul.f32 0.044715, %v4738_v25  ;;  %v4749_v41 = vmul.f32 0.5, %v460_v21  ;;  %v342_v27 = vld [vmem:[%s4709_s20 + $0x30] sm:$0xff] }
  0x19   : > { %v622_v38 = vmul.f32 %v568_v31, %v460_v21  ;;  %v644_v43 = vmul.f32 %v590_v35, %v482_v23  ;;  %v645_v44 = vmul.f32 %v591_v36, %v483_v24  ;;  %v461_v48 = vadd.f32 %v4714_v5, %v400_v28 }
  0x1a   : > { %v674_v42 = vmul.f32 %v620_v34, %v458_v19  ;;  %v675_v45 = vmul.f32 %v621_v37, %v459_v20  ;;  %v646_v47 = vmul.f32 %v592_v39, %v4738_v25  ;;  %v462_v52 = vadd.f32 %v4714_v5, %v401_v32  ;;  %v343_v34 = vld [vmem:[%s4709_s20 + $0x38] sm:$0xff]  ;;  %v344_v39 = vld [vmem:[%s4709_s20 + $0x40] sm:$0x3] }
  0x1b   : > { %v676_v46 = vmul.f32 %v622_v38, %v460_v21  ;;  %v698_v50 = vmul.f32 %v644_v43, %v482_v23  ;;  %v699_v51 = vmul.f32 %v645_v44, %v483_v24  ;;  %v4756_v56 = vadd.f32 %v4714_v5, %v402_v40 }
  0x1c   : > { %v728_v49 = vadd.f32 %v674_v42, %v458_v19  ;;  %v729_v53 = vadd.f32 %v675_v45, %v459_v20  ;;  %v700_v55 = vmul.f32 %v646_v47, %v4738_v25  ;;  %v4758_v58 = vmul.f32 0.5, %v482_v23 }
  0x1d   : > { %v730_v54 = vadd.f32 %v676_v46, %v460_v21  ;;  %v752_v59 = vadd.f32 %v698_v50, %v482_v23  ;;  %v753_v60 = vadd.f32 %v699_v51, %v483_v24  ;;  %v4762_v1 = vmul.f32 0.5, %v483_v24 }
  0x1e   : > { %v782_v57 = vmul.f32 0.7978846, %v728_v49  ;;  %v783_v63 = vmul.f32 0.7978846, %v729_v53  ;;  %v754_v6 = vadd.f32 %v700_v55, %v4738_v25  ;;  %v569_v10 = vmul.f32 0.044715, %v461_v48 }
  0x1f   : > { %v784_v0 = vmul.f32 0.7978846, %v730_v54  ;;  %v806_v8 = vmul.f32 0.7978846, %v752_v59  ;;  %v807_v9 = vmul.f32 0.7978846, %v753_v60  ;;  %v424_v15 = vmul.f32 %v4693_v2, %v363_v61 }
  0x20   : > { %4507 = vtanh.f32 %v782_v57  ;;  %v808_v11 = vmul.f32 0.7978846, %v754_v6  ;;  %v570_v12 = vmul.f32 0.044715, %v462_v52  ;;  %v571_v13 = vmul.f32 0.044715, %v4756_v56 }
  0x21   : > { %4509 = vtanh.f32 %v783_v63  ;;  %v623_v14 = vmul.f32 %v569_v10, %v461_v48  ;;  %v425_v16 = vmul.f32 %v4693_v2, %v364_v7  ;;  %v426_v19 = vmul.f32 %v4693_v2, %v365_v62 }
  0x22   : > { %4511 = vtanh.f32 %v784_v0  ;;  %v624_v17 = vmul.f32 %v570_v12, %v462_v52  ;;  %v625_v18 = vmul.f32 %v571_v13, %v4756_v56  ;;  %v485_v21 = vadd.f32 %v4714_v5, %v424_v15 }
  0x23   : > { %4513 = vtanh.f32 %v806_v8  ;;  %v677_v20 = vmul.f32 %v623_v14, %v461_v48  ;;  %v4773_v22 = vadd.f32 %v4714_v5, %v425_v16  ;;  %v4777_v26 = vadd.f32 %v4714_v5, %v426_v19 }
  0x24   : > { %4515 = vtanh.f32 %v807_v9  ;;  %v678_v23 = vmul.f32 %v624_v17, %v462_v52  ;;  %v679_v24 = vmul.f32 %v625_v18, %v4756_v56  ;;  %v4781_v28 = vmul.f32 0.5, %v4738_v25 }
  0x25   : > { %4517 = vtanh.f32 %v808_v11  ;;  %v4783_v30 = vmul.f32 0.5, %v461_v48  ;;  %v731_v31 = vadd.f32 %v677_v20, %v461_v48  ;;  %v593_v32 = vmul.f32 0.044715, %v485_v21 }
  0x26   : > { %v4786_v35 = vmul.f32 0.5, %v462_v52  ;;  %v732_v36 = vadd.f32 %v678_v23, %v462_v52  ;;  %v733_v37 = vadd.f32 %v679_v24, %v4756_v56  ;;  %v594_v38 = vmul.f32 0.044715, %v4773_v22 }
  0x27   : > { %v785_v40 = vmul.f32 0.7978846, %v731_v31  ;;  %v595_v42 = vmul.f32 0.044715, %v4777_v26  ;;  %v647_v43 = vmul.f32 %v593_v32, %v485_v21  ;;  %v403_v25 = vmul.f32 %v4693_v2, %v342_v27 }
  0x28   : > { %v786_v44 = vmul.f32 0.7978846, %v732_v36  ;;  %v787_v45 = vmul.f32 0.7978846, %v733_v37  ;;  %v648_v46 = vmul.f32 %v594_v38, %v4773_v22  ;;  %v404_v47 = vmul.f32 %v4693_v2, %v343_v34 }
  0x29   : > { %4519 = vtanh.f32 %v785_v40  ;;  %v649_v48 = vmul.f32 %v595_v42, %v4777_v26  ;;  %v701_v49 = vmul.f32 %v647_v43, %v485_v21  ;;  %v405_v50 = vmul.f32 %v4693_v2, %v344_v39 }
  0x2a   : > { %4521 = vtanh.f32 %v786_v44  ;;  %v702_v51 = vmul.f32 %v648_v46, %v4773_v22  ;;  %v4799_v52 = vadd.f32 %v4714_v5, %v403_v25  ;;  %v4802_v53 = vadd.f32 %v4714_v5, %v404_v47  ;;  %v367_v25 = vld [vmem:[%s4709_s20 + $0xf8] sm:$0xff] }
  0x2b   : > { %4523 = vtanh.f32 %v787_v45  ;;  %v703_v54 = vmul.f32 %v649_v48, %v4777_v26  ;;  %v755_v55 = vadd.f32 %v701_v49, %v485_v21  ;;  %v4806_v59 = vmul.f32 0.5, %v4756_v56 }
  0x2c   : > { %v756_v60 = vadd.f32 %v702_v51, %v4773_v22  ;;  %v4810_v61 = vadd.f32 %v4714_v5, %v405_v50  ;;  %v572_v62 = vmul.f32 0.044715, %v4799_v52  ;;  %v4813_v6 = vmul.f32 0.5, %v485_v21 }
  0x2d   : > { %v4508_v57 = vpop.eup %4507  ;;  %v757_v7 = vadd.f32 %v703_v54, %v4777_v26  ;;  %v809_v8 = vmul.f32 0.7978846, %v755_v55  ;;  %v573_v11 = vmul.f32 0.044715, %v4802_v53  ;;  %v4848_v37 = vmul.f32 0.5, %v4773_v22 }
  0x2e   : > { %v4510_v63 = vpop.eup %4509  ;;  %v890_v0 = vadd.f32 1.0, %v4508_v57  ;;  %v810_v56 = vmul.f32 0.7978846, %v756_v60  ;;  %v626_v12 = vmul.f32 %v572_v62, %v4799_v52  ;;  %v574_v20 = vmul.f32 0.044715, %v4810_v61 }
  0x2f   : > { %v4512_v9 = vpop.eup %4511  ;;  %v891_v10 = vadd.f32 1.0, %v4510_v63  ;;  %v811_v16 = vmul.f32 0.7978846, %v757_v7  ;;  %4525 = vtanh.f32 %v809_v8  ;;  %v368_v57 = vld [vmem:[%s4709_s20 + $0x100] sm:$0x3]  ;;  %v428_v7 = vmul.f32 %v4693_v2, %v367_v25 }
  0x30   : > { %v4514_v13 = vpop.eup %4513  ;;  %v892_v14 = vadd.f32 1.0, %v4512_v9  ;;  %v4819_v15 = vmul.f32 %v890_v0, %v4742_v29  ;;  %4527 = vtanh.f32 %v810_v56  ;;  %v628_v38 = vmul.f32 %v574_v20, %v4810_v61  ;;  %v4494_v25 = vld [vmem:[%s6906_s3 + $0x20] sm:$0xff]  }
  0x31   : > { %v4516_v17 = vpop.eup %4515  ;;  %v4822_v18 = vmul.f32 %v891_v10, %v4745_v33  ;;  %v914_v19 = vadd.f32 1.0, %v4514_v13  ;;  %4529 = vtanh.f32 %v811_v16  ;;  %v366_v33 = vld [vmem:[%s4709_s20 + $0xf0] sm:$0xff]  ;;  %v680_v42 = vmul.f32 %v626_v12, %v4799_v52 }
  0x32   : > { %v4518_v21 = vpop.eup %4517  ;;  %v4827_v23 = vmul.f32 %v892_v14, %v4749_v41  ;;  %v1118_v24 = vrot.slane %v4819_v15, 1  ;;  %v915_v29 = vadd.f32 1.0, %v4516_v17  ;;  %v627_v41 = vmul.f32 %v573_v11, %v4802_v53 }
  0x33   : > { %v1119_v27 = vrot.slane %v4822_v18, 1  ;;  %v916_v31 = vadd.f32 1.0, %v4518_v21  ;;  %v4840_v32 = vmul.f32 %v914_v19, %v4758_v58  ;;  %v734_v47 = vadd.f32 %v680_v42, %v4799_v52  ;;  %v346_v42 = vld [vmem:[%s4709_s20 + $0x50] sm:$0xff] }
  0x34   : > { %v1121_v34 = vrot.slane %v4827_v23, 1  ;;  %v4845_v36 = vmul.f32 %v915_v29, %v4762_v1  ;;  %v681_v43 = vmul.f32 %v627_v41, %v4802_v53  ;;  %v427_v48 = vmul.f32 %v4693_v2, %v366_v33  ;;  %v345_v41 = vld [vmem:[%s4709_s20 + $0x48] sm:$0xff] }
  0x35   : > { %v1120_v39 = vsel %vm1117_vm0, %v1118_v24, %v1119_v27  ;;  %v4853_v40 = vmul.f32 %v916_v31, %v4781_v28  ;;  %1022 = vst.msk [vmem:[%s4835_s26 + $0x6f] sm:$0xfe] %vm998_vm1, %v4840_v32  ;;  %v1158_v58 = vrot.slane %v4840_v32, 1  ;;  %v682_v28 = vmul.f32 %v628_v38, %v4810_v61 }
  0x36   : > { %v1122_v1 = vsel %vm1117_vm0, %v1119_v27, %v1121_v34  ;;  %1023 = vst.msk [vmem:[%s4835_s26 + $0x77] sm:$0xff] %vm1000_vm2, %v4845_v36  ;;  %v1159_v22 = vrot.slane %v4845_v36, 1  ;;  %v4520_v44 = vpop.eup %4519  ;;  %v735_v54 = vadd.f32 %v681_v43, %v4802_v53  ;;  %v788_v0 = vmul.f32 0.7978846, %v734_v47 }
  0x37   : > { %v1230_v45 = vpack.c.bf16 %v1122_v1, %v1120_v39  ;;  %1024 = vst.msk [vmem:[%s4835_s26 + $0x7f] sm:$0x1] %vm1002_vm3, %v4853_v40  ;;  %v1161_v46 = vrot.slane %v4853_v40, 1  ;;  %v4522_v49 = vpop.eup %4521  ;;  %v893_v51 = vadd.f32 1.0, %v4520_v44  ;;  %v736_v55 = vadd.f32 %v682_v28, %v4810_v61  ;;  %v347_v1 = vld [vmem:[%s4709_s20 + $0x58] sm:$0x3] }
  0x38   : > { %v1160_v50 = vsel %vm1117_vm0, %v1158_v58, %v1159_v22  ;;  %v4524_v60 = vpop.eup %4523  ;;  %v894_v63 = vadd.f32 1.0, %v4522_v49  ;;  %v789_v56 = vmul.f32 0.7978846, %v735_v54  ;;  %4531 = vtanh.f32 %v788_v0  ;;  %v369_v0 = vld [vmem:[%s4709_s20 + $0x108] sm:$0xff] }
  0x39   : > { %4156 = vmatprep.mubr.msk.bf16.mxu0 %vm1000_vm2, %v1230_v45  ;;  %v1162_v62 = vsel %vm1117_vm0, %v1159_v22, %v1161_v46  ;;  %v895_v9 = vadd.f32 1.0, %v4524_v60  ;;  %v4884_v10 = vmul.f32 %v893_v51, %v4783_v30  ;;  %v790_v12 = vmul.f32 0.7978846, %v736_v55 }
  0x3a   : > { %v4881_v8 = vpack.c.bf16 %v1162_v62, %v1160_v50  ;;  %v4887_v11 = vmul.f32 %v894_v63, %v4786_v35  ;;  %v429_v13 = vmul.f32 %v4693_v2, %v368_v57  ;;  %4533 = vtanh.f32 %v789_v56 }
  0x3b   : > { %v4893_v14 = vmul.f32 %v895_v9, %v4806_v59  ;;  %999 = vst.msk [vmem:[%s4835_s26 - $0x1] sm:$0xfe] %vm998_vm1, %v4884_v10  ;;  %v1123_v30 = vrot.slane %v4884_v10, 1  ;;  %v4900_v35 = vadd.f32 %v4714_v5, %v427_v48  ;;  %4535 = vtanh.f32 %v790_v12  ;;  %v370_v12 = vld [vmem:[%s4709_s20 + $0x110] sm:$0xff] }
  0x3c   : > { %6947 = vst [vmem:[#allocation2_spill] sm:$0xff] %v4881_v8  ;;  %4172 = vmatprep.mubr.msk.bf16.mxu1 %vm1000_vm2, %v4881_v8  ;;  %v4526_v16 = vpop.eup %4525  ;;  %1001 = vst.msk [vmem:[%s4835_s26 + $0x7] sm:$0xff] %vm1000_vm2, %v4887_v11  ;;  %v1124_v17 = vrot.slane %v4887_v11, 1  ;;  %v4907_v59 = vadd.f32 %v4714_v5, %v428_v7  ;;  %v4910_v19 = vadd.f32 %v4714_v5, %v429_v13  ;;  %v541_v24 = vmul.f32 0.5, %v4777_v26 }
  0x3d   : > { %v4528_v20 = vpop.eup %4527  ;;  %1003 = vst.msk [vmem:[%s4835_s26 + $0xf] sm:$0x1] %vm1002_vm3, %v4893_v14  ;;  %v1126_v21 = vrot.slane %v4893_v14, 1  ;;  %v917_v29 = vadd.f32 1.0, %v4526_v16  ;;  %v596_v58 = vmul.f32 0.044715, %v4900_v35  ;;  %v407_v49 = vmul.f32 %v4693_v2, %v346_v42 }
  0x3e   : > { %v4530_v33 = vpop.eup %4529  ;;  %v1125_v27 = vsel %vm1117_vm0, %v1123_v30, %v1124_v17  ;;  %v918_v31 = vadd.f32 1.0, %v4528_v20  ;;  %v597_v43 = vmul.f32 0.044715, %v4907_v59  ;;  %v598_v28 = vmul.f32 0.044715, %v4910_v19 }
  0x3f   : > { %v1127_v34 = vsel %vm1117_vm0, %v1124_v17, %v1126_v21  ;;  %v919_v38 = vadd.f32 1.0, %v4530_v33  ;;  %v4921_v39 = vmul.f32 %v917_v29, %v4813_v6  ;;  %v650_v45 = vmul.f32 %v596_v58, %v4900_v35  ;;  %v4493_v17 = vld [vmem:[%s6906_s3] sm:$0xff]   ;;  %v371_v33 = vld [vmem:[%s4709_s20 + $0x118] sm:$0x3] }
  0x40   : > { %v4926_v22 = vpack.c.bf16 %v1127_v34, %v1125_v27  ;;  %v4929_v26 = vmul.f32 %v918_v31, %v4848_v37  ;;  %v406_v37 = vmul.f32 %v4693_v2, %v345_v41  ;;  %v651_v47 = vmul.f32 %v597_v43, %v4907_v59 }
  0x41   : > { %v4936_v6 = vmul.f32 %v919_v38, %v541_v24  ;;  %1025 = vst.msk [vmem:[%s4835_s26 + $0x7f] sm:$0xfe] %vm998_vm1, %v4921_v39  ;;  %v1163_v44 = vrot.slane %v4921_v39, 1  ;;  %v652_v48 = vmul.f32 %v598_v28, %v4910_v19  ;;  %v704_v51 = vmul.f32 %v650_v45, %v4900_v35 }
  0x42   : > { %6948 = vst [vmem:[#allocation3_spill] sm:$0xff] %v4926_v22  ;;  %4157 = vmatmul.mubr.msk.bf16.vlgmr.msra.gmra.mxu0 %vm1000_vm2, %v4926_v22  ;;  %1026 = vst.msk [vmem:[%s4835_s26 + $0x87] sm:$0xff] %vm1000_vm2, %v4929_v26  ;;  %v1164_v46 = vrot.slane %v4929_v26, 1  ;;  %v408_v54 = vmul.f32 %v4693_v2, %v347_v1  ;;  %v4961_v55 = vadd.f32 %v4714_v5, %v406_v37  ;;  %v518_v60 = vmul.f32 0.5, %v4799_v52 }
  0x43   : > { %1027 = vst.msk [vmem:[%s4835_s26 + $0x8f] sm:$0x1] %vm1002_vm3, %v4936_v6  ;;  %v1166_v50 = vrot.slane %v4936_v6, 1  ;;  %4225 = vmatpush3.bf16.msra.mxu0 %v4704_v4  ;;  %v705_v62 = vmul.f32 %v651_v47, %v4907_v59  ;;  %v706_v63 = vmul.f32 %v652_v48, %v4910_v19  ;;  %v758_v7 = vadd.f32 %v704_v51, %v4900_v35 }
  0x44   : > { %v1165_v57 = vsel %vm1117_vm0, %v1163_v44, %v1164_v46  ;;  %4226 = vmatprep.subr.bf16.mxu0 %v4494_v25  ;;  %v4971_v9 = vadd.f32 %v4714_v5, %v407_v49  ;;  %v4974_v56 = vadd.f32 %v4714_v5, %v408_v54  ;;  %v519_v52 = vmul.f32 0.5, %v4802_v53  ;;  %v4495_v44 = vld [vmem:[%s6906_s3 + $0x38] sm:$0xff]  }
  0x45   : > { %v1167_v4 = vsel %vm1117_vm0, %v1164_v46, %v1166_v50  ;;  %v759_v30 = vadd.f32 %v705_v62, %v4907_v59  ;;  %v760_v16 = vadd.f32 %v706_v63, %v4910_v19  ;;  %v4532_v20 = vpop.eup %4531  ;;  %v520_v21 = vmul.f32 0.5, %v4810_v61 }
  0x46   : > { %v4977_v13 = vpack.c.bf16 %v1167_v4, %v1165_v57  ;;  %v812_v24 = vmul.f32 0.7978846, %v758_v7  ;;  %v575_v29 = vmul.f32 0.044715, %v4961_v55  ;;  %v430_v27 = vmul.f32 %v4693_v2, %v369_v0 }
  0x47   : > { %4227 = vmatpush3.bf16.msra.mxu0 %v4494_v25  ;;  %v4534_v31 = vpop.eup %4533  ;;  %v896_v53 = vadd.f32 1.0, %v4532_v20  ;;  %v813_v41 = vmul.f32 0.7978846, %v759_v30  ;;  %v814_v34 = vmul.f32 0.7978846, %v760_v16  ;;  %v431_v38 = vmul.f32 %v4693_v2, %v370_v12  ;;  %v348_v16 = vld [vmem:[%s4709_s20 + $0x60] sm:$0xff] }
  0x48   : > { %6949 = vst [vmem:[#allocation4_spill] sm:$0xff] %v4977_v13  ;;  %4173 = vmatmul.mubr.msk.bf16.vlgmr.msra.gmra.mxu1 %vm1000_vm2, %v4977_v13  ;;  %v4536_v58 = vpop.eup %4535  ;;  %v897_v61 = vadd.f32 1.0, %v4534_v31  ;;  %4537 = vtanh.f32 %v812_v24  ;;  %v576_v42 = vmul.f32 0.044715, %v4971_v9  ;;  %v577_v1 = vmul.f32 0.044715, %v4974_v56 }
  0x49   : > { %4189 = vmatpush3.bf16.msra.mxu1 %v4699_v3  ;;  %v898_v43 = vadd.f32 1.0, %v4536_v58  ;;  %v4995_v28 = vmul.f32 %v896_v53, %v518_v60  ;;  %4539 = vtanh.f32 %v813_v41  ;;  %v629_v25 = vmul.f32 %v575_v29, %v4961_v55  ;;  %v4496_v3 = vld [vmem:[%s6906_s3 + $0x48] sm:$0xff]  }
  0x4a   : > { %4190 = vmatprep.subr.bf16.mxu1 %v4493_v17  ;;  %v5004_v45 = vmul.f32 %v897_v61, %v519_v52  ;;  %4541 = vtanh.f32 %v814_v34  ;;  %v630_v37 = vmul.f32 %v576_v42, %v4971_v9  ;;  %v631_v46 = vmul.f32 %v577_v1, %v4974_v56  ;;  %4296 = vmatprep.subr.bf16.mxu0 %v4496_v3 }
  0x4b   : > { %v5008_v47 = vmul.f32 %v898_v43, %v520_v21  ;;  %1004 = vst.msk [vmem:[%s4835_s26 + $0xf] sm:$0xfe] %vm998_vm1, %v4995_v28  ;;  %v1128_v48 = vrot.slane %v4995_v28, 1  ;;  %v683_v49 = vmul.f32 %v629_v25, %v4961_v55  ;;  %v432_v50 = vmul.f32 %v4693_v2, %v371_v33  ;;  %v350_v33 = vld [vmem:[%s4709_s20 + $0x70] sm:$0x3]  ;;  %v372_v43 = vld [vmem:[%s4709_s20 + $0x120] sm:$0xff] }
  0x4c   : > { %1005 = vst.msk [vmem:[%s4835_s26 + $0x17] sm:$0xff] %vm1000_vm2, %v5004_v45  ;;  %v1129_v51 = vrot.slane %v5004_v45, 1  ;;  %v684_v54 = vmul.f32 %v630_v37, %v4971_v9  ;;  %v685_v57 = vmul.f32 %v631_v46, %v4974_v56  ;;  %v5023_v60 = vadd.f32 %v4714_v5, %v430_v27 }
  0x4d   : > { %4191 = vmatpush3.bf16.msra.mxu1 %v4493_v17  ;;  %1006 = vst.msk [vmem:[%s4835_s26 + $0x1f] sm:$0x1] %vm1002_vm3, %v5008_v47  ;;  %v1131_v62 = vrot.slane %v5008_v47, 1  ;;  %v737_v63 = vadd.f32 %v683_v49, %v4961_v55  ;;  %v5031_v0 = vadd.f32 %v4714_v5, %v431_v38  ;;  %v5034_v4 = vadd.f32 %v4714_v5, %v432_v50  ;;  %v349_v17 = vld [vmem:[%s4709_s20 + $0x68] sm:$0xff] }
  0x4e   : > { %4260 = vmatprep.subr.bf16.mxu1 %v4495_v44  ;;  %v1130_v7 = vsel %vm1117_vm0, %v1128_v48, %v1129_v51  ;;  %v542_v12 = vmul.f32 0.5, %v4900_v35  ;;  %v738_v52 = vadd.f32 %v684_v54, %v4971_v9  ;;  %v739_v30 = vadd.f32 %v685_v57, %v4974_v56 }
  0x4f   : > { %v1132_v20 = vsel %vm1117_vm0, %v1129_v51, %v1131_v62  ;;  %v543_v21 = vmul.f32 0.5, %v4907_v59  ;;  %v544_v24 = vmul.f32 0.5, %v4910_v19  ;;  %v791_v29 = vmul.f32 0.7978846, %v737_v63 }
  0x50   : > { %v5046_v27 = vpack.c.bf16 %v1132_v20, %v1130_v7  ;;  %v792_v31 = vmul.f32 0.7978846, %v738_v52  ;;  %v793_v53 = vmul.f32 0.7978846, %v739_v30  ;;  %v599_v35 = vmul.f32 0.044715, %v5023_v60 }
  0x51   : > { %4543 = vtanh.f32 %v791_v29  ;;  %v600_v41 = vmul.f32 0.044715, %v5031_v0  ;;  %v601_v34 = vmul.f32 0.044715, %v5034_v4  ;;  %v409_v38 = vmul.f32 %v4693_v2, %v348_v16 }
  0x52   : > { %6950 = vst [vmem:[#allocation5_spill] sm:$0xff] %v5046_v27  ;;  %4160 = vmatprep.mubr.msk.bf16.mxu0 %vm1000_vm2, %v5046_v27  ;;  %4545 = vtanh.f32 %v792_v31  ;;  %v653_v59 = vmul.f32 %v599_v35, %v5023_v60  ;;  %v410_v19 = vmul.f32 %v4693_v2, %v349_v17  ;;  %v411_v58 = vmul.f32 %v4693_v2, %v350_v33 }
  0x53   : > { %4547 = vtanh.f32 %v793_v53  ;;  %v654_v61 = vmul.f32 %v600_v41, %v5031_v0  ;;  %v655_v42 = vmul.f32 %v601_v34, %v5034_v4  ;;  %v5060_v1 = vadd.f32 %v4714_v5, %v409_v38  ;;  %v373_v41 = vld [vmem:[%s4709_s20 + $0x128] sm:$0xff] }
  0x54   : > { %v5064_v25 = vmul.f32 0.5, %v4961_v55  ;;  %v707_v44 = vmul.f32 %v653_v59, %v5023_v60  ;;  %v5068_v3 = vadd.f32 %v4714_v5, %v410_v19  ;;  %v5071_v37 = vadd.f32 %v4714_v5, %v411_v58  ;;  %v374_v59 = vld [vmem:[%s4709_s20 + $0x130] sm:$0x3] }
  0x55   : > { %v4538_v46 = vpop.eup %4537  ;;  %v5074_v48 = vmul.f32 0.5, %v4971_v9  ;;  %v708_v49 = vmul.f32 %v654_v61, %v5031_v0  ;;  %v709_v50 = vmul.f32 %v655_v42, %v5034_v4  ;;  %v578_v51 = vmul.f32 0.044715, %v5060_v1 }
  0x56   : > { %v4540_v55 = vpop.eup %4539  ;;  %v920_v54 = vadd.f32 1.0, %v4538_v46  ;;  %v5080_v57 = vmul.f32 0.5, %v4974_v56  ;;  %v761_v62 = vadd.f32 %v707_v44, %v5023_v60  ;;  %v433_v63 = vmul.f32 %v4693_v2, %v372_v43 }
  0x57   : > { %v4542_v7 = vpop.eup %4541  ;;  %v921_v9 = vadd.f32 1.0, %v4540_v55  ;;  %v762_v52 = vadd.f32 %v708_v49, %v5031_v0  ;;  %v763_v30 = vadd.f32 %v709_v50, %v5034_v4  ;;  %v579_v16 = vmul.f32 0.044715, %v5068_v3 }
  0x58   : > { %v922_v17 = vadd.f32 1.0, %v4542_v7  ;;  %v5087_v20 = vmul.f32 %v920_v54, %v542_v12  ;;  %v815_v56 = vmul.f32 0.7978846, %v761_v62  ;;  %v580_v29 = vmul.f32 0.044715, %v5071_v37 }
  0x59   : > { %v5090_v33 = vmul.f32 %v921_v9, %v543_v21  ;;  %v816_v31 = vmul.f32 0.7978846, %v762_v52  ;;  %v817_v53 = vmul.f32 0.7978846, %v763_v30  ;;  %v632_v35 = vmul.f32 %v578_v51, %v5060_v1 }
  0x5a   : > { %v5094_v34 = vmul.f32 %v922_v17, %v544_v24  ;;  %1028 = vst.msk [vmem:[%s4835_s26 + $0x8f] sm:$0xfe] %vm998_vm1, %v5087_v20  ;;  %v1168_v38 = vrot.slane %v5087_v20, 1  ;;  %4549 = vtanh.f32 %v815_v56  ;;  %v633_v12 = vmul.f32 %v579_v16, %v5068_v3 }
  0x5b   : > { %1029 = vst.msk [vmem:[%s4835_s26 + $0x97] sm:$0xff] %vm1000_vm2, %v5090_v33  ;;  %v1169_v21 = vrot.slane %v5090_v33, 1  ;;  %4551 = vtanh.f32 %v816_v31  ;;  %v634_v19 = vmul.f32 %v580_v29, %v5071_v37  ;;  %v686_v24 = vmul.f32 %v632_v35, %v5060_v1 }
  0x5c   : > { %1030 = vst.msk [vmem:[%s4835_s26 + $0x9f] sm:$0x1] %vm1002_vm3, %v5094_v34  ;;  %v1171_v58 = vrot.slane %v5094_v34, 1  ;;  %4553 = vtanh.f32 %v817_v53  ;;  %v687_v61 = vmul.f32 %v633_v12, %v5068_v3  ;;  %v434_v42 = vmul.f32 %v4693_v2, %v373_v41  ;;  %v351_v41 = vld [vmem:[%s4709_s20 + $0x78] sm:$0xff] }
  0x5d   : > { %v1170_v43 = vsel %vm1117_vm0, %v1168_v38, %v1169_v21  ;;  %v688_v44 = vmul.f32 %v634_v19, %v5071_v37  ;;  %v740_v46 = vadd.f32 %v686_v24, %v5060_v1  ;;  %v435_v49 = vmul.f32 %v4693_v2, %v374_v59  ;;  %v353_v19 = vld [vmem:[%s4709_s20 + $0x88] sm:$0x3] }
  0x5e   : > { %v4544_v50 = vpop.eup %4543  ;;  %v1172_v51 = vsel %vm1117_vm0, %v1169_v21, %v1171_v58  ;;  %v545_v55 = vmul.f32 0.5, %v5023_v60  ;;  %v741_v54 = vadd.f32 %v687_v61, %v5068_v3  ;;  %v5122_v62 = vadd.f32 %v4714_v5, %v433_v63  ;;  %v352_v21 = vld [vmem:[%s4709_s20 + $0x80] sm:$0xff] }
  0x5f   : > { %v4546_v7 = vpop.eup %4545  ;;  %v5124_v9 = vpack.c.bf16 %v1172_v51, %v1170_v43  ;;  %v899_v52 = vadd.f32 1.0, %v4544_v50  ;;  %v742_v30 = vadd.f32 %v688_v44, %v5071_v37  ;;  %v794_v16 = vmul.f32 0.7978846, %v740_v46 }
  0x60   : > { %v4548_v17 = vpop.eup %4547  ;;  %v900_v56 = vadd.f32 1.0, %v4546_v7  ;;  %v795_v29 = vmul.f32 0.7978846, %v741_v54  ;;  %v5128_v60 = vadd.f32 %v4714_v5, %v434_v42  ;;  %v5131_v63 = vadd.f32 %v4714_v5, %v435_v49 }
  0x61   : > { %6951 = vst [vmem:[#allocation6_spill] sm:$0xff] %v5124_v9  ;;  %4176 = vmatprep.mubr.msk.bf16.mxu1 %vm1000_vm2, %v5124_v9  ;;  %v901_v31 = vadd.f32 1.0, %v4548_v17  ;;  %v5136_v53 = vmul.f32 %v899_v52, %v5064_v25  ;;  %v796_v35 = vmul.f32 0.7978846, %v742_v30  ;;  %4555 = vtanh.f32 %v794_v16 }
  0x62   : > { %v5140_v38 = vmul.f32 %v900_v56, %v5074_v48  ;;  %v546_v12 = vmul.f32 0.5, %v5031_v0  ;;  %v547_v59 = vmul.f32 0.5, %v5034_v4  ;;  %4557 = vtanh.f32 %v795_v29 }
  0x63   : > { %v5147_v24 = vmul.f32 %v901_v31, %v5080_v57  ;;  %1007 = vst.msk [vmem:[%s4835_s26 + $0x1f] sm:$0xfe] %vm998_vm1, %v5136_v53  ;;  %v1133_v25 = vrot.slane %v5136_v53, 1  ;;  %4559 = vtanh.f32 %v796_v35  ;;  %v602_v48 = vmul.f32 0.044715, %v5122_v62 }
  0x64   : > { %1008 = vst.msk [vmem:[%s4835_s26 + $0x27] sm:$0xff] %vm1000_vm2, %v5140_v38  ;;  %v1134_v0 = vrot.slane %v5140_v38, 1  ;;  %v603_v4 = vmul.f32 0.044715, %v5128_v60  ;;  %v604_v58 = vmul.f32 0.044715, %v5131_v63  ;;  %v412_v57 = vmul.f32 %v4693_v2, %v351_v41 }
  0x65   : > { %1009 = vst.msk [vmem:[%s4835_s26 + $0x2f] sm:$0x1] %vm1002_vm3, %v5147_v24  ;;  %v1136_v61 = vrot.slane %v5147_v24, 1  ;;  %v656_v42 = vmul.f32 %v602_v48, %v5122_v62  ;;  %v413_v43 = vmul.f32 %v4693_v2, %v352_v21  ;;  %v414_v44 = vmul.f32 %v4693_v2, %v353_v19 }
  0x66   : > { %v1135_v46 = vsel %vm1117_vm0, %v1133_v25, %v1134_v0  ;;  %v524_v49 = vmul.f32 0.5, %v5060_v1  ;;  %v657_v50 = vmul.f32 %v603_v4, %v5128_v60  ;;  %v658_v51 = vmul.f32 %v604_v58, %v5131_v63 }
  0x67   : > { %v4550_v54 = vpop.eup %4549  ;;  %v1137_v7 = vsel %vm1117_vm0, %v1134_v0, %v1136_v61  ;;  %v525_v52 = vmul.f32 0.5, %v5068_v3  ;;  %v710_v30 = vmul.f32 %v656_v42, %v5122_v62  ;;  %v5176_v16 = vadd.f32 %v4714_v5, %v412_v57  ;;  %v375_v61 = vld [vmem:[%s4709_s20 + $0x138] sm:$0xff] }
  0x68   : > { %v4552_v17 = vpop.eup %4551  ;;  %v5178_v2 = vpack.c.bf16 %v1137_v7, %v1135_v46  ;;  %v923_v56 = vadd.f32 1.0, %v4550_v54  ;;  %v711_v1 = vmul.f32 %v657_v50, %v5128_v60  ;;  %v712_v29 = vmul.f32 %v658_v51, %v5131_v63  ;;  %v5220_v54 = vld [vmem:[%s6904_s1] ss:$0 sm:$0xff] }
  0x69   : > { %v4554_v31 = vpop.eup %4553  ;;  %v924_v35 = vadd.f32 1.0, %v4552_v17  ;;  %v764_v41 = vadd.f32 %v710_v30, %v5122_v62  ;;  %v5184_v3 = vadd.f32 %v4714_v5, %v413_v43  ;;  %v5187_v21 = vadd.f32 %v4714_v5, %v414_v44 }
  0x6a   : > { %6952 = vst [vmem:[#allocation7_spill] sm:$0xff] %v5178_v2  ;;  %4161 = vmatmul.mubr.msk.bf16.gmra.mxu0 %vm1000_vm2, %v5178_v2  ;;  %v925_v19 = vadd.f32 1.0, %v4554_v31  ;;  %v5191_v25 = vmul.f32 %v923_v56, %v545_v55  ;;  %v765_v48 = vadd.f32 %v711_v1, %v5128_v60  ;;  %v766_v0 = vadd.f32 %v712_v29, %v5131_v63  ;;  %v376_v29 = vld [vmem:[%s4709_s20 + $0x140] sm:$0xff] }
  0x6b   : > { %v5195_v4 = vmul.f32 %v924_v35, %v546_v12  ;;  %v526_v58 = vmul.f32 0.5, %v5071_v37  ;;  %v818_v57 = vmul.f32 0.7978846, %v764_v41  ;;  %v581_v5 = vmul.f32 0.044715, %v5176_v16 }
  0x6c   : > { %v5200_v42 = vmul.f32 %v925_v19, %v547_v59  ;;  %1031 = vst.msk [vmem:[%s4835_s26 + $0x9f] sm:$0xfe] %vm998_vm1, %v5191_v25  ;;  %v1173_v55 = vrot.slane %v5191_v25, 1  ;;  %v819_v43 = vmul.f32 0.7978846, %v765_v48  ;;  %v436_v7 = vmul.f32 %v5220_v54, %v375_v61 }
  0x6d   : > { %v820_v44 = vmul.f32 0.7978846, %v766_v0  ;;  %1032 = vst.msk [vmem:[%s4835_s26 + $0xa7] sm:$0xff] %vm1000_vm2, %v5195_v4  ;;  %v1174_v12 = vrot.slane %v5195_v4, 1  ;;  %4561 = vtanh.f32 %v818_v57  ;;  %v582_v37 = vmul.f32 0.044715, %v5184_v3 }
  0x6e   : > { %6953 = vst [vmem:[#allocation8_spill] sm:$0xff] %v5200_v42  ;;  %v583_v46 = vmul.f32 0.044715, %v5187_v21  ;;  %v4556_v59 = vpop.eup %4555  ;;  %1033 = vst.msk [vmem:[%s4835_s26 + $0xaf] sm:$0x1] %vm1002_vm3, %v5200_v42  ;;  %v1176_v50 = vrot.slane %v5200_v42, 1  ;;  %4563 = vtanh.f32 %v819_v43  ;;  %v635_v51 = vmul.f32 %v581_v5, %v5176_v16 }
  0x6f   : > { %v4558_v30 = vpop.eup %4557  ;;  %v1175_v17 = vsel %vm1117_vm0, %v1173_v55, %v1174_v12  ;;  %v902_v56 = vadd.f32 1.0, %v4556_v59  ;;  %4565 = vtanh.f32 %v820_v44  ;;  %v636_v1 = vmul.f32 %v582_v37, %v5184_v3  ;;  %v377_v0 = vld [vmem:[%s4709_s20 + $0x148] sm:$0x3] }
  0x70   : > { %v4560_v31 = vpop.eup %4559  ;;  %v1177_v35 = vsel %vm1117_vm0, %v1174_v12, %v1176_v50  ;;  %v903_v41 = vadd.f32 1.0, %v4558_v30  ;;  %v637_v19 = vmul.f32 %v583_v46, %v5187_v21  ;;  %v689_v48 = vmul.f32 %v635_v51, %v5176_v16  ;;  %v5258_v30 = vld [vmem:[%s6905_s2] ss:$0 sm:$0xff] }
  0x71   : > { %v5230_v57 = vpack.c.bf16 %v1177_v35, %v1175_v17  ;;  %v904_v5 = vadd.f32 1.0, %v4560_v31  ;;  %v5232_v61 = vmul.f32 %v902_v56, %v524_v49  ;;  %v690_v55 = vmul.f32 %v636_v1, %v5184_v3 }
  0x72   : > { %v5235_v43 = vmul.f32 %v903_v41, %v525_v52  ;;  %v691_v44 = vmul.f32 %v637_v19, %v5187_v21  ;;  %v743_v12 = vadd.f32 %v689_v48, %v5176_v16  ;;  %v437_v37 = vmul.f32 %v5220_v54, %v376_v29  ;;  %v354_v19 = vld [vmem:[%s4709_s20 + $0x90] sm:$0xff]  ;;  %v355_v48 = vld [vmem:[%s4709_s20 + $0x98] sm:$0xff] }
  0x73   : > { %6954 = vst [vmem:[#allocation9_spill] sm:$0xff] %v5230_v57  ;;  %4177 = vmatmul.mubr.msk.bf16.gmra.mxu1 %vm1000_vm2, %v5230_v57  ;;  %v5242_v46 = vmul.f32 %v904_v5, %v526_v58  ;;  %1010 = vst.msk [vmem:[%s4835_s26 + $0x2f] sm:$0xfe] %vm998_vm1, %v5232_v61  ;;  %v1138_v49 = vrot.slane %v5232_v61, 1  ;;  %v744_v52 = vadd.f32 %v690_v55, %v5184_v3  ;;  %v356_v5 = vld [vmem:[%s4709_s20 + $0xa0] sm:$0x3] }
  0x74   : > { %v438_v59 = vmul.f32 %v5220_v54, %v377_v0  ;;  %1011 = vst.msk [vmem:[%s4835_s26 + $0x37] sm:$0xff] %vm1000_vm2, %v5235_v43  ;;  %v1139_v50 = vrot.slane %v5235_v43, 1  ;;  %v745_v51 = vadd.f32 %v691_v44, %v5187_v21  ;;  %v797_v58 = vmul.f32 0.7978846, %v743_v12 }
  0x75   : > { %v5261_v17 = vadd.f32 %v5258_v30, %v436_v7  ;;  %1012 = vst.msk [vmem:[%s4835_s26 + $0x3f] sm:$0x1] %vm1002_vm3, %v5242_v46  ;;  %v1141_v56 = vrot.slane %v5242_v46, 1  ;;  %v798_v1 = vmul.f32 0.7978846, %v744_v52  ;;  %v5268_v29 = vadd.f32 %v5258_v30, %v437_v37 }
  0x76   : > { %v5271_v31 = vadd.f32 %v5258_v30, %v438_v59  ;;  %v1140_v35 = vsel %vm1117_vm0, %v1138_v49, %v1139_v50  ;;  %v799_v41 = vmul.f32 0.7978846, %v745_v51  ;;  %4567 = vtanh.f32 %v797_v58 }
  0x77   : > { %v1142_v7 = vsel %vm1117_vm0, %v1139_v50, %v1141_v56  ;;  %v548_v0 = vmul.f32 0.5, %v5122_v62  ;;  %4569 = vtanh.f32 %v798_v1  ;;  %v605_v44 = vmul.f32 0.044715, %v5261_v17 }
  0x78   : > { %v5279_v55 = vpack.c.bf16 %v1142_v7, %v1140_v35  ;;  %4571 = vtanh.f32 %v799_v41  ;;  %v606_v12 = vmul.f32 0.044715, %v5268_v29  ;;  %v549_v37 = vmul.f32 0.5, %v5128_v60 }
  0x79   : > { %v607_v49 = vmul.f32 0.044715, %v5271_v31  ;;  %v415_v52 = vmul.f32 %v5220_v54, %v354_v19  ;;  %v416_v59 = vmul.f32 %v5220_v54, %v355_v48  ;;  %v550_v62 = vmul.f32 0.5, %v5131_v63 }
  0x7a   : > { %6955 = vst [vmem:[#allocation10_spill] sm:$0xff] %v5279_v55  ;;  %v4562_v50 = vpop.eup %4561  ;;  %4164 = vmatprep.mubr.msk.bf16.mxu0 %vm1000_vm2, %v5279_v55  ;;  %v659_v51 = vmul.f32 %v605_v44, %v5261_v17  ;;  %v660_v58 = vmul.f32 %v606_v12, %v5268_v29  ;;  %v417_v56 = vmul.f32 %v5220_v54, %v356_v5  ;;  %v527_v35 = vmul.f32 0.5, %v5176_v16 }
  0x7b   : > { %v4564_v60 = vpop.eup %4563  ;;  %v926_v1 = vadd.f32 1.0, %v4562_v50  ;;  %v528_v41 = vmul.f32 0.5, %v5184_v3  ;;  %v661_v19 = vmul.f32 %v607_v49, %v5271_v31  ;;  %v5299_v12 = vadd.f32 %v5258_v30, %v415_v52  ;;  %v378_v49 = vld [vmem:[%s4709_s20 + $0x150] sm:$0xff] }
  0x7c   : > { %v4566_v48 = vpop.eup %4565  ;;  %v927_v7 = vadd.f32 1.0, %v4564_v60  ;;  %v713_v63 = vmul.f32 %v659_v51, %v5261_v17  ;;  %v714_v44 = vmul.f32 %v660_v58, %v5268_v29  ;;  %v5305_v3 = vadd.f32 %v5258_v30, %v416_v59  ;;  %v379_v60 = vld [vmem:[%s4709_s20 + $0x158] sm:$0xff] }
  0x7d   : > { %v928_v5 = vadd.f32 1.0, %v4566_v48  ;;  %v5301_v50 = vmul.f32 %v926_v1, %v548_v0  ;;  %v715_v16 = vmul.f32 %v661_v19, %v5271_v31  ;;  %v5313_v52 = vadd.f32 %v5258_v30, %v417_v56  ;;  %v380_v1 = vld [vmem:[%s4709_s20 + $0x160] sm:$0x3] }
  0x7e   : > { %v5308_v57 = vmul.f32 %v927_v7, %v549_v37  ;;  %v767_v51 = vadd.f32 %v713_v63, %v5261_v17  ;;  %v768_v58 = vadd.f32 %v714_v44, %v5268_v29  ;;  %v529_v59 = vmul.f32 0.5, %v5187_v21 }
  0x7f   : > { %6956 = vst [vmem:[#allocation11_spill] sm:$0xff] %v5301_v50  ;;  %v5316_v48 = vmul.f32 %v928_v5, %v550_v62  ;;  %1034 = vst.msk [vmem:[%s4835_s26 + $0xaf] sm:$0xfe] %vm998_vm1, %v5301_v50  ;;  %v1178_v0 = vrot.slane %v5301_v50, 1  ;;  %v769_v37 = vadd.f32 %v715_v16, %v5271_v31  ;;  %v439_v62 = vmul.f32 %v5220_v54, %v378_v49 }
  0x80   : > { %6957 = vst [vmem:[#allocation12_spill] sm:$0xff] %v5308_v57  ;;  %1035 = vst.msk [vmem:[%s4835_s26 + $0xb7] sm:$0xff] %vm1000_vm2, %v5308_v57  ;;  %v1179_v19 = vrot.slane %v5308_v57, 1  ;;  %v821_v56 = vmul.f32 0.7978846, %v767_v51  ;;  %v440_v5 = vmul.f32 %v5220_v54, %v379_v60  ;;  %v441_v8 = vmul.f32 %v5220_v54, %v380_v1 }
  0x81   : > { %6958 = vst [vmem:[#allocation13_spill] sm:$0xff] %v5316_v48  ;;  %v822_v7 = vmul.f32 0.7978846, %v768_v58  ;;  %1036 = vst.msk [vmem:[%s4835_s26 + $0xbf] sm:$0x1] %vm1002_vm3, %v5316_v48  ;;  %v1181_v63 = vrot.slane %v5316_v48, 1 }
  0x82   : > { %v823_v44 = vmul.f32 0.7978846, %v769_v37  ;;  %v584_v21 = vmul.f32 0.044715, %v5299_v12  ;;  %v1180_v16 = vsel %vm1117_vm0, %v1178_v0, %v1179_v19  ;;  %4573 = vtanh.f32 %v821_v56 }
  0x83   : > { %v585_v9 = vmul.f32 0.044715, %v5305_v3  ;;  %v586_v51 = vmul.f32 0.044715, %v5313_v52  ;;  %v4568_v58 = vpop.eup %4567  ;;  %v1182_v49 = vsel %vm1117_vm0, %v1179_v19, %v1181_v63  ;;  %4575 = vtanh.f32 %v822_v7 }
  0x84   : > { %v638_v13 = vmul.f32 %v584_v21, %v5299_v12  ;;  %v4570_v37 = vpop.eup %4569  ;;  %v5342_v55 = vpack.c.bf16 %v1182_v49, %v1180_v16  ;;  %v905_v2 = vadd.f32 1.0, %v4568_v58  ;;  %4577 = vtanh.f32 %v823_v44 }
  0x85   : > { %v639_v60 = vmul.f32 %v585_v9, %v5305_v3  ;;  %v4572_v0 = vpop.eup %4571  ;;  %v906_v56 = vadd.f32 1.0, %v4570_v37  ;;  %v640_v27 = vmul.f32 %v586_v51, %v5313_v52  ;;  %v5348_v7 = vadd.f32 %v5258_v30, %v439_v62  ;;  %v357_v51 = vld [vmem:[%s4709_s20 + $0xa8] sm:$0xff] }
  0x86   : > { %6959 = vst [vmem:[#allocation14_spill] sm:$0xff] %v5342_v55  ;;  %v692_v19 = vmul.f32 %v638_v13, %v5299_v12  ;;  %4180 = vmatprep.mubr.msk.bf16.mxu1 %vm1000_vm2, %v5342_v55  ;;  %v907_v1 = vadd.f32 1.0, %v4572_v0  ;;  %v5352_v63 = vmul.f32 %v905_v2, %v527_v35  ;;  %v5356_v9 = vadd.f32 %v5258_v30, %v440_v5 }
  0x87   : > { %v693_v44 = vmul.f32 %v639_v60, %v5305_v3  ;;  %v5358_v21 = vmul.f32 %v906_v56, %v528_v41  ;;  %v694_v13 = vmul.f32 %v640_v27, %v5313_v52  ;;  %v5363_v16 = vadd.f32 %v5258_v30, %v441_v8  ;;  %v358_v60 = vld [vmem:[%s4709_s20 + $0xb0] sm:$0xff] }
  0x88   : > { %v746_v62 = vadd.f32 %v692_v19, %v5299_v12  ;;  %v5366_v58 = vmul.f32 %v907_v1, %v529_v59  ;;  %1013 = vst.msk [vmem:[%s4835_s26 + $0x3f] sm:$0xfe] %vm998_vm1, %v5352_v63  ;;  %v1143_v2 = vrot.slane %v5352_v63, 1  ;;  %v551_v35 = vmul.f32 0.5, %v5261_v17 }
  0x89   : > { %v747_v41 = vadd.f32 %v693_v44, %v5305_v3  ;;  %1014 = vst.msk [vmem:[%s4835_s26 + $0x47] sm:$0xff] %vm1000_vm2, %v5358_v21  ;;  %v1144_v8 = vrot.slane %v5358_v21, 1  ;;  %v748_v27 = vadd.f32 %v694_v13, %v5313_v52  ;;  %v608_v59 = vmul.f32 0.044715, %v5348_v7  ;;  %v359_v44 = vld [vmem:[%s4709_s20 + $0xb8] sm:$0x3] }
  0x8a   : > { %v800_v5 = vmul.f32 0.7978846, %v746_v62  ;;  %1015 = vst.msk [vmem:[%s4835_s26 + $0x4f] sm:$0x1] %vm1002_vm3, %v5366_v58  ;;  %v1146_v49 = vrot.slane %v5366_v58, 1  ;;  %v418_v0 = vmul.f32 %v5220_v54, %v357_v51 }
  0x8b   : > { %v801_v37 = vmul.f32 0.7978846, %v747_v41  ;;  %v609_v17 = vmul.f32 0.044715, %v5356_v9  ;;  %v1145_v56 = vsel %vm1117_vm0, %v1143_v2, %v1144_v8  ;;  %v802_v19 = vmul.f32 0.7978846, %v748_v27 }
  0x8c   : > { %4579 = vtanh.f32 %v800_v5  ;;  %v610_v1 = vmul.f32 0.044715, %v5363_v16  ;;  %v1147_v13 = vsel %vm1117_vm0, %v1144_v8, %v1146_v49  ;;  %v662_v62 = vmul.f32 %v608_v59, %v5348_v7  ;;  %v381_v49 = vld [vmem:[%s4709_s20 + $0x168] sm:$0xff] }
  0x8d   : > { %4581 = vtanh.f32 %v801_v37  ;;  %v663_v41 = vmul.f32 %v609_v17, %v5356_v9  ;;  %v5393_v55 = vpack.c.bf16 %v1147_v13, %v1145_v56  ;;  %v419_v2 = vmul.f32 %v5220_v54, %v358_v60 }
  0x8e   : > { %4583 = vtanh.f32 %v802_v19  ;;  %v664_v51 = vmul.f32 %v610_v1, %v5363_v16  ;;  %v552_v27 = vmul.f32 0.5, %v5268_v29  ;;  %v716_v5 = vmul.f32 %v662_v62, %v5348_v7  ;;  %v382_v62 = vld [vmem:[%s4709_s20 + $0x170] sm:$0xff] }
  0x8f   : > { %6960 = vst [vmem:[#allocation15_spill] sm:$0xff] %v5393_v55  ;;  %v717_v22 = vmul.f32 %v663_v41, %v5356_v9  ;;  %v420_v8 = vmul.f32 %v5220_v54, %v359_v44  ;;  %v4574_v59 = vpop.eup %4573  ;;  %4165 = vmatmul.mubr.msk.bf16.gmra.mxu0 %vm1000_vm2, %v5393_v55  ;;  %v553_v37 = vmul.f32 0.5, %v5271_v31  ;;  %v530_v17 = vmul.f32 0.5, %v5299_v12 }
  0x90   : > { %v718_v60 = vmul.f32 %v664_v51, %v5363_v16  ;;  %v5408_v29 = vadd.f32 %v5258_v30, %v418_v0  ;;  %v4576_v56 = vpop.eup %4575  ;;  %v929_v19 = vadd.f32 1.0, %v4574_v59  ;;  %v770_v1 = vadd.f32 %v716_v5, %v5348_v7 }
  0x91   : > { %v771_v44 = vadd.f32 %v717_v22, %v5356_v9  ;;  %v5413_v13 = vadd.f32 %v5258_v30, %v419_v2  ;;  %v4578_v31 = vpop.eup %4577  ;;  %v930_v41 = vadd.f32 1.0, %v4576_v56  ;;  %v5418_v51 = vadd.f32 %v5258_v30, %v420_v8  ;;  %v383_v56 = vld [vmem:[%s4709_s20 + $0x178] sm:$0x3] }
  0x92   : > { %v772_v12 = vadd.f32 %v718_v60, %v5363_v16  ;;  %v442_v0 = vmul.f32 %v5220_v54, %v381_v49  ;;  %v931_v59 = vadd.f32 1.0, %v4578_v31  ;;  %v5421_v5 = vmul.f32 %v929_v19, %v551_v35 }
  0x93   : > { %v824_v55 = vmul.f32 0.7978846, %v770_v1  ;;  %v825_v22 = vmul.f32 0.7978846, %v771_v44  ;;  %v5423_v2 = vmul.f32 %v930_v41, %v552_v27  ;;  %v587_v57 = vmul.f32 0.044715, %v5408_v29 }
  0x94   : > { %v826_v48 = vmul.f32 0.7978846, %v772_v12  ;;  %v443_v60 = vmul.f32 %v5220_v54, %v382_v62  ;;  %v5428_v50 = vmul.f32 %v931_v59, %v553_v37  ;;  %1037 = vst.msk [vmem:[%s4835_s26 + $0xbf] sm:$0xfe] %vm998_vm1, %v5421_v5  ;;  %v1183_v8 = vrot.slane %v5421_v5, 1 }
  0x95   : > { %4585 = vtanh.f32 %v824_v55  ;;  %v588_v35 = vmul.f32 0.044715, %v5413_v13  ;;  %1038 = vst.msk [vmem:[%s4835_s26 + $0xc7] sm:$0xff] %vm1000_vm2, %v5423_v2  ;;  %v1184_v27 = vrot.slane %v5423_v2, 1  ;;  %v589_v49 = vmul.f32 0.044715, %v5418_v51 }
  0x96   : > { %4587 = vtanh.f32 %v825_v22  ;;  %v641_v19 = vmul.f32 %v587_v57, %v5408_v29  ;;  %1039 = vst.msk [vmem:[%s4835_s26 + $0xcf] sm:$0x1] %vm1002_vm3, %v5428_v50  ;;  %v1186_v37 = vrot.slane %v5428_v50, 1  ;;  %v444_v1 = vmul.f32 %v5220_v54, %v383_v56 }
  0x97   : > { %4589 = vtanh.f32 %v826_v48  ;;  %v642_v55 = vmul.f32 %v588_v35, %v5413_v13  ;;  %v1185_v44 = vsel %vm1117_vm0, %v1183_v8, %v1184_v27  ;;  %v531_v62 = vmul.f32 0.5, %v5305_v3 }
  0x98   : > { %v643_v31 = vmul.f32 %v589_v49, %v5418_v51  ;;  %v695_v41 = vmul.f32 %v641_v19, %v5408_v29  ;;  %v1187_v57 = vsel %vm1117_vm0, %v1184_v27, %v1186_v37  ;;  %v532_v59 = vmul.f32 0.5, %v5313_v52 }
  0x99   : > { %v4580_v12 = vpop.eup %4579  ;;  %v696_v22 = vmul.f32 %v642_v55, %v5413_v13  ;;  %v5455_v48 = vadd.f32 %v5258_v30, %v442_v0  ;;  %v5457_v56 = vpack.c.bf16 %v1187_v57, %v1185_v44  ;;  %v5463_v52 = vadd.f32 %v5258_v30, %v443_v60 }
  0x9a   : > { %v4582_v35 = vpop.eup %4581  ;;  %v908_v8 = vadd.f32 1.0, %v4580_v12  ;;  %v697_v3 = vmul.f32 %v643_v31, %v5418_v51  ;;  %v749_v49 = vadd.f32 %v695_v41, %v5408_v29  ;;  %v5466_v0 = vadd.f32 %v5258_v30, %v444_v1 }
  0x9b   : > { %6961 = vst [vmem:[#allocation16_spill] sm:$0xff] %v5457_v56  ;;  %v4584_v19 = vpop.eup %4583  ;;  %v909_v42 = vadd.f32 1.0, %v4582_v35  ;;  %v750_v27 = vadd.f32 %v696_v22, %v5413_v13  ;;  %4181 = vmatmul.mubr.msk.bf16.gmra.mxu1 %vm1000_vm2, %v5457_v56  ;;  %v611_v57 = vmul.f32 0.044715, %v5455_v48 }
  0x9c   : > { %v910_v37 = vadd.f32 1.0, %v4584_v19  ;;  %v5470_v55 = vmul.f32 %v908_v8, %v530_v17  ;;  %v751_v44 = vadd.f32 %v697_v3, %v5418_v51  ;;  %v803_v31 = vmul.f32 0.7978846, %v749_v49 }
  0x9d   : > { %v5473_v41 = vmul.f32 %v909_v42, %v531_v62  ;;  %v804_v12 = vmul.f32 0.7978846, %v750_v27  ;;  %v612_v42 = vmul.f32 0.044715, %v5463_v52  ;;  %v613_v62 = vmul.f32 0.044715, %v5466_v0 }
  0x9e   : > { %v5476_v60 = vmul.f32 %v910_v37, %v532_v59  ;;  %1016 = vst.msk [vmem:[%s4835_s26 + $0x4f] sm:$0xfe] %vm998_vm1, %v5470_v55  ;;  %v1148_v1 = vrot.slane %v5470_v55, 1  ;;  %v805_v22 = vmul.f32 0.7978846, %v751_v44  ;;  %4591 = vtanh.f32 %v803_v31 }
  0x9f   : > { %1017 = vst.msk [vmem:[%s4835_s26 + $0x57] sm:$0xff] %vm1000_vm2, %v5473_v41  ;;  %v1149_v17 = vrot.slane %v5473_v41, 1  ;;  %4593 = vtanh.f32 %v804_v12  ;;  %v665_v35 = vmul.f32 %v611_v57, %v5455_v48  ;;  %v554_v3 = vmul.f32 0.5, %v5348_v7 }
  0xa0   : > { %1018 = vst.msk [vmem:[%s4835_s26 + $0x5f] sm:$0x1] %vm1002_vm3, %v5476_v60  ;;  %v1151_v59 = vrot.slane %v5476_v60, 1  ;;  %4595 = vtanh.f32 %v805_v22  ;;  %v666_v49 = vmul.f32 %v612_v42, %v5463_v52  ;;  %v667_v19 = vmul.f32 %v613_v62, %v5466_v0 }
  0xa1   : > { %v1150_v8 = vsel %vm1117_vm0, %v1148_v1, %v1149_v17  ;;  %v555_v44 = vmul.f32 0.5, %v5356_v9  ;;  %v556_v31 = vmul.f32 0.5, %v5363_v16  ;;  %v719_v12 = vmul.f32 %v665_v35, %v5455_v48 }
  0xa2   : > { %v4586_v27 = vpop.eup %4585  ;;  %v1152_v37 = vsel %vm1117_vm0, %v1149_v17, %v1151_v59  ;;  %v720_v7 = vmul.f32 %v666_v49, %v5463_v52  ;;  %v721_v42 = vmul.f32 %v667_v19, %v5466_v0 }
  0xa3   : > { %v4588_v22 = vpop.eup %4587  ;;  %v5501_v57 = vpack.c.bf16 %v1152_v37, %v1150_v8  ;;  %v932_v1 = vadd.f32 1.0, %v4586_v27  ;;  %v773_v17 = vadd.f32 %v719_v12, %v5455_v48 }
  0xa4   : > { %v4590_v56 = vpop.eup %4589  ;;  %v933_v62 = vadd.f32 1.0, %v4588_v22  ;;  %v774_v59 = vadd.f32 %v720_v7, %v5463_v52  ;;  %v775_v35 = vadd.f32 %v721_v42, %v5466_v0  ;;  %v1695_v22 = vrot.slane %v4822_v18, 2 }
  0xa5   : > { %6962 = vst [vmem:[#allocation17_spill] sm:$0xff] %v5501_v57  ;;  %4168 = vmatprep.mubr.msk.bf16.mxu0 %vm1000_vm2, %v5501_v57  ;;  %v934_v9 = vadd.f32 1.0, %v4590_v56  ;;  %v5508_v16 = vmul.f32 %v932_v1, %v554_v3  ;;  %v827_v49 = vmul.f32 0.7978846, %v773_v17  ;;  %v1697_v56 = vrot.slane %v4827_v23, 2 }
  0xa6   : > { %v5512_v8 = vmul.f32 %v933_v62, %v555_v44  ;;  %v828_v37 = vmul.f32 0.7978846, %v774_v59  ;;  %v829_v12 = vmul.f32 0.7978846, %v775_v35  ;;  %v533_v23 = vmul.f32 0.5, %v5408_v29 }
  0xa7   : > { %v5514_v19 = vmul.f32 %v934_v9, %v556_v31  ;;  %1040 = vst.msk [vmem:[%s4835_s26 + $0xcf] sm:$0xfe] %vm998_vm1, %v5508_v16  ;;  %v1188_v27 = vrot.slane %v5508_v16, 1  ;;  %4597 = vtanh.f32 %v827_v49  ;;  %v1694_v31 = vrot.slane %v4819_v15, 2 }
  0xa8   : > { %1041 = vst.msk [vmem:[%s4835_s26 + $0xd7] sm:$0xff] %vm1000_vm2, %v5512_v8  ;;  %v1189_v3 = vrot.slane %v5512_v8, 1  ;;  %4599 = vtanh.f32 %v828_v37  ;;  %v534_v62 = vmul.f32 0.5, %v5413_v13  ;;  %v535_v59 = vmul.f32 0.5, %v5418_v51 }
  0xa9   : > { %1042 = vst.msk [vmem:[%s4835_s26 + $0xdf] sm:$0x1] %vm1002_vm3, %v5514_v19  ;;  %v1191_v44 = vrot.slane %v5514_v19, 1  ;;  %4601 = vtanh.f32 %v829_v12  ;;  %v1698_v29 = vsel %vm1693_vm4, %v1695_v22, %v1697_v56  ;;  %v1702_v12 = vrot.slane %v4893_v14, 2 }
  0xaa   : > { %v1190_v1 = vsel %vm1117_vm0, %v1188_v27, %v1189_v3  ;;  %v1696_v27 = vsel %vm1693_vm4, %v1694_v31, %v1695_v22  ;;  %v557_v51 = vmul.f32 0.5, %v5455_v48  ;;  %v5551_v31 = vpack.c.bf16 %v5235_v43, %v5232_v61 }
  0xab   : > { %v4592_v7 = vpop.eup %4591  ;;  %v1192_v42 = vsel %vm1117_vm0, %v1189_v3, %v1191_v44  ;;  %v1714_v56 = vrot.slane %v5232_v61, 2  ;;  %v1715_v48 = vrot.slane %v5235_v43, 2  ;;  %v5569_v61 = vpack.c.bf16 %v5358_v21, %v5352_v63 }
  0xac   : > { %v4594_v17 = vpop.eup %4593  ;;  %v5535_v9 = vpack.c.bf16 %v1192_v42, %v1190_v1  ;;  %v911_v35 = vadd.f32 1.0, %v4592_v7  ;;  %v558_v1 = vmul.f32 0.5, %v5463_v52  ;;  %v1699_v7 = vrot.slane %v4884_v10, 2 }
  0xad   : > { %v4596_v49 = vpop.eup %4595  ;;  %v912_v37 = vadd.f32 1.0, %v4594_v17  ;;  %v1717_v42 = vrot.slane %v5242_v46, 2  ;;  %v1716_v43 = vsel %vm1693_vm4, %v1714_v56, %v1715_v48  ;;  %v1719_v17 = vrot.slane %v5352_v63, 2 }
  0xae   : > { %6963 = vst [vmem:[#allocation18_spill] sm:$0xff] %v5535_v9  ;;  %4184 = vmatprep.mubr.msk.bf16.mxu1 %vm1000_vm2, %v5535_v9  ;;  %v913_v13 = vadd.f32 1.0, %v4596_v49  ;;  %v5543_v3 = vmul.f32 %v911_v35, %v533_v23  ;;  %v1806_v23 = vpack.c.bf16 %v1698_v29, %v1696_v27  ;;  %v1700_v49 = vrot.slane %v4887_v11, 2 }
  0xaf   : > { %v5546_v44 = vmul.f32 %v912_v37, %v534_v62  ;;  %v1718_v46 = vsel %vm1693_vm4, %v1715_v48, %v1717_v42  ;;  %v1722_v37 = vrot.slane %v5366_v58, 2  ;;  %v1704_v29 = vrot.slane %v4995_v28, 2 }
  0xb0   : > { %v5554_v14 = vmul.f32 %v913_v13, %v535_v59  ;;  %1019 = vst.msk [vmem:[%s4835_s26 + $0x5f] sm:$0xfe] %vm998_vm1, %v5543_v3  ;;  %v1153_v22 = vrot.slane %v5543_v3, 1  ;;  %v1720_v59 = vrot.slane %v5358_v21, 2  ;;  %v5584_v13 = vpack.c.bf16 %v1718_v46, %v1716_v43 }
  0xb1   : > { %1020 = vst.msk [vmem:[%s4835_s26 + $0x67] sm:$0xff] %vm1000_vm2, %v5546_v44  ;;  %v1154_v52 = vrot.slane %v5546_v44, 1  ;;  %v1705_v21 = vrot.slane %v5004_v45, 2  ;;  %v559_v58 = vmul.f32 0.5, %v5466_v0 }
  0xb2   : > { %1021 = vst.msk [vmem:[%s4835_s26 + $0x6f] sm:$0x1] %vm1002_vm3, %v5554_v14  ;;  %v1156_v62 = vrot.slane %v5554_v14, 1  ;;  %v1721_v56 = vsel %vm1693_vm4, %v1719_v17, %v1720_v59  ;;  %v1723_v57 = vsel %vm1693_vm4, %v1720_v59, %v1722_v37  ;;  %v1703_v59 = vsel %vm1693_vm4, %v1700_v49, %v1702_v12 }
  0xb3   : > { %v1155_v35 = vsel %vm1117_vm0, %v1153_v22, %v1154_v52  ;;  %v1707_v22 = vrot.slane %v5008_v47, 2  ;;  %v5593_v42 = vpack.c.bf16 %v1723_v57, %v1721_v56  ;;  %v1701_v47 = vsel %vm1693_vm4, %v1699_v7, %v1700_v49  ;;  %v4498_v56 = vld [vmem:[%s6906_s3 + $0x40] sm:$0xff]  }
  0xb4   : > { %v1157_v27 = vsel %vm1117_vm0, %v1154_v52, %v1156_v62  ;;  %v4598_v9 = vpop.eup %4597  ;;  %v1706_v57 = vsel %vm1693_vm4, %v1704_v29, %v1705_v21  ;;  %v5616_v7 = vpack.c.bf16 %v1703_v59, %v1701_v47  ;;  %v1709_v12 = vrot.slane %v5136_v53, 2 }
  0xb5   : > { %v5587_v63 = vpack.c.bf16 %v1157_v27, %v1155_v35  ;;  %v4600_v48 = vpop.eup %4599  ;;  %v935_v52 = vadd.f32 1.0, %v4598_v9  ;;  %v1708_v9 = vsel %vm1693_vm4, %v1705_v21, %v1707_v22  ;;  %v1710_v37 = vrot.slane %v5140_v38, 2 }
  0xb6   : > { %v4602_v62 = vpop.eup %4601  ;;  %v936_v43 = vadd.f32 1.0, %v4600_v48  ;;  %v5623_v49 = vpack.c.bf16 %v1708_v9, %v1706_v57  ;;  %v1712_v27 = vrot.slane %v5147_v24, 2  ;;  %v1049_v22 = vpack.c.bf16 %v4822_v18, %v4819_v15  ;;  %v4617_v24 = vld [vmem:[%s6906_s3 + $0x48] sm:$0xff]  }
  0xb7   : > { %4169 = vmatmul.mubr.msk.bf16.gmra.mxu0 %vm1000_vm2, %v5587_v63  ;;  %v937_v17 = vadd.f32 1.0, %v4602_v62  ;;  %v5597_v35 = vmul.f32 %v935_v52, %v557_v51  ;;  %v5650_v15 = vld [vmem:[%s6906_s3 + $0x68] sm:$0xff]   ;;  %v5655_v18 = vpack.c.bf16 %v4887_v11, %v4884_v10  ;;  %v1724_v47 = vrot.slane %v5470_v55, 2 }
  0xb8   : > { %4228 = vmatprep.mubr.msk.bf16.mxu0 %vm1000_vm2, %v1806_v23  ;;  %v5602_v0 = vmul.f32 %v936_v43, %v558_v1  ;;  %v1713_v52 = vsel %vm1693_vm4, %v1710_v37, %v1712_v27  ;;  %v5661_v43 = vpack.c.bf16 %v5423_v2, %v5421_v5  ;;  %v1725_v59 = vrot.slane %v5473_v41, 2 }
  0xb9   : > { %v5606_v46 = vmul.f32 %v937_v17, %v559_v58  ;;  %1043 = vst.msk [vmem:[%s4835_s26 + $0xdf] sm:$0xfe] %vm998_vm1, %v5597_v35  ;;  %v1193_v51 = vrot.slane %v5597_v35, 1  ;;  %v1711_v58 = vsel %vm1693_vm4, %v1709_v12, %v1710_v37  ;;  %v1759_v17 = vrot.slane %v5421_v5, 2  ;;  %v386_v37 = vld [vmem:[%s4709_s20 + $0x190] sm:$0x3] }
  0xba   : > { %1044 = vst.msk [vmem:[%s4835_s26 + $0xe7] sm:$0xff] %vm1000_vm2, %v5602_v0  ;;  %v1194_v23 = vrot.slane %v5602_v0, 1  ;;  %v5657_v62 = vpack.c.bf16 %v1713_v52, %v1711_v58  ;;  %v1760_v57 = vrot.slane %v5423_v2, 2  ;;  %v1762_v10 = vrot.slane %v5428_v50, 2  ;;  %v4618_v58 = vld [vmem:[%s6906_s3 + $0x38] sm:$0xff]  }
  0xbb   : > { %1045 = vst.msk [vmem:[%s4835_s26 + $0xef] sm:$0x1] %vm1002_vm3, %v5606_v46  ;;  %v1196_v1 = vrot.slane %v5606_v46, 1  ;;  %v1727_v11 = vrot.slane %v5476_v60, 2  ;;  %v5671_v9 = vpack.c.bf16 %v5512_v8, %v5508_v16  ;;  %v1765_v5 = vrot.slane %v5512_v8, 2 }
  0xbc   : > { %v1195_v29 = vsel %vm1117_vm0, %v1193_v51, %v1194_v23  ;;  %v1764_v51 = vrot.slane %v5508_v16, 2  ;;  %v5679_v12 = vpack.c.bf16 %v5004_v45, %v4995_v28  ;;  %v1761_v2 = vsel %vm1693_vm4, %v1759_v17, %v1760_v57  ;;  %v4497_v16 = vld [vmem:[%s6906_s3 + $0x30] sm:$0xff]  }
  0xbd   : > { %v1197_v21 = vsel %vm1117_vm0, %v1194_v23, %v1196_v1  ;;  %v384_v23 = vld [vmem:[%s4709_s20 + $0x180] sm:$0xff]  ;;  %v1763_v50 = vsel %vm1693_vm4, %v1760_v57, %v1762_v10  ;;  %v1767_v60 = vrot.slane %v5514_v19, 2  ;;  %v385_v1 = vld [vmem:[%s4709_s20 + $0x188] sm:$0xff]  ;;  %v5696_v45 = vpack.c.bf16 %v5602_v0, %v5597_v35 }
  0xbe   : > { %v5634_v48 = vpack.c.bf16 %v1197_v21, %v1195_v29  ;;  %v5691_v8 = vpack.c.bf16 %v1763_v50, %v1761_v2  ;;  %v1766_v28 = vsel %vm1693_vm4, %v1764_v51, %v1765_v5  ;;  %v1726_v19 = vsel %vm1693_vm4, %v1724_v47, %v1725_v59 }
  0xbf   : > { %4229 = vmatmul.mubr.msk.bf16.vlgmr.msra.gmra.mxu0 %vm1000_vm2, %v5616_v7  ;;  %v1768_v27 = vsel %vm1693_vm4, %v1765_v5, %v1767_v60  ;;  %v445_v29 = vmul.f32 %v5220_v54, %v384_v23  ;;  %v1729_v52 = vrot.slane %v5543_v3, 2  ;;  %v1730_v17 = vrot.slane %v5546_v44, 2 }
  0xc0   : > { %6964 = vst [vmem:[#allocation19_spill] sm:$0xff] %v5634_v48  ;;  %4297 = vmatpush3.bf16.msra.mxu0 %v4617_v24  ;;  %4232 = vmatprep.mubr.msk.bf16.mxu0 %vm1000_vm2, %v5623_v49  ;;  %v5706_v21 = vpack.c.bf16 %v1768_v27, %v1766_v28  ;;  %v447_v24 = vmul.f32 %v5220_v54, %v386_v37  ;;  %v1735_v23 = vrot.slane %v4845_v36, 2  ;;  %v1737_v2 = vrot.slane %v4853_v40, 2 }
  0xc1   : > { %4185 = vmatmul.mubr.msk.bf16.gmra.mxu1 %vm1000_vm2, %v5634_v48  ;;  %4298 = vmatprep.subr.bf16.mxu0 %v4498_v56  ;;  %v5718_v47 = vadd.f32 %v5258_v30, %v445_v29 }
  0xc2   : > { %4192 = vmatprep.mubr.msk.bf16.mxu1 %vm1000_vm2, %v1049_v22  ;;  %v446_v22 = vmul.f32 %v5220_v54, %v385_v1  ;;  %v5724_v54 = vld [vmem:[%s6906_s3 + $0x58] sm:$0xff]   ;;  %v5730_v10 = vadd.f32 %v5258_v30, %v447_v24  ;;  %v1738_v28 = vsel %vm1693_vm4, %v1735_v23, %v1737_v2  ;;  %v1740_v24 = vrot.slane %v4929_v26, 2 }
  0xc3   : > { %v614_v5 = vmul.f32 0.044715, %v5718_v47  ;;  %v1747_v2 = vrot.slane %v5094_v34, 2 }
  0xc4   : > { %4299 = vmatpush3.bf16.msra.mxu0 %v4498_v56  ;;  %v1728_v56 = vsel %vm1693_vm4, %v1725_v59, %v1727_v11  ;;  %v1732_v59 = vrot.slane %v5554_v14, 2  ;;  %v5727_v57 = vadd.f32 %v5258_v30, %v446_v22  ;;  %v5734_v11 = vpack.c.bf16 %v5140_v38, %v5136_v53 }
  0xc5   : > { %4368 = vmatprep.subr.bf16.mxu0 %v5650_v15  ;;  %v5736_v51 = vpack.c.bf16 %v1728_v56, %v1726_v19  ;;  %v1734_v14 = vrot.slane %v4840_v32, 2  ;;  %v616_v60 = vmul.f32 0.044715, %v5730_v10  ;;  %v1731_v30 = vsel %vm1693_vm4, %v1729_v52, %v1730_v17 }
  0xc6   : > { %v615_v50 = vmul.f32 0.044715, %v5727_v57  ;;  %v668_v53 = vmul.f32 %v614_v5, %v5718_v47  ;;  %v1733_v38 = vsel %vm1693_vm4, %v1730_v17, %v1732_v59  ;;  %v1739_v22 = vrot.slane %v4921_v39, 2 }
  0xc7   : > { %4233 = vmatmul.mubr.msk.bf16.gmra.mxu0 %vm1000_vm2, %v5657_v62  ;;  %v670_v40 = vmul.f32 %v616_v60, %v5730_v10  ;;  %v5763_v29 = vpack.c.bf16 %v1733_v38, %v1731_v30  ;;  %v1742_v59 = vrot.slane %v4936_v6, 2  ;;  %v5778_v30 = vpack.c.bf16 %v5473_v41, %v5470_v55 }
  0xc8   : > { %4236 = vmatprep.mubr.msk.bf16.mxu0 %vm1000_vm2, %v5584_v13  ;;  %v669_v1 = vmul.f32 %v615_v50, %v5727_v57  ;;  %v722_v37 = vmul.f32 %v668_v53, %v5718_v47  ;;  %v1741_v6 = vsel %vm1693_vm4, %v1739_v22, %v1740_v24 }
  0xc9   : > { %4193 = vmatmul.mubr.msk.bf16.vlgmr.msra.gmra.mxu1 %vm1000_vm2, %v5655_v18  ;;  %v724_v27 = vmul.f32 %v670_v40, %v5730_v10  ;;  %v1743_v53 = vsel %vm1693_vm4, %v1740_v24, %v1742_v59  ;;  %v1750_v40 = vrot.slane %v5195_v4, 2  ;;  %v6968_v24 = vld [vmem:[#allocation13_spill] sm:$0xff] }
  0xca   : > { %4261 = vmatpush3.bf16.msra.mxu1 %v4618_v58  ;;  %4196 = vmatprep.mubr.msk.bf16.mxu1 %vm1000_vm2, %v5679_v12  ;;  %v723_v19 = vmul.f32 %v669_v1, %v5727_v57  ;;  %v776_v56 = vadd.f32 %v722_v37, %v5718_v47  ;;  %v5792_v41 = vpack.c.bf16 %v1743_v53, %v1741_v6  ;;  %v1749_v1 = vrot.slane %v5191_v25, 2  ;;  %v6965_v37 = vld [vmem:[#allocation8_spill] sm:$0xff] }
  0xcb   : > { %4262 = vmatprep.subr.bf16.mxu1 %v4497_v16  ;;  %v778_v52 = vadd.f32 %v724_v27, %v5730_v10  ;;  %v562_v6 = vmul.f32 0.5, %v5730_v10 }
  0xcc   : > { %v777_v58 = vadd.f32 %v723_v19, %v5727_v57  ;;  %v830_v5 = vmul.f32 0.7978846, %v776_v56  ;;  %v6966_v19 = vld [vmem:[#allocation11_spill] sm:$0xff]  ;;  %v6967_v56 = vld [vmem:[#allocation12_spill] sm:$0xff]  ;;  %v1751_v59 = vsel %vm1693_vm4, %v1749_v1, %v1750_v40 }
  0xcd   : > { %v832_v60 = vmul.f32 0.7978846, %v778_v52  ;;  %v1754_v27 = vrot.slane %v6966_v19, 2  ;;  %v1755_v22 = vrot.slane %v6967_v56, 2  ;;  %v5808_v52 = vpack.c.bf16 %v4845_v36, %v4840_v32 }
  0xce   : > { %4263 = vmatpush3.bf16.msra.mxu1 %v4497_v16  ;;  %v1736_v16 = vsel %vm1693_vm4, %v1734_v14, %v1735_v23  ;;  %v1744_v14 = vrot.slane %v5087_v20, 2  ;;  %v1745_v23 = vrot.slane %v5090_v33, 2  ;;  %v831_v50 = vmul.f32 0.7978846, %v777_v58 }
  0xcf   : > { %4237 = vmatmul.mubr.msk.bf16.gmra.mxu0 %vm1000_vm2, %v5593_v42  ;;  %4332 = vmatprep.subr.bf16.mxu1 %v5724_v54  ;;  %v5770_v17 = vpack.c.bf16 %v1738_v28, %v1736_v16  ;;  %4603 = vtanh.f32 %v830_v5  ;;  %v1752_v16 = vrot.slane %v6965_v37, 2  ;;  %v5801_v28 = vpack.c.bf16 %v5546_v44, %v5543_v3 }
  0xd0   : > { %4240 = vmatprep.mubr.msk.bf16.mxu0 %vm1000_vm2, %v5736_v51  ;;  %4605 = vtanh.f32 %v831_v50  ;;  %v1746_v34 = vsel %vm1693_vm4, %v1744_v14, %v1745_v23  ;;  %v1748_v55 = vsel %vm1693_vm4, %v1745_v23, %v1747_v2  ;;  %v1757_v58 = vrot.slane %v6968_v24, 2 }
  0xd1   : > { %4197 = vmatmul.mubr.msk.bf16.gmra.mxu1 %vm1000_vm2, %v5734_v11  ;;  %4607 = vtanh.f32 %v832_v60  ;;  %v5794_v38 = vpack.c.bf16 %v1748_v55, %v1746_v34  ;;  %v1753_v3 = vsel %vm1693_vm4, %v1750_v40, %v1752_v16  ;;  %v1756_v44 = vsel %vm1693_vm4, %v1754_v27, %v1755_v22 }
  0xd2   : > { %4200 = vmatprep.mubr.msk.bf16.mxu1 %vm1000_vm2, %v5551_v31  ;;  %v1758_v14 = vsel %vm1693_vm4, %v1755_v22, %v1757_v58  ;;  %v560_v32 = vmul.f32 0.5, %v5718_v47  ;;  %v5823_v5 = vpack.c.bf16 %v1753_v3, %v1751_v59  ;;  %v561_v23 = vmul.f32 0.5, %v5727_v57 }
  0xd3   : > { %v5826_v50 = vpack.c.bf16 %v1758_v14, %v1756_v44  ;;  %v5831_v34 = vpack.c.bf16 %v4929_v26, %v4921_v39  ;;  %v5835_v55 = vpack.c.bf16 %v5090_v33, %v5087_v20  ;;  %v1769_v16 = vrot.slane %v5597_v35, 2  ;;  %v4502_v44 = vld [vmem:[%s6906_s3 + $0x60] sm:$0xff]  }
  0xd4   : > { %v1770_v27 = vrot.slane %v5602_v0, 2  ;;  %v1772_v22 = vrot.slane %v5606_v46, 2  ;;  %v5860_v58 = vpack.c.bf16 %v5195_v4, %v5191_v25  ;;  %v5866_v3 = vpack.c.bf16 %v6967_v56, %v6966_v19  ;;  %v6970_v4 = vld [vmem:[#allocation3_spill] sm:$0xff] }
  0xd6   : > { %v1771_v35 = vsel %vm1693_vm4, %v1769_v16, %v1770_v27  ;;  %v1773_v0 = vsel %vm1693_vm4, %v1770_v27, %v1772_v22 }
  0xd7   : > { %4241 = vmatmul.mubr.msk.bf16.gmra.mxu0 %vm1000_vm2, %v5763_v29  ;;  %v5878_v25 = vpack.c.bf16 %v1773_v0, %v1771_v35  ;;  %v6977_v0 = vld [vmem:[#allocation4_spill] sm:$0xff] }
  0xd8   : > { %4244 = vmatprep.mubr.msk.bf16.mxu0 %vm1000_vm2, %v5770_v17 }
  0xd9   : > { %4201 = vmatmul.mubr.msk.bf16.gmra.mxu1 %vm1000_vm2, %v5569_v61 }
  0xda   : > { %4204 = vmatprep.mubr.msk.bf16.mxu1 %vm1000_vm2, %v5778_v30 }
  0xdc   : > { %v4604_v36 = vpop.eup %4603 }
  0xdd   : > { %v4606_v2 = vpop.eup %4605  ;;  %v938_v60 = vadd.f32 1.0, %v4604_v36  ;;  %v6971_v36 = vld [vmem:[#allocation5_spill] sm:$0xff] }
  0xde   : > { %v4608_v53 = vpop.eup %4607  ;;  %v939_v47 = vadd.f32 1.0, %v4606_v2  ;;  %v6972_v2 = vld [vmem:[#allocation7_spill] sm:$0xff] }
  0xdf   : > { %4245 = vmatmul.mubr.msk.bf16.gmra.mxu0 %vm1000_vm2, %v5792_v41  ;;  %v992_v1 = vmul.f32 %v938_v60, %v560_v32  ;;  %v940_v57 = vadd.f32 1.0, %v4608_v53  ;;  %v5905_v60 = vld [vmem:[%s6906_s3 + $0x88] sm:$0xff]   ;;  %v6973_v53 = vld [vmem:[#allocation10_spill] sm:$0xff] }
  0xe0   : > { %4248 = vmatprep.mubr.msk.bf16.mxu0 %vm1000_vm2, %v5794_v38  ;;  %v993_v40 = vmul.f32 %v939_v47, %v561_v23  ;;  %v4501_v47 = vld [vmem:[%s6906_s3 + $0x50] sm:$0xff]  }
  0xe1   : > { %4205 = vmatmul.mubr.msk.bf16.gmra.mxu1 %vm1000_vm2, %v5801_v28  ;;  %1046 = vst.msk [vmem:[%s4835_s26 + $0xef] sm:$0xfe] %vm998_vm1, %v992_v1  ;;  %v994_v10 = vmul.f32 %v940_v57, %v562_v6  ;;  %v2297_v39 = vrot.slane %v992_v1, 1  ;;  %v2518_v46 = vrot.slane %v992_v1, 2  ;;  %v387_v6 = vld [vmem:[%s4709_s20 + $0x198] sm:$0xff] }
  0xe2   : > { %4208 = vmatprep.mubr.msk.bf16.mxu1 %vm1000_vm2, %v5808_v52  ;;  %1047 = vst.msk [vmem:[%s4835_s26 + $0xf7] sm:$0xff] %vm1000_vm2, %v993_v40  ;;  %v5847_v26 = vpack.c.bf16 %v993_v40, %v992_v1  ;;  %v2298_v20 = vrot.slane %v993_v40, 1  ;;  %v2519_v19 = vrot.slane %v993_v40, 2  ;;  %v4619_v1 = vld [vmem:[%s6904_s1] ss:$0 sm:$0xff]  ;;  %v6974_v40 = vld [vmem:[#allocation15_spill] sm:$0xff] }
  0xe3   : > { %1048 = vst.msk [vmem:[%s4835_s26 + $0xff] sm:$0x1] %vm1002_vm3, %v994_v10  ;;  %v2300_v33 = vrot.slane %v994_v10, 1  ;;  %v2521_v56 = vrot.slane %v994_v10, 2  ;;  %v448_v57 = vmul.f32 %v4619_v1, %v387_v6  ;;  %v5930_v10 = vld [vmem:[%s6906_s3 + $0x78] sm:$0xff]  }
  0xe4   : > { %v2299_v37 = vsel %vm1117_vm0, %v2297_v39, %v2298_v20  ;;  %v2520_v14 = vsel %vm1693_vm4, %v2518_v46, %v2519_v19  ;;  %v4620_v39 = vld [vmem:[%s6905_s2] ss:$0 sm:$0xff] }
  0xe5   : > { %v2301_v24 = vsel %vm1117_vm0, %v2298_v20, %v2300_v33  ;;  %v2522_v32 = vsel %vm1693_vm4, %v2519_v19, %v2521_v56  ;;  %v509_v20 = vadd.f32 %v4620_v39, %v448_v57  ;;  %v389_v19 = vld [vmem:[%s4709_s20 + $0x1a8] sm:$0x3] }
  0xe6   : > { %v5862_v59 = vpack.c.bf16 %v2301_v24, %v2299_v37  ;;  %v5895_v23 = vpack.c.bf16 %v2522_v32, %v2520_v14  ;;  %v6975_v37 = vld [vmem:[#allocation17_spill] sm:$0xff]  ;;  %v6976_v24 = vld [vmem:[#allocation2_spill] sm:$0xff] }
  0xe7   : > { %4249 = vmatmul.mubr.msk.bf16.gmra.mxu0 %vm1000_vm2, %v5823_v5  ;;  %v6978_v32 = vld [vmem:[#allocation6_spill] sm:$0xff] }
  0xe8   : > { %4252 = vmatprep.mubr.msk.bf16.mxu0 %vm1000_vm2, %v5826_v50  ;;  %6969 = vst [vmem:[#allocation8_spill] sm:$0xff] %v5862_v59 }
  0xe9   : > { %4209 = vmatmul.mubr.msk.bf16.gmra.mxu1 %vm1000_vm2, %v5831_v34 }
  0xea   : > { %4212 = vmatprep.mubr.msk.bf16.mxu1 %vm1000_vm2, %v5835_v55 }
  0xef   : > { %4253 = vmatmul.mubr.msk.bf16.gmra.mxu0 %vm1000_vm2, %v5691_v8 }
  0xf0   : > { %4256 = vmatprep.mubr.msk.bf16.mxu0 %vm1000_vm2, %v5706_v21 }
  0xf1   : > { %4213 = vmatmul.mubr.msk.bf16.gmra.mxu1 %vm1000_vm2, %v5860_v58 }
  0xf2   : > { %4216 = vmatprep.mubr.msk.bf16.mxu1 %vm1000_vm2, %v5866_v3 }
  0xf7   : > { %4257 = vmatmul.mubr.msk.bf16.gmra.mxu0 %vm1000_vm2, %v5878_v25 }
  0xf8   : > { %4300 = vmatprep.mubr.msk.bf16.mxu0 %vm1000_vm2, %v6970_v4 }
  0xf9   : > { %4217 = vmatmul.mubr.msk.bf16.gmra.mxu1 %vm1000_vm2, %v5661_v43 }
  0xfa   : > { %4220 = vmatprep.mubr.msk.bf16.mxu1 %vm1000_vm2, %v5671_v9 }
  0xff   : > { %4301 = vmatmul.mubr.msk.bf16.vlgmr.msra.gmra.mxu0 %vm1000_vm2, %v6971_v36 }
 0x100   : > { %4369 = vmatpush3.bf16.msra.mxu0 %v5650_v15  ;;  %4304 = vmatprep.mubr.msk.bf16.mxu0 %vm1000_vm2, %v6972_v2  ;;  %v388_v15 = vld [vmem:[%s4709_s20 + $0x1a0] sm:$0xff] }
 0x101   : > { %4221 = vmatmul.mubr.msk.bf16.gmra.mxu1 %vm1000_vm2, %v5696_v45  ;;  %4370 = vmatprep.subr.bf16.mxu0 %v4502_v44 }
 0x102   : > { %4264 = vmatprep.mubr.msk.bf16.mxu1 %vm1000_vm2, %v5655_v18  ;;  %v449_v18 = vmul.f32 %v4619_v1, %v388_v15  ;;  %v6979_v15 = vld [vmem:[#allocation9_spill] sm:$0xff] }
 0x104   : > { %4371 = vmatpush3.bf16.msra.mxu0 %v4502_v44  ;;  %v510_v33 = vadd.f32 %v4620_v39, %v449_v18  ;;  %v450_v44 = vmul.f32 %v4619_v1, %v389_v19 }
 0x105   : > { %4440 = vmatprep.subr.bf16.mxu0 %v5905_v60 }
 0x106   : > { %v618_v16 = vmul.f32 0.044715, %v510_v33  ;;  %v511_v14 = vadd.f32 %v4620_v39, %v450_v44  ;;  %v564_v19 = vmul.f32 0.5, %v510_v33 }
 0x107   : > { %4305 = vmatmul.mubr.msk.bf16.gmra.mxu0 %vm1000_vm2, %v6973_v53 }
 0x108   : > { %4308 = vmatprep.mubr.msk.bf16.mxu0 %vm1000_vm2, %v6974_v40  ;;  %v672_v22 = vmul.f32 %v618_v16, %v510_v33  ;;  %v619_v57 = vmul.f32 0.044715, %v511_v14  ;;  %v6981_v16 = vld [vmem:[#allocation16_spill] sm:$0xff] }
 0x109   : > { %4265 = vmatmul.mubr.msk.bf16.vlgmr.msra.gmra.mxu1 %vm1000_vm2, %v5679_v12 }
 0x10a   : > { %4333 = vmatpush3.bf16.msra.mxu1 %v5724_v54  ;;  %4268 = vmatprep.mubr.msk.bf16.mxu1 %vm1000_vm2, %v5734_v11  ;;  %v617_v54 = vmul.f32 0.044715, %v509_v20  ;;  %v726_v4 = vmul.f32 %v672_v22, %v510_v33  ;;  %v673_v18 = vmul.f32 %v619_v57, %v511_v14  ;;  %v6982_v22 = vld [vmem:[#allocation18_spill] sm:$0xff] }
 0x10b   : > { %4334 = vmatprep.subr.bf16.mxu1 %v4501_v47 }
 0x10c   : > { %v671_v27 = vmul.f32 %v617_v54, %v509_v20  ;;  %v780_v56 = vadd.f32 %v726_v4, %v510_v33  ;;  %v727_v1 = vmul.f32 %v673_v18, %v511_v14  ;;  %v6980_v54 = vld [vmem:[#allocation14_spill] sm:$0xff]  ;;  %v565_v18 = vmul.f32 0.5, %v511_v14 }
 0x10e   : > { %4335 = vmatpush3.bf16.msra.mxu1 %v4501_v47  ;;  %v725_v35 = vmul.f32 %v671_v27, %v509_v20  ;;  %v834_v47 = vmul.f32 0.7978846, %v780_v56  ;;  %v781_v39 = vadd.f32 %v727_v1, %v511_v14 }
 0x10f   : > { %4309 = vmatmul.mubr.msk.bf16.gmra.mxu0 %vm1000_vm2, %v6975_v37  ;;  %4404 = vmatprep.subr.bf16.mxu1 %v5930_v10 }
 0x110   : > { %4312 = vmatprep.mubr.msk.bf16.mxu0 %vm1000_vm2, %v5587_v63  ;;  %v779_v46 = vadd.f32 %v725_v35, %v509_v20  ;;  %v835_v27 = vmul.f32 0.7978846, %v781_v39 }
 0x111   : > { %4269 = vmatmul.mubr.msk.bf16.gmra.mxu1 %vm1000_vm2, %v5551_v31 }
 0x112   : > { %4272 = vmatprep.mubr.msk.bf16.mxu1 %vm1000_vm2, %v5569_v61  ;;  %v833_v6 = vmul.f32 0.7978846, %v779_v46  ;;  %v563_v46 = vmul.f32 0.5, %v509_v20 }
 0x114   : > { %4609 = vtanh.f32 %v833_v6 }
 0x115   : > { %4611 = vtanh.f32 %v834_v47 }
 0x116   : > { %4613 = vtanh.f32 %v835_v27  ;;  %v4506_v27 = vld [vmem:[%s6906_s3 + $0x80] sm:$0xff]  }
 0x117   : > { %4313 = vmatmul.mubr.msk.bf16.gmra.mxu0 %vm1000_vm2, %v6976_v24 }
 0x118   : > { %4316 = vmatprep.mubr.msk.bf16.mxu0 %vm1000_vm2, %v6977_v0 }
 0x119   : > { %4273 = vmatmul.mubr.msk.bf16.gmra.mxu1 %vm1000_vm2, %v5778_v30 }
 0x11a   : > { %4276 = vmatprep.mubr.msk.bf16.mxu1 %vm1000_vm2, %v5801_v28 }
 0x11f   : > { %4317 = vmatmul.mubr.msk.bf16.gmra.mxu0 %vm1000_vm2, %v6978_v32 }
 0x120   : > { %4320 = vmatprep.mubr.msk.bf16.mxu0 %vm1000_vm2, %v6979_v15 }
 0x121   : > { %4277 = vmatmul.mubr.msk.bf16.gmra.mxu1 %vm1000_vm2, %v5808_v52  ;;  %v4610_v35 = vpop.eup %4609 }
 0x122   : > { %4280 = vmatprep.mubr.msk.bf16.mxu1 %vm1000_vm2, %v5831_v34  ;;  %v4612_v4 = vpop.eup %4611  ;;  %v941_v56 = vadd.f32 1.0, %v4610_v35 }
 0x123   : > { %v942_v44 = vadd.f32 1.0, %v4612_v4  ;;  %v4614_v6 = vpop.eup %4613 }
 0x124   : > { %v5981_v47 = vmul.f32 %v941_v56, %v563_v46  ;;  %v943_v1 = vadd.f32 1.0, %v4614_v6  ;;  %v6019_v46 = vpop.f32.mrf.mxu0 }
 0x125   : > { %v5983_v57 = vmul.f32 %v942_v44, %v564_v19 }
 0x126   : > { %v2956_v20 = vrot.slane %v5981_v47, 1  ;;  %v5991_v39 = vmul.f32 %v943_v1, %v565_v18 }
 0x127   : > { %4321 = vmatmul.mubr.msk.bf16.gmra.mxu0 %vm1000_vm2, %v6980_v54  ;;  %v2957_v33 = vrot.slane %v5983_v57, 1 }
 0x128   : > { %4324 = vmatprep.mubr.msk.bf16.mxu0 %vm1000_vm2, %v6981_v16 }
 0x129   : > { %4281 = vmatmul.mubr.msk.bf16.gmra.mxu1 %vm1000_vm2, %v5835_v55  ;;  %v5998_v14 = vsel %vm1117_vm0, %v2956_v20, %v2957_v33  ;;  %v2739_v20 = vpack.c.bf16 %v5983_v57, %v5981_v47 }
 0x12a   : > { %4284 = vmatprep.mubr.msk.bf16.mxu1 %vm1000_vm2, %v5860_v58  ;;  %6983 = vst [vmem:[#allocation11_spill] sm:$0xff] %v5998_v14 }
 0x12f   : > { %4325 = vmatmul.mubr.msk.bf16.gmra.mxu0 %vm1000_vm2, %v6982_v22 }
 0x130   : > { %4328 = vmatprep.mubr.msk.bf16.mxu0 %vm1000_vm2, %v5634_v48 }
 0x131   : > { %4285 = vmatmul.mubr.msk.bf16.gmra.mxu1 %vm1000_vm2, %v5866_v3 }
 0x132   : > { %4288 = vmatprep.mubr.msk.bf16.mxu1 %vm1000_vm2, %v5661_v43 }
 0x137   : > { %4329 = vmatmul.mubr.msk.bf16.gmra.mxu0 %vm1000_vm2, %v5862_v59 }
 0x138   : > { %4372 = vmatprep.mubr.msk.bf16.mxu0 %vm1000_vm2, %v5679_v12  ;;  %v2959_v12 = vrot.slane %v5991_v39, 1 }
 0x139   : > { %4289 = vmatmul.mubr.msk.bf16.gmra.mxu1 %vm1000_vm2, %v5671_v9 }
 0x13a   : > { %4292 = vmatprep.mubr.msk.bf16.mxu1 %vm1000_vm2, %v5696_v45  ;;  %v6001_v35 = vsel %vm1117_vm0, %v2957_v33, %v2959_v12 }
 0x13b   : > { %6984 = vst [vmem:[#allocation12_spill] sm:$0xff] %v6001_v35 }
 0x13f   : > { %4373 = vmatmul.mubr.msk.bf16.vlgmr.msra.gmra.mxu0 %vm1000_vm2, %v5734_v11  ;;  %v4505_v11 = vld [vmem:[%s6906_s3 + $0x70] sm:$0xff]  }
 0x140   : > { %4441 = vmatpush3.bf16.msra.mxu0 %v5905_v60  ;;  %4376 = vmatprep.mubr.msk.bf16.mxu0 %vm1000_vm2, %v5551_v31  ;;  %v6028_v31 = vpop.f32.mrf.mxu0 }
 0x141   : > { %4293 = vmatmul.mubr.msk.bf16.gmra.mxu1 %vm1000_vm2, %v5847_v26  ;;  %4442 = vmatprep.subr.bf16.mxu0 %v4506_v27 }
 0x142   : > { %4336 = vmatprep.mubr.msk.bf16.mxu1 %vm1000_vm2, %v5616_v7  ;;  %v6038_v7 = vpop.f32.mrf.mxu1 }
 0x144   : > { %4443 = vmatpush3.bf16.msra.mxu0 %v4506_v27  ;;  %v6044_v60 = vpop.f32.mrf.mxu1 }
 0x147   : > { %4377 = vmatmul.mubr.msk.bf16.gmra.mxu0 %vm1000_vm2, %v5569_v61  ;;  %v6032_v61 = vpop.f32.mrf.mxu0 }
 0x148   : > { %4380 = vmatprep.mubr.msk.bf16.mxu0 %vm1000_vm2, %v5778_v30 }
 0x149   : > { %4337 = vmatmul.mubr.msk.bf16.vlgmr.msra.gmra.mxu1 %vm1000_vm2, %v5623_v49  ;;  %v6042_v30 = vpop.f32.mrf.mxu0 }
 0x14a   : > { %4405 = vmatpush3.bf16.msra.mxu1 %v5930_v10  ;;  %4340 = vmatprep.mubr.msk.bf16.mxu1 %vm1000_vm2, %v5657_v62 }
 0x14b   : > { %4406 = vmatprep.subr.bf16.mxu1 %v4505_v11 }
 0x14e   : > { %4407 = vmatpush3.bf16.msra.mxu1 %v4505_v11 }
 0x14f   : > { %4381 = vmatmul.mubr.msk.bf16.gmra.mxu0 %vm1000_vm2, %v5801_v28  ;;  %v6048_v28 = vpop.f32.mrf.mxu0 }
 0x150   : > { %4384 = vmatprep.mubr.msk.bf16.mxu0 %vm1000_vm2, %v5808_v52  ;;  %v6054_v52 = vpop.f32.mrf.mxu1 }
 0x151   : > { %4341 = vmatmul.mubr.msk.bf16.gmra.mxu1 %vm1000_vm2, %v5584_v13  ;;  %v6058_v10 = vpop.f32.mrf.mxu0 }
 0x152   : > { %4344 = vmatprep.mubr.msk.bf16.mxu1 %vm1000_vm2, %v5593_v42  ;;  %v6060_v19 = vpop.f32.mrf.mxu1 }
 0x157   : > { %4385 = vmatmul.mubr.msk.bf16.gmra.mxu0 %vm1000_vm2, %v5831_v34  ;;  %v6064_v34 = vpop.f32.mrf.mxu0 }
 0x158   : > { %4388 = vmatprep.mubr.msk.bf16.mxu0 %vm1000_vm2, %v5835_v55  ;;  %v6070_v55 = vpop.f32.mrf.mxu1 }
 0x159   : > { %4345 = vmatmul.mubr.msk.bf16.gmra.mxu1 %vm1000_vm2, %v5736_v51  ;;  %v6074_v56 = vpop.f32.mrf.mxu0 }
 0x15a   : > { %4348 = vmatprep.mubr.msk.bf16.mxu1 %vm1000_vm2, %v5763_v29  ;;  %v6076_v44 = vpop.f32.mrf.mxu1 }
 0x15f   : > { %4389 = vmatmul.mubr.msk.bf16.gmra.mxu0 %vm1000_vm2, %v5860_v58  ;;  %v6080_v58 = vpop.f32.mrf.mxu0 }
 0x160   : > { %4392 = vmatprep.mubr.msk.bf16.mxu0 %vm1000_vm2, %v5866_v3  ;;  %v6086_v3 = vpop.f32.mrf.mxu1 }
 0x161   : > { %4349 = vmatmul.mubr.msk.bf16.gmra.mxu1 %vm1000_vm2, %v5770_v17  ;;  %6985 = vst [vmem:[#allocation13_spill] sm:$0xff] %v6086_v3  ;;  %v6090_v6 = vpop.f32.mrf.mxu0 }
 0x162   : > { %4352 = vmatprep.mubr.msk.bf16.mxu1 %vm1000_vm2, %v5792_v41  ;;  %v6092_v18 = vpop.f32.mrf.mxu1 }
 0x163   : > { %6986 = vst [vmem:[#allocation3_spill] sm:$0xff] %v6092_v18 }
 0x167   : > { %4393 = vmatmul.mubr.msk.bf16.gmra.mxu0 %vm1000_vm2, %v5661_v43  ;;  %v6096_v43 = vpop.f32.mrf.mxu0 }
 0x168   : > { %4396 = vmatprep.mubr.msk.bf16.mxu0 %vm1000_vm2, %v5671_v9  ;;  %v6102_v9 = vpop.f32.mrf.mxu1 }
 0x169   : > { %4353 = vmatmul.mubr.msk.bf16.gmra.mxu1 %vm1000_vm2, %v5794_v38  ;;  %6987 = vst [vmem:[#allocation5_spill] sm:$0xff] %v6102_v9  ;;  %v6106_v1 = vpop.f32.mrf.mxu0 }
 0x16a   : > { %4356 = vmatprep.mubr.msk.bf16.mxu1 %vm1000_vm2, %v5823_v5  ;;  %v6110_v33 = vpop.f32.mrf.mxu1 }
 0x16b   : > { %6988 = vst [vmem:[#allocation7_spill] sm:$0xff] %v6110_v33 }
 0x16f   : > { %4397 = vmatmul.mubr.msk.bf16.gmra.mxu0 %vm1000_vm2, %v5696_v45 }
 0x170   : > { %4400 = vmatprep.mubr.msk.bf16.mxu0 %vm1000_vm2, %v5847_v26  ;;  %v6119_v26 = vpop.f32.mrf.mxu1 }
 0x171   : > { %4357 = vmatmul.mubr.msk.bf16.gmra.mxu1 %vm1000_vm2, %v5826_v50  ;;  %6989 = vst [vmem:[#allocation10_spill] sm:$0xff] %v6119_v26 }
 0x172   : > { %4360 = vmatprep.mubr.msk.bf16.mxu1 %vm1000_vm2, %v5691_v8  ;;  %v6127_v11 = vpop.f32.mrf.mxu1 }
 0x173   : > { %6990 = vst [vmem:[#allocation15_spill] sm:$0xff] %v6127_v11 }
 0x177   : > { %v6112_v45 = vpop.f32.mrf.mxu0  ;;  %4401 = vmatmul.mubr.msk.bf16.gmra.mxu0 %vm1000_vm2, %v2739_v20 }
 0x178   : > { %4444 = vmatprep.mubr.msk.bf16.mxu0 %vm1000_vm2, %v5623_v49 }
 0x179   : > { %4361 = vmatmul.mubr.msk.bf16.gmra.mxu1 %vm1000_vm2, %v5706_v21  ;;  %v6121_v12 = vpop.f32.mrf.mxu0 }
 0x17a   : > { %4364 = vmatprep.mubr.msk.bf16.mxu1 %vm1000_vm2, %v5878_v25 }
 0x17b   : > { %v6125_v27 = vpop.f32.mrf.mxu0 }
 0x17d   : > { %v6129_v4 = vpop.f32.mrf.mxu0 }
 0x17f   : > { %v4230_v20 = vpop.f32.mrf.mxu0  ;;  %4445 = vmatmul.mubr.msk.bf16.vlgmr.msra.gmra.mxu0 %vm1000_vm2, %v5657_v62 }
 0x180   : > { %4448 = vmatprep.mubr.msk.bf16.mxu0 %vm1000_vm2, %v5584_v13 }
 0x181   : > { %v6135_v49 = vpop.f32.mrf.mxu1  ;;  %4365 = vmatmul.mubr.msk.bf16.gmra.mxu1 %vm1000_vm2, %v5895_v23  ;;  %v1921_v14 = vpop.f32.mrf.mxu0 }
 0x182   : > { %6991 = vst [vmem:[#allocation17_spill] sm:$0xff] %v6135_v49  ;;  %4408 = vmatprep.mubr.msk.bf16.mxu1 %vm1000_vm2, %v6971_v36 }
 0x183   : > { %v6141_v35 = vpop.f32.mrf.mxu1  ;;  %v4231_v11 = vpop.f32.mrf.mxu0 }
 0x184   : > { %6992 = vst [vmem:[#allocation2_spill] sm:$0xff] %v6141_v35 }
 0x185   : > { %v6143_v26 = vpop.f32.mrf.mxu1  ;;  %v1924_v33 = vpop.f32.mrf.mxu0 }
 0x186   : > { %6993 = vst [vmem:[#allocation4_spill] sm:$0xff] %v6143_v26 }
 0x187   : > { %v6145_v59 = vpop.f32.mrf.mxu1  ;;  %v4234_v62 = vpop.f32.mrf.mxu0  ;;  %4449 = vmatmul.mubr.msk.bf16.gmra.mxu0 %vm1000_vm2, %v5593_v42 }
 0x188   : > { %6994 = vst [vmem:[#allocation6_spill] sm:$0xff] %v6145_v59  ;;  %4452 = vmatprep.mubr.msk.bf16.mxu0 %vm1000_vm2, %v5736_v51 }
 0x189   : > { %v4194_v13 = vpop.f32.mrf.mxu1  ;;  %4409 = vmatmul.mubr.msk.bf16.vlgmr.msra.gmra.mxu1 %vm1000_vm2, %v6972_v2  ;;  %v1937_v36 = vpop.f32.mrf.mxu0 }
 0x18a   : > { %v1575_v35 = vadd.f32 %v4194_v13, %v6019_v46  ;;  %4412 = vmatprep.mubr.msk.bf16.mxu1 %vm1000_vm2, %v6973_v53 }
 0x18b   : > { %v1566_v26 = vpop.f32.mrf.mxu1  ;;  %v4235_v49 = vpop.f32.mrf.mxu0 }
 0x18c   : > { %v6156_v59 = vadd.f32 %v4230_v20, %v1575_v35  ;;  %v1567_v9 = vadd.f32 %v1566_v26, %v6028_v31 }
 0x18d   : > { %v4195_v42 = vpop.f32.mrf.mxu1  ;;  %v1940_v48 = vpop.f32.mrf.mxu0 }
 0x18e   : > { %v6159_v18 = vadd.f32 %v1921_v14, %v1567_v9  ;;  %v1578_v51 = vadd.f32 %v4195_v42, %v6032_v61 }
 0x18f   : > { %v1569_v3 = vpop.f32.mrf.mxu1  ;;  %v4238_v2 = vpop.f32.mrf.mxu0  ;;  %4453 = vmatmul.mubr.msk.bf16.gmra.mxu0 %vm1000_vm2, %v5763_v29 }
 0x190   : > { %v6164_v46 = vadd.f32 %v4231_v11, %v1578_v51  ;;  %v1570_v53 = vadd.f32 %v1569_v3, %v6042_v30  ;;  %4456 = vmatprep.mubr.msk.bf16.mxu0 %vm1000_vm2, %v5770_v17 }
 0x191   : > { %v4198_v35 = vpop.f32.mrf.mxu1  ;;  %4413 = vmatmul.mubr.msk.bf16.gmra.mxu1 %vm1000_vm2, %v6974_v40  ;;  %v1953_v14 = vpop.f32.mrf.mxu0 }
 0x192   : > { %v6171_v31 = vadd.f32 %v1924_v33, %v1570_v53  ;;  %v1591_v61 = vadd.f32 %v4198_v35, %v6048_v28  ;;  %4416 = vmatprep.mubr.msk.bf16.mxu1 %vm1000_vm2, %v6975_v37 }
 0x193   : > { %v1582_v29 = vpop.f32.mrf.mxu1  ;;  %v4239_v9 = vpop.f32.mrf.mxu0 }
 0x194   : > { %v6176_v26 = vadd.f32 %v4234_v62, %v1591_v61  ;;  %v1583_v30 = vadd.f32 %v1582_v29, %v6058_v10 }
 0x195   : > { %v4199_v3 = vpop.f32.mrf.mxu1  ;;  %v1956_v17 = vpop.f32.mrf.mxu0 }
 0x196   : > { %v6179_v11 = vadd.f32 %v1937_v36, %v1583_v30  ;;  %v1594_v40 = vadd.f32 %v4199_v3, %v6064_v34 }
 0x197   : > { %v1585_v20 = vpop.f32.mrf.mxu1  ;;  %v4242_v33 = vpop.f32.mrf.mxu0  ;;  %4457 = vmatmul.mubr.msk.bf16.gmra.mxu0 %vm1000_vm2, %v5792_v41 }
 0x198   : > { %v6184_v28 = vadd.f32 %v4235_v49, %v1594_v40  ;;  %v1586_v37 = vadd.f32 %v1585_v20, %v6074_v56  ;;  %4460 = vmatprep.mubr.msk.bf16.mxu0 %vm1000_vm2, %v5794_v38 }
 0x199   : > { %v4202_v62 = vpop.f32.mrf.mxu1  ;;  %4417 = vmatmul.mubr.msk.bf16.gmra.mxu1 %vm1000_vm2, %v5587_v63  ;;  %v1969_v10 = vpop.f32.mrf.mxu0 }
 0x19a   : > { %v6191_v13 = vadd.f32 %v1940_v48, %v1586_v37  ;;  %v1607_v34 = vadd.f32 %v4202_v62, %v6080_v58  ;;  %4420 = vmatprep.mubr.msk.bf16.mxu1 %vm1000_vm2, %v6976_v24 }
 0x19b   : > { %v1598_v41 = vpop.f32.mrf.mxu1  ;;  %v4243_v49 = vpop.f32.mrf.mxu0 }
 0x19c   : > { %v6196_v36 = vadd.f32 %v4238_v2, %v1607_v34  ;;  %v1599_v56 = vadd.f32 %v1598_v41, %v6090_v6 }
 0x19d   : > { %v4203_v42 = vpop.f32.mrf.mxu1  ;;  %v1972_v38 = vpop.f32.mrf.mxu0 }
 0x19e   : > { %v6199_v51 = vadd.f32 %v1953_v14, %v1599_v56  ;;  %v1610_v63 = vadd.f32 %v4203_v42, %v6096_v43 }
 0x19f   : > { %v1601_v53 = vpop.f32.mrf.mxu1  ;;  %v4246_v48 = vpop.f32.mrf.mxu0  ;;  %4461 = vmatmul.mubr.msk.bf16.gmra.mxu0 %vm1000_vm2, %v5823_v5 }
 0x1a0   : > { %v6204_v58 = vadd.f32 %v4239_v9, %v1610_v63  ;;  %v1602_v24 = vadd.f32 %v1601_v53, %v6106_v1  ;;  %4464 = vmatprep.mubr.msk.bf16.mxu0 %vm1000_vm2, %v5826_v50 }
 0x1a1   : > { %v4206_v2 = vpop.f32.mrf.mxu1  ;;  %4421 = vmatmul.mubr.msk.bf16.gmra.mxu1 %vm1000_vm2, %v6977_v0  ;;  %v1985_v6 = vpop.f32.mrf.mxu0 }
 0x1a2   : > { %v6211_v35 = vadd.f32 %v1956_v17, %v1602_v24  ;;  %v1623_v43 = vadd.f32 %v4206_v2, %v6112_v45  ;;  %4424 = vmatprep.mubr.msk.bf16.mxu1 %vm1000_vm2, %v6978_v32 }
 0x1a3   : > { %v1614_v5 = vpop.f32.mrf.mxu1  ;;  %v4247_v14 = vpop.f32.mrf.mxu0 }
 0x1a4   : > { %v6216_v61 = vadd.f32 %v4242_v33, %v1623_v43  ;;  %v1615_v1 = vadd.f32 %v1614_v5, %v6121_v12 }
 0x1a5   : > { %v4207_v29 = vpop.f32.mrf.mxu1  ;;  %v1988_v50 = vpop.f32.mrf.mxu0 }
 0x1a6   : > { %v6219_v9 = vadd.f32 %v1969_v10, %v1615_v1  ;;  %v1626_v0 = vadd.f32 %v4207_v29, %v6125_v27  ;;  %v6997_v1 = vld [vmem:[#allocation19_spill] sm:$0xff] }
 0x1a7   : > { %v1617_v30 = vpop.f32.mrf.mxu1  ;;  %v4250_v3 = vpop.f32.mrf.mxu0  ;;  %4465 = vmatmul.mubr.msk.bf16.gmra.mxu0 %vm1000_vm2, %v5691_v8  ;;  %v3177_v8 = vrot.slane %v5981_v47, 2 }
 0x1a8   : > { %v6224_v45 = vadd.f32 %v4243_v49, %v1626_v0  ;;  %v1618_v32 = vadd.f32 %v1617_v30, %v6129_v4  ;;  %4468 = vmatprep.mubr.msk.bf16.mxu0 %vm1000_vm2, %v5706_v21  ;;  %v3178_v4 = vrot.slane %v5983_v57, 2  ;;  %v6999_v30 = vld [vmem:[#allocation8_spill] sm:$0xff] }
 0x1a9   : > { %v4210_v17 = vpop.f32.mrf.mxu1  ;;  %4425 = vmatmul.mubr.msk.bf16.gmra.mxu1 %vm1000_vm2, %v6979_v15  ;;  %v2001_v12 = vpop.f32.mrf.mxu0  ;;  %v3180_v15 = vrot.slane %v5991_v39, 2 }
 0x1aa   : > { %v6231_v40 = vadd.f32 %v1972_v38, %v1618_v32  ;;  %v1639_v27 = vadd.f32 %v4210_v17, %v6038_v7  ;;  %4428 = vmatprep.mubr.msk.bf16.mxu1 %vm1000_vm2, %v6980_v54  ;;  %v3179_v39 = vsel %vm1693_vm4, %v3177_v8, %v3178_v4 }
 0x1ab   : > { %v1630_v20 = vpop.f32.mrf.mxu1  ;;  %v4251_v33 = vpop.f32.mrf.mxu0 }
 0x1ac   : > { %v6238_v37 = vadd.f32 %v4246_v48, %v1639_v27  ;;  %v1631_v21 = vadd.f32 %v1630_v20, %v6044_v60  ;;  %v3181_v60 = vsel %vm1693_vm4, %v3178_v4, %v3180_v15  ;;  %v7001_v4 = vld [vmem:[#allocation10_spill] sm:$0xff] }
 0x1ad   : > { %v4211_v62 = vpop.f32.mrf.mxu1  ;;  %v2004_v10 = vpop.f32.mrf.mxu0  ;;  %v3184_v38 = vpack.c.bf16 %v3181_v60, %v3179_v39  ;;  %v7003_v39 = vld [vmem:[#allocation12_spill] sm:$0xff]  ;;  %v7004_v60 = vld [vmem:[#allocation11_spill] sm:$0xff] }
 0x1ae   : > { %v6242_v34 = vadd.f32 %v1985_v6, %v1631_v21  ;;  %v1642_v7 = vadd.f32 %v4211_v62, %v6054_v52 }
 0x1af   : > { %v1633_v41 = vpop.f32.mrf.mxu1  ;;  %v4254_v54 = vpop.f32.mrf.mxu0  ;;  %4469 = vmatmul.mubr.msk.bf16.gmra.mxu0 %vm1000_vm2, %v5878_v25 }
 0x1b0   : > { %v6247_v47 = vadd.f32 %v4247_v14, %v1642_v7  ;;  %v1634_v57 = vadd.f32 %v1633_v41, %v6060_v19  ;;  %4472 = vmatprep.mubr.msk.bf16.mxu0 %vm1000_vm2, %v5895_v23  ;;  %v7002_v7 = vld [vmem:[#allocation15_spill] sm:$0xff] }
 0x1b1   : > { %v4214_v49 = vpop.f32.mrf.mxu1  ;;  %4429 = vmatmul.mubr.msk.bf16.gmra.mxu1 %vm1000_vm2, %v6981_v16  ;;  %v2017_v52 = vpop.f32.mrf.mxu0  ;;  %v6995_v16 = vld [vmem:[#allocation13_spill] sm:$0xff] }
 0x1b2   : > { %v6256_v56 = vadd.f32 %v1988_v50, %v1634_v57  ;;  %v1655_v25 = vadd.f32 %v4214_v49, %v6070_v55  ;;  %4432 = vmatprep.mubr.msk.bf16.mxu1 %vm1000_vm2, %v6982_v22  ;;  %v6996_v22 = vld [vmem:[#allocation3_spill] sm:$0xff]  ;;  %v6998_v50 = vld [vmem:[#allocation5_spill] sm:$0xff]  ;;  %v7005_v49 = vpack.c.bf16 %v7003_v39, %v7004_v60 }
 0x1b3   : > { %v1646_v19 = vpop.f32.mrf.mxu1  ;;  %v4255_v42 = vpop.f32.mrf.mxu0 }
 0x1b4   : > { %v6261_v23 = vadd.f32 %v4250_v3, %v1655_v25  ;;  %v1647_v63 = vadd.f32 %v1646_v19, %v6076_v44  ;;  %v7006_v19 = vld [vmem:[#allocation17_spill] sm:$0xff] }
 0x1b5   : > { %v4215_v53 = vpop.f32.mrf.mxu1  ;;  %v2020_v48 = vpop.f32.mrf.mxu0 }
 0x1b6   : > { %v6264_v24 = vadd.f32 %v2001_v12, %v1647_v63  ;;  %v1658_v2 = vadd.f32 %v4215_v53, %v6995_v16  ;;  %v7000_v12 = vld [vmem:[#allocation7_spill] sm:$0xff]  ;;  %v7007_v16 = vld [vmem:[#allocation2_spill] sm:$0xff] }
 0x1b7   : > { %v1649_v6 = vpop.f32.mrf.mxu1  ;;  %v4258_v43 = vpop.f32.mrf.mxu0  ;;  %4473 = vmatmul.mubr.msk.bf16.gmra.mxu0 %vm1000_vm2, %v3184_v38 }
 0x1b8   : > { %v6268_v55 = vadd.f32 %v4251_v33, %v1658_v2  ;;  %v1650_v5 = vadd.f32 %v1649_v6, %v6996_v22 }
 0x1b9   : > { %v4218_v14 = vpop.f32.mrf.mxu1  ;;  %4433 = vmatmul.mubr.msk.bf16.gmra.mxu1 %vm1000_vm2, %v6997_v1  ;;  %v2033_v29 = vpop.f32.mrf.mxu0 }
 0x1ba   : > { %v6273_v44 = vadd.f32 %v2004_v10, %v1650_v5  ;;  %v1671_v0 = vadd.f32 %v4218_v14, %v6998_v50  ;;  %4436 = vmatprep.mubr.msk.bf16.mxu1 %vm1000_vm2, %v6999_v30  ;;  %v7008_v5 = vld [vmem:[#allocation4_spill] sm:$0xff] }
 0x1bb   : > { %v1662_v3 = vpop.f32.mrf.mxu1  ;;  %v4259_v32 = vpop.f32.mrf.mxu0 }
 0x1bc   : > { %v6278_v17 = vadd.f32 %v4254_v54, %v1671_v0  ;;  %v1663_v27 = vadd.f32 %v1662_v3, %v7000_v12 }
 0x1bd   : > { %v4219_v8 = vpop.f32.mrf.mxu1  ;;  %v2036_v20 = vpop.f32.mrf.mxu0 }
 0x1be   : > { %v6281_v33 = vadd.f32 %v2017_v52, %v1663_v27  ;;  %v1674_v21 = vadd.f32 %v4219_v8, %v7001_v4 }
 0x1bf   : > { %v1665_v15 = vpop.f32.mrf.mxu1  ;;  %v4302_v62 = vpop.f32.mrf.mxu0 }
 0x1c0   : > { %v6284_v10 = vadd.f32 %v4255_v42, %v1674_v21  ;;  %v1666_v41 = vadd.f32 %v1665_v15, %v7002_v7 }
 0x1c1   : > { %v4222_v57 = vpop.f32.mrf.mxu1  ;;  %4437 = vmatmul.mubr.msk.bf16.gmra.mxu1 %vm1000_vm2, %v7005_v49  ;;  %v2359_v54 = vpop.f32.mrf.mxu0 }
 0x1c2   : > { %v6291_v25 = vadd.f32 %v2020_v48, %v1666_v41  ;;  %v1687_v52 = vadd.f32 %v4222_v57, %v7006_v19  ;;  %v7009_v48 = vld [vmem:[#allocation6_spill] sm:$0xff] }
 0x1c3   : > { %v1678_v38 = vpop.f32.mrf.mxu1  ;;  %v4303_v63 = vpop.f32.mrf.mxu0 }
 0x1c4   : > { %v6294_v53 = vadd.f32 %v4258_v43, %v1687_v52  ;;  %v1679_v42 = vadd.f32 %v1678_v38, %v7007_v16 }
 0x1c5   : > { %v4223_v2 = vpop.f32.mrf.mxu1  ;;  %v2362_v6 = vpop.f32.mrf.mxu0 }
 0x1c6   : > { %v6297_v22 = vadd.f32 %v2033_v29, %v1679_v42  ;;  %v1690_v14 = vadd.f32 %v4223_v2, %v7008_v5 }
 0x1c7   : > { %v1681_v1 = vpop.f32.mrf.mxu1  ;;  %v4306_v50 = vpop.f32.mrf.mxu0 }
 0x1c8   : > { %v6300_v0 = vadd.f32 %v4259_v32, %v1690_v14  ;;  %v1682_v30 = vadd.f32 %v1681_v1, %v7009_v48 }
 0x1c9   : > { %v4266_v3 = vpop.f32.mrf.mxu1  ;;  %v2375_v12 = vpop.f32.mrf.mxu0 }
 0x1ca   : > { %v6303_v27 = vadd.f32 %v2036_v20, %v1682_v30  ;;  %v2264_v43 = vadd.f32 %v4266_v3, %v6156_v59 }
 0x1cb   : > { %v2135_v8 = vpop.f32.mrf.mxu1  ;;  %v4307_v4 = vpop.f32.mrf.mxu0 }
 0x1cc   : > { %v6306_v21 = vadd.f32 %v4302_v62, %v2264_v43  ;;  %v2262_v29 = vadd.f32 %v2135_v8, %v6159_v18 }
 0x1cd   : > { %v4267_v15 = vpop.f32.mrf.mxu1  ;;  %v2378_v7 = vpop.f32.mrf.mxu0 }
 0x1ce   : > { %v6309_v41 = vadd.f32 %v2359_v54, %v2262_v29  ;;  %v2265_v32 = vadd.f32 %v4267_v15, %v6164_v46 }
 0x1cf   : > { %v2138_v57 = vpop.f32.mrf.mxu1  ;;  %v4310_v39 = vpop.f32.mrf.mxu0 }
 0x1d0   : > { %v6312_v60 = vadd.f32 %v4303_v63, %v2265_v32  ;;  %v2263_v20 = vadd.f32 %v2138_v57, %v6171_v31 }
 0x1d1   : > { %v4270_v49 = vpop.f32.mrf.mxu1  ;;  %v2391_v59 = vpop.f32.mrf.mxu0 }
 0x1d2   : > { %v6315_v19 = vadd.f32 %v2362_v6, %v2263_v20  ;;  %v2268_v62 = vadd.f32 %v4270_v49, %v6176_v26 }
 0x1d3   : > { %v2151_v52 = vpop.f32.mrf.mxu1  ;;  %v4311_v18 = vpop.f32.mrf.mxu0 }
 0x1d4   : > { %v6318_v38 = vadd.f32 %v4306_v50, %v2268_v62  ;;  %v2266_v54 = vadd.f32 %v2151_v52, %v6179_v11 }
 0x1d5   : > { %v4271_v16 = vpop.f32.mrf.mxu1  ;;  %v2394_v46 = vpop.f32.mrf.mxu0 }
 0x1d6   : > { %v6321_v42 = vadd.f32 %v2375_v12, %v2266_v54  ;;  %v2269_v63 = vadd.f32 %v4271_v16, %v6184_v28 }
 0x1d7   : > { %v2154_v2 = vpop.f32.mrf.mxu1  ;;  %v4314_v31 = vpop.f32.mrf.mxu0 }
 0x1d8   : > { %v6324_v5 = vadd.f32 %v4307_v4, %v2269_v63  ;;  %v2267_v6 = vadd.f32 %v2154_v2, %v6191_v13 }
 0x1d9   : > { %v4274_v14 = vpop.f32.mrf.mxu1  ;;  %v2407_v26 = vpop.f32.mrf.mxu0 }
 0x1da   : > { %v6327_v1 = vadd.f32 %v2378_v7, %v2267_v6  ;;  %v2272_v50 = vadd.f32 %v4274_v14, %v6196_v36 }
 0x1db   : > { %v2167_v48 = vpop.f32.mrf.mxu1  ;;  %v4315_v11 = vpop.f32.mrf.mxu0 }
 0x1dc   : > { %v6330_v30 = vadd.f32 %v4310_v39, %v2272_v50  ;;  %v2270_v3 = vadd.f32 %v2167_v48, %v6199_v51 }
 0x1dd   : > { %v4275_v12 = vpop.f32.mrf.mxu1  ;;  %v2410_v28 = vpop.f32.mrf.mxu0 }
 0x1de   : > { %v6333_v43 = vadd.f32 %v2391_v59, %v2270_v3  ;;  %v2273_v8 = vadd.f32 %v4275_v12, %v6204_v58 }
 0x1df   : > { %v2170_v4 = vpop.f32.mrf.mxu1  ;;  %v4318_v13 = vpop.f32.mrf.mxu0 }
 0x1e0   : > { %v6336_v29 = vadd.f32 %v4311_v18, %v2273_v8  ;;  %v2271_v15 = vadd.f32 %v2170_v4, %v6211_v35 }
 0x1e1   : > { %v4278_v7 = vpop.f32.mrf.mxu1  ;;  %v2423_v36 = vpop.f32.mrf.mxu0 }
 0x1e2   : > { %v6339_v32 = vadd.f32 %v2394_v46, %v2271_v15  ;;  %v2276_v57 = vadd.f32 %v4278_v7, %v6216_v61 }
 0x1e3   : > { %v2183_v39 = vpop.f32.mrf.mxu1  ;;  %v4319_v51 = vpop.f32.mrf.mxu0 }
 0x1e4   : > { %v6342_v20 = vadd.f32 %v4314_v31, %v2276_v57  ;;  %v2274_v49 = vadd.f32 %v2183_v39, %v6219_v9 }
 0x1e5   : > { %v4279_v59 = vpop.f32.mrf.mxu1  ;;  %v2426_v58 = vpop.f32.mrf.mxu0 }
 0x1e6   : > { %v6345_v62 = vadd.f32 %v2407_v26, %v2274_v49  ;;  %v2277_v52 = vadd.f32 %v4279_v59, %v6224_v45 }
 0x1e7   : > { %v2186_v18 = vpop.f32.mrf.mxu1  ;;  %v4322_v35 = vpop.f32.mrf.mxu0 }
 0x1e8   : > { %v6348_v54 = vadd.f32 %v4315_v11, %v2277_v52  ;;  %v2275_v16 = vadd.f32 %v2186_v18, %v6231_v40 }
 0x1e9   : > { %v4282_v46 = vpop.f32.mrf.mxu1  ;;  %v2439_v61 = vpop.f32.mrf.mxu0 }
 0x1ea   : > { %v6351_v63 = vadd.f32 %v2410_v28, %v2275_v16  ;;  %v2280_v2 = vadd.f32 %v4282_v46, %v6238_v37 }
 0x1eb   : > { %v2199_v31 = vpop.f32.mrf.mxu1  ;;  %v4323_v9 = vpop.f32.mrf.mxu0 }
 0x1ec   : > { %v6354_v6 = vadd.f32 %v4318_v13, %v2280_v2  ;;  %v2278_v14 = vadd.f32 %v2199_v31, %v6242_v34 }
 0x1ed   : > { %v4283_v26 = vpop.f32.mrf.mxu1  ;;  %v2442_v45 = vpop.f32.mrf.mxu0 }
 0x1ee   : > { %v6357_v50 = vadd.f32 %v2423_v36, %v2278_v14  ;;  %v2281_v48 = vadd.f32 %v4283_v26, %v6247_v47 }
 0x1ef   : > { %v2202_v11 = vpop.f32.mrf.mxu1  ;;  %v4326_v40 = vpop.f32.mrf.mxu0 }
 0x1f0   : > { %v6360_v3 = vadd.f32 %v4319_v51, %v2281_v48  ;;  %v2279_v12 = vadd.f32 %v2202_v11, %v6256_v56 }
 0x1f1   : > { %v4286_v28 = vpop.f32.mrf.mxu1  ;;  %v2455_v37 = vpop.f32.mrf.mxu0 }
 0x1f2   : > { %v6363_v8 = vadd.f32 %v2426_v58, %v2279_v12  ;;  %v2284_v4 = vadd.f32 %v4286_v28, %v6261_v23 }
 0x1f3   : > { %v2215_v13 = vpop.f32.mrf.mxu1  ;;  %v4327_v34 = vpop.f32.mrf.mxu0 }
 0x1f4   : > { %7010 = vst [vmem:[#allocation9_spill] sm:$0xff] %v6363_v8  ;;  %v6366_v15 = vadd.f32 %v4322_v35, %v2284_v4  ;;  %v2282_v7 = vadd.f32 %v2215_v13, %v6264_v24 }
 0x1f5   : > { %v4287_v36 = vpop.f32.mrf.mxu1  ;;  %v2458_v47 = vpop.f32.mrf.mxu0 }
 0x1f6   : > { %7011 = vst [vmem:[#allocation14_spill] sm:$0xff] %v6366_v15  ;;  %v6369_v57 = vadd.f32 %v2439_v61, %v2282_v7  ;;  %v2285_v39 = vadd.f32 %v4287_v36, %v6268_v55 }
 0x1f7   : > { %v2218_v51 = vpop.f32.mrf.mxu1  ;;  %v4330_v56 = vpop.f32.mrf.mxu0 }
 0x1f8   : > { %7012 = vst [vmem:[#allocation16_spill] sm:$0xff] %v6369_v57  ;;  %v6372_v49 = vadd.f32 %v4323_v9, %v2285_v39  ;;  %v2283_v59 = vadd.f32 %v2218_v51, %v6273_v44 }
 0x1f9   : > { %v4290_v58 = vpop.f32.mrf.mxu1  ;;  %v2471_v23 = vpop.f32.mrf.mxu0 }
 0x1fa   : > { %7013 = vst [vmem:[#allocation18_spill] sm:$0xff] %v6372_v49  ;;  %v6375_v52 = vadd.f32 %v2442_v45, %v2283_v59  ;;  %v2288_v18 = vadd.f32 %v4290_v58, %v6278_v17 }
 0x1fb   : > { %v2231_v35 = vpop.f32.mrf.mxu1  ;;  %v4331_v24 = vpop.f32.mrf.mxu0 }
 0x1fc   : > { %7014 = vst [vmem:[#allocation13_spill] sm:$0xff] %v6375_v52  ;;  %v6378_v16 = vadd.f32 %v4326_v40, %v2288_v18  ;;  %v2286_v46 = vadd.f32 %v2231_v35, %v6281_v33 }
 0x1fd   : > { %v4291_v61 = vpop.f32.mrf.mxu1  ;;  %v2474_v55 = vpop.f32.mrf.mxu0 }
 0x1fe   : > { %7015 = vst [vmem:[#allocation3_spill] sm:$0xff] %v6378_v16  ;;  %v6381_v2 = vadd.f32 %v2455_v37, %v2286_v46  ;;  %v2289_v31 = vadd.f32 %v4291_v61, %v6284_v10 }
 0x1ff   : > { %v2234_v9 = vpop.f32.mrf.mxu1  ;;  %v6384_v44 = vpop.f32.mrf.mxu0 }
 0x200   : > { %7016 = vst [vmem:[#allocation19_spill] sm:$0xff] %v6381_v2  ;;  %v6386_v14 = vadd.f32 %v4327_v34, %v2289_v31  ;;  %v2287_v26 = vadd.f32 %v2234_v9, %v6291_v25 }
 0x201   : > { %v4294_v17 = vpop.f32.mrf.mxu1  ;;  %v6389_v45 = vpop.f32.mrf.mxu0 }
 0x202   : > { %7017 = vst [vmem:[#allocation5_spill] sm:$0xff] %v6386_v14  ;;  %v6391_v48 = vadd.f32 %v2458_v47, %v2287_v26  ;;  %v2292_v33 = vadd.f32 %v4294_v17, %v6294_v53 }
 0x203   : > { %v2247_v11 = vpop.f32.mrf.mxu1  ;;  %v6394_v40 = vpop.f32.mrf.mxu0 }
 0x204   : > { %7018 = vst [vmem:[#allocation8_spill] sm:$0xff] %v6391_v48  ;;  %v6396_v12 = vadd.f32 %v4330_v56, %v2292_v33  ;;  %v2290_v10 = vadd.f32 %v2247_v11, %v6297_v22 }
 0x205   : > { %v4295_v28 = vpop.f32.mrf.mxu1  ;;  %v6399_v37 = vpop.f32.mrf.mxu0 }
 0x206   : > { %7019 = vst [vmem:[#allocation7_spill] sm:$0xff] %v6396_v12  ;;  %v6401_v4 = vadd.f32 %v2471_v23, %v2290_v10  ;;  %v2293_v25 = vadd.f32 %v4295_v28, %v6300_v0 }
 0x207   : > { %v2250_v13 = vpop.f32.mrf.mxu1  ;;  %v6404_v34 = vpop.f32.mrf.mxu0 }
 0x208   : > { %7020 = vst [vmem:[#allocation10_spill] sm:$0xff] %v6401_v4  ;;  %v6406_v7 = vadd.f32 %v4331_v24, %v2293_v25  ;;  %v2291_v53 = vadd.f32 %v2250_v13, %v6303_v27 }
 0x209   : > { %v4338_v36 = vpop.f32.mrf.mxu1  ;;  %v6409_v47 = vpop.f32.mrf.mxu0 }
 0x20a   : > { %7021 = vst [vmem:[#allocation15_spill] sm:$0xff] %v6406_v7  ;;  %v6411_v39 = vadd.f32 %v2474_v55, %v2291_v53 }
 0x20b   : > { %v2580_v22 = vpop.f32.mrf.mxu1  ;;  %v6413_v51 = vpop.f32.mrf.mxu0 }
 0x20c   : > { %7022 = vst [vmem:[#allocation12_spill] sm:$0xff] %v6411_v39 }
 0x20d   : > { %v4339_v56 = vpop.f32.mrf.mxu1  ;;  %v6415_v59 = vpop.f32.mrf.mxu0 }
 0x20f   : > { %v2583_v58 = vpop.f32.mrf.mxu1  ;;  %v6417_v0 = vpop.f32.mrf.mxu0 }
 0x211   : > { %v4342_v23 = vpop.f32.mrf.mxu1  ;;  %v6419_v18 = vpop.f32.mrf.mxu0 }
 0x213   : > { %v2596_v35 = vpop.f32.mrf.mxu1  ;;  %v6421_v24 = vpop.f32.mrf.mxu0 }
 0x215   : > { %v4343_v27 = vpop.f32.mrf.mxu1  ;;  %v6423_v46 = vpop.f32.mrf.mxu0 }
 0x217   : > { %v2599_v61 = vpop.f32.mrf.mxu1  ;;  %v6425_v55 = vpop.f32.mrf.mxu0 }
 0x219   : > { %v4346_v31 = vpop.f32.mrf.mxu1  ;;  %v6427_v9 = vpop.f32.mrf.mxu0 }
 0x21b   : > { %v2612_v26 = vpop.f32.mrf.mxu1  ;;  %v6429_v17 = vpop.f32.mrf.mxu0 }
 0x21c   : > { %7023 = vst [vmem:[#allocation11_spill] sm:$0xff] %v6429_v17 }
 0x21d   : > { %v4347_v33 = vpop.f32.mrf.mxu1  ;;  %v6431_v11 = vpop.f32.mrf.mxu0 }
 0x21e   : > { %7024 = vst [vmem:[#allocation17_spill] sm:$0xff] %v6431_v11 }
 0x21f   : > { %v2615_v10 = vpop.f32.mrf.mxu1  ;;  %v6433_v28 = vpop.f32.mrf.mxu0 }
 0x220   : > { %7025 = vst [vmem:[#allocation2_spill] sm:$0xff] %v6433_v28 }
 0x221   : > { %v4350_v25 = vpop.f32.mrf.mxu1  ;;  %v6435_v13 = vpop.f32.mrf.mxu0 }
 0x222   : > { %7026 = vst [vmem:[#allocation4_spill] sm:$0xff] %v6435_v13 }
 0x223   : > { %v2628_v53 = vpop.f32.mrf.mxu1  ;;  %v6437_v39 = vpop.f32.mrf.mxu0 }
 0x224   : > { %7027 = vst [vmem:[#allocation6_spill] sm:$0xff] %v6437_v39 }
 0x225   : > { %v4351_v7 = vpop.f32.mrf.mxu1  ;;  %v6439_v4 = vpop.f32.mrf.mxu0 }
 0x226   : > { %7028 = vst [vmem:[#allocation20_spill] sm:$0xff] %v6439_v4 }
 0x227   : > { %v2631_v12 = vpop.f32.mrf.mxu1  ;;  %v6441_v48 = vpop.f32.mrf.mxu0 }
 0x228   : > { %7029 = vst [vmem:[#allocation21_spill] sm:$0xff] %v6441_v48 }
 0x229   : > { %v4354_v14 = vpop.f32.mrf.mxu1  ;;  %v6443_v2 = vpop.f32.mrf.mxu0 }
 0x22a   : > { %7030 = vst [vmem:[#allocation22_spill] sm:$0xff] %v6443_v2 }
 0x22b   : > { %v2644_v16 = vpop.f32.mrf.mxu1  ;;  %v6445_v52 = vpop.f32.mrf.mxu0 }
 0x22c   : > { %7031 = vst [vmem:[#allocation23_spill] sm:$0xff] %v6445_v52 }
 0x22d   : > { %v4355_v49 = vpop.f32.mrf.mxu1  ;;  %v6447_v57 = vpop.f32.mrf.mxu0 }
 0x22e   : > { %7032 = vst [vmem:[#allocation24_spill] sm:$0xff] %v6447_v57 }
 0x22f   : > { %v6449_v15 = vpop.f32.mrf.mxu1  ;;  %v6451_v8 = vpop.f32.mrf.mxu0 }
 0x230   : > { %7033 = vst [vmem:[#allocation25_spill] sm:$0xff] %v6449_v15  ;;  %7034 = vst [vmem:[#allocation26_spill] sm:$0xff] %v6451_v8 }
 0x231   : > { %v6453_v39 = vpop.f32.mrf.mxu1  ;;  %v6455_v13 = vpop.f32.mrf.mxu0 }
 0x232   : > { %7035 = vst [vmem:[#allocation27_spill] sm:$0xff] %v6453_v39  ;;  %7036 = vst [vmem:[#allocation28_spill] sm:$0xff] %v6455_v13 }
 0x233   : > { %v6457_v4 = vpop.f32.mrf.mxu1  ;;  %v6459_v48 = vpop.f32.mrf.mxu0 }
 0x234   : > { %7037 = vst [vmem:[#allocation29_spill] sm:$0xff] %v6457_v4  ;;  %7038 = vst [vmem:[#allocation30_spill] sm:$0xff] %v6459_v48  ;;  %v2709_v48 = vadd.f32 %v4338_v36, %v6306_v21  ;;  %v2711_v36 = vadd.f32 %v2596_v35, %v6321_v42  ;;  %v2719_v42 = vadd.f32 %v2628_v53, %v6345_v62 }
 0x235   : > { %v6461_v28 = vpop.f32.mrf.mxu1  ;;  %v6463_v2 = vpop.f32.mrf.mxu0 }
 0x236   : > { %7039 = vst [vmem:[#allocation31_spill] sm:$0xff] %v6461_v28  ;;  %7040 = vst [vmem:[#allocation32_spill] sm:$0xff] %v6463_v2  ;;  %v2707_v2 = vadd.f32 %v2580_v22, %v6309_v41  ;;  %v2712_v22 = vadd.f32 %v2599_v61, %v6327_v1  ;;  %v7055_v61 = vld [vmem:[#allocation6_spill] sm:$0xff] }
 0x237   : > { %v6465_v52 = vpop.f32.mrf.mxu1  ;;  %v6467_v11 = vpop.f32.mrf.mxu0  ;;  %v7054_v35 = vld [vmem:[#allocation25_spill] sm:$0xff] }
 0x238   : > { %7041 = vst [vmem:[#allocation33_spill] sm:$0xff] %v6465_v52  ;;  %7042 = vst [vmem:[#allocation34_spill] sm:$0xff] %v6467_v11  ;;  %v2710_v11 = vadd.f32 %v4339_v56, %v6312_v60  ;;  %v2714_v60 = vadd.f32 %v4343_v27, %v6324_v5  ;;  %v2722_v5 = vadd.f32 %v4351_v7, %v6348_v54  ;;  %v7050_v7 = vld [vmem:[#allocation17_spill] sm:$0xff]  ;;  %v6567_v27 = vld [vmem:[%s6907_s4] ss:$0 sm:$0xff] }
 0x239   : > { %v6469_v57 = vpop.f32.mrf.mxu1  ;;  %v6471_v15 = vpop.f32.mrf.mxu0  ;;  %v6527_v62 = vadd.f32 %v6415_v59, %v2712_v22  ;;  %v2726_v54 = vadd.f32 %v4355_v49, %v6360_v3  ;;  %v6548_v3 = vadd.f32 %v6427_v9, %v2719_v42  ;;  %v7049_v49 = vld [vmem:[#allocation11_spill] sm:$0xff] }
 0x23a   : > { %7043 = vst [vmem:[#allocation35_spill] sm:$0xff] %v6469_v57  ;;  %7044 = vst [vmem:[#allocation36_spill] sm:$0xff] %v6471_v15  ;;  %v2924_v41 = vadd.f32 %v6394_v40, %v2710_v11  ;;  %v2721_v40 = vadd.f32 %v4350_v25, %v6342_v20  ;;  %v6524_v20 = vadd.f32 %v6413_v51, %v2714_v60  ;;  %v7051_v51 = vld [vmem:[#allocation2_spill] sm:$0xff]  ;;  %v7057_v9 = vld [vmem:[#allocation27_spill] sm:$0xff] }
 0x23b   : > { %v6473_v8 = vpop.f32.mrf.mxu1  ;;  %v6475_v39 = vpop.f32.mrf.mxu0  ;;  %v7059_v25 = vld [vmem:[#allocation29_spill] sm:$0xff] }
 0x23c   : > { %7045 = vst [vmem:[#allocation37_spill] sm:$0xff] %v6473_v8  ;;  %7046 = vst [vmem:[#allocation38_spill] sm:$0xff] %v6475_v39  ;;  %v2708_v8 = vadd.f32 %v2583_v58, %v6315_v19  ;;  %v2923_v39 = vadd.f32 %v6384_v44, %v2709_v48  ;;  %v2717_v19 = vadd.f32 %v4346_v31, %v6330_v30  ;;  %v7056_v31 = vld [vmem:[#allocation14_spill] sm:$0xff] }
 0x23d   : > { %v6477_v13 = vpop.f32.mrf.mxu1  ;;  %v6479_v4 = vpop.f32.mrf.mxu0  ;;  %v2715_v44 = vadd.f32 %v2612_v26, %v6333_v43  ;;  %v2720_v30 = vadd.f32 %v2631_v12, %v6351_v63  ;;  %v2725_v43 = vadd.f32 %v4354_v14, %v6354_v6  ;;  %v2729_v26 = vadd.f32 %v7057_v9, %v7056_v31  ;;  %v7061_v60 = vld [vmem:[#allocation31_spill] sm:$0xff] }
 0x23e   : > { %7047 = vst [vmem:[#allocation39_spill] sm:$0xff] %v6477_v13  ;;  %7048 = vst [vmem:[#allocation40_spill] sm:$0xff] %v6479_v4  ;;  %v2921_v13 = vadd.f32 %v6389_v45, %v2707_v2  ;;  %v2713_v4 = vadd.f32 %v4342_v23, %v6318_v38  ;;  %v2718_v2 = vadd.f32 %v4347_v33, %v6336_v29 }
 0x23f   : > { %v6483_v28 = vpop.f32.mrf.mxu1  ;;  %v4446_v52 = vpop.f32.mrf.mxu0  ;;  %v2716_v38 = vadd.f32 %v2615_v10, %v6339_v32  ;;  %v2922_v56 = vadd.f32 %v6399_v37, %v2708_v8  ;;  %v2723_v29 = vadd.f32 %v2644_v16, %v6357_v50  ;;  %v6521_v8 = vadd.f32 %v6409_v47, %v2711_v36  ;;  %v7058_v10 = vld [vmem:[#allocation16_spill] sm:$0xff]  ;;  %v7060_v36 = vld [vmem:[#allocation18_spill] sm:$0xff] }
 0x240   : > { %v6511_v1 = vadd.f32 %v6404_v34, %v2713_v4  ;;  %v6531_v63 = vadd.f32 %v6417_v0, %v2717_v19  ;;  %v6534_v6 = vadd.f32 %v6419_v18, %v2715_v44  ;;  %v6537_v50 = vadd.f32 %v6421_v24, %v2718_v2  ;;  %v7052_v0 = vld [vmem:[#allocation4_spill] sm:$0xff]  ;;  %v7053_v18 = vld [vmem:[#allocation9_spill] sm:$0xff] }
 0x241   : > { %v6486_v57 = vpop.f32.mrf.mxu1  ;;  %v3239_v15 = vpop.f32.mrf.mxu0  ;;  %v6540_v16 = vadd.f32 %v6423_v46, %v2716_v38  ;;  %v6545_v37 = vadd.f32 %v6425_v55, %v2721_v40  ;;  %v6551_v4 = vadd.f32 %v7049_v49, %v2722_v5  ;;  %v6554_v47 = vadd.f32 %v7050_v7, %v2720_v30  ;;  %v7062_v19 = vld [vmem:[#allocation13_spill] sm:$0xff]  ;;  %v7064_v38 = vld [vmem:[#allocation3_spill] sm:$0xff]  ;;  %v7068_v49 = vld [vmem:[#allocation20_spill] sm:$0xff] }
 0x242   : > { %v6557_v59 = vadd.f32 %v7051_v51, %v2725_v43  ;;  %v6560_v23 = vadd.f32 %v7052_v0, %v2723_v29  ;;  %v2724_v24 = vadd.f32 %v7054_v35, %v7053_v18  ;;  %v6572_v55 = vadd.f32 %v7055_v61, %v2726_v54  ;;  %v7063_v44 = vld [vmem:[#allocation33_spill] sm:$0xff]  ;;  %v7065_v40 = vld [vmem:[#allocation35_spill] sm:$0xff]  ;;  %v7071_v18 = vld [vmem:[#allocation8_spill] sm:$0xff] }
 0x243   : > { %v6492_v17 = vpop.f32.mrf.mxu1  ;;  %v6494_v21 = vpop.f32.mrf.mxu0  ;;  %v2727_v53 = vadd.f32 %v7059_v25, %v7058_v10  ;;  %v2730_v22 = vadd.f32 %v7061_v60, %v7060_v36  ;;  %v2728_v2 = vadd.f32 %v7063_v44, %v7062_v19  ;;  %v2733_v42 = vadd.f32 %v7065_v40, %v7064_v38  ;;  %v7066_v5 = vld [vmem:[#allocation19_spill] sm:$0xff]  ;;  %v7067_v30 = vld [vmem:[#allocation37_spill] sm:$0xff]  ;;  %v7073_v10 = vld [vmem:[#allocation10_spill] sm:$0xff] }
 0x244   : > { %v2731_v43 = vadd.f32 %v7067_v30, %v7066_v5  ;;  %v7069_v7 = vld [vmem:[#allocation5_spill] sm:$0xff]  ;;  %v2732_v35 = vadd.f32 %v6483_v28, %v7071_v18  ;;  %v7076_v36 = vld [vmem:[#allocation22_spill] sm:$0xff]  ;;  %v7077_v60 = vld [vmem:[#allocation23_spill] sm:$0xff] }
 0x245   : > { %v4367_v45 = vpop.f32.mrf.mxu1  ;;  %v6504_v48 = vpop.f32.mrf.mxu0  ;;  %v7070_v51 = vld [vmem:[#allocation39_spill] sm:$0xff]  ;;  %v7075_v25 = vld [vmem:[#allocation21_spill] sm:$0xff]  ;;  %v6621_v19 = vadd.f32 %v7077_v60, %v2730_v22  ;;  %v7081_v22 = vld [vmem:[#allocation30_spill] sm:$0xff] }
 0x246   : > { %v2734_v0 = vadd.f32 %v7070_v51, %v7069_v7  ;;  %v6615_v28 = vadd.f32 %v7075_v25, %v2729_v26  ;;  %v7083_v7 = vld [vmem:[#allocation34_spill] sm:$0xff]  ;;  %v7084_v51 = vld [vmem:[#allocation36_spill] sm:$0xff] }
 0x247   : > { %v6516_v32 = vpop.f32.mrf.mxu1  ;;  %v6518_v58 = vpop.f32.mrf.mxu0 }
 0x248   : > { %v6638_v30 = vadd.f32 %v7081_v22, %v2734_v0 }
 0x249   : > { %v4410_v14 = vpop.f32.mrf.mxu1  ;;  %v6542_v12 = vpop.f32.mrf.mxu0 }
 0x24a   : > { %v3147_v34 = vadd.f32 %v4410_v14, %v2923_v39 }
 0x24b   : > { %v3018_v46 = vpop.f32.mrf.mxu1  ;;  %v6569_v39 = vpop.f32.mrf.mxu0 }
 0x24c   : > { %v3368_v33 = vadd.f32 %v4446_v52, %v3147_v34  ;;  %v3145_v11 = vadd.f32 %v3018_v46, %v2921_v13  ;;  %v6597_v34 = vadd.f32 %v7068_v49, %v2724_v24  ;;  %v7072_v46 = vld [vmem:[#allocation7_spill] sm:$0xff] }
 0x24d   : > { %v4411_v52 = vpop.f32.mrf.mxu1  ;;  %v6591_v13 = vpop.f32.mrf.mxu0  ;;  %v2737_v61 = vadd.f32 %v6486_v57, %v7072_v46  ;;  %v6618_v57 = vadd.f32 %v7076_v36, %v2727_v53  ;;  %v7085_v46 = vld [vmem:[#allocation38_spill] sm:$0xff] }
 0x24e   : > { %v3407_v29 = vadd.f32 %v6567_v27, %v3368_v33  ;;  %v3366_v54 = vadd.f32 %v3239_v15, %v3145_v11  ;;  %v3148_v14 = vadd.f32 %v4411_v52, %v2924_v41  ;;  %v2735_v15 = vadd.f32 %v6492_v17, %v7073_v10  ;;  %v7074_v41 = vld [vmem:[#allocation15_spill] sm:$0xff]  ;;  %v7079_v52 = vld [vmem:[#allocation26_spill] sm:$0xff] }
 0x24f   : > { %v3021_v31 = vpop.f32.mrf.mxu1  ;;  %v6605_v9 = vpop.f32.mrf.mxu0  ;;  %v2738_v33 = vadd.f32 %v4367_v45, %v7074_v41  ;;  %v7078_v45 = vld [vmem:[#allocation24_spill] sm:$0xff]  ;;  %v6629_v5 = vadd.f32 %v7079_v52, %v2733_v42 }
 0x250   : > { %3439 = vst.msk [vmem:[%s6589_s14 + $0x10] sm:$0xff] %vm1000_vm2, %v3407_v29  ;;  %v3405_v24 = vadd.f32 %v6567_v27, %v3366_v54  ;;  %v3369_v11 = vadd.f32 %v6494_v21, %v3148_v14  ;;  %v3146_v44 = vadd.f32 %v3021_v31, %v2922_v56  ;;  %v6626_v40 = vadd.f32 %v7078_v45, %v2728_v2  ;;  %v7080_v21 = vld [vmem:[#allocation28_spill] sm:$0xff] }
 0x251   : > { %v4414_v38 = vpop.f32.mrf.mxu1  ;;  %v6623_v17 = vpop.f32.mrf.mxu0  ;;  %v6632_v26 = vadd.f32 %v7080_v21, %v2731_v43  ;;  %v7082_v56 = vld [vmem:[#allocation32_spill] sm:$0xff]  ;;  %v6648_v43 = vadd.f32 %v7083_v7, %v2737_v61  ;;  %v6651_v18 = vadd.f32 %v7084_v51, %v2735_v15  ;;  %v6654_v0 = vadd.f32 %v7085_v46, %v2738_v33 }
 0x252   : > { %3437 = vst.msk [vmem:[%s6589_s14] sm:$0xff] %vm1000_vm2, %v3405_v24  ;;  %v3408_v53 = vadd.f32 %v6567_v27, %v3369_v11  ;;  %v6641_v54 = vadd.f32 %v7082_v56, %v2732_v35  ;;  %v3367_v14 = vadd.f32 %v6504_v48, %v3146_v44  ;;  %v3151_v2 = vadd.f32 %v4414_v38, %v6511_v1  ;;  %v7086_v11 = vld [vmem:[#allocation12_spill] sm:$0xff] }
 0x253   : > { %v3034_v49 = vpop.f32.mrf.mxu1  ;;  %v6645_v42 = vpop.f32.mrf.mxu0  ;;  %v3541_v48 = vmul.f32 %v3407_v29, %v3407_v29  ;;  %v3539_v31 = vmul.f32 %v3405_v24, %v3405_v24  ;;  %v6665_v15 = vadd.f32 %v6516_v32, %v7086_v11  ;;  %v3469_v33 = vsel %vm1000_vm2, %v3405_v24, 0.0 }
 0x254   : > { %3440 = vst.msk [vmem:[%s6589_s14 + $0x18] sm:$0xff] %vm1000_vm2, %v3408_v53  ;;  %v3149_v35 = vadd.f32 %v3034_v49, %v6521_v8  ;;  %v3406_v1 = vadd.f32 %v6567_v27, %v3367_v14  ;;  %v3372_v10 = vadd.f32 %v6518_v58, %v3151_v2  ;;  %v3542_v8 = vmul.f32 %v3408_v53, %v3408_v53 }
 0x255   : > { %v4415_v41 = vpop.f32.mrf.mxu1  ;;  %v6661_v61 = vpop.f32.mrf.mxu0  ;;  %v3472_v52 = vsel %vm1000_vm2, %v3407_v29, 0.0  ;;  %v3574_v21 = vsel %vm1000_vm2, %v3541_v48, 0.0  ;;  %v3571_v22 = vsel %vm1000_vm2, %v3539_v31, 0.0  ;;  %v3474_v49 = vsel %vm1000_vm2, %v3408_v53, 0.0 }
 0x256   : > { %v3370_v25 = vadd.f32 %v6542_v12, %v3149_v35  ;;  %v3152_v36 = vadd.f32 %v4415_v41, %v6524_v20  ;;  %3438 = vst.msk [vmem:[%s6589_s14 + $0x8] sm:$0xff] %vm1000_vm2, %v3406_v1  ;;  %v3470_v60 = vsel %vm1000_vm2, %v3406_v1, 0.0  ;;  %v3540_v58 = vmul.f32 %v3406_v1, %v3406_v1 }
 0x257   : > { %v3411_v44 = vadd.f32 %v6567_v27, %v3372_v10  ;;  %v3037_v38 = vpop.f32.mrf.mxu1  ;;  %v6674_v45 = vpop.f32.mrf.mxu0  ;;  %v3471_v32 = vadd.f32 %v3470_v60, %v3469_v33  ;;  %v3576_v29 = vsel %vm1000_vm2, %v3542_v8, 0.0 }
 0x258   : > { %v3409_v24 = vadd.f32 %v6567_v27, %v3370_v25  ;;  %v3373_v12 = vadd.f32 %v6569_v39, %v3152_v36  ;;  %v3150_v20 = vadd.f32 %v3037_v38, %v6527_v62  ;;  %v3572_v56 = vsel %vm1000_vm2, %v3540_v58, 0.0 }
 0x259   : > { %3443 = vst.msk [vmem:[%s6589_s14 + $0x30] sm:$0xff] %vm1000_vm2, %v3411_v44  ;;  %v4418_v14 = vpop.f32.mrf.mxu1  ;;  %v6685_v2 = vpop.f32.mrf.mxu0  ;;  %v3473_v7 = vadd.f32 %v3472_v52, %v3471_v32  ;;  %v3573_v39 = vadd.f32 %v3572_v56, %v3571_v22  ;;  %v3545_v53 = vmul.f32 %v3411_v44, %v3411_v44 }
 0x25a   : > { %3441 = vst.msk [vmem:[%s6589_s14 + $0x20] sm:$0xff] %vm1000_vm2, %v3409_v24  ;;  %v3543_v62 = vmul.f32 %v3409_v24, %v3409_v24  ;;  %v3412_v51 = vadd.f32 %v6567_v27, %v3373_v12  ;;  %v3371_v46 = vadd.f32 %v6591_v13, %v3150_v20  ;;  %v3155_v35 = vadd.f32 %v4418_v14, %v6531_v63 }
 0x25b   : > { %v3050_v48 = vpop.f32.mrf.mxu1  ;;  %v6694_v31 = vpop.f32.mrf.mxu0  ;;  %v3575_v1 = vadd.f32 %v3574_v21, %v3573_v39  ;;  %v3475_v10 = vadd.f32 %v3474_v49, %v3473_v7  ;;  %v3476_v11 = vsel %vm1000_vm2, %v3409_v24, 0.0  ;;  %v3582_v56 = vsel %vm1000_vm2, %v3545_v53, 0.0 }
 0x25c   : > { %v3153_v41 = vadd.f32 %v3050_v48, %v6534_v6  ;;  %v3578_v33 = vsel %vm1000_vm2, %v3543_v62, 0.0  ;;  %3444 = vst.msk [vmem:[%s6589_s14 + $0x38] sm:$0xff] %vm1000_vm2, %v3412_v51  ;;  %v3410_v25 = vadd.f32 %v6567_v27, %v3371_v46  ;;  %v3376_v13 = vadd.f32 %v6605_v9, %v3155_v35 }
 0x25d   : > { %v4419_v63 = vpop.f32.mrf.mxu1  ;;  %v6703_v36 = vpop.f32.mrf.mxu0  ;;  %v3477_v8 = vadd.f32 %v3476_v11, %v3475_v10  ;;  %v3577_v60 = vadd.f32 %v3576_v29, %v3575_v1  ;;  %v3546_v38 = vmul.f32 %v3412_v51, %v3412_v51  ;;  %v3482_v62 = vsel %vm1000_vm2, %v3412_v51, 0.0 }
 0x25e   : > { %v3374_v58 = vadd.f32 %v6623_v17, %v3153_v41  ;;  %v3156_v6 = vadd.f32 %v4419_v63, %v6537_v50  ;;  %3442 = vst.msk [vmem:[%s6589_s14 + $0x28] sm:$0xff] %vm1000_vm2, %v3410_v25  ;;  %v3478_v32 = vsel %vm1000_vm2, %v3410_v25, 0.0  ;;  %v3544_v24 = vmul.f32 %v3410_v25, %v3410_v25 }
 0x25f   : > { %v3415_v12 = vadd.f32 %v6567_v27, %v3376_v13  ;;  %v3053_v20 = vpop.f32.mrf.mxu1  ;;  %v6711_v9 = vpop.f32.mrf.mxu0  ;;  %v3579_v52 = vadd.f32 %v3578_v33, %v3577_v60  ;;  %v3479_v21 = vadd.f32 %v3478_v32, %v3477_v8  ;;  %v3480_v50 = vsel %vm1000_vm2, %v3411_v44, 0.0 }
 0x260   : > { %v3413_v22 = vadd.f32 %v6567_v27, %v3374_v58  ;;  %v3377_v17 = vadd.f32 %v6645_v42, %v3156_v6  ;;  %v3580_v14 = vsel %vm1000_vm2, %v3544_v24, 0.0  ;;  %v3154_v49 = vadd.f32 %v3053_v20, %v6540_v16 }
 0x261   : > { %3447 = vst.msk [vmem:[%s6589_s14 + $0x50] sm:$0xff] %vm1000_vm2, %v3415_v12  ;;  %v4422_v7 = vpop.f32.mrf.mxu1  ;;  %v6721_v39 = vpop.f32.mrf.mxu0  ;;  %v3481_v29 = vadd.f32 %v3480_v50, %v3479_v21  ;;  %v3581_v46 = vadd.f32 %v3580_v14, %v3579_v52  ;;  %v3584_v44 = vsel %vm1000_vm2, %v3546_v38, 0.0  ;;  %v3549_v51 = vmul.f32 %v3415_v12, %v3415_v12 }
 0x262   : > { %3445 = vst.msk [vmem:[%s6589_s14 + $0x40] sm:$0xff] %vm1000_vm2, %v3413_v22  ;;  %v3547_v42 = vmul.f32 %v3413_v22, %v3413_v22  ;;  %v3416_v35 = vadd.f32 %v6567_v27, %v3377_v17  ;;  %v3375_v48 = vadd.f32 %v6661_v61, %v3154_v49  ;;  %v3159_v1 = vadd.f32 %v4422_v7, %v6545_v37 }
 0x263   : > { %v3066_v16 = vpop.f32.mrf.mxu1  ;;  %v6730_v53 = vpop.f32.mrf.mxu0  ;;  %v3583_v10 = vadd.f32 %v3582_v56, %v3581_v46  ;;  %v3483_v41 = vadd.f32 %v3482_v62, %v3481_v29  ;;  %v3484_v33 = vsel %vm1000_vm2, %v3413_v22, 0.0  ;;  %v3590_v17 = vsel %vm1000_vm2, %v3549_v51, 0.0 }
 0x264   : > { %v3157_v11 = vadd.f32 %v3066_v16, %v6548_v3  ;;  %v3586_v25 = vsel %vm1000_vm2, %v3547_v42, 0.0  ;;  %3448 = vst.msk [vmem:[%s6589_s14 + $0x58] sm:$0xff] %vm1000_vm2, %v3416_v35  ;;  %v3414_v13 = vadd.f32 %v6567_v27, %v3375_v48  ;;  %v3380_v61 = vadd.f32 %v6674_v45, %v3159_v1 }
 0x265   : > { %v4423_v37 = vpop.f32.mrf.mxu1  ;;  %v6739_v63 = vpop.f32.mrf.mxu0  ;;  %v3485_v8 = vadd.f32 %v3484_v33, %v3483_v41  ;;  %v3585_v60 = vadd.f32 %v3584_v44, %v3583_v10  ;;  %v3550_v6 = vmul.f32 %v3416_v35, %v3416_v35  ;;  %v3490_v7 = vsel %vm1000_vm2, %v3416_v35, 0.0 }
 0x266   : > { %v3378_v58 = vadd.f32 %v6685_v2, %v3157_v11  ;;  %v3160_v3 = vadd.f32 %v4423_v37, %v6551_v4  ;;  %3446 = vst.msk [vmem:[%s6589_s14 + $0x48] sm:$0xff] %vm1000_vm2, %v3414_v13  ;;  %v3486_v38 = vsel %vm1000_vm2, %v3414_v13, 0.0  ;;  %v3548_v32 = vmul.f32 %v3414_v13, %v3414_v13 }
 0x267   : > { %v3419_v24 = vadd.f32 %v6567_v27, %v3380_v61  ;;  %v3069_v20 = vpop.f32.mrf.mxu1  ;;  %v6747_v45 = vpop.f32.mrf.mxu0  ;;  %v3587_v52 = vadd.f32 %v3586_v25, %v3585_v60  ;;  %v3487_v21 = vadd.f32 %v3486_v38, %v3485_v8  ;;  %v3488_v4 = vsel %vm1000_vm2, %v3415_v12, 0.0 }
 0x268   : > { %v3417_v22 = vadd.f32 %v6567_v27, %v3378_v58  ;;  %v3381_v2 = vadd.f32 %v6694_v31, %v3160_v3  ;;  %v3588_v50 = vsel %vm1000_vm2, %v3548_v32, 0.0  ;;  %v3158_v56 = vadd.f32 %v3069_v20, %v6554_v47 }
 0x269   : > { %3451 = vst.msk [vmem:[%s6589_s14 + $0x70] sm:$0xff] %vm1000_vm2, %v3419_v24  ;;  %v4426_v14 = vpop.f32.mrf.mxu1  ;;  %v6757_v49 = vpop.f32.mrf.mxu0  ;;  %v3489_v62 = vadd.f32 %v3488_v4, %v3487_v21  ;;  %v3589_v29 = vadd.f32 %v3588_v50, %v3587_v52  ;;  %v3592_v12 = vsel %vm1000_vm2, %v3550_v6, 0.0  ;;  %v3553_v35 = vmul.f32 %v3419_v24, %v3419_v24 }
 0x26a   : > { %3449 = vst.msk [vmem:[%s6589_s14 + $0x60] sm:$0xff] %vm1000_vm2, %v3417_v22  ;;  %v3551_v31 = vmul.f32 %v3417_v22, %v3417_v22  ;;  %v3420_v46 = vadd.f32 %v6567_v27, %v3381_v2  ;;  %v3379_v42 = vadd.f32 %v6703_v36, %v3158_v56  ;;  %v3163_v44 = vadd.f32 %v4426_v14, %v6557_v59 }
 0x26b   : > { %v3082_v47 = vpop.f32.mrf.mxu1  ;;  %v6766_v48 = vpop.f32.mrf.mxu0  ;;  %v3591_v1 = vadd.f32 %v3590_v17, %v3589_v29  ;;  %v3491_v16 = vadd.f32 %v3490_v7, %v3489_v62  ;;  %v3492_v51 = vsel %vm1000_vm2, %v3417_v22, 0.0  ;;  %v3598_v20 = vsel %vm1000_vm2, %v3553_v35, 0.0 }
 0x26c   : > { %v3161_v10 = vadd.f32 %v3082_v47, %v6560_v23  ;;  %v3594_v41 = vsel %vm1000_vm2, %v3551_v31, 0.0  ;;  %3452 = vst.msk [vmem:[%s6589_s14 + $0x78] sm:$0xff] %vm1000_vm2, %v3420_v46  ;;  %v3418_v11 = vadd.f32 %v6567_v27, %v3379_v42  ;;  %v3384_v36 = vadd.f32 %v6711_v9, %v3163_v44 }
 0x26d   : > { %v4427_v59 = vpop.f32.mrf.mxu1  ;;  %v6775_v33 = vpop.f32.mrf.mxu0  ;;  %v3493_v25 = vadd.f32 %v3492_v51, %v3491_v16  ;;  %v3593_v13 = vadd.f32 %v3592_v12, %v3591_v1  ;;  %v3554_v37 = vmul.f32 %v3420_v46, %v3420_v46  ;;  %v3498_v2 = vsel %vm1000_vm2, %v3420_v46, 0.0 }
 0x26e   : > { %v3382_v61 = vadd.f32 %v6721_v39, %v3161_v10  ;;  %v3164_v23 = vadd.f32 %v4427_v59, %v6572_v55  ;;  %3450 = vst.msk [vmem:[%s6589_s14 + $0x68] sm:$0xff] %vm1000_vm2, %v3418_v11  ;;  %v3494_v8 = vsel %vm1000_vm2, %v3418_v11, 0.0  ;;  %v3552_v60 = vmul.f32 %v3418_v11, %v3418_v11 }
 0x26f   : > { %v3423_v58 = vadd.f32 %v6567_v27, %v3384_v36  ;;  %v3085_v9 = vpop.f32.mrf.mxu1  ;;  %v6783_v3 = vpop.f32.mrf.mxu0  ;;  %v3595_v6 = vadd.f32 %v3594_v41, %v3593_v13  ;;  %v3495_v38 = vadd.f32 %v3494_v8, %v3493_v25  ;;  %v3496_v55 = vsel %vm1000_vm2, %v3419_v24, 0.0 }
 0x270   : > { %v3421_v32 = vadd.f32 %v6567_v27, %v3382_v61  ;;  %v3385_v39 = vadd.f32 %v6730_v53, %v3164_v23  ;;  %v3596_v52 = vsel %vm1000_vm2, %v3552_v60, 0.0  ;;  %v3162_v21 = vadd.f32 %v3085_v9, %v6597_v34 }
 0x271   : > { %3455 = vst.msk [vmem:[%s6589_s14 + $0x90] sm:$0xff] %vm1000_vm2, %v3423_v58  ;;  %v4430_v22 = vpop.f32.mrf.mxu1  ;;  %v3497_v4 = vadd.f32 %v3496_v55, %v3495_v38  ;;  %v3597_v17 = vadd.f32 %v3596_v52, %v3595_v6  ;;  %v3335_v53 = vpop.f32.mrf.mxu0  ;;  %v3600_v24 = vsel %vm1000_vm2, %v3554_v37, 0.0  ;;  %v3557_v29 = vmul.f32 %v3423_v58, %v3423_v58 }
 0x272   : > { %3453 = vst.msk [vmem:[%s6589_s14 + $0x80] sm:$0xff] %vm1000_vm2, %v3421_v32  ;;  %v3555_v50 = vmul.f32 %v3421_v32, %v3421_v32  ;;  %v3424_v56 = vadd.f32 %v6567_v27, %v3385_v39  ;;  %v3383_v14 = vadd.f32 %v6739_v63, %v3162_v21  ;;  %v3167_v7 = vadd.f32 %v4430_v22, %v6615_v28 }
 0x273   : > { %v3098_v62 = vpop.f32.mrf.mxu1  ;;  %v3599_v34 = vadd.f32 %v3598_v20, %v3597_v17  ;;  %v3499_v31 = vadd.f32 %v3498_v2, %v3497_v4  ;;  %v3500_v46 = vsel %vm1000_vm2, %v3421_v32, 0.0  ;;  %v4471_v10 = vpop.f32.mrf.mxu0  ;;  %v3504_v13 = vsel %vm1000_vm2, %v3423_v58, 0.0 }
 0x274   : > { %v3165_v12 = vadd.f32 %v3098_v62, %v6618_v57  ;;  %v3602_v42 = vsel %vm1000_vm2, %v3555_v50, 0.0  ;;  %3456 = vst.msk [vmem:[%s6589_s14 + $0x98] sm:$0xff] %vm1000_vm2, %v3424_v56  ;;  %v3422_v44 = vadd.f32 %v6567_v27, %v3383_v14  ;;  %v3388_v47 = vadd.f32 %v6747_v45, %v3167_v7 }
 0x275   : > { %v4431_v63 = vpop.f32.mrf.mxu1  ;;  %v3501_v1 = vadd.f32 %v3500_v46, %v3499_v31  ;;  %v3601_v28 = vadd.f32 %v3600_v24, %v3599_v34  ;;  %v3558_v57 = vmul.f32 %v3424_v56, %v3424_v56  ;;  %v3506_v8 = vsel %vm1000_vm2, %v3424_v56, 0.0 }
 0x276   : > { %v3386_v35 = vadd.f32 %v6757_v49, %v3165_v12  ;;  %v3168_v16 = vadd.f32 %v4431_v63, %v6621_v19  ;;  %3454 = vst.msk [vmem:[%s6589_s14 + $0x88] sm:$0xff] %vm1000_vm2, %v3422_v44  ;;  %v3502_v51 = vsel %vm1000_vm2, %v3422_v44, 0.0  ;;  %v3556_v41 = vmul.f32 %v3422_v44, %v3422_v44 }
 0x277   : > { %v3427_v11 = vadd.f32 %v6567_v27, %v3388_v47  ;;  %v3101_v36 = vpop.f32.mrf.mxu1  ;;  %v3603_v45 = vadd.f32 %v3602_v42, %v3601_v28  ;;  %v3503_v59 = vadd.f32 %v3502_v51, %v3501_v1  ;;  %v3606_v19 = vsel %vm1000_vm2, %v3557_v29, 0.0 }
 0x278   : > { %v3425_v25 = vadd.f32 %v6567_v27, %v3386_v35  ;;  %v3389_v49 = vadd.f32 %v6766_v48, %v3168_v16  ;;  %v3604_v61 = vsel %vm1000_vm2, %v3556_v41, 0.0  ;;  %v3166_v23 = vadd.f32 %v3101_v36, %v6626_v40  ;;  %v3338_v48 = vpop.f32.mrf.mxu0 }
 0x279   : > { %3459 = vst.msk [vmem:[%s6589_s14 + $0xb0] sm:$0xff] %vm1000_vm2, %v3427_v11  ;;  %v4434_v37 = vpop.f32.mrf.mxu1  ;;  %v3505_v60 = vadd.f32 %v3504_v13, %v3503_v59  ;;  %v3605_v9 = vadd.f32 %v3604_v61, %v3603_v45  ;;  %v3608_v58 = vsel %vm1000_vm2, %v3558_v57, 0.0  ;;  %v3561_v20 = vmul.f32 %v3427_v11, %v3427_v11 }
 0x27a   : > { %3457 = vst.msk [vmem:[%s6589_s14 + $0xa0] sm:$0xff] %vm1000_vm2, %v3425_v25  ;;  %v3559_v6 = vmul.f32 %v3425_v25, %v3425_v25  ;;  %v3428_v38 = vadd.f32 %v6567_v27, %v3389_v49  ;;  %v3387_v32 = vadd.f32 %v6775_v33, %v3166_v23  ;;  %v3171_v39 = vadd.f32 %v4434_v37, %v6629_v5  ;;  %v4474_v14 = vpop.f32.mrf.mxu0 }
 0x27b   : > { %v3114_v55 = vpop.f32.mrf.mxu1  ;;  %v3607_v40 = vadd.f32 %v3606_v19, %v3605_v9  ;;  %v3507_v52 = vadd.f32 %v3506_v8, %v3505_v60  ;;  %v3508_v22 = vsel %vm1000_vm2, %v3425_v25, 0.0  ;;  %v3614_v1 = vsel %vm1000_vm2, %v3561_v20, 0.0 }
 0x27c   : > { %v3169_v21 = vadd.f32 %v3114_v55, %v6632_v26  ;;  %v3610_v2 = vsel %vm1000_vm2, %v3559_v6, 0.0  ;;  %3460 = vst.msk [vmem:[%s6589_s14 + $0xb8] sm:$0xff] %vm1000_vm2, %v3428_v38  ;;  %v3426_v4 = vadd.f32 %v6567_v27, %v3387_v32  ;;  %v3392_v17 = vadd.f32 %v6783_v3, %v3171_v39 }
 0x27d   : > { %v4435_v33 = vpop.f32.mrf.mxu1  ;;  %v3509_v50 = vadd.f32 %v3508_v22, %v3507_v52  ;;  %v3609_v5 = vadd.f32 %v3608_v58, %v3607_v40  ;;  %v3562_v7 = vmul.f32 %v3428_v38, %v3428_v38  ;;  %v3514_v28 = vsel %vm1000_vm2, %v3428_v38, 0.0 }
 0x27e   : > { %v3390_v24 = vadd.f32 %v3335_v53, %v3169_v21  ;;  %v3172_v56 = vadd.f32 %v4435_v33, %v6638_v30  ;;  %3458 = vst.msk [vmem:[%s6589_s14 + $0xa8] sm:$0xff] %vm1000_vm2, %v3426_v4  ;;  %v3510_v26 = vsel %vm1000_vm2, %v3426_v4, 0.0  ;;  %v3560_v62 = vmul.f32 %v3426_v4, %v3426_v4  ;;  %v7087_v53 = vld [vmem:[#allocation40_spill] sm:$0xff] }
 0x27f   : > { %v3431_v34 = vadd.f32 %v6567_v27, %v3392_v17  ;;  %v3117_v29 = vpop.f32.mrf.mxu1  ;;  %v3611_v31 = vadd.f32 %v3610_v2, %v3609_v5  ;;  %v3511_v3 = vadd.f32 %v3510_v26, %v3509_v50  ;;  %v2950_v42 = vadd.f32 %v7087_v53, %v6665_v15 }
 0x280   : > { %v3429_v12 = vadd.f32 %v6567_v27, %v3390_v24  ;;  %v3393_v46 = vadd.f32 %v4471_v10, %v3172_v56  ;;  %v3512_v30 = vsel %vm1000_vm2, %v3427_v11, 0.0  ;;  %v3612_v44 = vsel %vm1000_vm2, %v3560_v62, 0.0  ;;  %v3351_v10 = vpop.f32.mrf.mxu0 }
 0x281   : > { %3463 = vst.msk [vmem:[%s6589_s14 + $0xd0] sm:$0xff] %vm1000_vm2, %v3431_v34  ;;  %v3170_v47 = vadd.f32 %v3117_v29, %v6641_v54  ;;  %v4438_v63 = vpop.f32.mrf.mxu1  ;;  %v3513_v35 = vadd.f32 %v3512_v30, %v3511_v3  ;;  %v3613_v16 = vadd.f32 %v3612_v44, %v3611_v31  ;;  %v3616_v54 = vsel %vm1000_vm2, %v3562_v7, 0.0 }
 0x282   : > { %3461 = vst.msk [vmem:[%s6589_s14 + $0xc0] sm:$0xff] %vm1000_vm2, %v3429_v12  ;;  %v3563_v15 = vmul.f32 %v3429_v12, %v3429_v12  ;;  %v3432_v57 = vadd.f32 %v6567_v27, %v3393_v46  ;;  %v3175_v41 = vadd.f32 %v4438_v63, %v6648_v43  ;;  %v3565_v25 = vmul.f32 %v3431_v34, %v3431_v34  ;;  %v4475_v60 = vpop.f32.mrf.mxu0 }
 0x283   : > { %v3391_v51 = vadd.f32 %v3338_v48, %v3170_v47  ;;  %v3130_v11 = vpop.f32.mrf.mxu1  ;;  %v3615_v36 = vadd.f32 %v3614_v1, %v3613_v16  ;;  %v3515_v45 = vadd.f32 %v3514_v28, %v3513_v35  ;;  %v3516_v49 = vsel %vm1000_vm2, %v3429_v12, 0.0 }
 0x284   : > { %v3173_v59 = vadd.f32 %v3130_v11, %v6651_v18  ;;  %3464 = vst.msk [vmem:[%s6589_s14 + $0xd8] sm:$0xff] %vm1000_vm2, %v3432_v57  ;;  %v3396_v19 = vadd.f32 %v4474_v14, %v3175_v41  ;;  %v3618_v9 = vsel %vm1000_vm2, %v3563_v15, 0.0  ;;  %v3520_v40 = vsel %vm1000_vm2, %v3431_v34, 0.0  ;;  %v3354_v4 = vpop.f32.mrf.mxu0 }
 0x285   : > { %v3430_v13 = vadd.f32 %v6567_v27, %v3391_v51  ;;  %v4439_v61 = vpop.f32.mrf.mxu1  ;;  %v3517_v23 = vadd.f32 %v3516_v49, %v3515_v45  ;;  %v3617_v37 = vadd.f32 %v3616_v54, %v3615_v36  ;;  %v3622_v21 = vsel %vm1000_vm2, %v3565_v25, 0.0 }
 0x286   : > { %v3394_v43 = vadd.f32 %v3351_v10, %v3173_v59  ;;  %v3176_v8 = vadd.f32 %v4439_v61, %v6654_v0  ;;  %v3435_v48 = vadd.f32 %v6567_v27, %v3396_v19  ;;  %v3566_v0 = vmul.f32 %v3432_v57, %v3432_v57 }
 0x287   : > { %3462 = vst.msk [vmem:[%s6589_s14 + $0xc8] sm:$0xff] %vm1000_vm2, %v3430_v13  ;;  %v3518_v18 = vsel %vm1000_vm2, %v3430_v13, 0.0  ;;  %v3564_v6 = vmul.f32 %v3430_v13, %v3430_v13  ;;  %v3133_v58 = vpop.f32.mrf.mxu1  ;;  %v3619_v38 = vadd.f32 %v3618_v9, %v3617_v37  ;;  %v3522_v17 = vsel %vm1000_vm2, %v3432_v57, 0.0 }
 0x288   : > { %v3519_v32 = vadd.f32 %v3518_v18, %v3517_v23  ;;  %v3433_v39 = vadd.f32 %v6567_v27, %v3394_v43  ;;  %v3397_v55 = vadd.f32 %v4475_v60, %v3176_v8  ;;  %3467 = vst.msk [vmem:[%s6589_s14 + $0xf0] sm:$0xff] %vm1000_vm2, %v3435_v48  ;;  %v3174_v52 = vadd.f32 %v3133_v58, %v2950_v42 }
 0x289   : > { %v3620_v20 = vsel %vm1000_vm2, %v3564_v6, 0.0  ;;  %v3624_v14 = vsel %vm1000_vm2, %v3566_v0, 0.0  ;;  %v3569_v29 = vmul.f32 %v3435_v48, %v3435_v48  ;;  %v3528_v42 = vsel %vm1000_vm2, %v3435_v48, 0.0 }
 0x28a   : > { %v3521_v22 = vadd.f32 %v3520_v40, %v3519_v32  ;;  %v3621_v2 = vadd.f32 %v3620_v20, %v3619_v38  ;;  %3465 = vst.msk [vmem:[%s6589_s14 + $0xe0] sm:$0xff] %vm1000_vm2, %v3433_v39  ;;  %v3567_v33 = vmul.f32 %v3433_v39, %v3433_v39  ;;  %v3436_v50 = vadd.f32 %v6567_v27, %v3397_v55 }
 0x28b   : > { %v3395_v5 = vadd.f32 %v3354_v4, %v3174_v52  ;;  %v3524_v7 = vsel %vm1000_vm2, %v3433_v39, 0.0 }
 0x28c   : > { %v3623_v24 = vadd.f32 %v3622_v21, %v3621_v2  ;;  %v3523_v56 = vadd.f32 %v3522_v17, %v3521_v22  ;;  %3468 = vst.msk [vmem:[%s6589_s14 + $0xf8] sm:$0xff] %vm1000_vm2, %v3436_v50  ;;  %v3626_v31 = vsel %vm1000_vm2, %v3567_v33, 0.0  ;;  %v3570_v30 = vmul.f32 %v3436_v50, %v3436_v50 }
 0x28d   : > { %v3434_v26 = vadd.f32 %v6567_v27, %v3395_v5  ;;  %v3630_v27 = vsel %vm1000_vm2, %v3569_v29, 0.0  ;;  %v3530_v1 = vsel %vm1000_vm2, %v3436_v50, 0.0 }
 0x28e   : > { %v3525_v62 = vadd.f32 %v3524_v7, %v3523_v56  ;;  %v3625_v34 = vadd.f32 %v3624_v14, %v3623_v24  ;;  %v3632_v16 = vsel %vm1000_vm2, %v3570_v30, 0.0 }
 0x28f   : > { %3466 = vst.msk [vmem:[%s6589_s14 + $0xe8] sm:$0xff] %vm1000_vm2, %v3434_v26  ;;  %v3526_v3 = vsel %vm1000_vm2, %v3434_v26, 0.0  ;;  %v3568_v12 = vmul.f32 %v3434_v26, %v3434_v26 }
 0x290   : > { %v3627_v46 = vadd.f32 %v3626_v31, %v3625_v34  ;;  %v3527_v53 = vadd.f32 %v3526_v3, %v3525_v62 }
 0x291   : > { %v3628_v44 = vsel %vm1000_vm2, %v3568_v12, 0.0 }
 0x292   : > { %v3529_v47 = vadd.f32 %v3528_v42, %v3527_v53  ;;  %v3629_v63 = vadd.f32 %v3628_v44, %v3627_v46 }
 0x294   : > { %v3531_v28 = vadd.f32 %v3530_v1, %v3529_v47  ;;  %v3631_v35 = vadd.f32 %v3630_v27, %v3629_v63 }
 0x296   : > { %v3532_v10 = vrot.slane %v3531_v28, 4  ;;  %v3633_v15 = vadd.f32 %v3632_v16, %v3631_v35 }
 0x298   : > { %v3533_v57 = vadd.f32 %v3532_v10, %v3531_v28  ;;  %v3634_v51 = vrot.slane %v3633_v15, 4 }
 0x29a   : > { %v3534_v41 = vrot.slane %v3533_v57, 2  ;;  %v3635_v11 = vadd.f32 %v3634_v51, %v3633_v15 }
 0x29c   : > { %v3535_v54 = vadd.f32 %v3534_v41, %v3533_v57  ;;  %v3636_v36 = vrot.slane %v3635_v11, 2 }
 0x29e   : > { %v3536_v45 = vrot.slane %v3535_v54, 1  ;;  %v3637_v59 = vadd.f32 %v3636_v36, %v3635_v11 }
 0x2a0   : > { %v3537_v25 = vadd.f32 %v3536_v45, %v3535_v54  ;;  %v3638_v49 = vrot.slane %v3637_v59, 1 }
 0x2a2   : > { %3538 = vst.msk [vmem:[%s331_s16] sm:$0x1] %vm1002_vm3, %v3537_v25  ;;  %v3639_v13 = vadd.f32 %v3638_v49, %v3637_v59 }
 0x2a4   : > { %3640 = vst.msk [vmem:[%s334_s19] sm:$0x1] %vm1002_vm3, %v3639_v13 }
 0x2a5 PF: > { %s19_s27 = sadd.s32 1, %s4627_s27  }
 0x2a6   : > { %p16_p4 = scmp.ge.s32.totalorder %s19_s27, 4  }
 0x2a8   :  { %18 = sbr.rel (!%p16_p4) target bundleno = 1 (0x1), region = 114 }

</bundles_post_ra>
